<compile_context>
chip_gen: v7x
topology: tpu7x:2x2x1
jax: 0.10.0
libtpu: 0.0.40
codegen_flags: <defaults>
</compile_context>

<pallas_src>
import functools

import jax
import jax.numpy as jnp
from jax.experimental import pallas as pl
from jax.experimental.pallas import tpu as pltpu


def _round_up(x, m):
  return -(-x // m) * m


# ----------------------------------------------------------------------------
# Fused forward kernel (one grid step == one batch element)
# ----------------------------------------------------------------------------
def _bpnet_fused_kernel(
    x_ref,      # (1, C_PAD, L_in_pad)   bf16  (channels 4 -> C_PAD, len padded)
    iw_ref,     # (K_ICONV, nf, C_PAD)   bf16  iconv weights, tap-major
    ib_ref,     # (nf, 1)                f32
    rw_ref,     # (n_layers, 3, nf, nf)  bf16  residual conv weights, tap-major
    rb_ref,     # (n_layers, nf, 1)      f32
    pw_ref,     # (K_PEN, 2, nf)         bf16  pen conv (final 1x1 folded in)
    pb_ref,     # (2, 1)                 f32
    cw_ref,     # (2, nf)                f32   counts head (counts_conv folded)
    cb_ref,     # (2, 1)                 f32
    prof_ref,   # (1, 2, L_pen_pad)      f32   output: profile logits (padded)
    cnt_ref,    # (1, 2, 1)              f32   output: log-counts
    buf_a,      # (nf, BUF_LEN)          act_dtype  VMEM ping-pong activation
    buf_b,      # (nf, BUF_LEN)          act_dtype  VMEM ping-pong activation
    *, nf, n_layers, L1, L1_pad, L_pen_pad, PAD, BUF_LEN, L_TILE,
    K_ICONV, K_PEN, trim_start, trim_len, act_dtype):
  f32 = jnp.float32
  bf16 = jnp.bfloat16

  def mm(w, x):
    return jnp.dot(w, x, preferred_element_type=f32)

  def as_op(v):   # matmul-operand cast (no-op when activations are bf16)
    return v if v.dtype == bf16 else v.astype(bf16)

  # Zero the never-written halo regions of both activation buffers.
  # (Deliberately NOT guarded by program_id==0: scratch is per-core under
  # megacore "parallel" grid sharding, so only the first core would init.)
  n_zero_tail = BUF_LEN - (PAD + L1_pad)
  for buf in (buf_a, buf_b):
    buf[:, :PAD] = jnp.zeros((nf, PAD), dtype=act_dtype)
    if n_zero_tail > 0:
      buf[:, PAD + L1_pad:] = jnp.zeros((nf, n_zero_tail), dtype=act_dtype)

  # Columns in [L1, L1_pad) are computed as full lane-dense tiles but hold
  # fake values; re-zero them after every layer so the conv zero-padding
  # semantics (PyTorch padding=d) stay exact for valid positions.
  n_fake = L1_pad - L1

  def zero_fake(buf):
    if n_fake > 0:
      buf[:, PAD + L1:PAD + L1_pad] = jnp.zeros((nf, n_fake), dtype=act_dtype)

  # ---- iconv (K=21): per-tap accumulated dots, f32 acc, then ReLU ---------
  ib_bc = jnp.broadcast_to(ib_ref[...], (nf, L_TILE))       # hoisted bias
  for l0 in range(0, L1_pad, L_TILE):
    w = min(L_TILE, L1_pad - l0)
    acc = mm(iw_ref[0], x_ref[0, :, l0:l0 + w])
    for k in range(1, K_ICONV):
      acc = acc + mm(iw_ref[k], x_ref[0, :, l0 + k:l0 + k + w])
    buf_a[:, PAD + l0:PAD + l0 + w] = jnp.maximum(
        acc + ib_bc[:, :w], 0.0).astype(act_dtype)
  zero_fake(buf_a)

  # ---- dilated residual stack: X = X + relu(rconv_i(X)) -------------------
  cur, nxt = buf_a, buf_b
  for i in range(n_layers):
    d = 2 ** (i + 1)
    w0, w1, w2 = rw_ref[i, 0], rw_ref[i, 1], rw_ref[i, 2]    # (nf, nf) bf16
    b_bc = jnp.broadcast_to(rb_ref[i], (nf, L_TILE))         # hoisted bias
    for l0 in range(0, L1_pad, L_TILE):
      w = min(L_TILE, L1_pad - l0)
      c0 = PAD + l0
      center = cur[:, c0:c0 + w]                   # tap k=1, also the residual
      acc = mm(w1, as_op(center))
      acc = acc + mm(w0, as_op(cur[:, c0 - d:c0 - d + w]))
      acc = acc + mm(w2, as_op(cur[:, c0 + d:c0 + d + w]))
      y = center.astype(f32) + jnp.maximum(acc + b_bc[:, :w], 0.0)
      nxt[:, c0:c0 + w] = y.astype(act_dtype)
    zero_fake(nxt)
    cur, nxt = nxt, cur                            # ping-pong

  # ---- profile head: pen conv (K=75, final 1x1 folded), per-tap dots ------
  pb_bc = jnp.broadcast_to(pb_ref[...], (2, L_TILE))
  for l0 in range(0, L_pen_pad, L_TILE):
    w = min(L_TILE, L_pen_pad - l0)
    c0 = PAD + l0
    acc = mm(pw_ref[0], as_op(cur[:, c0:c0 + w]))
    for k in range(1, K_PEN):
      acc = acc + mm(pw_ref[k], as_op(cur[:, c0 + k:c0 + k + w]))
    prof_ref[0, :, l0:l0 + w] = acc + pb_bc[:, :w]

  # ---- counts head: trim -> AvgPool -> Linear -> counts_conv (all folded) --
  # counts = mean( (ccW @ linW) @ Xtrim , axis=-1) + (ccW @ linB + ccB)
  xt = cur[:, PAD + trim_start:PAD + trim_start + trim_len].astype(f32)
  z = jnp.dot(cw_ref[...], xt, preferred_element_type=f32)        # (2, P)
  cnt_ref[0] = jnp.mean(z, axis=-1, keepdims=True) + cb_ref[...]


# ----------------------------------------------------------------------------
# One-time parameter preparation (layout + algebraic folding)
# ----------------------------------------------------------------------------
def prepare_params(raw, *, n_filters, n_layers, c_pad=16):
  nf = n_filters
  f32, bf16 = jnp.float32, jnp.bfloat16

  # iconv: (nf, 4, 21) -> tap-major (21, nf, c_pad), zero-padded channels.
  iw = jnp.pad(raw["iconv_w"].astype(f32), ((0, 0), (0, c_pad - 4), (0, 0)))
  iw = jnp.transpose(iw, (2, 0, 1)).astype(bf16)                  # (21, nf, c_pad)
  ib = raw["iconv_b"].reshape(nf, 1).astype(f32)

  # residual convs: (nf, nf, 3) -> (n_layers, 3, nf_out, nf_in) tap-major.
  rw = jnp.stack([jnp.transpose(w.astype(f32), (2, 0, 1))
                  for w in raw["rconv_w"]]).astype(bf16)
  rb = jnp.stack([b.reshape(nf, 1) for b in raw["rconv_b"]]).astype(f32)

  # fold final_conv (1x1, 2->2) into penultimate_conv; tap-major layout.
  fin_w = raw["fin_w"].reshape(2, 2).astype(f32)
  pw = jnp.einsum("ab,bik->aik", fin_w, raw["pen_w"].astype(f32))  # (2, nf, 75)
  pb = fin_w @ raw["pen_b"].astype(f32) + raw["fin_b"].astype(f32)
  pw = jnp.transpose(pw, (2, 0, 1)).astype(bf16)                   # (75, 2, nf)
  pb = pb.reshape(2, 1).astype(f32)

  # fold counts_conv (1x1, 2->2) into the Linear layer (kept f32, tiny).
  cc_w = raw["cc_w"].reshape(2, 2).astype(f32)
  cw = (cc_w @ raw["lin_w"].astype(f32)).astype(f32)               # (2, nf)
  cb = (cc_w @ raw["lin_b"].astype(f32)
        + raw["cc_b"].astype(f32)).reshape(2, 1).astype(f32)

  return dict(iw=iw, ib=ib, rw=rw, rb=rb, pw=pw, pb=pb, cw=cw, cb=cb)


def _default_act_dtype():
  # bf16 activations on v6e/v7x (native bf16 VPU); f32 on v5e and older
  # (no bf16 elementwise -> keep f32 buffers, cast matmul operands only).
  try:
    kind = jax.devices()[0].device_kind.lower()
  except Exception:
    return jnp.float32
  return jnp.bfloat16 if ("v6" in kind or "v7" in kind) else jnp.float32


# ----------------------------------------------------------------------------
# Forward pass (single fused pallas_call)
# ----------------------------------------------------------------------------
@functools.partial(jax.jit,
                   static_argnames=("output_prof_len", "l_tile", "act_dtype"))
def bpnet_forward(params, X, *, output_prof_len, l_tile=512, act_dtype=None):
  if act_dtype is None:
    act_dtype = _default_act_dtype()

  B, C_in, L_in = X.shape
  n_layers = params["rw"].shape[0]
  nf = params["rw"].shape[2]
  K_ICONV = params["iw"].shape[0]
  C_PAD = params["iw"].shape[2]
  K_PEN = params["pw"].shape[0]

  L1 = L_in - (K_ICONV - 1)                  # length after iconv
  L_pen = L1 - (K_PEN - 1)                   # profile logits length
  P = output_prof_len
  trim_start = (L1 - P) // 2                 # exact int, matches torch trim

  PAD = 128                                  # >= max dilation, lane-aligned halo
  assert PAD >= 2 ** n_layers
  L1_pad = _round_up(max(L1, 128), 128)      # lane-dense tiles, full width
  L_pen_pad = _round_up(max(L_pen, 128), 128)
  L_TILE = min(_round_up(l_tile, 128), L1_pad)
  BUF_LEN = PAD + _round_up(max(L1_pad + 2 ** n_layers,
                                L_pen_pad + K_PEN - 1), 128)
  L_in_pad = L1_pad + (K_ICONV - 1)

  # Pad input channels 4 -> C_PAD and length to L_in_pad; cast to bf16
  # (one-hot input is exactly representable; it is only a matmul operand).
  Xp = jnp.pad(X.astype(jnp.float32),
               ((0, 0), (0, C_PAD - C_in), (0, L_in_pad - L_in))
               ).astype(jnp.bfloat16)

  kernel = functools.partial(
      _bpnet_fused_kernel, nf=nf, n_layers=n_layers, L1=L1, L1_pad=L1_pad,
      L_pen_pad=L_pen_pad, PAD=PAD, BUF_LEN=BUF_LEN, L_TILE=L_TILE,
      K_ICONV=K_ICONV, K_PEN=K_PEN, trim_start=trim_start, trim_len=P,
      act_dtype=act_dtype)

  prof, cnt = pl.pallas_call(
      kernel,
      grid=(B,),
      in_specs=[
          pl.BlockSpec((1, C_PAD, L_in_pad), lambda b: (b, 0, 0)),
          pl.BlockSpec((K_ICONV, nf, C_PAD), lambda b: (0, 0, 0)),
          pl.BlockSpec((nf, 1), lambda b: (0, 0)),
          pl.BlockSpec((n_layers, 3, nf, nf), lambda b: (0, 0, 0, 0)),
          pl.BlockSpec((n_layers, nf, 1), lambda b: (0, 0, 0)),
          pl.BlockSpec((K_PEN, 2, nf), lambda b: (0, 0, 0)),
          pl.BlockSpec((2, 1), lambda b: (0, 0)),
          pl.BlockSpec((2, nf), lambda b: (0, 0)),
          pl.BlockSpec((2, 1), lambda b: (0, 0)),
      ],
      out_specs=(pl.BlockSpec((1, 2, L_pen_pad), lambda b: (b, 0, 0)),
                 pl.BlockSpec((1, 2, 1), lambda b: (b, 0, 0))),
      out_shape=(jax.ShapeDtypeStruct((B, 2, L_pen_pad), jnp.float32),
                 jax.ShapeDtypeStruct((B, 2, 1), jnp.float32)),
      scratch_shapes=[
          pltpu.VMEM((nf, BUF_LEN), act_dtype),
          pltpu.VMEM((nf, BUF_LEN), act_dtype),
      ],
      compiler_params=pltpu.CompilerParams(
          dimension_semantics=("parallel",)),
  )(Xp, params["iw"], params["ib"], params["rw"], params["rb"],
    params["pw"], params["pb"], params["cw"], params["cb"])

  y_profile = prof[:, :, :L_pen]           # drop lane-padding columns
  if B == 1:                                # torch `.squeeze()` drops only batch
    y_profile = y_profile[0]
  return y_profile, cnt


# ----------------------------------------------------------------------------
# Random parameter init (raw PyTorch-layout shapes)
# ----------------------------------------------------------------------------
def init_params(key, n_filters, n_layers):
  scale = 0.05
  keys = iter(jax.random.split(key, 16 + 2 * n_layers))
  p = {
      "iconv_w": scale * jax.random.normal(next(keys), (n_filters, 4, 21), jnp.float32),
      "iconv_b": scale * jax.random.normal(next(keys), (n_filters,), jnp.float32),
      "rconv_w": [], "rconv_b": [],
      "pen_w": scale * jax.random.normal(next(keys), (2, n_filters, 75), jnp.float32),
      "pen_b": scale * jax.random.normal(next(keys), (2,), jnp.float32),
      "fin_w": scale * jax.random.normal(next(keys), (2, 2, 1), jnp.float32),
      "fin_b": scale * jax.random.normal(next(keys), (2,), jnp.float32),
      "lin_w": scale * jax.random.normal(next(keys), (2, n_filters), jnp.float32),
      "lin_b": scale * jax.random.normal(next(keys), (2,), jnp.float32),
      "cc_w": scale * jax.random.normal(next(keys), (2, 2, 1), jnp.float32),
      "cc_b": scale * jax.random.normal(next(keys), (2,), jnp.float32),
  }
  for _ in range(n_layers):
    p["rconv_w"].append(
        scale * jax.random.normal(next(keys), (n_filters, n_filters, 3), jnp.float32))
    p["rconv_b"].append(
        scale * jax.random.normal(next(keys), (n_filters,), jnp.float32))
  return p


if __name__ == "__main__":
  B = 2
  n_filters = 32
  n_layers = 6
  input_seq_len = 256       # small-shape stand-in for 2114
  output_prof_len = 128     # small-shape stand-in for 1000

  key = jax.random.PRNGKey(0)
  kx, kp = jax.random.split(key)
  X = jax.random.normal(kx, (B, 4, input_seq_len), dtype=jnp.float32)
  raw = init_params(kp, n_filters, n_layers)
  params = prepare_params(raw, n_filters=n_filters, n_layers=n_layers)

  y_profile, y_logcounts = bpnet_forward(
      params, X, output_prof_len=output_prof_len)
  jax.block_until_ready((y_profile, y_logcounts))

  assert y_profile.shape == (B, 2, input_seq_len - 20 - 74), y_profile.shape
  assert y_logcounts.shape == (B, 2, 1), y_logcounts.shape
  assert bool(jnp.all(jnp.isfinite(y_profile)))
  assert bool(jnp.all(jnp.isfinite(y_logcounts)))
  print("KERNEL_OK")
</pallas_src>

<mosaic_0001>
module attributes {stable_mosaic.version = 11 : i64} {
  func.func @_bpnet_fused_kernel(%arg0: i32, %arg1: memref<1x16x276xbf16, #tpu.memory_space<vmem>>, %arg2: memref<21x32x16xbf16, #tpu.memory_space<vmem>>, %arg3: memref<32x1xf32, #tpu.memory_space<vmem>>, %arg4: memref<6x3x32x32xbf16, #tpu.memory_space<vmem>>, %arg5: memref<6x32x1xf32, #tpu.memory_space<vmem>>, %arg6: memref<75x2x32xbf16, #tpu.memory_space<vmem>>, %arg7: memref<2x1xf32, #tpu.memory_space<vmem>>, %arg8: memref<2x32xf32, #tpu.memory_space<vmem>>, %arg9: memref<2x1xf32, #tpu.memory_space<vmem>>, %arg10: memref<1x2x256xf32, #tpu.memory_space<vmem>>, %arg11: memref<1x2x1xf32, #tpu.memory_space<vmem>>, %arg12: memref<32x512xf32, #tpu.memory_space<vmem>>, %arg13: memref<32x512xf32, #tpu.memory_space<vmem>>) attributes {dimension_semantics = [#tpu.dimension_semantics<parallel>], iteration_bounds = array<i64: 2>, scalar_prefetch = 0 : i64, scratch_operands = 2 : i64, tpu.core_type = #tpu.core_type<tc>, window_params = [{transform_indices = @transform_0, window_bounds = array<i64: 1, 16, 276>}, {pipeline_mode = #tpu.pipeline_mode<synchronous>, transform_indices = @transform_1, window_bounds = array<i64: 21, 32, 16>}, {pipeline_mode = #tpu.pipeline_mode<synchronous>, transform_indices = @transform_2, window_bounds = array<i64: 32, 1>}, {pipeline_mode = #tpu.pipeline_mode<synchronous>, transform_indices = @transform_3, window_bounds = array<i64: 6, 3, 32, 32>}, {pipeline_mode = #tpu.pipeline_mode<synchronous>, transform_indices = @transform_4, window_bounds = array<i64: 6, 32, 1>}, {pipeline_mode = #tpu.pipeline_mode<synchronous>, transform_indices = @transform_5, window_bounds = array<i64: 75, 2, 32>}, {pipeline_mode = #tpu.pipeline_mode<synchronous>, transform_indices = @transform_6, window_bounds = array<i64: 2, 1>}, {pipeline_mode = #tpu.pipeline_mode<synchronous>, transform_indices = @transform_7, window_bounds = array<i64: 2, 32>}, {pipeline_mode = #tpu.pipeline_mode<synchronous>, transform_indices = @transform_8, window_bounds = array<i64: 2, 1>}, {transform_indices = @transform_9, window_bounds = array<i64: 1, 2, 256>}, {transform_indices = @transform_10, window_bounds = array<i64: 1, 2, 1>}]} {
    %cst = arith.constant 0.000000e+00 : f32
    %0 = vector.broadcast %cst : f32 to vector<32x128xf32>
    %c0 = arith.constant 0 : index
    %c0_0 = arith.constant 0 : index
    %1 = vector.load %arg12[%c0, %c0_0] : memref<32x512xf32, #tpu.memory_space<vmem>>, vector<32x128xf32>
    tpu.vector_store %arg12[%c0, %c0_0], %0 {strides = array<i32>} : memref<32x512xf32, #tpu.memory_space<vmem>>, vector<32x128xf32>,
    %cst_1 = arith.constant 0.000000e+00 : f32
    %2 = vector.broadcast %cst_1 : f32 to vector<32x128xf32>
    %c0_2 = arith.constant 0 : index
    %c384 = arith.constant 384 : index
    %3 = vector.load %arg12[%c0_2, %c384] : memref<32x512xf32, #tpu.memory_space<vmem>>, vector<32x128xf32>
    tpu.vector_store %arg12[%c0_2, %c384], %2 {strides = array<i32>} : memref<32x512xf32, #tpu.memory_space<vmem>>, vector<32x128xf32>,
    %cst_3 = arith.constant 0.000000e+00 : f32
    %4 = vector.broadcast %cst_3 : f32 to vector<32x128xf32>
    %c0_4 = arith.constant 0 : index
    %c0_5 = arith.constant 0 : index
    %5 = vector.load %arg13[%c0_4, %c0_5] : memref<32x512xf32, #tpu.memory_space<vmem>>, vector<32x128xf32>
    tpu.vector_store %arg13[%c0_4, %c0_5], %4 {strides = array<i32>} : memref<32x512xf32, #tpu.memory_space<vmem>>, vector<32x128xf32>,
    %cst_6 = arith.constant 0.000000e+00 : f32
    %6 = vector.broadcast %cst_6 : f32 to vector<32x128xf32>
    %c0_7 = arith.constant 0 : index
    %c384_8 = arith.constant 384 : index
    %7 = vector.load %arg13[%c0_7, %c384_8] : memref<32x512xf32, #tpu.memory_space<vmem>>, vector<32x128xf32>
    tpu.vector_store %arg13[%c0_7, %c384_8], %6 {strides = array<i32>} : memref<32x512xf32, #tpu.memory_space<vmem>>, vector<32x128xf32>,
    %c0_9 = arith.constant 0 : index
    %c0_10 = arith.constant 0 : index
    %8 = vector.load %arg3[%c0_9, %c0_10] : memref<32x1xf32, #tpu.memory_space<vmem>>, vector<32x1xf32>
    %9 = vector.shape_cast %8 : vector<32x1xf32> to vector<32x1xf32>
    %10 = vector.broadcast %9 : vector<32x1xf32> to vector<32x256xf32>
    %c0_11 = arith.constant 0 : index
    %c0_12 = arith.constant 0 : index
    %c0_13 = arith.constant 0 : index
    %11 = vector.load %arg2[%c0_11, %c0_12, %c0_13] : memref<21x32x16xbf16, #tpu.memory_space<vmem>>, vector<1x32x16xbf16>
    %12 = vector.shape_cast %11 : vector<1x32x16xbf16> to vector<32x16xbf16>
    %c0_14 = arith.constant 0 : index
    %c0_15 = arith.constant 0 : index
    %c0_16 = arith.constant 0 : index
    %13 = vector.load %arg1[%c0_14, %c0_15, %c0_16] : memref<1x16x276xbf16, #tpu.memory_space<vmem>>, vector<1x16x256xbf16>
    %14 = vector.shape_cast %13 : vector<1x16x256xbf16> to vector<16x256xbf16>
    %cst_17 = arith.constant dense<0.000000e+00> : vector<32x256xf32>
    %15 = tpu.matmul %12, %14, %cst_17 {dimension_numbers = #tpu.dot_dimension_numbers<[1], [0], [0], [1], [0, 0, 1, 1], [], []>} : vector<32x16xbf16>, vector<16x256xbf16>, vector<32x256xf32> -> vector<32x256xf32>
    %c1 = arith.constant 1 : index
    %c0_18 = arith.constant 0 : index
    %c0_19 = arith.constant 0 : index
    %16 = vector.load %arg2[%c1, %c0_18, %c0_19] : memref<21x32x16xbf16, #tpu.memory_space<vmem>>, vector<1x32x16xbf16>
    %17 = vector.shape_cast %16 : vector<1x32x16xbf16> to vector<32x16xbf16>
    %c0_20 = arith.constant 0 : index
    %c0_21 = arith.constant 0 : index
    %c1_22 = arith.constant 1 : index
    %18 = vector.load %arg1[%c0_20, %c0_21, %c1_22] : memref<1x16x276xbf16, #tpu.memory_space<vmem>>, vector<1x16x256xbf16>
    %19 = vector.shape_cast %18 : vector<1x16x256xbf16> to vector<16x256xbf16>
    %cst_23 = arith.constant dense<0.000000e+00> : vector<32x256xf32>
    %20 = tpu.matmul %17, %19, %cst_23 {dimension_numbers = #tpu.dot_dimension_numbers<[1], [0], [0], [1], [0, 0, 1, 1], [], []>} : vector<32x16xbf16>, vector<16x256xbf16>, vector<32x256xf32> -> vector<32x256xf32>
    %21 = arith.addf %15, %20 : vector<32x256xf32>
    %c2 = arith.constant 2 : index
    %c0_24 = arith.constant 0 : index
    %c0_25 = arith.constant 0 : index
    %22 = vector.load %arg2[%c2, %c0_24, %c0_25] : memref<21x32x16xbf16, #tpu.memory_space<vmem>>, vector<1x32x16xbf16>
    %23 = vector.shape_cast %22 : vector<1x32x16xbf16> to vector<32x16xbf16>
    %c0_26 = arith.constant 0 : index
    %c0_27 = arith.constant 0 : index
    %c2_28 = arith.constant 2 : index
    %24 = vector.load %arg1[%c0_26, %c0_27, %c2_28] : memref<1x16x276xbf16, #tpu.memory_space<vmem>>, vector<1x16x256xbf16>
    %25 = vector.shape_cast %24 : vector<1x16x256xbf16> to vector<16x256xbf16>
    %cst_29 = arith.constant dense<0.000000e+00> : vector<32x256xf32>
    %26 = tpu.matmul %23, %25, %cst_29 {dimension_numbers = #tpu.dot_dimension_numbers<[1], [0], [0], [1], [0, 0, 1, 1], [], []>} : vector<32x16xbf16>, vector<16x256xbf16>, vector<32x256xf32> -> vector<32x256xf32>
    %27 = arith.addf %21, %26 : vector<32x256xf32>
    %c3 = arith.constant 3 : index
    %c0_30 = arith.constant 0 : index
    %c0_31 = arith.constant 0 : index
    %28 = vector.load %arg2[%c3, %c0_30, %c0_31] : memref<21x32x16xbf16, #tpu.memory_space<vmem>>, vector<1x32x16xbf16>
    %29 = vector.shape_cast %28 : vector<1x32x16xbf16> to vector<32x16xbf16>
    %c0_32 = arith.constant 0 : index
    %c0_33 = arith.constant 0 : index
    %c3_34 = arith.constant 3 : index
    %30 = vector.load %arg1[%c0_32, %c0_33, %c3_34] : memref<1x16x276xbf16, #tpu.memory_space<vmem>>, vector<1x16x256xbf16>
    %31 = vector.shape_cast %30 : vector<1x16x256xbf16> to vector<16x256xbf16>
    %cst_35 = arith.constant dense<0.000000e+00> : vector<32x256xf32>
    %32 = tpu.matmul %29, %31, %cst_35 {dimension_numbers = #tpu.dot_dimension_numbers<[1], [0], [0], [1], [0, 0, 1, 1], [], []>} : vector<32x16xbf16>, vector<16x256xbf16>, vector<32x256xf32> -> vector<32x256xf32>
    %33 = arith.addf %27, %32 : vector<32x256xf32>
    %c4 = arith.constant 4 : index
    %c0_36 = arith.constant 0 : index
    %c0_37 = arith.constant 0 : index
    %34 = vector.load %arg2[%c4, %c0_36, %c0_37] : memref<21x32x16xbf16, #tpu.memory_space<vmem>>, vector<1x32x16xbf16>
    %35 = vector.shape_cast %34 : vector<1x32x16xbf16> to vector<32x16xbf16>
    %c0_38 = arith.constant 0 : index
    %c0_39 = arith.constant 0 : index
    %c4_40 = arith.constant 4 : index
    %36 = vector.load %arg1[%c0_38, %c0_39, %c4_40] : memref<1x16x276xbf16, #tpu.memory_space<vmem>>, vector<1x16x256xbf16>
    %37 = vector.shape_cast %36 : vector<1x16x256xbf16> to vector<16x256xbf16>
    %cst_41 = arith.constant dense<0.000000e+00> : vector<32x256xf32>
    %38 = tpu.matmul %35, %37, %cst_41 {dimension_numbers = #tpu.dot_dimension_numbers<[1], [0], [0], [1], [0, 0, 1, 1], [], []>} : vector<32x16xbf16>, vector<16x256xbf16>, vector<32x256xf32> -> vector<32x256xf32>
    %39 = arith.addf %33, %38 : vector<32x256xf32>
    %c5 = arith.constant 5 : index
    %c0_42 = arith.constant 0 : index
    %c0_43 = arith.constant 0 : index
    %40 = vector.load %arg2[%c5, %c0_42, %c0_43] : memref<21x32x16xbf16, #tpu.memory_space<vmem>>, vector<1x32x16xbf16>
    %41 = vector.shape_cast %40 : vector<1x32x16xbf16> to vector<32x16xbf16>
    %c0_44 = arith.constant 0 : index
    %c0_45 = arith.constant 0 : index
    %c5_46 = arith.constant 5 : index
    %42 = vector.load %arg1[%c0_44, %c0_45, %c5_46] : memref<1x16x276xbf16, #tpu.memory_space<vmem>>, vector<1x16x256xbf16>
    %43 = vector.shape_cast %42 : vector<1x16x256xbf16> to vector<16x256xbf16>
    %cst_47 = arith.constant dense<0.000000e+00> : vector<32x256xf32>
    %44 = tpu.matmul %41, %43, %cst_47 {dimension_numbers = #tpu.dot_dimension_numbers<[1], [0], [0], [1], [0, 0, 1, 1], [], []>} : vector<32x16xbf16>, vector<16x256xbf16>, vector<32x256xf32> -> vector<32x256xf32>
    %45 = arith.addf %39, %44 : vector<32x256xf32>
    %c6 = arith.constant 6 : index
    %c0_48 = arith.constant 0 : index
    %c0_49 = arith.constant 0 : index
    %46 = vector.load %arg2[%c6, %c0_48, %c0_49] : memref<21x32x16xbf16, #tpu.memory_space<vmem>>, vector<1x32x16xbf16>
    %47 = vector.shape_cast %46 : vector<1x32x16xbf16> to vector<32x16xbf16>
    %c0_50 = arith.constant 0 : index
    %c0_51 = arith.constant 0 : index
    %c6_52 = arith.constant 6 : index
    %48 = vector.load %arg1[%c0_50, %c0_51, %c6_52] : memref<1x16x276xbf16, #tpu.memory_space<vmem>>, vector<1x16x256xbf16>
    %49 = vector.shape_cast %48 : vector<1x16x256xbf16> to vector<16x256xbf16>
    %cst_53 = arith.constant dense<0.000000e+00> : vector<32x256xf32>
    %50 = tpu.matmul %47, %49, %cst_53 {dimension_numbers = #tpu.dot_dimension_numbers<[1], [0], [0], [1], [0, 0, 1, 1], [], []>} : vector<32x16xbf16>, vector<16x256xbf16>, vector<32x256xf32> -> vector<32x256xf32>
    %51 = arith.addf %45, %50 : vector<32x256xf32>
    %c7 = arith.constant 7 : index
    %c0_54 = arith.constant 0 : index
    %c0_55 = arith.constant 0 : index
    %52 = vector.load %arg2[%c7, %c0_54, %c0_55] : memref<21x32x16xbf16, #tpu.memory_space<vmem>>, vector<1x32x16xbf16>
    %53 = vector.shape_cast %52 : vector<1x32x16xbf16> to vector<32x16xbf16>
    %c0_56 = arith.constant 0 : index
    %c0_57 = arith.constant 0 : index
    %c7_58 = arith.constant 7 : index
    %54 = vector.load %arg1[%c0_56, %c0_57, %c7_58] : memref<1x16x276xbf16, #tpu.memory_space<vmem>>, vector<1x16x256xbf16>
    %55 = vector.shape_cast %54 : vector<1x16x256xbf16> to vector<16x256xbf16>
    %cst_59 = arith.constant dense<0.000000e+00> : vector<32x256xf32>
    %56 = tpu.matmul %53, %55, %cst_59 {dimension_numbers = #tpu.dot_dimension_numbers<[1], [0], [0], [1], [0, 0, 1, 1], [], []>} : vector<32x16xbf16>, vector<16x256xbf16>, vector<32x256xf32> -> vector<32x256xf32>
    %57 = arith.addf %51, %56 : vector<32x256xf32>
    %c8 = arith.constant 8 : index
    %c0_60 = arith.constant 0 : index
    %c0_61 = arith.constant 0 : index
    %58 = vector.load %arg2[%c8, %c0_60, %c0_61] : memref<21x32x16xbf16, #tpu.memory_space<vmem>>, vector<1x32x16xbf16>
    %59 = vector.shape_cast %58 : vector<1x32x16xbf16> to vector<32x16xbf16>
    %c0_62 = arith.constant 0 : index
    %c0_63 = arith.constant 0 : index
    %c8_64 = arith.constant 8 : index
    %60 = vector.load %arg1[%c0_62, %c0_63, %c8_64] : memref<1x16x276xbf16, #tpu.memory_space<vmem>>, vector<1x16x256xbf16>
    %61 = vector.shape_cast %60 : vector<1x16x256xbf16> to vector<16x256xbf16>
    %cst_65 = arith.constant dense<0.000000e+00> : vector<32x256xf32>
    %62 = tpu.matmul %59, %61, %cst_65 {dimension_numbers = #tpu.dot_dimension_numbers<[1], [0], [0], [1], [0, 0, 1, 1], [], []>} : vector<32x16xbf16>, vector<16x256xbf16>, vector<32x256xf32> -> vector<32x256xf32>
    %63 = arith.addf %57, %62 : vector<32x256xf32>
    %c9 = arith.constant 9 : index
    %c0_66 = arith.constant 0 : index
    %c0_67 = arith.constant 0 : index
    %64 = vector.load %arg2[%c9, %c0_66, %c0_67] : memref<21x32x16xbf16, #tpu.memory_space<vmem>>, vector<1x32x16xbf16>
    %65 = vector.shape_cast %64 : vector<1x32x16xbf16> to vector<32x16xbf16>
    %c0_68 = arith.constant 0 : index
    %c0_69 = arith.constant 0 : index
    %c9_70 = arith.constant 9 : index
    %66 = vector.load %arg1[%c0_68, %c0_69, %c9_70] : memref<1x16x276xbf16, #tpu.memory_space<vmem>>, vector<1x16x256xbf16>
    %67 = vector.shape_cast %66 : vector<1x16x256xbf16> to vector<16x256xbf16>
    %cst_71 = arith.constant dense<0.000000e+00> : vector<32x256xf32>
    %68 = tpu.matmul %65, %67, %cst_71 {dimension_numbers = #tpu.dot_dimension_numbers<[1], [0], [0], [1], [0, 0, 1, 1], [], []>} : vector<32x16xbf16>, vector<16x256xbf16>, vector<32x256xf32> -> vector<32x256xf32>
    %69 = arith.addf %63, %68 : vector<32x256xf32>
    %c10 = arith.constant 10 : index
    %c0_72 = arith.constant 0 : index
    %c0_73 = arith.constant 0 : index
    %70 = vector.load %arg2[%c10, %c0_72, %c0_73] : memref<21x32x16xbf16, #tpu.memory_space<vmem>>, vector<1x32x16xbf16>
    %71 = vector.shape_cast %70 : vector<1x32x16xbf16> to vector<32x16xbf16>
    %c0_74 = arith.constant 0 : index
    %c0_75 = arith.constant 0 : index
    %c10_76 = arith.constant 10 : index
    %72 = vector.load %arg1[%c0_74, %c0_75, %c10_76] : memref<1x16x276xbf16, #tpu.memory_space<vmem>>, vector<1x16x256xbf16>
    %73 = vector.shape_cast %72 : vector<1x16x256xbf16> to vector<16x256xbf16>
    %cst_77 = arith.constant dense<0.000000e+00> : vector<32x256xf32>
    %74 = tpu.matmul %71, %73, %cst_77 {dimension_numbers = #tpu.dot_dimension_numbers<[1], [0], [0], [1], [0, 0, 1, 1], [], []>} : vector<32x16xbf16>, vector<16x256xbf16>, vector<32x256xf32> -> vector<32x256xf32>
    %75 = arith.addf %69, %74 : vector<32x256xf32>
    %c11 = arith.constant 11 : index
    %c0_78 = arith.constant 0 : index
    %c0_79 = arith.constant 0 : index
    %76 = vector.load %arg2[%c11, %c0_78, %c0_79] : memref<21x32x16xbf16, #tpu.memory_space<vmem>>, vector<1x32x16xbf16>
    %77 = vector.shape_cast %76 : vector<1x32x16xbf16> to vector<32x16xbf16>
    %c0_80 = arith.constant 0 : index
    %c0_81 = arith.constant 0 : index
    %c11_82 = arith.constant 11 : index
    %78 = vector.load %arg1[%c0_80, %c0_81, %c11_82] : memref<1x16x276xbf16, #tpu.memory_space<vmem>>, vector<1x16x256xbf16>
    %79 = vector.shape_cast %78 : vector<1x16x256xbf16> to vector<16x256xbf16>
    %cst_83 = arith.constant dense<0.000000e+00> : vector<32x256xf32>
    %80 = tpu.matmul %77, %79, %cst_83 {dimension_numbers = #tpu.dot_dimension_numbers<[1], [0], [0], [1], [0, 0, 1, 1], [], []>} : vector<32x16xbf16>, vector<16x256xbf16>, vector<32x256xf32> -> vector<32x256xf32>
    %81 = arith.addf %75, %80 : vector<32x256xf32>
    %c12 = arith.constant 12 : index
    %c0_84 = arith.constant 0 : index
    %c0_85 = arith.constant 0 : index
    %82 = vector.load %arg2[%c12, %c0_84, %c0_85] : memref<21x32x16xbf16, #tpu.memory_space<vmem>>, vector<1x32x16xbf16>
    %83 = vector.shape_cast %82 : vector<1x32x16xbf16> to vector<32x16xbf16>
    %c0_86 = arith.constant 0 : index
    %c0_87 = arith.constant 0 : index
    %c12_88 = arith.constant 12 : index
    %84 = vector.load %arg1[%c0_86, %c0_87, %c12_88] : memref<1x16x276xbf16, #tpu.memory_space<vmem>>, vector<1x16x256xbf16>
    %85 = vector.shape_cast %84 : vector<1x16x256xbf16> to vector<16x256xbf16>
    %cst_89 = arith.constant dense<0.000000e+00> : vector<32x256xf32>
    %86 = tpu.matmul %83, %85, %cst_89 {dimension_numbers = #tpu.dot_dimension_numbers<[1], [0], [0], [1], [0, 0, 1, 1], [], []>} : vector<32x16xbf16>, vector<16x256xbf16>, vector<32x256xf32> -> vector<32x256xf32>
    %87 = arith.addf %81, %86 : vector<32x256xf32>
    %c13 = arith.constant 13 : index
    %c0_90 = arith.constant 0 : index
    %c0_91 = arith.constant 0 : index
    %88 = vector.load %arg2[%c13, %c0_90, %c0_91] : memref<21x32x16xbf16, #tpu.memory_space<vmem>>, vector<1x32x16xbf16>
    %89 = vector.shape_cast %88 : vector<1x32x16xbf16> to vector<32x16xbf16>
    %c0_92 = arith.constant 0 : index
    %c0_93 = arith.constant 0 : index
    %c13_94 = arith.constant 13 : index
    %90 = vector.load %arg1[%c0_92, %c0_93, %c13_94] : memref<1x16x276xbf16, #tpu.memory_space<vmem>>, vector<1x16x256xbf16>
    %91 = vector.shape_cast %90 : vector<1x16x256xbf16> to vector<16x256xbf16>
    %cst_95 = arith.constant dense<0.000000e+00> : vector<32x256xf32>
    %92 = tpu.matmul %89, %91, %cst_95 {dimension_numbers = #tpu.dot_dimension_numbers<[1], [0], [0], [1], [0, 0, 1, 1], [], []>} : vector<32x16xbf16>, vector<16x256xbf16>, vector<32x256xf32> -> vector<32x256xf32>
    %93 = arith.addf %87, %92 : vector<32x256xf32>
    %c14 = arith.constant 14 : index
    %c0_96 = arith.constant 0 : index
    %c0_97 = arith.constant 0 : index
    %94 = vector.load %arg2[%c14, %c0_96, %c0_97] : memref<21x32x16xbf16, #tpu.memory_space<vmem>>, vector<1x32x16xbf16>
    %95 = vector.shape_cast %94 : vector<1x32x16xbf16> to vector<32x16xbf16>
    %c0_98 = arith.constant 0 : index
    %c0_99 = arith.constant 0 : index
    %c14_100 = arith.constant 14 : index
    %96 = vector.load %arg1[%c0_98, %c0_99, %c14_100] : memref<1x16x276xbf16, #tpu.memory_space<vmem>>, vector<1x16x256xbf16>
    %97 = vector.shape_cast %96 : vector<1x16x256xbf16> to vector<16x256xbf16>
    %cst_101 = arith.constant dense<0.000000e+00> : vector<32x256xf32>
    %98 = tpu.matmul %95, %97, %cst_101 {dimension_numbers = #tpu.dot_dimension_numbers<[1], [0], [0], [1], [0, 0, 1, 1], [], []>} : vector<32x16xbf16>, vector<16x256xbf16>, vector<32x256xf32> -> vector<32x256xf32>
    %99 = arith.addf %93, %98 : vector<32x256xf32>
    %c15 = arith.constant 15 : index
    %c0_102 = arith.constant 0 : index
    %c0_103 = arith.constant 0 : index
    %100 = vector.load %arg2[%c15, %c0_102, %c0_103] : memref<21x32x16xbf16, #tpu.memory_space<vmem>>, vector<1x32x16xbf16>
    %101 = vector.shape_cast %100 : vector<1x32x16xbf16> to vector<32x16xbf16>
    %c0_104 = arith.constant 0 : index
    %c0_105 = arith.constant 0 : index
    %c15_106 = arith.constant 15 : index
    %102 = vector.load %arg1[%c0_104, %c0_105, %c15_106] : memref<1x16x276xbf16, #tpu.memory_space<vmem>>, vector<1x16x256xbf16>
    %103 = vector.shape_cast %102 : vector<1x16x256xbf16> to vector<16x256xbf16>
    %cst_107 = arith.constant dense<0.000000e+00> : vector<32x256xf32>
    %104 = tpu.matmul %101, %103, %cst_107 {dimension_numbers = #tpu.dot_dimension_numbers<[1], [0], [0], [1], [0, 0, 1, 1], [], []>} : vector<32x16xbf16>, vector<16x256xbf16>, vector<32x256xf32> -> vector<32x256xf32>
    %105 = arith.addf %99, %104 : vector<32x256xf32>
    %c16 = arith.constant 16 : index
    %c0_108 = arith.constant 0 : index
    %c0_109 = arith.constant 0 : index
    %106 = vector.load %arg2[%c16, %c0_108, %c0_109] : memref<21x32x16xbf16, #tpu.memory_space<vmem>>, vector<1x32x16xbf16>
    %107 = vector.shape_cast %106 : vector<1x32x16xbf16> to vector<32x16xbf16>
    %c0_110 = arith.constant 0 : index
    %c0_111 = arith.constant 0 : index
    %c16_112 = arith.constant 16 : index
    %108 = vector.load %arg1[%c0_110, %c0_111, %c16_112] : memref<1x16x276xbf16, #tpu.memory_space<vmem>>, vector<1x16x256xbf16>
    %109 = vector.shape_cast %108 : vector<1x16x256xbf16> to vector<16x256xbf16>
    %cst_113 = arith.constant dense<0.000000e+00> : vector<32x256xf32>
    %110 = tpu.matmul %107, %109, %cst_113 {dimension_numbers = #tpu.dot_dimension_numbers<[1], [0], [0], [1], [0, 0, 1, 1], [], []>} : vector<32x16xbf16>, vector<16x256xbf16>, vector<32x256xf32> -> vector<32x256xf32>
    %111 = arith.addf %105, %110 : vector<32x256xf32>
    %c17 = arith.constant 17 : index
    %c0_114 = arith.constant 0 : index
    %c0_115 = arith.constant 0 : index
    %112 = vector.load %arg2[%c17, %c0_114, %c0_115] : memref<21x32x16xbf16, #tpu.memory_space<vmem>>, vector<1x32x16xbf16>
    %113 = vector.shape_cast %112 : vector<1x32x16xbf16> to vector<32x16xbf16>
    %c0_116 = arith.constant 0 : index
    %c0_117 = arith.constant 0 : index
    %c17_118 = arith.constant 17 : index
    %114 = vector.load %arg1[%c0_116, %c0_117, %c17_118] : memref<1x16x276xbf16, #tpu.memory_space<vmem>>, vector<1x16x256xbf16>
    %115 = vector.shape_cast %114 : vector<1x16x256xbf16> to vector<16x256xbf16>
    %cst_119 = arith.constant dense<0.000000e+00> : vector<32x256xf32>
    %116 = tpu.matmul %113, %115, %cst_119 {dimension_numbers = #tpu.dot_dimension_numbers<[1], [0], [0], [1], [0, 0, 1, 1], [], []>} : vector<32x16xbf16>, vector<16x256xbf16>, vector<32x256xf32> -> vector<32x256xf32>
    %117 = arith.addf %111, %116 : vector<32x256xf32>
    %c18 = arith.constant 18 : index
    %c0_120 = arith.constant 0 : index
    %c0_121 = arith.constant 0 : index
    %118 = vector.load %arg2[%c18, %c0_120, %c0_121] : memref<21x32x16xbf16, #tpu.memory_space<vmem>>, vector<1x32x16xbf16>
    %119 = vector.shape_cast %118 : vector<1x32x16xbf16> to vector<32x16xbf16>
    %c0_122 = arith.constant 0 : index
    %c0_123 = arith.constant 0 : index
    %c18_124 = arith.constant 18 : index
    %120 = vector.load %arg1[%c0_122, %c0_123, %c18_124] : memref<1x16x276xbf16, #tpu.memory_space<vmem>>, vector<1x16x256xbf16>
    %121 = vector.shape_cast %120 : vector<1x16x256xbf16> to vector<16x256xbf16>
    %cst_125 = arith.constant dense<0.000000e+00> : vector<32x256xf32>
    %122 = tpu.matmul %119, %121, %cst_125 {dimension_numbers = #tpu.dot_dimension_numbers<[1], [0], [0], [1], [0, 0, 1, 1], [], []>} : vector<32x16xbf16>, vector<16x256xbf16>, vector<32x256xf32> -> vector<32x256xf32>
    %123 = arith.addf %117, %122 : vector<32x256xf32>
    %c19 = arith.constant 19 : index
    %c0_126 = arith.constant 0 : index
    %c0_127 = arith.constant 0 : index
    %124 = vector.load %arg2[%c19, %c0_126, %c0_127] : memref<21x32x16xbf16, #tpu.memory_space<vmem>>, vector<1x32x16xbf16>
    %125 = vector.shape_cast %124 : vector<1x32x16xbf16> to vector<32x16xbf16>
    %c0_128 = arith.constant 0 : index
    %c0_129 = arith.constant 0 : index
    %c19_130 = arith.constant 19 : index
    %126 = vector.load %arg1[%c0_128, %c0_129, %c19_130] : memref<1x16x276xbf16, #tpu.memory_space<vmem>>, vector<1x16x256xbf16>
    %127 = vector.shape_cast %126 : vector<1x16x256xbf16> to vector<16x256xbf16>
    %cst_131 = arith.constant dense<0.000000e+00> : vector<32x256xf32>
    %128 = tpu.matmul %125, %127, %cst_131 {dimension_numbers = #tpu.dot_dimension_numbers<[1], [0], [0], [1], [0, 0, 1, 1], [], []>} : vector<32x16xbf16>, vector<16x256xbf16>, vector<32x256xf32> -> vector<32x256xf32>
    %129 = arith.addf %123, %128 : vector<32x256xf32>
    %c20 = arith.constant 20 : index
    %c0_132 = arith.constant 0 : index
    %c0_133 = arith.constant 0 : index
    %130 = vector.load %arg2[%c20, %c0_132, %c0_133] : memref<21x32x16xbf16, #tpu.memory_space<vmem>>, vector<1x32x16xbf16>
    %131 = vector.shape_cast %130 : vector<1x32x16xbf16> to vector<32x16xbf16>
    %c0_134 = arith.constant 0 : index
    %c0_135 = arith.constant 0 : index
    %c20_136 = arith.constant 20 : index
    %132 = vector.load %arg1[%c0_134, %c0_135, %c20_136] : memref<1x16x276xbf16, #tpu.memory_space<vmem>>, vector<1x16x256xbf16>
    %133 = vector.shape_cast %132 : vector<1x16x256xbf16> to vector<16x256xbf16>
    %cst_137 = arith.constant dense<0.000000e+00> : vector<32x256xf32>
    %134 = tpu.matmul %131, %133, %cst_137 {dimension_numbers = #tpu.dot_dimension_numbers<[1], [0], [0], [1], [0, 0, 1, 1], [], []>} : vector<32x16xbf16>, vector<16x256xbf16>, vector<32x256xf32> -> vector<32x256xf32>
    %135 = arith.addf %129, %134 : vector<32x256xf32>
    %136 = arith.addf %135, %10 : vector<32x256xf32>
    %cst_138 = arith.constant 0.000000e+00 : f32
    %137 = vector.broadcast %cst_138 : f32 to vector<32x256xf32>
    %138 = arith.maximumf %136, %137 : vector<32x256xf32>
    %c0_139 = arith.constant 0 : index
    %c128 = arith.constant 128 : index
    %139 = vector.load %arg12[%c0_139, %c128] : memref<32x512xf32, #tpu.memory_space<vmem>>, vector<32x256xf32>
    tpu.vector_store %arg12[%c0_139, %c128], %138 {strides = array<i32>} : memref<32x512xf32, #tpu.memory_space<vmem>>, vector<32x256xf32>,
    %cst_140 = arith.constant 0.000000e+00 : f32
    %140 = vector.broadcast %cst_140 : f32 to vector<32x20xf32>
    %c0_141 = arith.constant 0 : index
    %c364 = arith.constant 364 : index
    %141 = vector.load %arg12[%c0_141, %c364] : memref<32x512xf32, #tpu.memory_space<vmem>>, vector<32x20xf32>
    tpu.vector_store %arg12[%c0_141, %c364], %140 {strides = array<i32>} : memref<32x512xf32, #tpu.memory_space<vmem>>, vector<32x20xf32>,
    %c0_142 = arith.constant 0 : index
    %c0_143 = arith.constant 0 : index
    %c0_144 = arith.constant 0 : index
    %c0_145 = arith.constant 0 : index
    %142 = vector.load %arg4[%c0_142, %c0_143, %c0_144, %c0_145] : memref<6x3x32x32xbf16, #tpu.memory_space<vmem>>, vector<1x1x32x32xbf16>
    %143 = vector.shape_cast %142 : vector<1x1x32x32xbf16> to vector<32x32xbf16>
    %c0_146 = arith.constant 0 : index
    %c1_147 = arith.constant 1 : index
    %c0_148 = arith.constant 0 : index
    %c0_149 = arith.constant 0 : index
    %144 = vector.load %arg4[%c0_146, %c1_147, %c0_148, %c0_149] : memref<6x3x32x32xbf16, #tpu.memory_space<vmem>>, vector<1x1x32x32xbf16>
    %145 = vector.shape_cast %144 : vector<1x1x32x32xbf16> to vector<32x32xbf16>
    %c0_150 = arith.constant 0 : index
    %c2_151 = arith.constant 2 : index
    %c0_152 = arith.constant 0 : index
    %c0_153 = arith.constant 0 : index
    %146 = vector.load %arg4[%c0_150, %c2_151, %c0_152, %c0_153] : memref<6x3x32x32xbf16, #tpu.memory_space<vmem>>, vector<1x1x32x32xbf16>
    %147 = vector.shape_cast %146 : vector<1x1x32x32xbf16> to vector<32x32xbf16>
    %c0_154 = arith.constant 0 : index
    %c0_155 = arith.constant 0 : index
    %c0_156 = arith.constant 0 : index
    %148 = vector.load %arg5[%c0_154, %c0_155, %c0_156] : memref<6x32x1xf32, #tpu.memory_space<vmem>>, vector<1x32x1xf32>
    %149 = vector.shape_cast %148 : vector<1x32x1xf32> to vector<32x1xf32>
    %150 = vector.shape_cast %149 : vector<32x1xf32> to vector<32x1xf32>
    %151 = vector.broadcast %150 : vector<32x1xf32> to vector<32x256xf32>
    %c0_157 = arith.constant 0 : index
    %c128_158 = arith.constant 128 : index
    %152 = vector.load %arg12[%c0_157, %c128_158] : memref<32x512xf32, #tpu.memory_space<vmem>>, vector<32x256xf32>
    %153 = arith.truncf %152 : vector<32x256xf32> to vector<32x256xbf16>
    %cst_159 = arith.constant dense<0.000000e+00> : vector<32x256xf32>
    %154 = tpu.matmul %145, %153, %cst_159 {dimension_numbers = #tpu.dot_dimension_numbers<[1], [0], [0], [1], [0, 0, 1, 1], [], []>} : vector<32x32xbf16>, vector<32x256xbf16>, vector<32x256xf32> -> vector<32x256xf32>
    %c0_160 = arith.constant 0 : index
    %c126 = arith.constant 126 : index
    %155 = vector.load %arg12[%c0_160, %c126] : memref<32x512xf32, #tpu.memory_space<vmem>>, vector<32x256xf32>
    %156 = arith.truncf %155 : vector<32x256xf32> to vector<32x256xbf16>
    %cst_161 = arith.constant dense<0.000000e+00> : vector<32x256xf32>
    %157 = tpu.matmul %143, %156, %cst_161 {dimension_numbers = #tpu.dot_dimension_numbers<[1], [0], [0], [1], [0, 0, 1, 1], [], []>} : vector<32x32xbf16>, vector<32x256xbf16>, vector<32x256xf32> -> vector<32x256xf32>
    %158 = arith.addf %154, %157 : vector<32x256xf32>
    %c0_162 = arith.constant 0 : index
    %c130 = arith.constant 130 : index
    %159 = vector.load %arg12[%c0_162, %c130] : memref<32x512xf32, #tpu.memory_space<vmem>>, vector<32x256xf32>
    %160 = arith.truncf %159 : vector<32x256xf32> to vector<32x256xbf16>
    %cst_163 = arith.constant dense<0.000000e+00> : vector<32x256xf32>
    %161 = tpu.matmul %147, %160, %cst_163 {dimension_numbers = #tpu.dot_dimension_numbers<[1], [0], [0], [1], [0, 0, 1, 1], [], []>} : vector<32x32xbf16>, vector<32x256xbf16>, vector<32x256xf32> -> vector<32x256xf32>
    %162 = arith.addf %158, %161 : vector<32x256xf32>
    %163 = arith.addf %162, %151 : vector<32x256xf32>
    %cst_164 = arith.constant 0.000000e+00 : f32
    %164 = vector.broadcast %cst_164 : f32 to vector<32x256xf32>
    %165 = arith.maximumf %163, %164 : vector<32x256xf32>
    %166 = arith.addf %152, %165 : vector<32x256xf32>
    %c0_165 = arith.constant 0 : index
    %c128_166 = arith.constant 128 : index
    %167 = vector.load %arg13[%c0_165, %c128_166] : memref<32x512xf32, #tpu.memory_space<vmem>>, vector<32x256xf32>
    tpu.vector_store %arg13[%c0_165, %c128_166], %166 {strides = array<i32>} : memref<32x512xf32, #tpu.memory_space<vmem>>, vector<32x256xf32>,
    %cst_167 = arith.constant 0.000000e+00 : f32
    %168 = vector.broadcast %cst_167 : f32 to vector<32x20xf32>
    %c0_168 = arith.constant 0 : index
    %c364_169 = arith.constant 364 : index
    %169 = vector.load %arg13[%c0_168, %c364_169] : memref<32x512xf32, #tpu.memory_space<vmem>>, vector<32x20xf32>
    tpu.vector_store %arg13[%c0_168, %c364_169], %168 {strides = array<i32>} : memref<32x512xf32, #tpu.memory_space<vmem>>, vector<32x20xf32>,
    %c1_170 = arith.constant 1 : index
    %c0_171 = arith.constant 0 : index
    %c0_172 = arith.constant 0 : index
    %c0_173 = arith.constant 0 : index
    %170 = vector.load %arg4[%c1_170, %c0_171, %c0_172, %c0_173] : memref<6x3x32x32xbf16, #tpu.memory_space<vmem>>, vector<1x1x32x32xbf16>
    %171 = vector.shape_cast %170 : vector<1x1x32x32xbf16> to vector<32x32xbf16>
    %c1_174 = arith.constant 1 : index
    %c1_175 = arith.constant 1 : index
    %c0_176 = arith.constant 0 : index
    %c0_177 = arith.constant 0 : index
    %172 = vector.load %arg4[%c1_174, %c1_175, %c0_176, %c0_177] : memref<6x3x32x32xbf16, #tpu.memory_space<vmem>>, vector<1x1x32x32xbf16>
    %173 = vector.shape_cast %172 : vector<1x1x32x32xbf16> to vector<32x32xbf16>
    %c1_178 = arith.constant 1 : index
    %c2_179 = arith.constant 2 : index
    %c0_180 = arith.constant 0 : index
    %c0_181 = arith.constant 0 : index
    %174 = vector.load %arg4[%c1_178, %c2_179, %c0_180, %c0_181] : memref<6x3x32x32xbf16, #tpu.memory_space<vmem>>, vector<1x1x32x32xbf16>
    %175 = vector.shape_cast %174 : vector<1x1x32x32xbf16> to vector<32x32xbf16>
    %c1_182 = arith.constant 1 : index
    %c0_183 = arith.constant 0 : index
    %c0_184 = arith.constant 0 : index
    %176 = vector.load %arg5[%c1_182, %c0_183, %c0_184] : memref<6x32x1xf32, #tpu.memory_space<vmem>>, vector<1x32x1xf32>
    %177 = vector.shape_cast %176 : vector<1x32x1xf32> to vector<32x1xf32>
    %178 = vector.shape_cast %177 : vector<32x1xf32> to vector<32x1xf32>
    %179 = vector.broadcast %178 : vector<32x1xf32> to vector<32x256xf32>
    %c0_185 = arith.constant 0 : index
    %c128_186 = arith.constant 128 : index
    %180 = vector.load %arg13[%c0_185, %c128_186] : memref<32x512xf32, #tpu.memory_space<vmem>>, vector<32x256xf32>
    %181 = arith.truncf %180 : vector<32x256xf32> to vector<32x256xbf16>
    %cst_187 = arith.constant dense<0.000000e+00> : vector<32x256xf32>
    %182 = tpu.matmul %173, %181, %cst_187 {dimension_numbers = #tpu.dot_dimension_numbers<[1], [0], [0], [1], [0, 0, 1, 1], [], []>} : vector<32x32xbf16>, vector<32x256xbf16>, vector<32x256xf32> -> vector<32x256xf32>
    %c0_188 = arith.constant 0 : index
    %c124 = arith.constant 124 : index
    %183 = vector.load %arg13[%c0_188, %c124] : memref<32x512xf32, #tpu.memory_space<vmem>>, vector<32x256xf32>
    %184 = arith.truncf %183 : vector<32x256xf32> to vector<32x256xbf16>
    %cst_189 = arith.constant dense<0.000000e+00> : vector<32x256xf32>
    %185 = tpu.matmul %171, %184, %cst_189 {dimension_numbers = #tpu.dot_dimension_numbers<[1], [0], [0], [1], [0, 0, 1, 1], [], []>} : vector<32x32xbf16>, vector<32x256xbf16>, vector<32x256xf32> -> vector<32x256xf32>
    %186 = arith.addf %182, %185 : vector<32x256xf32>
    %c0_190 = arith.constant 0 : index
    %c132 = arith.constant 132 : index
    %187 = vector.load %arg13[%c0_190, %c132] : memref<32x512xf32, #tpu.memory_space<vmem>>, vector<32x256xf32>
    %188 = arith.truncf %187 : vector<32x256xf32> to vector<32x256xbf16>
    %cst_191 = arith.constant dense<0.000000e+00> : vector<32x256xf32>
    %189 = tpu.matmul %175, %188, %cst_191 {dimension_numbers = #tpu.dot_dimension_numbers<[1], [0], [0], [1], [0, 0, 1, 1], [], []>} : vector<32x32xbf16>, vector<32x256xbf16>, vector<32x256xf32> -> vector<32x256xf32>
    %190 = arith.addf %186, %189 : vector<32x256xf32>
    %191 = arith.addf %190, %179 : vector<32x256xf32>
    %cst_192 = arith.constant 0.000000e+00 : f32
    %192 = vector.broadcast %cst_192 : f32 to vector<32x256xf32>
    %193 = arith.maximumf %191, %192 : vector<32x256xf32>
    %194 = arith.addf %180, %193 : vector<32x256xf32>
    %c0_193 = arith.constant 0 : index
    %c128_194 = arith.constant 128 : index
    %195 = vector.load %arg12[%c0_193, %c128_194] : memref<32x512xf32, #tpu.memory_space<vmem>>, vector<32x256xf32>
    tpu.vector_store %arg12[%c0_193, %c128_194], %194 {strides = array<i32>} : memref<32x512xf32, #tpu.memory_space<vmem>>, vector<32x256xf32>,
    %cst_195 = arith.constant 0.000000e+00 : f32
    %196 = vector.broadcast %cst_195 : f32 to vector<32x20xf32>
    %c0_196 = arith.constant 0 : index
    %c364_197 = arith.constant 364 : index
    %197 = vector.load %arg12[%c0_196, %c364_197] : memref<32x512xf32, #tpu.memory_space<vmem>>, vector<32x20xf32>
    tpu.vector_store %arg12[%c0_196, %c364_197], %196 {strides = array<i32>} : memref<32x512xf32, #tpu.memory_space<vmem>>, vector<32x20xf32>,
    %c2_198 = arith.constant 2 : index
    %c0_199 = arith.constant 0 : index
    %c0_200 = arith.constant 0 : index
    %c0_201 = arith.constant 0 : index
    %198 = vector.load %arg4[%c2_198, %c0_199, %c0_200, %c0_201] : memref<6x3x32x32xbf16, #tpu.memory_space<vmem>>, vector<1x1x32x32xbf16>
    %199 = vector.shape_cast %198 : vector<1x1x32x32xbf16> to vector<32x32xbf16>
    %c2_202 = arith.constant 2 : index
    %c1_203 = arith.constant 1 : index
    %c0_204 = arith.constant 0 : index
    %c0_205 = arith.constant 0 : index
    %200 = vector.load %arg4[%c2_202, %c1_203, %c0_204, %c0_205] : memref<6x3x32x32xbf16, #tpu.memory_space<vmem>>, vector<1x1x32x32xbf16>
    %201 = vector.shape_cast %200 : vector<1x1x32x32xbf16> to vector<32x32xbf16>
    %c2_206 = arith.constant 2 : index
    %c2_207 = arith.constant 2 : index
    %c0_208 = arith.constant 0 : index
    %c0_209 = arith.constant 0 : index
    %202 = vector.load %arg4[%c2_206, %c2_207, %c0_208, %c0_209] : memref<6x3x32x32xbf16, #tpu.memory_space<vmem>>, vector<1x1x32x32xbf16>
    %203 = vector.shape_cast %202 : vector<1x1x32x32xbf16> to vector<32x32xbf16>
    %c2_210 = arith.constant 2 : index
    %c0_211 = arith.constant 0 : index
    %c0_212 = arith.constant 0 : index
    %204 = vector.load %arg5[%c2_210, %c0_211, %c0_212] : memref<6x32x1xf32, #tpu.memory_space<vmem>>, vector<1x32x1xf32>
    %205 = vector.shape_cast %204 : vector<1x32x1xf32> to vector<32x1xf32>
    %206 = vector.shape_cast %205 : vector<32x1xf32> to vector<32x1xf32>
    %207 = vector.broadcast %206 : vector<32x1xf32> to vector<32x256xf32>
    %c0_213 = arith.constant 0 : index
    %c128_214 = arith.constant 128 : index
    %208 = vector.load %arg12[%c0_213, %c128_214] : memref<32x512xf32, #tpu.memory_space<vmem>>, vector<32x256xf32>
    %209 = arith.truncf %208 : vector<32x256xf32> to vector<32x256xbf16>
    %cst_215 = arith.constant dense<0.000000e+00> : vector<32x256xf32>
    %210 = tpu.matmul %201, %209, %cst_215 {dimension_numbers = #tpu.dot_dimension_numbers<[1], [0], [0], [1], [0, 0, 1, 1], [], []>} : vector<32x32xbf16>, vector<32x256xbf16>, vector<32x256xf32> -> vector<32x256xf32>
    %c0_216 = arith.constant 0 : index
    %c120 = arith.constant 120 : index
    %211 = vector.load %arg12[%c0_216, %c120] : memref<32x512xf32, #tpu.memory_space<vmem>>, vector<32x256xf32>
    %212 = arith.truncf %211 : vector<32x256xf32> to vector<32x256xbf16>
    %cst_217 = arith.constant dense<0.000000e+00> : vector<32x256xf32>
    %213 = tpu.matmul %199, %212, %cst_217 {dimension_numbers = #tpu.dot_dimension_numbers<[1], [0], [0], [1], [0, 0, 1, 1], [], []>} : vector<32x32xbf16>, vector<32x256xbf16>, vector<32x256xf32> -> vector<32x256xf32>
    %214 = arith.addf %210, %213 : vector<32x256xf32>
    %c0_218 = arith.constant 0 : index
    %c136 = arith.constant 136 : index
    %215 = vector.load %arg12[%c0_218, %c136] : memref<32x512xf32, #tpu.memory_space<vmem>>, vector<32x256xf32>
    %216 = arith.truncf %215 : vector<32x256xf32> to vector<32x256xbf16>
    %cst_219 = arith.constant dense<0.000000e+00> : vector<32x256xf32>
    %217 = tpu.matmul %203, %216, %cst_219 {dimension_numbers = #tpu.dot_dimension_numbers<[1], [0], [0], [1], [0, 0, 1, 1], [], []>} : vector<32x32xbf16>, vector<32x256xbf16>, vector<32x256xf32> -> vector<32x256xf32>
    %218 = arith.addf %214, %217 : vector<32x256xf32>
    %219 = arith.addf %218, %207 : vector<32x256xf32>
    %cst_220 = arith.constant 0.000000e+00 : f32
    %220 = vector.broadcast %cst_220 : f32 to vector<32x256xf32>
    %221 = arith.maximumf %219, %220 : vector<32x256xf32>
    %222 = arith.addf %208, %221 : vector<32x256xf32>
    %c0_221 = arith.constant 0 : index
    %c128_222 = arith.constant 128 : index
    %223 = vector.load %arg13[%c0_221, %c128_222] : memref<32x512xf32, #tpu.memory_space<vmem>>, vector<32x256xf32>
    tpu.vector_store %arg13[%c0_221, %c128_222], %222 {strides = array<i32>} : memref<32x512xf32, #tpu.memory_space<vmem>>, vector<32x256xf32>,
    %cst_223 = arith.constant 0.000000e+00 : f32
    %224 = vector.broadcast %cst_223 : f32 to vector<32x20xf32>
    %c0_224 = arith.constant 0 : index
    %c364_225 = arith.constant 364 : index
    %225 = vector.load %arg13[%c0_224, %c364_225] : memref<32x512xf32, #tpu.memory_space<vmem>>, vector<32x20xf32>
    tpu.vector_store %arg13[%c0_224, %c364_225], %224 {strides = array<i32>} : memref<32x512xf32, #tpu.memory_space<vmem>>, vector<32x20xf32>,
    %c3_226 = arith.constant 3 : index
    %c0_227 = arith.constant 0 : index
    %c0_228 = arith.constant 0 : index
    %c0_229 = arith.constant 0 : index
    %226 = vector.load %arg4[%c3_226, %c0_227, %c0_228, %c0_229] : memref<6x3x32x32xbf16, #tpu.memory_space<vmem>>, vector<1x1x32x32xbf16>
    %227 = vector.shape_cast %226 : vector<1x1x32x32xbf16> to vector<32x32xbf16>
    %c3_230 = arith.constant 3 : index
    %c1_231 = arith.constant 1 : index
    %c0_232 = arith.constant 0 : index
    %c0_233 = arith.constant 0 : index
    %228 = vector.load %arg4[%c3_230, %c1_231, %c0_232, %c0_233] : memref<6x3x32x32xbf16, #tpu.memory_space<vmem>>, vector<1x1x32x32xbf16>
    %229 = vector.shape_cast %228 : vector<1x1x32x32xbf16> to vector<32x32xbf16>
    %c3_234 = arith.constant 3 : index
    %c2_235 = arith.constant 2 : index
    %c0_236 = arith.constant 0 : index
    %c0_237 = arith.constant 0 : index
    %230 = vector.load %arg4[%c3_234, %c2_235, %c0_236, %c0_237] : memref<6x3x32x32xbf16, #tpu.memory_space<vmem>>, vector<1x1x32x32xbf16>
    %231 = vector.shape_cast %230 : vector<1x1x32x32xbf16> to vector<32x32xbf16>
    %c3_238 = arith.constant 3 : index
    %c0_239 = arith.constant 0 : index
    %c0_240 = arith.constant 0 : index
    %232 = vector.load %arg5[%c3_238, %c0_239, %c0_240] : memref<6x32x1xf32, #tpu.memory_space<vmem>>, vector<1x32x1xf32>
    %233 = vector.shape_cast %232 : vector<1x32x1xf32> to vector<32x1xf32>
    %234 = vector.shape_cast %233 : vector<32x1xf32> to vector<32x1xf32>
    %235 = vector.broadcast %234 : vector<32x1xf32> to vector<32x256xf32>
    %c0_241 = arith.constant 0 : index
    %c128_242 = arith.constant 128 : index
    %236 = vector.load %arg13[%c0_241, %c128_242] : memref<32x512xf32, #tpu.memory_space<vmem>>, vector<32x256xf32>
    %237 = arith.truncf %236 : vector<32x256xf32> to vector<32x256xbf16>
    %cst_243 = arith.constant dense<0.000000e+00> : vector<32x256xf32>
    %238 = tpu.matmul %229, %237, %cst_243 {dimension_numbers = #tpu.dot_dimension_numbers<[1], [0], [0], [1], [0, 0, 1, 1], [], []>} : vector<32x32xbf16>, vector<32x256xbf16>, vector<32x256xf32> -> vector<32x256xf32>
    %c0_244 = arith.constant 0 : index
    %c112 = arith.constant 112 : index
    %239 = vector.load %arg13[%c0_244, %c112] : memref<32x512xf32, #tpu.memory_space<vmem>>, vector<32x256xf32>
    %240 = arith.truncf %239 : vector<32x256xf32> to vector<32x256xbf16>
    %cst_245 = arith.constant dense<0.000000e+00> : vector<32x256xf32>
    %241 = tpu.matmul %227, %240, %cst_245 {dimension_numbers = #tpu.dot_dimension_numbers<[1], [0], [0], [1], [0, 0, 1, 1], [], []>} : vector<32x32xbf16>, vector<32x256xbf16>, vector<32x256xf32> -> vector<32x256xf32>
    %242 = arith.addf %238, %241 : vector<32x256xf32>
    %c0_246 = arith.constant 0 : index
    %c144 = arith.constant 144 : index
    %243 = vector.load %arg13[%c0_246, %c144] : memref<32x512xf32, #tpu.memory_space<vmem>>, vector<32x256xf32>
    %244 = arith.truncf %243 : vector<32x256xf32> to vector<32x256xbf16>
    %cst_247 = arith.constant dense<0.000000e+00> : vector<32x256xf32>
    %245 = tpu.matmul %231, %244, %cst_247 {dimension_numbers = #tpu.dot_dimension_numbers<[1], [0], [0], [1], [0, 0, 1, 1], [], []>} : vector<32x32xbf16>, vector<32x256xbf16>, vector<32x256xf32> -> vector<32x256xf32>
    %246 = arith.addf %242, %245 : vector<32x256xf32>
    %247 = arith.addf %246, %235 : vector<32x256xf32>
    %cst_248 = arith.constant 0.000000e+00 : f32
    %248 = vector.broadcast %cst_248 : f32 to vector<32x256xf32>
    %249 = arith.maximumf %247, %248 : vector<32x256xf32>
    %250 = arith.addf %236, %249 : vector<32x256xf32>
    %c0_249 = arith.constant 0 : index
    %c128_250 = arith.constant 128 : index
    %251 = vector.load %arg12[%c0_249, %c128_250] : memref<32x512xf32, #tpu.memory_space<vmem>>, vector<32x256xf32>
    tpu.vector_store %arg12[%c0_249, %c128_250], %250 {strides = array<i32>} : memref<32x512xf32, #tpu.memory_space<vmem>>, vector<32x256xf32>,
    %cst_251 = arith.constant 0.000000e+00 : f32
    %252 = vector.broadcast %cst_251 : f32 to vector<32x20xf32>
    %c0_252 = arith.constant 0 : index
    %c364_253 = arith.constant 364 : index
    %253 = vector.load %arg12[%c0_252, %c364_253] : memref<32x512xf32, #tpu.memory_space<vmem>>, vector<32x20xf32>
    tpu.vector_store %arg12[%c0_252, %c364_253], %252 {strides = array<i32>} : memref<32x512xf32, #tpu.memory_space<vmem>>, vector<32x20xf32>,
    %c4_254 = arith.constant 4 : index
    %c0_255 = arith.constant 0 : index
    %c0_256 = arith.constant 0 : index
    %c0_257 = arith.constant 0 : index
    %254 = vector.load %arg4[%c4_254, %c0_255, %c0_256, %c0_257] : memref<6x3x32x32xbf16, #tpu.memory_space<vmem>>, vector<1x1x32x32xbf16>
    %255 = vector.shape_cast %254 : vector<1x1x32x32xbf16> to vector<32x32xbf16>
    %c4_258 = arith.constant 4 : index
    %c1_259 = arith.constant 1 : index
    %c0_260 = arith.constant 0 : index
    %c0_261 = arith.constant 0 : index
    %256 = vector.load %arg4[%c4_258, %c1_259, %c0_260, %c0_261] : memref<6x3x32x32xbf16, #tpu.memory_space<vmem>>, vector<1x1x32x32xbf16>
    %257 = vector.shape_cast %256 : vector<1x1x32x32xbf16> to vector<32x32xbf16>
    %c4_262 = arith.constant 4 : index
    %c2_263 = arith.constant 2 : index
    %c0_264 = arith.constant 0 : index
    %c0_265 = arith.constant 0 : index
    %258 = vector.load %arg4[%c4_262, %c2_263, %c0_264, %c0_265] : memref<6x3x32x32xbf16, #tpu.memory_space<vmem>>, vector<1x1x32x32xbf16>
    %259 = vector.shape_cast %258 : vector<1x1x32x32xbf16> to vector<32x32xbf16>
    %c4_266 = arith.constant 4 : index
    %c0_267 = arith.constant 0 : index
    %c0_268 = arith.constant 0 : index
    %260 = vector.load %arg5[%c4_266, %c0_267, %c0_268] : memref<6x32x1xf32, #tpu.memory_space<vmem>>, vector<1x32x1xf32>
    %261 = vector.shape_cast %260 : vector<1x32x1xf32> to vector<32x1xf32>
    %262 = vector.shape_cast %261 : vector<32x1xf32> to vector<32x1xf32>
    %263 = vector.broadcast %262 : vector<32x1xf32> to vector<32x256xf32>
    %c0_269 = arith.constant 0 : index
    %c128_270 = arith.constant 128 : index
    %264 = vector.load %arg12[%c0_269, %c128_270] : memref<32x512xf32, #tpu.memory_space<vmem>>, vector<32x256xf32>
    %265 = arith.truncf %264 : vector<32x256xf32> to vector<32x256xbf16>
    %cst_271 = arith.constant dense<0.000000e+00> : vector<32x256xf32>
    %266 = tpu.matmul %257, %265, %cst_271 {dimension_numbers = #tpu.dot_dimension_numbers<[1], [0], [0], [1], [0, 0, 1, 1], [], []>} : vector<32x32xbf16>, vector<32x256xbf16>, vector<32x256xf32> -> vector<32x256xf32>
    %c0_272 = arith.constant 0 : index
    %c96 = arith.constant 96 : index
    %267 = vector.load %arg12[%c0_272, %c96] : memref<32x512xf32, #tpu.memory_space<vmem>>, vector<32x256xf32>
    %268 = arith.truncf %267 : vector<32x256xf32> to vector<32x256xbf16>
    %cst_273 = arith.constant dense<0.000000e+00> : vector<32x256xf32>
    %269 = tpu.matmul %255, %268, %cst_273 {dimension_numbers = #tpu.dot_dimension_numbers<[1], [0], [0], [1], [0, 0, 1, 1], [], []>} : vector<32x32xbf16>, vector<32x256xbf16>, vector<32x256xf32> -> vector<32x256xf32>
    %270 = arith.addf %266, %269 : vector<32x256xf32>
    %c0_274 = arith.constant 0 : index
    %c160 = arith.constant 160 : index
    %271 = vector.load %arg12[%c0_274, %c160] : memref<32x512xf32, #tpu.memory_space<vmem>>, vector<32x256xf32>
    %272 = arith.truncf %271 : vector<32x256xf32> to vector<32x256xbf16>
    %cst_275 = arith.constant dense<0.000000e+00> : vector<32x256xf32>
    %273 = tpu.matmul %259, %272, %cst_275 {dimension_numbers = #tpu.dot_dimension_numbers<[1], [0], [0], [1], [0, 0, 1, 1], [], []>} : vector<32x32xbf16>, vector<32x256xbf16>, vector<32x256xf32> -> vector<32x256xf32>
    %274 = arith.addf %270, %273 : vector<32x256xf32>
    %275 = arith.addf %274, %263 : vector<32x256xf32>
    %cst_276 = arith.constant 0.000000e+00 : f32
    %276 = vector.broadcast %cst_276 : f32 to vector<32x256xf32>
    %277 = arith.maximumf %275, %276 : vector<32x256xf32>
    %278 = arith.addf %264, %277 : vector<32x256xf32>
    %c0_277 = arith.constant 0 : index
    %c128_278 = arith.constant 128 : index
    %279 = vector.load %arg13[%c0_277, %c128_278] : memref<32x512xf32, #tpu.memory_space<vmem>>, vector<32x256xf32>
    tpu.vector_store %arg13[%c0_277, %c128_278], %278 {strides = array<i32>} : memref<32x512xf32, #tpu.memory_space<vmem>>, vector<32x256xf32>,
    %cst_279 = arith.constant 0.000000e+00 : f32
    %280 = vector.broadcast %cst_279 : f32 to vector<32x20xf32>
    %c0_280 = arith.constant 0 : index
    %c364_281 = arith.constant 364 : index
    %281 = vector.load %arg13[%c0_280, %c364_281] : memref<32x512xf32, #tpu.memory_space<vmem>>, vector<32x20xf32>
    tpu.vector_store %arg13[%c0_280, %c364_281], %280 {strides = array<i32>} : memref<32x512xf32, #tpu.memory_space<vmem>>, vector<32x20xf32>,
    %c5_282 = arith.constant 5 : index
    %c0_283 = arith.constant 0 : index
    %c0_284 = arith.constant 0 : index
    %c0_285 = arith.constant 0 : index
    %282 = vector.load %arg4[%c5_282, %c0_283, %c0_284, %c0_285] : memref<6x3x32x32xbf16, #tpu.memory_space<vmem>>, vector<1x1x32x32xbf16>
    %283 = vector.shape_cast %282 : vector<1x1x32x32xbf16> to vector<32x32xbf16>
    %c5_286 = arith.constant 5 : index
    %c1_287 = arith.constant 1 : index
    %c0_288 = arith.constant 0 : index
    %c0_289 = arith.constant 0 : index
    %284 = vector.load %arg4[%c5_286, %c1_287, %c0_288, %c0_289] : memref<6x3x32x32xbf16, #tpu.memory_space<vmem>>, vector<1x1x32x32xbf16>
    %285 = vector.shape_cast %284 : vector<1x1x32x32xbf16> to vector<32x32xbf16>
    %c5_290 = arith.constant 5 : index
    %c2_291 = arith.constant 2 : index
    %c0_292 = arith.constant 0 : index
    %c0_293 = arith.constant 0 : index
    %286 = vector.load %arg4[%c5_290, %c2_291, %c0_292, %c0_293] : memref<6x3x32x32xbf16, #tpu.memory_space<vmem>>, vector<1x1x32x32xbf16>
    %287 = vector.shape_cast %286 : vector<1x1x32x32xbf16> to vector<32x32xbf16>
    %c5_294 = arith.constant 5 : index
    %c0_295 = arith.constant 0 : index
    %c0_296 = arith.constant 0 : index
    %288 = vector.load %arg5[%c5_294, %c0_295, %c0_296] : memref<6x32x1xf32, #tpu.memory_space<vmem>>, vector<1x32x1xf32>
    %289 = vector.shape_cast %288 : vector<1x32x1xf32> to vector<32x1xf32>
    %290 = vector.shape_cast %289 : vector<32x1xf32> to vector<32x1xf32>
    %291 = vector.broadcast %290 : vector<32x1xf32> to vector<32x256xf32>
    %c0_297 = arith.constant 0 : index
    %c128_298 = arith.constant 128 : index
    %292 = vector.load %arg13[%c0_297, %c128_298] : memref<32x512xf32, #tpu.memory_space<vmem>>, vector<32x256xf32>
    %293 = arith.truncf %292 : vector<32x256xf32> to vector<32x256xbf16>
    %cst_299 = arith.constant dense<0.000000e+00> : vector<32x256xf32>
    %294 = tpu.matmul %285, %293, %cst_299 {dimension_numbers = #tpu.dot_dimension_numbers<[1], [0], [0], [1], [0, 0, 1, 1], [], []>} : vector<32x32xbf16>, vector<32x256xbf16>, vector<32x256xf32> -> vector<32x256xf32>
    %c0_300 = arith.constant 0 : index
    %c64 = arith.constant 64 : index
    %295 = vector.load %arg13[%c0_300, %c64] : memref<32x512xf32, #tpu.memory_space<vmem>>, vector<32x256xf32>
    %296 = arith.truncf %295 : vector<32x256xf32> to vector<32x256xbf16>
    %cst_301 = arith.constant dense<0.000000e+00> : vector<32x256xf32>
    %297 = tpu.matmul %283, %296, %cst_301 {dimension_numbers = #tpu.dot_dimension_numbers<[1], [0], [0], [1], [0, 0, 1, 1], [], []>} : vector<32x32xbf16>, vector<32x256xbf16>, vector<32x256xf32> -> vector<32x256xf32>
    %298 = arith.addf %294, %297 : vector<32x256xf32>
    %c0_302 = arith.constant 0 : index
    %c192 = arith.constant 192 : index
    %299 = vector.load %arg13[%c0_302, %c192] : memref<32x512xf32, #tpu.memory_space<vmem>>, vector<32x256xf32>
    %300 = arith.truncf %299 : vector<32x256xf32> to vector<32x256xbf16>
    %cst_303 = arith.constant dense<0.000000e+00> : vector<32x256xf32>
    %301 = tpu.matmul %287, %300, %cst_303 {dimension_numbers = #tpu.dot_dimension_numbers<[1], [0], [0], [1], [0, 0, 1, 1], [], []>} : vector<32x32xbf16>, vector<32x256xbf16>, vector<32x256xf32> -> vector<32x256xf32>
    %302 = arith.addf %298, %301 : vector<32x256xf32>
    %303 = arith.addf %302, %291 : vector<32x256xf32>
    %cst_304 = arith.constant 0.000000e+00 : f32
    %304 = vector.broadcast %cst_304 : f32 to vector<32x256xf32>
    %305 = arith.maximumf %303, %304 : vector<32x256xf32>
    %306 = arith.addf %292, %305 : vector<32x256xf32>
    %c0_305 = arith.constant 0 : index
    %c128_306 = arith.constant 128 : index
    %307 = vector.load %arg12[%c0_305, %c128_306] : memref<32x512xf32, #tpu.memory_space<vmem>>, vector<32x256xf32>
    tpu.vector_store %arg12[%c0_305, %c128_306], %306 {strides = array<i32>} : memref<32x512xf32, #tpu.memory_space<vmem>>, vector<32x256xf32>,
    %cst_307 = arith.constant 0.000000e+00 : f32
    %308 = vector.broadcast %cst_307 : f32 to vector<32x20xf32>
    %c0_308 = arith.constant 0 : index
    %c364_309 = arith.constant 364 : index
    %309 = vector.load %arg12[%c0_308, %c364_309] : memref<32x512xf32, #tpu.memory_space<vmem>>, vector<32x20xf32>
    tpu.vector_store %arg12[%c0_308, %c364_309], %308 {strides = array<i32>} : memref<32x512xf32, #tpu.memory_space<vmem>>, vector<32x20xf32>,
    %c0_310 = arith.constant 0 : index
    %c0_311 = arith.constant 0 : index
    %310 = vector.load %arg7[%c0_310, %c0_311] : memref<2x1xf32, #tpu.memory_space<vmem>>, vector<2x1xf32>
    %311 = vector.shape_cast %310 : vector<2x1xf32> to vector<2x1xf32>
    %312 = vector.broadcast %311 : vector<2x1xf32> to vector<2x256xf32>
    %c0_312 = arith.constant 0 : index
    %c0_313 = arith.constant 0 : index
    %c0_314 = arith.constant 0 : index
    %313 = vector.load %arg6[%c0_312, %c0_313, %c0_314] : memref<75x2x32xbf16, #tpu.memory_space<vmem>>, vector<1x2x32xbf16>
    %314 = vector.shape_cast %313 : vector<1x2x32xbf16> to vector<2x32xbf16>
    %c0_315 = arith.constant 0 : index
    %c128_316 = arith.constant 128 : index
    %315 = vector.load %arg12[%c0_315, %c128_316] : memref<32x512xf32, #tpu.memory_space<vmem>>, vector<32x256xf32>
    %316 = arith.truncf %315 : vector<32x256xf32> to vector<32x256xbf16>
    %cst_317 = arith.constant dense<0.000000e+00> : vector<2x256xf32>
    %317 = tpu.matmul %314, %316, %cst_317 {dimension_numbers = #tpu.dot_dimension_numbers<[1], [0], [0], [1], [0, 0, 1, 1], [], []>} : vector<2x32xbf16>, vector<32x256xbf16>, vector<2x256xf32> -> vector<2x256xf32>
    %c1_318 = arith.constant 1 : index
    %c0_319 = arith.constant 0 : index
    %c0_320 = arith.constant 0 : index
    %318 = vector.load %arg6[%c1_318, %c0_319, %c0_320] : memref<75x2x32xbf16, #tpu.memory_space<vmem>>, vector<1x2x32xbf16>
    %319 = vector.shape_cast %318 : vector<1x2x32xbf16> to vector<2x32xbf16>
    %c0_321 = arith.constant 0 : index
    %c129 = arith.constant 129 : index
    %320 = vector.load %arg12[%c0_321, %c129] : memref<32x512xf32, #tpu.memory_space<vmem>>, vector<32x256xf32>
    %321 = arith.truncf %320 : vector<32x256xf32> to vector<32x256xbf16>
    %cst_322 = arith.constant dense<0.000000e+00> : vector<2x256xf32>
    %322 = tpu.matmul %319, %321, %cst_322 {dimension_numbers = #tpu.dot_dimension_numbers<[1], [0], [0], [1], [0, 0, 1, 1], [], []>} : vector<2x32xbf16>, vector<32x256xbf16>, vector<2x256xf32> -> vector<2x256xf32>
    %323 = arith.addf %317, %322 : vector<2x256xf32>
    %c2_323 = arith.constant 2 : index
    %c0_324 = arith.constant 0 : index
    %c0_325 = arith.constant 0 : index
    %324 = vector.load %arg6[%c2_323, %c0_324, %c0_325] : memref<75x2x32xbf16, #tpu.memory_space<vmem>>, vector<1x2x32xbf16>
    %325 = vector.shape_cast %324 : vector<1x2x32xbf16> to vector<2x32xbf16>
    %c0_326 = arith.constant 0 : index
    %c130_327 = arith.constant 130 : index
    %326 = vector.load %arg12[%c0_326, %c130_327] : memref<32x512xf32, #tpu.memory_space<vmem>>, vector<32x256xf32>
    %327 = arith.truncf %326 : vector<32x256xf32> to vector<32x256xbf16>
    %cst_328 = arith.constant dense<0.000000e+00> : vector<2x256xf32>
    %328 = tpu.matmul %325, %327, %cst_328 {dimension_numbers = #tpu.dot_dimension_numbers<[1], [0], [0], [1], [0, 0, 1, 1], [], []>} : vector<2x32xbf16>, vector<32x256xbf16>, vector<2x256xf32> -> vector<2x256xf32>
    %329 = arith.addf %323, %328 : vector<2x256xf32>
    %c3_329 = arith.constant 3 : index
    %c0_330 = arith.constant 0 : index
    %c0_331 = arith.constant 0 : index
    %330 = vector.load %arg6[%c3_329, %c0_330, %c0_331] : memref<75x2x32xbf16, #tpu.memory_space<vmem>>, vector<1x2x32xbf16>
    %331 = vector.shape_cast %330 : vector<1x2x32xbf16> to vector<2x32xbf16>
    %c0_332 = arith.constant 0 : index
    %c131 = arith.constant 131 : index
    %332 = vector.load %arg12[%c0_332, %c131] : memref<32x512xf32, #tpu.memory_space<vmem>>, vector<32x256xf32>
    %333 = arith.truncf %332 : vector<32x256xf32> to vector<32x256xbf16>
    %cst_333 = arith.constant dense<0.000000e+00> : vector<2x256xf32>
    %334 = tpu.matmul %331, %333, %cst_333 {dimension_numbers = #tpu.dot_dimension_numbers<[1], [0], [0], [1], [0, 0, 1, 1], [], []>} : vector<2x32xbf16>, vector<32x256xbf16>, vector<2x256xf32> -> vector<2x256xf32>
    %335 = arith.addf %329, %334 : vector<2x256xf32>
    %c4_334 = arith.constant 4 : index
    %c0_335 = arith.constant 0 : index
    %c0_336 = arith.constant 0 : index
    %336 = vector.load %arg6[%c4_334, %c0_335, %c0_336] : memref<75x2x32xbf16, #tpu.memory_space<vmem>>, vector<1x2x32xbf16>
    %337 = vector.shape_cast %336 : vector<1x2x32xbf16> to vector<2x32xbf16>
    %c0_337 = arith.constant 0 : index
    %c132_338 = arith.constant 132 : index
    %338 = vector.load %arg12[%c0_337, %c132_338] : memref<32x512xf32, #tpu.memory_space<vmem>>, vector<32x256xf32>
    %339 = arith.truncf %338 : vector<32x256xf32> to vector<32x256xbf16>
    %cst_339 = arith.constant dense<0.000000e+00> : vector<2x256xf32>
    %340 = tpu.matmul %337, %339, %cst_339 {dimension_numbers = #tpu.dot_dimension_numbers<[1], [0], [0], [1], [0, 0, 1, 1], [], []>} : vector<2x32xbf16>, vector<32x256xbf16>, vector<2x256xf32> -> vector<2x256xf32>
    %341 = arith.addf %335, %340 : vector<2x256xf32>
    %c5_340 = arith.constant 5 : index
    %c0_341 = arith.constant 0 : index
    %c0_342 = arith.constant 0 : index
    %342 = vector.load %arg6[%c5_340, %c0_341, %c0_342] : memref<75x2x32xbf16, #tpu.memory_space<vmem>>, vector<1x2x32xbf16>
    %343 = vector.shape_cast %342 : vector<1x2x32xbf16> to vector<2x32xbf16>
    %c0_343 = arith.constant 0 : index
    %c133 = arith.constant 133 : index
    %344 = vector.load %arg12[%c0_343, %c133] : memref<32x512xf32, #tpu.memory_space<vmem>>, vector<32x256xf32>
    %345 = arith.truncf %344 : vector<32x256xf32> to vector<32x256xbf16>
    %cst_344 = arith.constant dense<0.000000e+00> : vector<2x256xf32>
    %346 = tpu.matmul %343, %345, %cst_344 {dimension_numbers = #tpu.dot_dimension_numbers<[1], [0], [0], [1], [0, 0, 1, 1], [], []>} : vector<2x32xbf16>, vector<32x256xbf16>, vector<2x256xf32> -> vector<2x256xf32>
    %347 = arith.addf %341, %346 : vector<2x256xf32>
    %c6_345 = arith.constant 6 : index
    %c0_346 = arith.constant 0 : index
    %c0_347 = arith.constant 0 : index
    %348 = vector.load %arg6[%c6_345, %c0_346, %c0_347] : memref<75x2x32xbf16, #tpu.memory_space<vmem>>, vector<1x2x32xbf16>
    %349 = vector.shape_cast %348 : vector<1x2x32xbf16> to vector<2x32xbf16>
    %c0_348 = arith.constant 0 : index
    %c134 = arith.constant 134 : index
    %350 = vector.load %arg12[%c0_348, %c134] : memref<32x512xf32, #tpu.memory_space<vmem>>, vector<32x256xf32>
    %351 = arith.truncf %350 : vector<32x256xf32> to vector<32x256xbf16>
    %cst_349 = arith.constant dense<0.000000e+00> : vector<2x256xf32>
    %352 = tpu.matmul %349, %351, %cst_349 {dimension_numbers = #tpu.dot_dimension_numbers<[1], [0], [0], [1], [0, 0, 1, 1], [], []>} : vector<2x32xbf16>, vector<32x256xbf16>, vector<2x256xf32> -> vector<2x256xf32>
    %353 = arith.addf %347, %352 : vector<2x256xf32>
    %c7_350 = arith.constant 7 : index
    %c0_351 = arith.constant 0 : index
    %c0_352 = arith.constant 0 : index
    %354 = vector.load %arg6[%c7_350, %c0_351, %c0_352] : memref<75x2x32xbf16, #tpu.memory_space<vmem>>, vector<1x2x32xbf16>
    %355 = vector.shape_cast %354 : vector<1x2x32xbf16> to vector<2x32xbf16>
    %c0_353 = arith.constant 0 : index
    %c135 = arith.constant 135 : index
    %356 = vector.load %arg12[%c0_353, %c135] : memref<32x512xf32, #tpu.memory_space<vmem>>, vector<32x256xf32>
    %357 = arith.truncf %356 : vector<32x256xf32> to vector<32x256xbf16>
    %cst_354 = arith.constant dense<0.000000e+00> : vector<2x256xf32>
    %358 = tpu.matmul %355, %357, %cst_354 {dimension_numbers = #tpu.dot_dimension_numbers<[1], [0], [0], [1], [0, 0, 1, 1], [], []>} : vector<2x32xbf16>, vector<32x256xbf16>, vector<2x256xf32> -> vector<2x256xf32>
    %359 = arith.addf %353, %358 : vector<2x256xf32>
    %c8_355 = arith.constant 8 : index
    %c0_356 = arith.constant 0 : index
    %c0_357 = arith.constant 0 : index
    %360 = vector.load %arg6[%c8_355, %c0_356, %c0_357] : memref<75x2x32xbf16, #tpu.memory_space<vmem>>, vector<1x2x32xbf16>
    %361 = vector.shape_cast %360 : vector<1x2x32xbf16> to vector<2x32xbf16>
    %c0_358 = arith.constant 0 : index
    %c136_359 = arith.constant 136 : index
    %362 = vector.load %arg12[%c0_358, %c136_359] : memref<32x512xf32, #tpu.memory_space<vmem>>, vector<32x256xf32>
    %363 = arith.truncf %362 : vector<32x256xf32> to vector<32x256xbf16>
    %cst_360 = arith.constant dense<0.000000e+00> : vector<2x256xf32>
    %364 = tpu.matmul %361, %363, %cst_360 {dimension_numbers = #tpu.dot_dimension_numbers<[1], [0], [0], [1], [0, 0, 1, 1], [], []>} : vector<2x32xbf16>, vector<32x256xbf16>, vector<2x256xf32> -> vector<2x256xf32>
    %365 = arith.addf %359, %364 : vector<2x256xf32>
    %c9_361 = arith.constant 9 : index
    %c0_362 = arith.constant 0 : index
    %c0_363 = arith.constant 0 : index
    %366 = vector.load %arg6[%c9_361, %c0_362, %c0_363] : memref<75x2x32xbf16, #tpu.memory_space<vmem>>, vector<1x2x32xbf16>
    %367 = vector.shape_cast %366 : vector<1x2x32xbf16> to vector<2x32xbf16>
    %c0_364 = arith.constant 0 : index
    %c137 = arith.constant 137 : index
    %368 = vector.load %arg12[%c0_364, %c137] : memref<32x512xf32, #tpu.memory_space<vmem>>, vector<32x256xf32>
    %369 = arith.truncf %368 : vector<32x256xf32> to vector<32x256xbf16>
    %cst_365 = arith.constant dense<0.000000e+00> : vector<2x256xf32>
    %370 = tpu.matmul %367, %369, %cst_365 {dimension_numbers = #tpu.dot_dimension_numbers<[1], [0], [0], [1], [0, 0, 1, 1], [], []>} : vector<2x32xbf16>, vector<32x256xbf16>, vector<2x256xf32> -> vector<2x256xf32>
    %371 = arith.addf %365, %370 : vector<2x256xf32>
    %c10_366 = arith.constant 10 : index
    %c0_367 = arith.constant 0 : index
    %c0_368 = arith.constant 0 : index
    %372 = vector.load %arg6[%c10_366, %c0_367, %c0_368] : memref<75x2x32xbf16, #tpu.memory_space<vmem>>, vector<1x2x32xbf16>
    %373 = vector.shape_cast %372 : vector<1x2x32xbf16> to vector<2x32xbf16>
    %c0_369 = arith.constant 0 : index
    %c138 = arith.constant 138 : index
    %374 = vector.load %arg12[%c0_369, %c138] : memref<32x512xf32, #tpu.memory_space<vmem>>, vector<32x256xf32>
    %375 = arith.truncf %374 : vector<32x256xf32> to vector<32x256xbf16>
    %cst_370 = arith.constant dense<0.000000e+00> : vector<2x256xf32>
    %376 = tpu.matmul %373, %375, %cst_370 {dimension_numbers = #tpu.dot_dimension_numbers<[1], [0], [0], [1], [0, 0, 1, 1], [], []>} : vector<2x32xbf16>, vector<32x256xbf16>, vector<2x256xf32> -> vector<2x256xf32>
    %377 = arith.addf %371, %376 : vector<2x256xf32>
    %c11_371 = arith.constant 11 : index
    %c0_372 = arith.constant 0 : index
    %c0_373 = arith.constant 0 : index
    %378 = vector.load %arg6[%c11_371, %c0_372, %c0_373] : memref<75x2x32xbf16, #tpu.memory_space<vmem>>, vector<1x2x32xbf16>
    %379 = vector.shape_cast %378 : vector<1x2x32xbf16> to vector<2x32xbf16>
    %c0_374 = arith.constant 0 : index
    %c139 = arith.constant 139 : index
    %380 = vector.load %arg12[%c0_374, %c139] : memref<32x512xf32, #tpu.memory_space<vmem>>, vector<32x256xf32>
    %381 = arith.truncf %380 : vector<32x256xf32> to vector<32x256xbf16>
    %cst_375 = arith.constant dense<0.000000e+00> : vector<2x256xf32>
    %382 = tpu.matmul %379, %381, %cst_375 {dimension_numbers = #tpu.dot_dimension_numbers<[1], [0], [0], [1], [0, 0, 1, 1], [], []>} : vector<2x32xbf16>, vector<32x256xbf16>, vector<2x256xf32> -> vector<2x256xf32>
    %383 = arith.addf %377, %382 : vector<2x256xf32>
    %c12_376 = arith.constant 12 : index
    %c0_377 = arith.constant 0 : index
    %c0_378 = arith.constant 0 : index
    %384 = vector.load %arg6[%c12_376, %c0_377, %c0_378] : memref<75x2x32xbf16, #tpu.memory_space<vmem>>, vector<1x2x32xbf16>
    %385 = vector.shape_cast %384 : vector<1x2x32xbf16> to vector<2x32xbf16>
    %c0_379 = arith.constant 0 : index
    %c140 = arith.constant 140 : index
    %386 = vector.load %arg12[%c0_379, %c140] : memref<32x512xf32, #tpu.memory_space<vmem>>, vector<32x256xf32>
    %387 = arith.truncf %386 : vector<32x256xf32> to vector<32x256xbf16>
    %cst_380 = arith.constant dense<0.000000e+00> : vector<2x256xf32>
    %388 = tpu.matmul %385, %387, %cst_380 {dimension_numbers = #tpu.dot_dimension_numbers<[1], [0], [0], [1], [0, 0, 1, 1], [], []>} : vector<2x32xbf16>, vector<32x256xbf16>, vector<2x256xf32> -> vector<2x256xf32>
    %389 = arith.addf %383, %388 : vector<2x256xf32>
    %c13_381 = arith.constant 13 : index
    %c0_382 = arith.constant 0 : index
    %c0_383 = arith.constant 0 : index
    %390 = vector.load %arg6[%c13_381, %c0_382, %c0_383] : memref<75x2x32xbf16, #tpu.memory_space<vmem>>, vector<1x2x32xbf16>
    %391 = vector.shape_cast %390 : vector<1x2x32xbf16> to vector<2x32xbf16>
    %c0_384 = arith.constant 0 : index
    %c141 = arith.constant 141 : index
    %392 = vector.load %arg12[%c0_384, %c141] : memref<32x512xf32, #tpu.memory_space<vmem>>, vector<32x256xf32>
    %393 = arith.truncf %392 : vector<32x256xf32> to vector<32x256xbf16>
    %cst_385 = arith.constant dense<0.000000e+00> : vector<2x256xf32>
    %394 = tpu.matmul %391, %393, %cst_385 {dimension_numbers = #tpu.dot_dimension_numbers<[1], [0], [0], [1], [0, 0, 1, 1], [], []>} : vector<2x32xbf16>, vector<32x256xbf16>, vector<2x256xf32> -> vector<2x256xf32>
    %395 = arith.addf %389, %394 : vector<2x256xf32>
    %c14_386 = arith.constant 14 : index
    %c0_387 = arith.constant 0 : index
    %c0_388 = arith.constant 0 : index
    %396 = vector.load %arg6[%c14_386, %c0_387, %c0_388] : memref<75x2x32xbf16, #tpu.memory_space<vmem>>, vector<1x2x32xbf16>
    %397 = vector.shape_cast %396 : vector<1x2x32xbf16> to vector<2x32xbf16>
    %c0_389 = arith.constant 0 : index
    %c142 = arith.constant 142 : index
    %398 = vector.load %arg12[%c0_389, %c142] : memref<32x512xf32, #tpu.memory_space<vmem>>, vector<32x256xf32>
    %399 = arith.truncf %398 : vector<32x256xf32> to vector<32x256xbf16>
    %cst_390 = arith.constant dense<0.000000e+00> : vector<2x256xf32>
    %400 = tpu.matmul %397, %399, %cst_390 {dimension_numbers = #tpu.dot_dimension_numbers<[1], [0], [0], [1], [0, 0, 1, 1], [], []>} : vector<2x32xbf16>, vector<32x256xbf16>, vector<2x256xf32> -> vector<2x256xf32>
    %401 = arith.addf %395, %400 : vector<2x256xf32>
    %c15_391 = arith.constant 15 : index
    %c0_392 = arith.constant 0 : index
    %c0_393 = arith.constant 0 : index
    %402 = vector.load %arg6[%c15_391, %c0_392, %c0_393] : memref<75x2x32xbf16, #tpu.memory_space<vmem>>, vector<1x2x32xbf16>
    %403 = vector.shape_cast %402 : vector<1x2x32xbf16> to vector<2x32xbf16>
    %c0_394 = arith.constant 0 : index
    %c143 = arith.constant 143 : index
    %404 = vector.load %arg12[%c0_394, %c143] : memref<32x512xf32, #tpu.memory_space<vmem>>, vector<32x256xf32>
    %405 = arith.truncf %404 : vector<32x256xf32> to vector<32x256xbf16>
    %cst_395 = arith.constant dense<0.000000e+00> : vector<2x256xf32>
    %406 = tpu.matmul %403, %405, %cst_395 {dimension_numbers = #tpu.dot_dimension_numbers<[1], [0], [0], [1], [0, 0, 1, 1], [], []>} : vector<2x32xbf16>, vector<32x256xbf16>, vector<2x256xf32> -> vector<2x256xf32>
    %407 = arith.addf %401, %406 : vector<2x256xf32>
    %c16_396 = arith.constant 16 : index
    %c0_397 = arith.constant 0 : index
    %c0_398 = arith.constant 0 : index
    %408 = vector.load %arg6[%c16_396, %c0_397, %c0_398] : memref<75x2x32xbf16, #tpu.memory_space<vmem>>, vector<1x2x32xbf16>
    %409 = vector.shape_cast %408 : vector<1x2x32xbf16> to vector<2x32xbf16>
    %c0_399 = arith.constant 0 : index
    %c144_400 = arith.constant 144 : index
    %410 = vector.load %arg12[%c0_399, %c144_400] : memref<32x512xf32, #tpu.memory_space<vmem>>, vector<32x256xf32>
    %411 = arith.truncf %410 : vector<32x256xf32> to vector<32x256xbf16>
    %cst_401 = arith.constant dense<0.000000e+00> : vector<2x256xf32>
    %412 = tpu.matmul %409, %411, %cst_401 {dimension_numbers = #tpu.dot_dimension_numbers<[1], [0], [0], [1], [0, 0, 1, 1], [], []>} : vector<2x32xbf16>, vector<32x256xbf16>, vector<2x256xf32> -> vector<2x256xf32>
    %413 = arith.addf %407, %412 : vector<2x256xf32>
    %c17_402 = arith.constant 17 : index
    %c0_403 = arith.constant 0 : index
    %c0_404 = arith.constant 0 : index
    %414 = vector.load %arg6[%c17_402, %c0_403, %c0_404] : memref<75x2x32xbf16, #tpu.memory_space<vmem>>, vector<1x2x32xbf16>
    %415 = vector.shape_cast %414 : vector<1x2x32xbf16> to vector<2x32xbf16>
    %c0_405 = arith.constant 0 : index
    %c145 = arith.constant 145 : index
    %416 = vector.load %arg12[%c0_405, %c145] : memref<32x512xf32, #tpu.memory_space<vmem>>, vector<32x256xf32>
    %417 = arith.truncf %416 : vector<32x256xf32> to vector<32x256xbf16>
    %cst_406 = arith.constant dense<0.000000e+00> : vector<2x256xf32>
    %418 = tpu.matmul %415, %417, %cst_406 {dimension_numbers = #tpu.dot_dimension_numbers<[1], [0], [0], [1], [0, 0, 1, 1], [], []>} : vector<2x32xbf16>, vector<32x256xbf16>, vector<2x256xf32> -> vector<2x256xf32>
    %419 = arith.addf %413, %418 : vector<2x256xf32>
    %c18_407 = arith.constant 18 : index
    %c0_408 = arith.constant 0 : index
    %c0_409 = arith.constant 0 : index
    %420 = vector.load %arg6[%c18_407, %c0_408, %c0_409] : memref<75x2x32xbf16, #tpu.memory_space<vmem>>, vector<1x2x32xbf16>
    %421 = vector.shape_cast %420 : vector<1x2x32xbf16> to vector<2x32xbf16>
    %c0_410 = arith.constant 0 : index
    %c146 = arith.constant 146 : index
    %422 = vector.load %arg12[%c0_410, %c146] : memref<32x512xf32, #tpu.memory_space<vmem>>, vector<32x256xf32>
    %423 = arith.truncf %422 : vector<32x256xf32> to vector<32x256xbf16>
    %cst_411 = arith.constant dense<0.000000e+00> : vector<2x256xf32>
    %424 = tpu.matmul %421, %423, %cst_411 {dimension_numbers = #tpu.dot_dimension_numbers<[1], [0], [0], [1], [0, 0, 1, 1], [], []>} : vector<2x32xbf16>, vector<32x256xbf16>, vector<2x256xf32> -> vector<2x256xf32>
    %425 = arith.addf %419, %424 : vector<2x256xf32>
    %c19_412 = arith.constant 19 : index
    %c0_413 = arith.constant 0 : index
    %c0_414 = arith.constant 0 : index
    %426 = vector.load %arg6[%c19_412, %c0_413, %c0_414] : memref<75x2x32xbf16, #tpu.memory_space<vmem>>, vector<1x2x32xbf16>
    %427 = vector.shape_cast %426 : vector<1x2x32xbf16> to vector<2x32xbf16>
    %c0_415 = arith.constant 0 : index
    %c147 = arith.constant 147 : index
    %428 = vector.load %arg12[%c0_415, %c147] : memref<32x512xf32, #tpu.memory_space<vmem>>, vector<32x256xf32>
    %429 = arith.truncf %428 : vector<32x256xf32> to vector<32x256xbf16>
    %cst_416 = arith.constant dense<0.000000e+00> : vector<2x256xf32>
    %430 = tpu.matmul %427, %429, %cst_416 {dimension_numbers = #tpu.dot_dimension_numbers<[1], [0], [0], [1], [0, 0, 1, 1], [], []>} : vector<2x32xbf16>, vector<32x256xbf16>, vector<2x256xf32> -> vector<2x256xf32>
    %431 = arith.addf %425, %430 : vector<2x256xf32>
    %c20_417 = arith.constant 20 : index
    %c0_418 = arith.constant 0 : index
    %c0_419 = arith.constant 0 : index
    %432 = vector.load %arg6[%c20_417, %c0_418, %c0_419] : memref<75x2x32xbf16, #tpu.memory_space<vmem>>, vector<1x2x32xbf16>
    %433 = vector.shape_cast %432 : vector<1x2x32xbf16> to vector<2x32xbf16>
    %c0_420 = arith.constant 0 : index
    %c148 = arith.constant 148 : index
    %434 = vector.load %arg12[%c0_420, %c148] : memref<32x512xf32, #tpu.memory_space<vmem>>, vector<32x256xf32>
    %435 = arith.truncf %434 : vector<32x256xf32> to vector<32x256xbf16>
    %cst_421 = arith.constant dense<0.000000e+00> : vector<2x256xf32>
    %436 = tpu.matmul %433, %435, %cst_421 {dimension_numbers = #tpu.dot_dimension_numbers<[1], [0], [0], [1], [0, 0, 1, 1], [], []>} : vector<2x32xbf16>, vector<32x256xbf16>, vector<2x256xf32> -> vector<2x256xf32>
    %437 = arith.addf %431, %436 : vector<2x256xf32>
    %c21 = arith.constant 21 : index
    %c0_422 = arith.constant 0 : index
    %c0_423 = arith.constant 0 : index
    %438 = vector.load %arg6[%c21, %c0_422, %c0_423] : memref<75x2x32xbf16, #tpu.memory_space<vmem>>, vector<1x2x32xbf16>
    %439 = vector.shape_cast %438 : vector<1x2x32xbf16> to vector<2x32xbf16>
    %c0_424 = arith.constant 0 : index
    %c149 = arith.constant 149 : index
    %440 = vector.load %arg12[%c0_424, %c149] : memref<32x512xf32, #tpu.memory_space<vmem>>, vector<32x256xf32>
    %441 = arith.truncf %440 : vector<32x256xf32> to vector<32x256xbf16>
    %cst_425 = arith.constant dense<0.000000e+00> : vector<2x256xf32>
    %442 = tpu.matmul %439, %441, %cst_425 {dimension_numbers = #tpu.dot_dimension_numbers<[1], [0], [0], [1], [0, 0, 1, 1], [], []>} : vector<2x32xbf16>, vector<32x256xbf16>, vector<2x256xf32> -> vector<2x256xf32>
    %443 = arith.addf %437, %442 : vector<2x256xf32>
    %c22 = arith.constant 22 : index
    %c0_426 = arith.constant 0 : index
    %c0_427 = arith.constant 0 : index
    %444 = vector.load %arg6[%c22, %c0_426, %c0_427] : memref<75x2x32xbf16, #tpu.memory_space<vmem>>, vector<1x2x32xbf16>
    %445 = vector.shape_cast %444 : vector<1x2x32xbf16> to vector<2x32xbf16>
    %c0_428 = arith.constant 0 : index
    %c150 = arith.constant 150 : index
    %446 = vector.load %arg12[%c0_428, %c150] : memref<32x512xf32, #tpu.memory_space<vmem>>, vector<32x256xf32>
    %447 = arith.truncf %446 : vector<32x256xf32> to vector<32x256xbf16>
    %cst_429 = arith.constant dense<0.000000e+00> : vector<2x256xf32>
    %448 = tpu.matmul %445, %447, %cst_429 {dimension_numbers = #tpu.dot_dimension_numbers<[1], [0], [0], [1], [0, 0, 1, 1], [], []>} : vector<2x32xbf16>, vector<32x256xbf16>, vector<2x256xf32> -> vector<2x256xf32>
    %449 = arith.addf %443, %448 : vector<2x256xf32>
    %c23 = arith.constant 23 : index
    %c0_430 = arith.constant 0 : index
    %c0_431 = arith.constant 0 : index
    %450 = vector.load %arg6[%c23, %c0_430, %c0_431] : memref<75x2x32xbf16, #tpu.memory_space<vmem>>, vector<1x2x32xbf16>
    %451 = vector.shape_cast %450 : vector<1x2x32xbf16> to vector<2x32xbf16>
    %c0_432 = arith.constant 0 : index
    %c151 = arith.constant 151 : index
    %452 = vector.load %arg12[%c0_432, %c151] : memref<32x512xf32, #tpu.memory_space<vmem>>, vector<32x256xf32>
    %453 = arith.truncf %452 : vector<32x256xf32> to vector<32x256xbf16>
    %cst_433 = arith.constant dense<0.000000e+00> : vector<2x256xf32>
    %454 = tpu.matmul %451, %453, %cst_433 {dimension_numbers = #tpu.dot_dimension_numbers<[1], [0], [0], [1], [0, 0, 1, 1], [], []>} : vector<2x32xbf16>, vector<32x256xbf16>, vector<2x256xf32> -> vector<2x256xf32>
    %455 = arith.addf %449, %454 : vector<2x256xf32>
    %c24 = arith.constant 24 : index
    %c0_434 = arith.constant 0 : index
    %c0_435 = arith.constant 0 : index
    %456 = vector.load %arg6[%c24, %c0_434, %c0_435] : memref<75x2x32xbf16, #tpu.memory_space<vmem>>, vector<1x2x32xbf16>
    %457 = vector.shape_cast %456 : vector<1x2x32xbf16> to vector<2x32xbf16>
    %c0_436 = arith.constant 0 : index
    %c152 = arith.constant 152 : index
    %458 = vector.load %arg12[%c0_436, %c152] : memref<32x512xf32, #tpu.memory_space<vmem>>, vector<32x256xf32>
    %459 = arith.truncf %458 : vector<32x256xf32> to vector<32x256xbf16>
    %cst_437 = arith.constant dense<0.000000e+00> : vector<2x256xf32>
    %460 = tpu.matmul %457, %459, %cst_437 {dimension_numbers = #tpu.dot_dimension_numbers<[1], [0], [0], [1], [0, 0, 1, 1], [], []>} : vector<2x32xbf16>, vector<32x256xbf16>, vector<2x256xf32> -> vector<2x256xf32>
    %461 = arith.addf %455, %460 : vector<2x256xf32>
    %c25 = arith.constant 25 : index
    %c0_438 = arith.constant 0 : index
    %c0_439 = arith.constant 0 : index
    %462 = vector.load %arg6[%c25, %c0_438, %c0_439] : memref<75x2x32xbf16, #tpu.memory_space<vmem>>, vector<1x2x32xbf16>
    %463 = vector.shape_cast %462 : vector<1x2x32xbf16> to vector<2x32xbf16>
    %c0_440 = arith.constant 0 : index
    %c153 = arith.constant 153 : index
    %464 = vector.load %arg12[%c0_440, %c153] : memref<32x512xf32, #tpu.memory_space<vmem>>, vector<32x256xf32>
    %465 = arith.truncf %464 : vector<32x256xf32> to vector<32x256xbf16>
    %cst_441 = arith.constant dense<0.000000e+00> : vector<2x256xf32>
    %466 = tpu.matmul %463, %465, %cst_441 {dimension_numbers = #tpu.dot_dimension_numbers<[1], [0], [0], [1], [0, 0, 1, 1], [], []>} : vector<2x32xbf16>, vector<32x256xbf16>, vector<2x256xf32> -> vector<2x256xf32>
    %467 = arith.addf %461, %466 : vector<2x256xf32>
    %c26 = arith.constant 26 : index
    %c0_442 = arith.constant 0 : index
    %c0_443 = arith.constant 0 : index
    %468 = vector.load %arg6[%c26, %c0_442, %c0_443] : memref<75x2x32xbf16, #tpu.memory_space<vmem>>, vector<1x2x32xbf16>
    %469 = vector.shape_cast %468 : vector<1x2x32xbf16> to vector<2x32xbf16>
    %c0_444 = arith.constant 0 : index
    %c154 = arith.constant 154 : index
    %470 = vector.load %arg12[%c0_444, %c154] : memref<32x512xf32, #tpu.memory_space<vmem>>, vector<32x256xf32>
    %471 = arith.truncf %470 : vector<32x256xf32> to vector<32x256xbf16>
    %cst_445 = arith.constant dense<0.000000e+00> : vector<2x256xf32>
    %472 = tpu.matmul %469, %471, %cst_445 {dimension_numbers = #tpu.dot_dimension_numbers<[1], [0], [0], [1], [0, 0, 1, 1], [], []>} : vector<2x32xbf16>, vector<32x256xbf16>, vector<2x256xf32> -> vector<2x256xf32>
    %473 = arith.addf %467, %472 : vector<2x256xf32>
    %c27 = arith.constant 27 : index
    %c0_446 = arith.constant 0 : index
    %c0_447 = arith.constant 0 : index
    %474 = vector.load %arg6[%c27, %c0_446, %c0_447] : memref<75x2x32xbf16, #tpu.memory_space<vmem>>, vector<1x2x32xbf16>
    %475 = vector.shape_cast %474 : vector<1x2x32xbf16> to vector<2x32xbf16>
    %c0_448 = arith.constant 0 : index
    %c155 = arith.constant 155 : index
    %476 = vector.load %arg12[%c0_448, %c155] : memref<32x512xf32, #tpu.memory_space<vmem>>, vector<32x256xf32>
    %477 = arith.truncf %476 : vector<32x256xf32> to vector<32x256xbf16>
    %cst_449 = arith.constant dense<0.000000e+00> : vector<2x256xf32>
    %478 = tpu.matmul %475, %477, %cst_449 {dimension_numbers = #tpu.dot_dimension_numbers<[1], [0], [0], [1], [0, 0, 1, 1], [], []>} : vector<2x32xbf16>, vector<32x256xbf16>, vector<2x256xf32> -> vector<2x256xf32>
    %479 = arith.addf %473, %478 : vector<2x256xf32>
    %c28 = arith.constant 28 : index
    %c0_450 = arith.constant 0 : index
    %c0_451 = arith.constant 0 : index
    %480 = vector.load %arg6[%c28, %c0_450, %c0_451] : memref<75x2x32xbf16, #tpu.memory_space<vmem>>, vector<1x2x32xbf16>
    %481 = vector.shape_cast %480 : vector<1x2x32xbf16> to vector<2x32xbf16>
    %c0_452 = arith.constant 0 : index
    %c156 = arith.constant 156 : index
    %482 = vector.load %arg12[%c0_452, %c156] : memref<32x512xf32, #tpu.memory_space<vmem>>, vector<32x256xf32>
    %483 = arith.truncf %482 : vector<32x256xf32> to vector<32x256xbf16>
    %cst_453 = arith.constant dense<0.000000e+00> : vector<2x256xf32>
    %484 = tpu.matmul %481, %483, %cst_453 {dimension_numbers = #tpu.dot_dimension_numbers<[1], [0], [0], [1], [0, 0, 1, 1], [], []>} : vector<2x32xbf16>, vector<32x256xbf16>, vector<2x256xf32> -> vector<2x256xf32>
    %485 = arith.addf %479, %484 : vector<2x256xf32>
    %c29 = arith.constant 29 : index
    %c0_454 = arith.constant 0 : index
    %c0_455 = arith.constant 0 : index
    %486 = vector.load %arg6[%c29, %c0_454, %c0_455] : memref<75x2x32xbf16, #tpu.memory_space<vmem>>, vector<1x2x32xbf16>
    %487 = vector.shape_cast %486 : vector<1x2x32xbf16> to vector<2x32xbf16>
    %c0_456 = arith.constant 0 : index
    %c157 = arith.constant 157 : index
    %488 = vector.load %arg12[%c0_456, %c157] : memref<32x512xf32, #tpu.memory_space<vmem>>, vector<32x256xf32>
    %489 = arith.truncf %488 : vector<32x256xf32> to vector<32x256xbf16>
    %cst_457 = arith.constant dense<0.000000e+00> : vector<2x256xf32>
    %490 = tpu.matmul %487, %489, %cst_457 {dimension_numbers = #tpu.dot_dimension_numbers<[1], [0], [0], [1], [0, 0, 1, 1], [], []>} : vector<2x32xbf16>, vector<32x256xbf16>, vector<2x256xf32> -> vector<2x256xf32>
    %491 = arith.addf %485, %490 : vector<2x256xf32>
    %c30 = arith.constant 30 : index
    %c0_458 = arith.constant 0 : index
    %c0_459 = arith.constant 0 : index
    %492 = vector.load %arg6[%c30, %c0_458, %c0_459] : memref<75x2x32xbf16, #tpu.memory_space<vmem>>, vector<1x2x32xbf16>
    %493 = vector.shape_cast %492 : vector<1x2x32xbf16> to vector<2x32xbf16>
    %c0_460 = arith.constant 0 : index
    %c158 = arith.constant 158 : index
    %494 = vector.load %arg12[%c0_460, %c158] : memref<32x512xf32, #tpu.memory_space<vmem>>, vector<32x256xf32>
    %495 = arith.truncf %494 : vector<32x256xf32> to vector<32x256xbf16>
    %cst_461 = arith.constant dense<0.000000e+00> : vector<2x256xf32>
    %496 = tpu.matmul %493, %495, %cst_461 {dimension_numbers = #tpu.dot_dimension_numbers<[1], [0], [0], [1], [0, 0, 1, 1], [], []>} : vector<2x32xbf16>, vector<32x256xbf16>, vector<2x256xf32> -> vector<2x256xf32>
    %497 = arith.addf %491, %496 : vector<2x256xf32>
    %c31 = arith.constant 31 : index
    %c0_462 = arith.constant 0 : index
    %c0_463 = arith.constant 0 : index
    %498 = vector.load %arg6[%c31, %c0_462, %c0_463] : memref<75x2x32xbf16, #tpu.memory_space<vmem>>, vector<1x2x32xbf16>
    %499 = vector.shape_cast %498 : vector<1x2x32xbf16> to vector<2x32xbf16>
    %c0_464 = arith.constant 0 : index
    %c159 = arith.constant 159 : index
    %500 = vector.load %arg12[%c0_464, %c159] : memref<32x512xf32, #tpu.memory_space<vmem>>, vector<32x256xf32>
    %501 = arith.truncf %500 : vector<32x256xf32> to vector<32x256xbf16>
    %cst_465 = arith.constant dense<0.000000e+00> : vector<2x256xf32>
    %502 = tpu.matmul %499, %501, %cst_465 {dimension_numbers = #tpu.dot_dimension_numbers<[1], [0], [0], [1], [0, 0, 1, 1], [], []>} : vector<2x32xbf16>, vector<32x256xbf16>, vector<2x256xf32> -> vector<2x256xf32>
    %503 = arith.addf %497, %502 : vector<2x256xf32>
    %c32 = arith.constant 32 : index
    %c0_466 = arith.constant 0 : index
    %c0_467 = arith.constant 0 : index
    %504 = vector.load %arg6[%c32, %c0_466, %c0_467] : memref<75x2x32xbf16, #tpu.memory_space<vmem>>, vector<1x2x32xbf16>
    %505 = vector.shape_cast %504 : vector<1x2x32xbf16> to vector<2x32xbf16>
    %c0_468 = arith.constant 0 : index
    %c160_469 = arith.constant 160 : index
    %506 = vector.load %arg12[%c0_468, %c160_469] : memref<32x512xf32, #tpu.memory_space<vmem>>, vector<32x256xf32>
    %507 = arith.truncf %506 : vector<32x256xf32> to vector<32x256xbf16>
    %cst_470 = arith.constant dense<0.000000e+00> : vector<2x256xf32>
    %508 = tpu.matmul %505, %507, %cst_470 {dimension_numbers = #tpu.dot_dimension_numbers<[1], [0], [0], [1], [0, 0, 1, 1], [], []>} : vector<2x32xbf16>, vector<32x256xbf16>, vector<2x256xf32> -> vector<2x256xf32>
    %509 = arith.addf %503, %508 : vector<2x256xf32>
    %c33 = arith.constant 33 : index
    %c0_471 = arith.constant 0 : index
    %c0_472 = arith.constant 0 : index
    %510 = vector.load %arg6[%c33, %c0_471, %c0_472] : memref<75x2x32xbf16, #tpu.memory_space<vmem>>, vector<1x2x32xbf16>
    %511 = vector.shape_cast %510 : vector<1x2x32xbf16> to vector<2x32xbf16>
    %c0_473 = arith.constant 0 : index
    %c161 = arith.constant 161 : index
    %512 = vector.load %arg12[%c0_473, %c161] : memref<32x512xf32, #tpu.memory_space<vmem>>, vector<32x256xf32>
    %513 = arith.truncf %512 : vector<32x256xf32> to vector<32x256xbf16>
    %cst_474 = arith.constant dense<0.000000e+00> : vector<2x256xf32>
    %514 = tpu.matmul %511, %513, %cst_474 {dimension_numbers = #tpu.dot_dimension_numbers<[1], [0], [0], [1], [0, 0, 1, 1], [], []>} : vector<2x32xbf16>, vector<32x256xbf16>, vector<2x256xf32> -> vector<2x256xf32>
    %515 = arith.addf %509, %514 : vector<2x256xf32>
    %c34 = arith.constant 34 : index
    %c0_475 = arith.constant 0 : index
    %c0_476 = arith.constant 0 : index
    %516 = vector.load %arg6[%c34, %c0_475, %c0_476] : memref<75x2x32xbf16, #tpu.memory_space<vmem>>, vector<1x2x32xbf16>
    %517 = vector.shape_cast %516 : vector<1x2x32xbf16> to vector<2x32xbf16>
    %c0_477 = arith.constant 0 : index
    %c162 = arith.constant 162 : index
    %518 = vector.load %arg12[%c0_477, %c162] : memref<32x512xf32, #tpu.memory_space<vmem>>, vector<32x256xf32>
    %519 = arith.truncf %518 : vector<32x256xf32> to vector<32x256xbf16>
    %cst_478 = arith.constant dense<0.000000e+00> : vector<2x256xf32>
    %520 = tpu.matmul %517, %519, %cst_478 {dimension_numbers = #tpu.dot_dimension_numbers<[1], [0], [0], [1], [0, 0, 1, 1], [], []>} : vector<2x32xbf16>, vector<32x256xbf16>, vector<2x256xf32> -> vector<2x256xf32>
    %521 = arith.addf %515, %520 : vector<2x256xf32>
    %c35 = arith.constant 35 : index
    %c0_479 = arith.constant 0 : index
    %c0_480 = arith.constant 0 : index
    %522 = vector.load %arg6[%c35, %c0_479, %c0_480] : memref<75x2x32xbf16, #tpu.memory_space<vmem>>, vector<1x2x32xbf16>
    %523 = vector.shape_cast %522 : vector<1x2x32xbf16> to vector<2x32xbf16>
    %c0_481 = arith.constant 0 : index
    %c163 = arith.constant 163 : index
    %524 = vector.load %arg12[%c0_481, %c163] : memref<32x512xf32, #tpu.memory_space<vmem>>, vector<32x256xf32>
    %525 = arith.truncf %524 : vector<32x256xf32> to vector<32x256xbf16>
    %cst_482 = arith.constant dense<0.000000e+00> : vector<2x256xf32>
    %526 = tpu.matmul %523, %525, %cst_482 {dimension_numbers = #tpu.dot_dimension_numbers<[1], [0], [0], [1], [0, 0, 1, 1], [], []>} : vector<2x32xbf16>, vector<32x256xbf16>, vector<2x256xf32> -> vector<2x256xf32>
    %527 = arith.addf %521, %526 : vector<2x256xf32>
    %c36 = arith.constant 36 : index
    %c0_483 = arith.constant 0 : index
    %c0_484 = arith.constant 0 : index
    %528 = vector.load %arg6[%c36, %c0_483, %c0_484] : memref<75x2x32xbf16, #tpu.memory_space<vmem>>, vector<1x2x32xbf16>
    %529 = vector.shape_cast %528 : vector<1x2x32xbf16> to vector<2x32xbf16>
    %c0_485 = arith.constant 0 : index
    %c164 = arith.constant 164 : index
    %530 = vector.load %arg12[%c0_485, %c164] : memref<32x512xf32, #tpu.memory_space<vmem>>, vector<32x256xf32>
    %531 = arith.truncf %530 : vector<32x256xf32> to vector<32x256xbf16>
    %cst_486 = arith.constant dense<0.000000e+00> : vector<2x256xf32>
    %532 = tpu.matmul %529, %531, %cst_486 {dimension_numbers = #tpu.dot_dimension_numbers<[1], [0], [0], [1], [0, 0, 1, 1], [], []>} : vector<2x32xbf16>, vector<32x256xbf16>, vector<2x256xf32> -> vector<2x256xf32>
    %533 = arith.addf %527, %532 : vector<2x256xf32>
    %c37 = arith.constant 37 : index
    %c0_487 = arith.constant 0 : index
    %c0_488 = arith.constant 0 : index
    %534 = vector.load %arg6[%c37, %c0_487, %c0_488] : memref<75x2x32xbf16, #tpu.memory_space<vmem>>, vector<1x2x32xbf16>
    %535 = vector.shape_cast %534 : vector<1x2x32xbf16> to vector<2x32xbf16>
    %c0_489 = arith.constant 0 : index
    %c165 = arith.constant 165 : index
    %536 = vector.load %arg12[%c0_489, %c165] : memref<32x512xf32, #tpu.memory_space<vmem>>, vector<32x256xf32>
    %537 = arith.truncf %536 : vector<32x256xf32> to vector<32x256xbf16>
    %cst_490 = arith.constant dense<0.000000e+00> : vector<2x256xf32>
    %538 = tpu.matmul %535, %537, %cst_490 {dimension_numbers = #tpu.dot_dimension_numbers<[1], [0], [0], [1], [0, 0, 1, 1], [], []>} : vector<2x32xbf16>, vector<32x256xbf16>, vector<2x256xf32> -> vector<2x256xf32>
    %539 = arith.addf %533, %538 : vector<2x256xf32>
    %c38 = arith.constant 38 : index
    %c0_491 = arith.constant 0 : index
    %c0_492 = arith.constant 0 : index
    %540 = vector.load %arg6[%c38, %c0_491, %c0_492] : memref<75x2x32xbf16, #tpu.memory_space<vmem>>, vector<1x2x32xbf16>
    %541 = vector.shape_cast %540 : vector<1x2x32xbf16> to vector<2x32xbf16>
    %c0_493 = arith.constant 0 : index
    %c166 = arith.constant 166 : index
    %542 = vector.load %arg12[%c0_493, %c166] : memref<32x512xf32, #tpu.memory_space<vmem>>, vector<32x256xf32>
    %543 = arith.truncf %542 : vector<32x256xf32> to vector<32x256xbf16>
    %cst_494 = arith.constant dense<0.000000e+00> : vector<2x256xf32>
    %544 = tpu.matmul %541, %543, %cst_494 {dimension_numbers = #tpu.dot_dimension_numbers<[1], [0], [0], [1], [0, 0, 1, 1], [], []>} : vector<2x32xbf16>, vector<32x256xbf16>, vector<2x256xf32> -> vector<2x256xf32>
    %545 = arith.addf %539, %544 : vector<2x256xf32>
    %c39 = arith.constant 39 : index
    %c0_495 = arith.constant 0 : index
    %c0_496 = arith.constant 0 : index
    %546 = vector.load %arg6[%c39, %c0_495, %c0_496] : memref<75x2x32xbf16, #tpu.memory_space<vmem>>, vector<1x2x32xbf16>
    %547 = vector.shape_cast %546 : vector<1x2x32xbf16> to vector<2x32xbf16>
    %c0_497 = arith.constant 0 : index
    %c167 = arith.constant 167 : index
    %548 = vector.load %arg12[%c0_497, %c167] : memref<32x512xf32, #tpu.memory_space<vmem>>, vector<32x256xf32>
    %549 = arith.truncf %548 : vector<32x256xf32> to vector<32x256xbf16>
    %cst_498 = arith.constant dense<0.000000e+00> : vector<2x256xf32>
    %550 = tpu.matmul %547, %549, %cst_498 {dimension_numbers = #tpu.dot_dimension_numbers<[1], [0], [0], [1], [0, 0, 1, 1], [], []>} : vector<2x32xbf16>, vector<32x256xbf16>, vector<2x256xf32> -> vector<2x256xf32>
    %551 = arith.addf %545, %550 : vector<2x256xf32>
    %c40 = arith.constant 40 : index
    %c0_499 = arith.constant 0 : index
    %c0_500 = arith.constant 0 : index
    %552 = vector.load %arg6[%c40, %c0_499, %c0_500] : memref<75x2x32xbf16, #tpu.memory_space<vmem>>, vector<1x2x32xbf16>
    %553 = vector.shape_cast %552 : vector<1x2x32xbf16> to vector<2x32xbf16>
    %c0_501 = arith.constant 0 : index
    %c168 = arith.constant 168 : index
    %554 = vector.load %arg12[%c0_501, %c168] : memref<32x512xf32, #tpu.memory_space<vmem>>, vector<32x256xf32>
    %555 = arith.truncf %554 : vector<32x256xf32> to vector<32x256xbf16>
    %cst_502 = arith.constant dense<0.000000e+00> : vector<2x256xf32>
    %556 = tpu.matmul %553, %555, %cst_502 {dimension_numbers = #tpu.dot_dimension_numbers<[1], [0], [0], [1], [0, 0, 1, 1], [], []>} : vector<2x32xbf16>, vector<32x256xbf16>, vector<2x256xf32> -> vector<2x256xf32>
    %557 = arith.addf %551, %556 : vector<2x256xf32>
    %c41 = arith.constant 41 : index
    %c0_503 = arith.constant 0 : index
    %c0_504 = arith.constant 0 : index
    %558 = vector.load %arg6[%c41, %c0_503, %c0_504] : memref<75x2x32xbf16, #tpu.memory_space<vmem>>, vector<1x2x32xbf16>
    %559 = vector.shape_cast %558 : vector<1x2x32xbf16> to vector<2x32xbf16>
    %c0_505 = arith.constant 0 : index
    %c169 = arith.constant 169 : index
    %560 = vector.load %arg12[%c0_505, %c169] : memref<32x512xf32, #tpu.memory_space<vmem>>, vector<32x256xf32>
    %561 = arith.truncf %560 : vector<32x256xf32> to vector<32x256xbf16>
    %cst_506 = arith.constant dense<0.000000e+00> : vector<2x256xf32>
    %562 = tpu.matmul %559, %561, %cst_506 {dimension_numbers = #tpu.dot_dimension_numbers<[1], [0], [0], [1], [0, 0, 1, 1], [], []>} : vector<2x32xbf16>, vector<32x256xbf16>, vector<2x256xf32> -> vector<2x256xf32>
    %563 = arith.addf %557, %562 : vector<2x256xf32>
    %c42 = arith.constant 42 : index
    %c0_507 = arith.constant 0 : index
    %c0_508 = arith.constant 0 : index
    %564 = vector.load %arg6[%c42, %c0_507, %c0_508] : memref<75x2x32xbf16, #tpu.memory_space<vmem>>, vector<1x2x32xbf16>
    %565 = vector.shape_cast %564 : vector<1x2x32xbf16> to vector<2x32xbf16>
    %c0_509 = arith.constant 0 : index
    %c170 = arith.constant 170 : index
    %566 = vector.load %arg12[%c0_509, %c170] : memref<32x512xf32, #tpu.memory_space<vmem>>, vector<32x256xf32>
    %567 = arith.truncf %566 : vector<32x256xf32> to vector<32x256xbf16>
    %cst_510 = arith.constant dense<0.000000e+00> : vector<2x256xf32>
    %568 = tpu.matmul %565, %567, %cst_510 {dimension_numbers = #tpu.dot_dimension_numbers<[1], [0], [0], [1], [0, 0, 1, 1], [], []>} : vector<2x32xbf16>, vector<32x256xbf16>, vector<2x256xf32> -> vector<2x256xf32>
    %569 = arith.addf %563, %568 : vector<2x256xf32>
    %c43 = arith.constant 43 : index
    %c0_511 = arith.constant 0 : index
    %c0_512 = arith.constant 0 : index
    %570 = vector.load %arg6[%c43, %c0_511, %c0_512] : memref<75x2x32xbf16, #tpu.memory_space<vmem>>, vector<1x2x32xbf16>
    %571 = vector.shape_cast %570 : vector<1x2x32xbf16> to vector<2x32xbf16>
    %c0_513 = arith.constant 0 : index
    %c171 = arith.constant 171 : index
    %572 = vector.load %arg12[%c0_513, %c171] : memref<32x512xf32, #tpu.memory_space<vmem>>, vector<32x256xf32>
    %573 = arith.truncf %572 : vector<32x256xf32> to vector<32x256xbf16>
    %cst_514 = arith.constant dense<0.000000e+00> : vector<2x256xf32>
    %574 = tpu.matmul %571, %573, %cst_514 {dimension_numbers = #tpu.dot_dimension_numbers<[1], [0], [0], [1], [0, 0, 1, 1], [], []>} : vector<2x32xbf16>, vector<32x256xbf16>, vector<2x256xf32> -> vector<2x256xf32>
    %575 = arith.addf %569, %574 : vector<2x256xf32>
    %c44 = arith.constant 44 : index
    %c0_515 = arith.constant 0 : index
    %c0_516 = arith.constant 0 : index
    %576 = vector.load %arg6[%c44, %c0_515, %c0_516] : memref<75x2x32xbf16, #tpu.memory_space<vmem>>, vector<1x2x32xbf16>
    %577 = vector.shape_cast %576 : vector<1x2x32xbf16> to vector<2x32xbf16>
    %c0_517 = arith.constant 0 : index
    %c172 = arith.constant 172 : index
    %578 = vector.load %arg12[%c0_517, %c172] : memref<32x512xf32, #tpu.memory_space<vmem>>, vector<32x256xf32>
    %579 = arith.truncf %578 : vector<32x256xf32> to vector<32x256xbf16>
    %cst_518 = arith.constant dense<0.000000e+00> : vector<2x256xf32>
    %580 = tpu.matmul %577, %579, %cst_518 {dimension_numbers = #tpu.dot_dimension_numbers<[1], [0], [0], [1], [0, 0, 1, 1], [], []>} : vector<2x32xbf16>, vector<32x256xbf16>, vector<2x256xf32> -> vector<2x256xf32>
    %581 = arith.addf %575, %580 : vector<2x256xf32>
    %c45 = arith.constant 45 : index
    %c0_519 = arith.constant 0 : index
    %c0_520 = arith.constant 0 : index
    %582 = vector.load %arg6[%c45, %c0_519, %c0_520] : memref<75x2x32xbf16, #tpu.memory_space<vmem>>, vector<1x2x32xbf16>
    %583 = vector.shape_cast %582 : vector<1x2x32xbf16> to vector<2x32xbf16>
    %c0_521 = arith.constant 0 : index
    %c173 = arith.constant 173 : index
    %584 = vector.load %arg12[%c0_521, %c173] : memref<32x512xf32, #tpu.memory_space<vmem>>, vector<32x256xf32>
    %585 = arith.truncf %584 : vector<32x256xf32> to vector<32x256xbf16>
    %cst_522 = arith.constant dense<0.000000e+00> : vector<2x256xf32>
    %586 = tpu.matmul %583, %585, %cst_522 {dimension_numbers = #tpu.dot_dimension_numbers<[1], [0], [0], [1], [0, 0, 1, 1], [], []>} : vector<2x32xbf16>, vector<32x256xbf16>, vector<2x256xf32> -> vector<2x256xf32>
    %587 = arith.addf %581, %586 : vector<2x256xf32>
    %c46 = arith.constant 46 : index
    %c0_523 = arith.constant 0 : index
    %c0_524 = arith.constant 0 : index
    %588 = vector.load %arg6[%c46, %c0_523, %c0_524] : memref<75x2x32xbf16, #tpu.memory_space<vmem>>, vector<1x2x32xbf16>
    %589 = vector.shape_cast %588 : vector<1x2x32xbf16> to vector<2x32xbf16>
    %c0_525 = arith.constant 0 : index
    %c174 = arith.constant 174 : index
    %590 = vector.load %arg12[%c0_525, %c174] : memref<32x512xf32, #tpu.memory_space<vmem>>, vector<32x256xf32>
    %591 = arith.truncf %590 : vector<32x256xf32> to vector<32x256xbf16>
    %cst_526 = arith.constant dense<0.000000e+00> : vector<2x256xf32>
    %592 = tpu.matmul %589, %591, %cst_526 {dimension_numbers = #tpu.dot_dimension_numbers<[1], [0], [0], [1], [0, 0, 1, 1], [], []>} : vector<2x32xbf16>, vector<32x256xbf16>, vector<2x256xf32> -> vector<2x256xf32>
    %593 = arith.addf %587, %592 : vector<2x256xf32>
    %c47 = arith.constant 47 : index
    %c0_527 = arith.constant 0 : index
    %c0_528 = arith.constant 0 : index
    %594 = vector.load %arg6[%c47, %c0_527, %c0_528] : memref<75x2x32xbf16, #tpu.memory_space<vmem>>, vector<1x2x32xbf16>
    %595 = vector.shape_cast %594 : vector<1x2x32xbf16> to vector<2x32xbf16>
    %c0_529 = arith.constant 0 : index
    %c175 = arith.constant 175 : index
    %596 = vector.load %arg12[%c0_529, %c175] : memref<32x512xf32, #tpu.memory_space<vmem>>, vector<32x256xf32>
    %597 = arith.truncf %596 : vector<32x256xf32> to vector<32x256xbf16>
    %cst_530 = arith.constant dense<0.000000e+00> : vector<2x256xf32>
    %598 = tpu.matmul %595, %597, %cst_530 {dimension_numbers = #tpu.dot_dimension_numbers<[1], [0], [0], [1], [0, 0, 1, 1], [], []>} : vector<2x32xbf16>, vector<32x256xbf16>, vector<2x256xf32> -> vector<2x256xf32>
    %599 = arith.addf %593, %598 : vector<2x256xf32>
    %c48 = arith.constant 48 : index
    %c0_531 = arith.constant 0 : index
    %c0_532 = arith.constant 0 : index
    %600 = vector.load %arg6[%c48, %c0_531, %c0_532] : memref<75x2x32xbf16, #tpu.memory_space<vmem>>, vector<1x2x32xbf16>
    %601 = vector.shape_cast %600 : vector<1x2x32xbf16> to vector<2x32xbf16>
    %c0_533 = arith.constant 0 : index
    %c176 = arith.constant 176 : index
    %602 = vector.load %arg12[%c0_533, %c176] : memref<32x512xf32, #tpu.memory_space<vmem>>, vector<32x256xf32>
    %603 = arith.truncf %602 : vector<32x256xf32> to vector<32x256xbf16>
    %cst_534 = arith.constant dense<0.000000e+00> : vector<2x256xf32>
    %604 = tpu.matmul %601, %603, %cst_534 {dimension_numbers = #tpu.dot_dimension_numbers<[1], [0], [0], [1], [0, 0, 1, 1], [], []>} : vector<2x32xbf16>, vector<32x256xbf16>, vector<2x256xf32> -> vector<2x256xf32>
    %605 = arith.addf %599, %604 : vector<2x256xf32>
    %c49 = arith.constant 49 : index
    %c0_535 = arith.constant 0 : index
    %c0_536 = arith.constant 0 : index
    %606 = vector.load %arg6[%c49, %c0_535, %c0_536] : memref<75x2x32xbf16, #tpu.memory_space<vmem>>, vector<1x2x32xbf16>
    %607 = vector.shape_cast %606 : vector<1x2x32xbf16> to vector<2x32xbf16>
    %c0_537 = arith.constant 0 : index
    %c177 = arith.constant 177 : index
    %608 = vector.load %arg12[%c0_537, %c177] : memref<32x512xf32, #tpu.memory_space<vmem>>, vector<32x256xf32>
    %609 = arith.truncf %608 : vector<32x256xf32> to vector<32x256xbf16>
    %cst_538 = arith.constant dense<0.000000e+00> : vector<2x256xf32>
    %610 = tpu.matmul %607, %609, %cst_538 {dimension_numbers = #tpu.dot_dimension_numbers<[1], [0], [0], [1], [0, 0, 1, 1], [], []>} : vector<2x32xbf16>, vector<32x256xbf16>, vector<2x256xf32> -> vector<2x256xf32>
    %611 = arith.addf %605, %610 : vector<2x256xf32>
    %c50 = arith.constant 50 : index
    %c0_539 = arith.constant 0 : index
    %c0_540 = arith.constant 0 : index
    %612 = vector.load %arg6[%c50, %c0_539, %c0_540] : memref<75x2x32xbf16, #tpu.memory_space<vmem>>, vector<1x2x32xbf16>
    %613 = vector.shape_cast %612 : vector<1x2x32xbf16> to vector<2x32xbf16>
    %c0_541 = arith.constant 0 : index
    %c178 = arith.constant 178 : index
    %614 = vector.load %arg12[%c0_541, %c178] : memref<32x512xf32, #tpu.memory_space<vmem>>, vector<32x256xf32>
    %615 = arith.truncf %614 : vector<32x256xf32> to vector<32x256xbf16>
    %cst_542 = arith.constant dense<0.000000e+00> : vector<2x256xf32>
    %616 = tpu.matmul %613, %615, %cst_542 {dimension_numbers = #tpu.dot_dimension_numbers<[1], [0], [0], [1], [0, 0, 1, 1], [], []>} : vector<2x32xbf16>, vector<32x256xbf16>, vector<2x256xf32> -> vector<2x256xf32>
    %617 = arith.addf %611, %616 : vector<2x256xf32>
    %c51 = arith.constant 51 : index
    %c0_543 = arith.constant 0 : index
    %c0_544 = arith.constant 0 : index
    %618 = vector.load %arg6[%c51, %c0_543, %c0_544] : memref<75x2x32xbf16, #tpu.memory_space<vmem>>, vector<1x2x32xbf16>
    %619 = vector.shape_cast %618 : vector<1x2x32xbf16> to vector<2x32xbf16>
    %c0_545 = arith.constant 0 : index
    %c179 = arith.constant 179 : index
    %620 = vector.load %arg12[%c0_545, %c179] : memref<32x512xf32, #tpu.memory_space<vmem>>, vector<32x256xf32>
    %621 = arith.truncf %620 : vector<32x256xf32> to vector<32x256xbf16>
    %cst_546 = arith.constant dense<0.000000e+00> : vector<2x256xf32>
    %622 = tpu.matmul %619, %621, %cst_546 {dimension_numbers = #tpu.dot_dimension_numbers<[1], [0], [0], [1], [0, 0, 1, 1], [], []>} : vector<2x32xbf16>, vector<32x256xbf16>, vector<2x256xf32> -> vector<2x256xf32>
    %623 = arith.addf %617, %622 : vector<2x256xf32>
    %c52 = arith.constant 52 : index
    %c0_547 = arith.constant 0 : index
    %c0_548 = arith.constant 0 : index
    %624 = vector.load %arg6[%c52, %c0_547, %c0_548] : memref<75x2x32xbf16, #tpu.memory_space<vmem>>, vector<1x2x32xbf16>
    %625 = vector.shape_cast %624 : vector<1x2x32xbf16> to vector<2x32xbf16>
    %c0_549 = arith.constant 0 : index
    %c180 = arith.constant 180 : index
    %626 = vector.load %arg12[%c0_549, %c180] : memref<32x512xf32, #tpu.memory_space<vmem>>, vector<32x256xf32>
    %627 = arith.truncf %626 : vector<32x256xf32> to vector<32x256xbf16>
    %cst_550 = arith.constant dense<0.000000e+00> : vector<2x256xf32>
    %628 = tpu.matmul %625, %627, %cst_550 {dimension_numbers = #tpu.dot_dimension_numbers<[1], [0], [0], [1], [0, 0, 1, 1], [], []>} : vector<2x32xbf16>, vector<32x256xbf16>, vector<2x256xf32> -> vector<2x256xf32>
    %629 = arith.addf %623, %628 : vector<2x256xf32>
    %c53 = arith.constant 53 : index
    %c0_551 = arith.constant 0 : index
    %c0_552 = arith.constant 0 : index
    %630 = vector.load %arg6[%c53, %c0_551, %c0_552] : memref<75x2x32xbf16, #tpu.memory_space<vmem>>, vector<1x2x32xbf16>
    %631 = vector.shape_cast %630 : vector<1x2x32xbf16> to vector<2x32xbf16>
    %c0_553 = arith.constant 0 : index
    %c181 = arith.constant 181 : index
    %632 = vector.load %arg12[%c0_553, %c181] : memref<32x512xf32, #tpu.memory_space<vmem>>, vector<32x256xf32>
    %633 = arith.truncf %632 : vector<32x256xf32> to vector<32x256xbf16>
    %cst_554 = arith.constant dense<0.000000e+00> : vector<2x256xf32>
    %634 = tpu.matmul %631, %633, %cst_554 {dimension_numbers = #tpu.dot_dimension_numbers<[1], [0], [0], [1], [0, 0, 1, 1], [], []>} : vector<2x32xbf16>, vector<32x256xbf16>, vector<2x256xf32> -> vector<2x256xf32>
    %635 = arith.addf %629, %634 : vector<2x256xf32>
    %c54 = arith.constant 54 : index
    %c0_555 = arith.constant 0 : index
    %c0_556 = arith.constant 0 : index
    %636 = vector.load %arg6[%c54, %c0_555, %c0_556] : memref<75x2x32xbf16, #tpu.memory_space<vmem>>, vector<1x2x32xbf16>
    %637 = vector.shape_cast %636 : vector<1x2x32xbf16> to vector<2x32xbf16>
    %c0_557 = arith.constant 0 : index
    %c182 = arith.constant 182 : index
    %638 = vector.load %arg12[%c0_557, %c182] : memref<32x512xf32, #tpu.memory_space<vmem>>, vector<32x256xf32>
    %639 = arith.truncf %638 : vector<32x256xf32> to vector<32x256xbf16>
    %cst_558 = arith.constant dense<0.000000e+00> : vector<2x256xf32>
    %640 = tpu.matmul %637, %639, %cst_558 {dimension_numbers = #tpu.dot_dimension_numbers<[1], [0], [0], [1], [0, 0, 1, 1], [], []>} : vector<2x32xbf16>, vector<32x256xbf16>, vector<2x256xf32> -> vector<2x256xf32>
    %641 = arith.addf %635, %640 : vector<2x256xf32>
    %c55 = arith.constant 55 : index
    %c0_559 = arith.constant 0 : index
    %c0_560 = arith.constant 0 : index
    %642 = vector.load %arg6[%c55, %c0_559, %c0_560] : memref<75x2x32xbf16, #tpu.memory_space<vmem>>, vector<1x2x32xbf16>
    %643 = vector.shape_cast %642 : vector<1x2x32xbf16> to vector<2x32xbf16>
    %c0_561 = arith.constant 0 : index
    %c183 = arith.constant 183 : index
    %644 = vector.load %arg12[%c0_561, %c183] : memref<32x512xf32, #tpu.memory_space<vmem>>, vector<32x256xf32>
    %645 = arith.truncf %644 : vector<32x256xf32> to vector<32x256xbf16>
    %cst_562 = arith.constant dense<0.000000e+00> : vector<2x256xf32>
    %646 = tpu.matmul %643, %645, %cst_562 {dimension_numbers = #tpu.dot_dimension_numbers<[1], [0], [0], [1], [0, 0, 1, 1], [], []>} : vector<2x32xbf16>, vector<32x256xbf16>, vector<2x256xf32> -> vector<2x256xf32>
    %647 = arith.addf %641, %646 : vector<2x256xf32>
    %c56 = arith.constant 56 : index
    %c0_563 = arith.constant 0 : index
    %c0_564 = arith.constant 0 : index
    %648 = vector.load %arg6[%c56, %c0_563, %c0_564] : memref<75x2x32xbf16, #tpu.memory_space<vmem>>, vector<1x2x32xbf16>
    %649 = vector.shape_cast %648 : vector<1x2x32xbf16> to vector<2x32xbf16>
    %c0_565 = arith.constant 0 : index
    %c184 = arith.constant 184 : index
    %650 = vector.load %arg12[%c0_565, %c184] : memref<32x512xf32, #tpu.memory_space<vmem>>, vector<32x256xf32>
    %651 = arith.truncf %650 : vector<32x256xf32> to vector<32x256xbf16>
    %cst_566 = arith.constant dense<0.000000e+00> : vector<2x256xf32>
    %652 = tpu.matmul %649, %651, %cst_566 {dimension_numbers = #tpu.dot_dimension_numbers<[1], [0], [0], [1], [0, 0, 1, 1], [], []>} : vector<2x32xbf16>, vector<32x256xbf16>, vector<2x256xf32> -> vector<2x256xf32>
    %653 = arith.addf %647, %652 : vector<2x256xf32>
    %c57 = arith.constant 57 : index
    %c0_567 = arith.constant 0 : index
    %c0_568 = arith.constant 0 : index
    %654 = vector.load %arg6[%c57, %c0_567, %c0_568] : memref<75x2x32xbf16, #tpu.memory_space<vmem>>, vector<1x2x32xbf16>
    %655 = vector.shape_cast %654 : vector<1x2x32xbf16> to vector<2x32xbf16>
    %c0_569 = arith.constant 0 : index
    %c185 = arith.constant 185 : index
    %656 = vector.load %arg12[%c0_569, %c185] : memref<32x512xf32, #tpu.memory_space<vmem>>, vector<32x256xf32>
    %657 = arith.truncf %656 : vector<32x256xf32> to vector<32x256xbf16>
    %cst_570 = arith.constant dense<0.000000e+00> : vector<2x256xf32>
    %658 = tpu.matmul %655, %657, %cst_570 {dimension_numbers = #tpu.dot_dimension_numbers<[1], [0], [0], [1], [0, 0, 1, 1], [], []>} : vector<2x32xbf16>, vector<32x256xbf16>, vector<2x256xf32> -> vector<2x256xf32>
    %659 = arith.addf %653, %658 : vector<2x256xf32>
    %c58 = arith.constant 58 : index
    %c0_571 = arith.constant 0 : index
    %c0_572 = arith.constant 0 : index
    %660 = vector.load %arg6[%c58, %c0_571, %c0_572] : memref<75x2x32xbf16, #tpu.memory_space<vmem>>, vector<1x2x32xbf16>
    %661 = vector.shape_cast %660 : vector<1x2x32xbf16> to vector<2x32xbf16>
    %c0_573 = arith.constant 0 : index
    %c186 = arith.constant 186 : index
    %662 = vector.load %arg12[%c0_573, %c186] : memref<32x512xf32, #tpu.memory_space<vmem>>, vector<32x256xf32>
    %663 = arith.truncf %662 : vector<32x256xf32> to vector<32x256xbf16>
    %cst_574 = arith.constant dense<0.000000e+00> : vector<2x256xf32>
    %664 = tpu.matmul %661, %663, %cst_574 {dimension_numbers = #tpu.dot_dimension_numbers<[1], [0], [0], [1], [0, 0, 1, 1], [], []>} : vector<2x32xbf16>, vector<32x256xbf16>, vector<2x256xf32> -> vector<2x256xf32>
    %665 = arith.addf %659, %664 : vector<2x256xf32>
    %c59 = arith.constant 59 : index
    %c0_575 = arith.constant 0 : index
    %c0_576 = arith.constant 0 : index
    %666 = vector.load %arg6[%c59, %c0_575, %c0_576] : memref<75x2x32xbf16, #tpu.memory_space<vmem>>, vector<1x2x32xbf16>
    %667 = vector.shape_cast %666 : vector<1x2x32xbf16> to vector<2x32xbf16>
    %c0_577 = arith.constant 0 : index
    %c187 = arith.constant 187 : index
    %668 = vector.load %arg12[%c0_577, %c187] : memref<32x512xf32, #tpu.memory_space<vmem>>, vector<32x256xf32>
    %669 = arith.truncf %668 : vector<32x256xf32> to vector<32x256xbf16>
    %cst_578 = arith.constant dense<0.000000e+00> : vector<2x256xf32>
    %670 = tpu.matmul %667, %669, %cst_578 {dimension_numbers = #tpu.dot_dimension_numbers<[1], [0], [0], [1], [0, 0, 1, 1], [], []>} : vector<2x32xbf16>, vector<32x256xbf16>, vector<2x256xf32> -> vector<2x256xf32>
    %671 = arith.addf %665, %670 : vector<2x256xf32>
    %c60 = arith.constant 60 : index
    %c0_579 = arith.constant 0 : index
    %c0_580 = arith.constant 0 : index
    %672 = vector.load %arg6[%c60, %c0_579, %c0_580] : memref<75x2x32xbf16, #tpu.memory_space<vmem>>, vector<1x2x32xbf16>
    %673 = vector.shape_cast %672 : vector<1x2x32xbf16> to vector<2x32xbf16>
    %c0_581 = arith.constant 0 : index
    %c188 = arith.constant 188 : index
    %674 = vector.load %arg12[%c0_581, %c188] : memref<32x512xf32, #tpu.memory_space<vmem>>, vector<32x256xf32>
    %675 = arith.truncf %674 : vector<32x256xf32> to vector<32x256xbf16>
    %cst_582 = arith.constant dense<0.000000e+00> : vector<2x256xf32>
    %676 = tpu.matmul %673, %675, %cst_582 {dimension_numbers = #tpu.dot_dimension_numbers<[1], [0], [0], [1], [0, 0, 1, 1], [], []>} : vector<2x32xbf16>, vector<32x256xbf16>, vector<2x256xf32> -> vector<2x256xf32>
    %677 = arith.addf %671, %676 : vector<2x256xf32>
    %c61 = arith.constant 61 : index
    %c0_583 = arith.constant 0 : index
    %c0_584 = arith.constant 0 : index
    %678 = vector.load %arg6[%c61, %c0_583, %c0_584] : memref<75x2x32xbf16, #tpu.memory_space<vmem>>, vector<1x2x32xbf16>
    %679 = vector.shape_cast %678 : vector<1x2x32xbf16> to vector<2x32xbf16>
    %c0_585 = arith.constant 0 : index
    %c189 = arith.constant 189 : index
    %680 = vector.load %arg12[%c0_585, %c189] : memref<32x512xf32, #tpu.memory_space<vmem>>, vector<32x256xf32>
    %681 = arith.truncf %680 : vector<32x256xf32> to vector<32x256xbf16>
    %cst_586 = arith.constant dense<0.000000e+00> : vector<2x256xf32>
    %682 = tpu.matmul %679, %681, %cst_586 {dimension_numbers = #tpu.dot_dimension_numbers<[1], [0], [0], [1], [0, 0, 1, 1], [], []>} : vector<2x32xbf16>, vector<32x256xbf16>, vector<2x256xf32> -> vector<2x256xf32>
    %683 = arith.addf %677, %682 : vector<2x256xf32>
    %c62 = arith.constant 62 : index
    %c0_587 = arith.constant 0 : index
    %c0_588 = arith.constant 0 : index
    %684 = vector.load %arg6[%c62, %c0_587, %c0_588] : memref<75x2x32xbf16, #tpu.memory_space<vmem>>, vector<1x2x32xbf16>
    %685 = vector.shape_cast %684 : vector<1x2x32xbf16> to vector<2x32xbf16>
    %c0_589 = arith.constant 0 : index
    %c190 = arith.constant 190 : index
    %686 = vector.load %arg12[%c0_589, %c190] : memref<32x512xf32, #tpu.memory_space<vmem>>, vector<32x256xf32>
    %687 = arith.truncf %686 : vector<32x256xf32> to vector<32x256xbf16>
    %cst_590 = arith.constant dense<0.000000e+00> : vector<2x256xf32>
    %688 = tpu.matmul %685, %687, %cst_590 {dimension_numbers = #tpu.dot_dimension_numbers<[1], [0], [0], [1], [0, 0, 1, 1], [], []>} : vector<2x32xbf16>, vector<32x256xbf16>, vector<2x256xf32> -> vector<2x256xf32>
    %689 = arith.addf %683, %688 : vector<2x256xf32>
    %c63 = arith.constant 63 : index
    %c0_591 = arith.constant 0 : index
    %c0_592 = arith.constant 0 : index
    %690 = vector.load %arg6[%c63, %c0_591, %c0_592] : memref<75x2x32xbf16, #tpu.memory_space<vmem>>, vector<1x2x32xbf16>
    %691 = vector.shape_cast %690 : vector<1x2x32xbf16> to vector<2x32xbf16>
    %c0_593 = arith.constant 0 : index
    %c191 = arith.constant 191 : index
    %692 = vector.load %arg12[%c0_593, %c191] : memref<32x512xf32, #tpu.memory_space<vmem>>, vector<32x256xf32>
    %693 = arith.truncf %692 : vector<32x256xf32> to vector<32x256xbf16>
    %cst_594 = arith.constant dense<0.000000e+00> : vector<2x256xf32>
    %694 = tpu.matmul %691, %693, %cst_594 {dimension_numbers = #tpu.dot_dimension_numbers<[1], [0], [0], [1], [0, 0, 1, 1], [], []>} : vector<2x32xbf16>, vector<32x256xbf16>, vector<2x256xf32> -> vector<2x256xf32>
    %695 = arith.addf %689, %694 : vector<2x256xf32>
    %c64_595 = arith.constant 64 : index
    %c0_596 = arith.constant 0 : index
    %c0_597 = arith.constant 0 : index
    %696 = vector.load %arg6[%c64_595, %c0_596, %c0_597] : memref<75x2x32xbf16, #tpu.memory_space<vmem>>, vector<1x2x32xbf16>
    %697 = vector.shape_cast %696 : vector<1x2x32xbf16> to vector<2x32xbf16>
    %c0_598 = arith.constant 0 : index
    %c192_599 = arith.constant 192 : index
    %698 = vector.load %arg12[%c0_598, %c192_599] : memref<32x512xf32, #tpu.memory_space<vmem>>, vector<32x256xf32>
    %699 = arith.truncf %698 : vector<32x256xf32> to vector<32x256xbf16>
    %cst_600 = arith.constant dense<0.000000e+00> : vector<2x256xf32>
    %700 = tpu.matmul %697, %699, %cst_600 {dimension_numbers = #tpu.dot_dimension_numbers<[1], [0], [0], [1], [0, 0, 1, 1], [], []>} : vector<2x32xbf16>, vector<32x256xbf16>, vector<2x256xf32> -> vector<2x256xf32>
    %701 = arith.addf %695, %700 : vector<2x256xf32>
    %c65 = arith.constant 65 : index
    %c0_601 = arith.constant 0 : index
    %c0_602 = arith.constant 0 : index
    %702 = vector.load %arg6[%c65, %c0_601, %c0_602] : memref<75x2x32xbf16, #tpu.memory_space<vmem>>, vector<1x2x32xbf16>
    %703 = vector.shape_cast %702 : vector<1x2x32xbf16> to vector<2x32xbf16>
    %c0_603 = arith.constant 0 : index
    %c193 = arith.constant 193 : index
    %704 = vector.load %arg12[%c0_603, %c193] : memref<32x512xf32, #tpu.memory_space<vmem>>, vector<32x256xf32>
    %705 = arith.truncf %704 : vector<32x256xf32> to vector<32x256xbf16>
    %cst_604 = arith.constant dense<0.000000e+00> : vector<2x256xf32>
    %706 = tpu.matmul %703, %705, %cst_604 {dimension_numbers = #tpu.dot_dimension_numbers<[1], [0], [0], [1], [0, 0, 1, 1], [], []>} : vector<2x32xbf16>, vector<32x256xbf16>, vector<2x256xf32> -> vector<2x256xf32>
    %707 = arith.addf %701, %706 : vector<2x256xf32>
    %c66 = arith.constant 66 : index
    %c0_605 = arith.constant 0 : index
    %c0_606 = arith.constant 0 : index
    %708 = vector.load %arg6[%c66, %c0_605, %c0_606] : memref<75x2x32xbf16, #tpu.memory_space<vmem>>, vector<1x2x32xbf16>
    %709 = vector.shape_cast %708 : vector<1x2x32xbf16> to vector<2x32xbf16>
    %c0_607 = arith.constant 0 : index
    %c194 = arith.constant 194 : index
    %710 = vector.load %arg12[%c0_607, %c194] : memref<32x512xf32, #tpu.memory_space<vmem>>, vector<32x256xf32>
    %711 = arith.truncf %710 : vector<32x256xf32> to vector<32x256xbf16>
    %cst_608 = arith.constant dense<0.000000e+00> : vector<2x256xf32>
    %712 = tpu.matmul %709, %711, %cst_608 {dimension_numbers = #tpu.dot_dimension_numbers<[1], [0], [0], [1], [0, 0, 1, 1], [], []>} : vector<2x32xbf16>, vector<32x256xbf16>, vector<2x256xf32> -> vector<2x256xf32>
    %713 = arith.addf %707, %712 : vector<2x256xf32>
    %c67 = arith.constant 67 : index
    %c0_609 = arith.constant 0 : index
    %c0_610 = arith.constant 0 : index
    %714 = vector.load %arg6[%c67, %c0_609, %c0_610] : memref<75x2x32xbf16, #tpu.memory_space<vmem>>, vector<1x2x32xbf16>
    %715 = vector.shape_cast %714 : vector<1x2x32xbf16> to vector<2x32xbf16>
    %c0_611 = arith.constant 0 : index
    %c195 = arith.constant 195 : index
    %716 = vector.load %arg12[%c0_611, %c195] : memref<32x512xf32, #tpu.memory_space<vmem>>, vector<32x256xf32>
    %717 = arith.truncf %716 : vector<32x256xf32> to vector<32x256xbf16>
    %cst_612 = arith.constant dense<0.000000e+00> : vector<2x256xf32>
    %718 = tpu.matmul %715, %717, %cst_612 {dimension_numbers = #tpu.dot_dimension_numbers<[1], [0], [0], [1], [0, 0, 1, 1], [], []>} : vector<2x32xbf16>, vector<32x256xbf16>, vector<2x256xf32> -> vector<2x256xf32>
    %719 = arith.addf %713, %718 : vector<2x256xf32>
    %c68 = arith.constant 68 : index
    %c0_613 = arith.constant 0 : index
    %c0_614 = arith.constant 0 : index
    %720 = vector.load %arg6[%c68, %c0_613, %c0_614] : memref<75x2x32xbf16, #tpu.memory_space<vmem>>, vector<1x2x32xbf16>
    %721 = vector.shape_cast %720 : vector<1x2x32xbf16> to vector<2x32xbf16>
    %c0_615 = arith.constant 0 : index
    %c196 = arith.constant 196 : index
    %722 = vector.load %arg12[%c0_615, %c196] : memref<32x512xf32, #tpu.memory_space<vmem>>, vector<32x256xf32>
    %723 = arith.truncf %722 : vector<32x256xf32> to vector<32x256xbf16>
    %cst_616 = arith.constant dense<0.000000e+00> : vector<2x256xf32>
    %724 = tpu.matmul %721, %723, %cst_616 {dimension_numbers = #tpu.dot_dimension_numbers<[1], [0], [0], [1], [0, 0, 1, 1], [], []>} : vector<2x32xbf16>, vector<32x256xbf16>, vector<2x256xf32> -> vector<2x256xf32>
    %725 = arith.addf %719, %724 : vector<2x256xf32>
    %c69 = arith.constant 69 : index
    %c0_617 = arith.constant 0 : index
    %c0_618 = arith.constant 0 : index
    %726 = vector.load %arg6[%c69, %c0_617, %c0_618] : memref<75x2x32xbf16, #tpu.memory_space<vmem>>, vector<1x2x32xbf16>
    %727 = vector.shape_cast %726 : vector<1x2x32xbf16> to vector<2x32xbf16>
    %c0_619 = arith.constant 0 : index
    %c197 = arith.constant 197 : index
    %728 = vector.load %arg12[%c0_619, %c197] : memref<32x512xf32, #tpu.memory_space<vmem>>, vector<32x256xf32>
    %729 = arith.truncf %728 : vector<32x256xf32> to vector<32x256xbf16>
    %cst_620 = arith.constant dense<0.000000e+00> : vector<2x256xf32>
    %730 = tpu.matmul %727, %729, %cst_620 {dimension_numbers = #tpu.dot_dimension_numbers<[1], [0], [0], [1], [0, 0, 1, 1], [], []>} : vector<2x32xbf16>, vector<32x256xbf16>, vector<2x256xf32> -> vector<2x256xf32>
    %731 = arith.addf %725, %730 : vector<2x256xf32>
    %c70 = arith.constant 70 : index
    %c0_621 = arith.constant 0 : index
    %c0_622 = arith.constant 0 : index
    %732 = vector.load %arg6[%c70, %c0_621, %c0_622] : memref<75x2x32xbf16, #tpu.memory_space<vmem>>, vector<1x2x32xbf16>
    %733 = vector.shape_cast %732 : vector<1x2x32xbf16> to vector<2x32xbf16>
    %c0_623 = arith.constant 0 : index
    %c198 = arith.constant 198 : index
    %734 = vector.load %arg12[%c0_623, %c198] : memref<32x512xf32, #tpu.memory_space<vmem>>, vector<32x256xf32>
    %735 = arith.truncf %734 : vector<32x256xf32> to vector<32x256xbf16>
    %cst_624 = arith.constant dense<0.000000e+00> : vector<2x256xf32>
    %736 = tpu.matmul %733, %735, %cst_624 {dimension_numbers = #tpu.dot_dimension_numbers<[1], [0], [0], [1], [0, 0, 1, 1], [], []>} : vector<2x32xbf16>, vector<32x256xbf16>, vector<2x256xf32> -> vector<2x256xf32>
    %737 = arith.addf %731, %736 : vector<2x256xf32>
    %c71 = arith.constant 71 : index
    %c0_625 = arith.constant 0 : index
    %c0_626 = arith.constant 0 : index
    %738 = vector.load %arg6[%c71, %c0_625, %c0_626] : memref<75x2x32xbf16, #tpu.memory_space<vmem>>, vector<1x2x32xbf16>
    %739 = vector.shape_cast %738 : vector<1x2x32xbf16> to vector<2x32xbf16>
    %c0_627 = arith.constant 0 : index
    %c199 = arith.constant 199 : index
    %740 = vector.load %arg12[%c0_627, %c199] : memref<32x512xf32, #tpu.memory_space<vmem>>, vector<32x256xf32>
    %741 = arith.truncf %740 : vector<32x256xf32> to vector<32x256xbf16>
    %cst_628 = arith.constant dense<0.000000e+00> : vector<2x256xf32>
    %742 = tpu.matmul %739, %741, %cst_628 {dimension_numbers = #tpu.dot_dimension_numbers<[1], [0], [0], [1], [0, 0, 1, 1], [], []>} : vector<2x32xbf16>, vector<32x256xbf16>, vector<2x256xf32> -> vector<2x256xf32>
    %743 = arith.addf %737, %742 : vector<2x256xf32>
    %c72 = arith.constant 72 : index
    %c0_629 = arith.constant 0 : index
    %c0_630 = arith.constant 0 : index
    %744 = vector.load %arg6[%c72, %c0_629, %c0_630] : memref<75x2x32xbf16, #tpu.memory_space<vmem>>, vector<1x2x32xbf16>
    %745 = vector.shape_cast %744 : vector<1x2x32xbf16> to vector<2x32xbf16>
    %c0_631 = arith.constant 0 : index
    %c200 = arith.constant 200 : index
    %746 = vector.load %arg12[%c0_631, %c200] : memref<32x512xf32, #tpu.memory_space<vmem>>, vector<32x256xf32>
    %747 = arith.truncf %746 : vector<32x256xf32> to vector<32x256xbf16>
    %cst_632 = arith.constant dense<0.000000e+00> : vector<2x256xf32>
    %748 = tpu.matmul %745, %747, %cst_632 {dimension_numbers = #tpu.dot_dimension_numbers<[1], [0], [0], [1], [0, 0, 1, 1], [], []>} : vector<2x32xbf16>, vector<32x256xbf16>, vector<2x256xf32> -> vector<2x256xf32>
    %749 = arith.addf %743, %748 : vector<2x256xf32>
    %c73 = arith.constant 73 : index
    %c0_633 = arith.constant 0 : index
    %c0_634 = arith.constant 0 : index
    %750 = vector.load %arg6[%c73, %c0_633, %c0_634] : memref<75x2x32xbf16, #tpu.memory_space<vmem>>, vector<1x2x32xbf16>
    %751 = vector.shape_cast %750 : vector<1x2x32xbf16> to vector<2x32xbf16>
    %c0_635 = arith.constant 0 : index
    %c201 = arith.constant 201 : index
    %752 = vector.load %arg12[%c0_635, %c201] : memref<32x512xf32, #tpu.memory_space<vmem>>, vector<32x256xf32>
    %753 = arith.truncf %752 : vector<32x256xf32> to vector<32x256xbf16>
    %cst_636 = arith.constant dense<0.000000e+00> : vector<2x256xf32>
    %754 = tpu.matmul %751, %753, %cst_636 {dimension_numbers = #tpu.dot_dimension_numbers<[1], [0], [0], [1], [0, 0, 1, 1], [], []>} : vector<2x32xbf16>, vector<32x256xbf16>, vector<2x256xf32> -> vector<2x256xf32>
    %755 = arith.addf %749, %754 : vector<2x256xf32>
    %c74 = arith.constant 74 : index
    %c0_637 = arith.constant 0 : index
    %c0_638 = arith.constant 0 : index
    %756 = vector.load %arg6[%c74, %c0_637, %c0_638] : memref<75x2x32xbf16, #tpu.memory_space<vmem>>, vector<1x2x32xbf16>
    %757 = vector.shape_cast %756 : vector<1x2x32xbf16> to vector<2x32xbf16>
    %c0_639 = arith.constant 0 : index
    %c202 = arith.constant 202 : index
    %758 = vector.load %arg12[%c0_639, %c202] : memref<32x512xf32, #tpu.memory_space<vmem>>, vector<32x256xf32>
    %759 = arith.truncf %758 : vector<32x256xf32> to vector<32x256xbf16>
    %cst_640 = arith.constant dense<0.000000e+00> : vector<2x256xf32>
    %760 = tpu.matmul %757, %759, %cst_640 {dimension_numbers = #tpu.dot_dimension_numbers<[1], [0], [0], [1], [0, 0, 1, 1], [], []>} : vector<2x32xbf16>, vector<32x256xbf16>, vector<2x256xf32> -> vector<2x256xf32>
    %761 = arith.addf %755, %760 : vector<2x256xf32>
    %762 = arith.addf %761, %312 : vector<2x256xf32>
    %c0_641 = arith.constant 0 : index
    %c0_642 = arith.constant 0 : index
    %c0_643 = arith.constant 0 : index
    %763 = vector.load %arg10[%c0_641, %c0_642, %c0_643] : memref<1x2x256xf32, #tpu.memory_space<vmem>>, vector<1x2x256xf32>
    %764 = vector.shape_cast %763 : vector<1x2x256xf32> to vector<2x256xf32>
    %765 = vector.shape_cast %762 : vector<2x256xf32> to vector<1x2x256xf32>
    tpu.vector_store %arg10[%c0_641, %c0_642, %c0_643], %765 {strides = array<i32>} : memref<1x2x256xf32, #tpu.memory_space<vmem>>, vector<1x2x256xf32>,
    %c0_644 = arith.constant 0 : index
    %c182_645 = arith.constant 182 : index
    %766 = vector.load %arg12[%c0_644, %c182_645] : memref<32x512xf32, #tpu.memory_space<vmem>>, vector<32x128xf32>
    %c0_646 = arith.constant 0 : index
    %c0_647 = arith.constant 0 : index
    %767 = vector.load %arg8[%c0_646, %c0_647] : memref<2x32xf32, #tpu.memory_space<vmem>>, vector<2x32xf32>
    %cst_648 = arith.constant dense<0.000000e+00> : vector<2x128xf32>
    %768 = tpu.matmul %767, %766, %cst_648 {dimension_numbers = #tpu.dot_dimension_numbers<[1], [0], [0], [1], [0, 0, 1, 1], [], []>} : vector<2x32xf32>, vector<32x128xf32>, vector<2x128xf32> -> vector<2x128xf32>
    %cst_649 = arith.constant dense<0.000000e+00> : vector<2xf32>
    %769 = vector.multi_reduction <add>, %768, %cst_649 [1] : vector<2x128xf32> to vector<2xf32>
    %770 = vector.shape_cast %769 : vector<2xf32> to vector<2x1xf32>
    %cst_650 = arith.constant 1.280000e+02 : f32
    %771 = vector.broadcast %cst_650 : f32 to vector<2x1xf32>
    %772 = arith.divf %770, %771 : vector<2x1xf32>
    %c0_651 = arith.constant 0 : index
    %c0_652 = arith.constant 0 : index
    %773 = vector.load %arg9[%c0_651, %c0_652] : memref<2x1xf32, #tpu.memory_space<vmem>>, vector<2x1xf32>
    %774 = arith.addf %772, %773 : vector<2x1xf32>
    %c0_653 = arith.constant 0 : index
    %c0_654 = arith.constant 0 : index
    %c0_655 = arith.constant 0 : index
    %775 = vector.load %arg11[%c0_653, %c0_654, %c0_655] : memref<1x2x1xf32, #tpu.memory_space<vmem>>, vector<1x2x1xf32>
    %776 = vector.shape_cast %775 : vector<1x2x1xf32> to vector<2x1xf32>
    %777 = vector.shape_cast %774 : vector<2x1xf32> to vector<1x2x1xf32>
    tpu.vector_store %arg11[%c0_653, %c0_654, %c0_655], %777 {strides = array<i32>} : memref<1x2x1xf32, #tpu.memory_space<vmem>>, vector<1x2x1xf32>,
    return
  }
  func.func @transform_0(%arg0: i32) -> (i32, i32, i32) {
    %c0_i32 = arith.constant 0 : i32
    %c0_i32_0 = arith.constant 0 : i32
    %c0_i32_1 = arith.constant 0 : i32
    return %arg0, %c0_i32, %c0_i32_0 : i32, i32, i32
  }
  func.func @transform_1(%arg0: i32) -> (i32, i32, i32) {
    %c0_i32 = arith.constant 0 : i32
    %c0_i32_0 = arith.constant 0 : i32
    %c0_i32_1 = arith.constant 0 : i32
    %c0_i32_2 = arith.constant 0 : i32
    return %c0_i32, %c0_i32_0, %c0_i32_1 : i32, i32, i32
  }
  func.func @transform_2(%arg0: i32) -> (i32, i32) {
    %c0_i32 = arith.constant 0 : i32
    %c0_i32_0 = arith.constant 0 : i32
    %c0_i32_1 = arith.constant 0 : i32
    return %c0_i32, %c0_i32_0 : i32, i32
  }
  func.func @transform_3(%arg0: i32) -> (i32, i32, i32, i32) {
    %c0_i32 = arith.constant 0 : i32
    %c0_i32_0 = arith.constant 0 : i32
    %c0_i32_1 = arith.constant 0 : i32
    %c0_i32_2 = arith.constant 0 : i32
    %c0_i32_3 = arith.constant 0 : i32
    return %c0_i32, %c0_i32_0, %c0_i32_1, %c0_i32_2 : i32, i32, i32, i32
  }
  func.func @transform_4(%arg0: i32) -> (i32, i32, i32) {
    %c0_i32 = arith.constant 0 : i32
    %c0_i32_0 = arith.constant 0 : i32
    %c0_i32_1 = arith.constant 0 : i32
    %c0_i32_2 = arith.constant 0 : i32
    return %c0_i32, %c0_i32_0, %c0_i32_1 : i32, i32, i32
  }
  func.func @transform_5(%arg0: i32) -> (i32, i32, i32) {
    %c0_i32 = arith.constant 0 : i32
    %c0_i32_0 = arith.constant 0 : i32
    %c0_i32_1 = arith.constant 0 : i32
    %c0_i32_2 = arith.constant 0 : i32
    return %c0_i32, %c0_i32_0, %c0_i32_1 : i32, i32, i32
  }
  func.func @transform_6(%arg0: i32) -> (i32, i32) {
    %c0_i32 = arith.constant 0 : i32
    %c0_i32_0 = arith.constant 0 : i32
    %c0_i32_1 = arith.constant 0 : i32
    return %c0_i32, %c0_i32_0 : i32, i32
  }
  func.func @transform_7(%arg0: i32) -> (i32, i32) {
    %c0_i32 = arith.constant 0 : i32
    %c0_i32_0 = arith.constant 0 : i32
    %c0_i32_1 = arith.constant 0 : i32
    return %c0_i32, %c0_i32_0 : i32, i32
  }
  func.func @transform_8(%arg0: i32) -> (i32, i32) {
    %c0_i32 = arith.constant 0 : i32
    %c0_i32_0 = arith.constant 0 : i32
    %c0_i32_1 = arith.constant 0 : i32
    return %c0_i32, %c0_i32_0 : i32, i32
  }
  func.func @transform_9(%arg0: i32) -> (i32, i32, i32) {
    %c0_i32 = arith.constant 0 : i32
    %c0_i32_0 = arith.constant 0 : i32
    %c0_i32_1 = arith.constant 0 : i32
    return %arg0, %c0_i32, %c0_i32_0 : i32, i32, i32
  }
  func.func @transform_10(%arg0: i32) -> (i32, i32, i32) {
    %c0_i32 = arith.constant 0 : i32
    %c0_i32_0 = arith.constant 0 : i32
    %c0_i32_1 = arith.constant 0 : i32
    return %arg0, %c0_i32, %c0_i32_0 : i32, i32, i32
  }
}

</mosaic_0001>

<bundles_post_ra>
// kernel: bpnet_forward.1
= control target key start
LH: loop header
LB: loop body
LE: loop exit
PB: predicated region body
PF: predicated region fallthrough
CT: control target
= control target key end

     0   :  { %s15573_s0 = inlined_call_operand.vmem [shape: bf16[2,16,276], index: 0, kind: input, shape index: {}]   ;;  %s15574_s1 = inlined_call_operand.vmem [shape: bf16[21,32,16], index: 1, kind: input, shape index: {}]   ;;  %s15575_s2 = inlined_call_operand.vmem [shape: f32[32,1], index: 2, kind: input, shape index: {}]   ;;  %s15576_s3 = inlined_call_operand.vmem [shape: bf16[6,3,32,32], index: 3, kind: input, shape index: {}]   ;;  %s15577_s4 = inlined_call_operand.vmem [shape: f32[6,32,1], index: 4, kind: input, shape index: {}]   ;;  %s15578_s5 = inlined_call_operand.vmem [shape: bf16[75,2,32], index: 5, kind: input, shape index: {}]   ;;  %s15579_s6 = inlined_call_operand.vmem [shape: f32[2,1], index: 6, kind: input, shape index: {}]   ;;  %s15580_s7 = inlined_call_operand.vmem [shape: f32[2,32], index: 7, kind: input, shape index: {}]   ;;  %s15581_s8 = inlined_call_operand.vmem [shape: f32[2,1], index: 8, kind: input, shape index: {}]   ;;  %s15582_s9 = inlined_call_operand.hbm [shape: f32[2,2,256], index: 9, kind: output, shape index: {0}]   ;;  %s15583_s10 = inlined_call_operand.vmem [shape: f32[2,2,1], index: 10, kind: output, shape index: {1}]  }
   0x1   :  { %15813 = sst [smem:[#allocation216_spill]] %s15573_s0 }
   0x2   :  { %15814 = sst [smem:[#allocation217_spill]] %s15574_s1 }
   0x3   :  { %15815 = sst [smem:[#allocation218_spill]] %s15575_s2 }
   0x4   :  { %15816 = sst [smem:[#allocation219_spill]] %s15576_s3 }
   0x5   :  { %15817 = sst [smem:[#allocation220_spill]] %s15577_s4 }
   0x6   :  { %15818 = sst [smem:[#allocation221_spill]] %s15578_s5 }
   0x7   :  { %15819 = sst [smem:[#allocation222_spill]] %s15579_s6 }
   0x8   :  { %15820 = sst [smem:[#allocation223_spill]] %s15580_s7 }
   0x9   :  { %15821 = sst [smem:[#allocation224_spill]] %s15581_s8 }
   0xa   :  { %15822 = sst [smem:[#allocation225_spill]] %s15582_s9 }
   0xb   :  { %15823 = sst [smem:[#allocation226_spill]] %s15583_s10 }
   0xc   :  { %16 = vsyncpa [#allocation5], 0 }
   0xd   :  { %18 = vsyncpa [#allocation5 + $0x1], 0  ;;  %s11279_s13 = smov 0   ;;  %s11281_s14 = smov 0  }
   0xe   :  { %s11283_s15 = smov 0   ;;  %s11285_s16 = smov 0  }
   0xf LB: > { %15824 = sst [smem:[#allocation7_spill]] %s11126_s13  ;;  %s11300_s17 = sadd.s32 4294967295, %s11138_s16   ;;  %s11138_s16 = sphi %s11285_s16, %s16441_s16   ;;  %s11134_s15 = sphi %s11283_s15, %s16444_s15   ;;  %s11130_s14 = sphi %s11281_s14, %s16443_s14   ;;  %s11126_s13 = sphi %s11279_s13, %s16442_s13  }
  0x10   : > { %15825 = sst [smem:[#allocation8_spill]] %s11130_s14  ;;  %s10077_s18 = sadd.s32 4294967294, %s11138_s16  }
  0x11   : > { %15826 = sst [smem:[#allocation9_spill]] %s11134_s15  ;;  %s11304_s19 = sadd.s32 1, %s11138_s16  }
  0x12   : > { %15827 = sst [smem:[#allocation10_spill]] %s11138_s16  ;;  %s225_s20 = sadd.s32 1, %s11134_s15 }
  0x13   : > { %15828 = sst [smem:[#allocation11_spill]] %s11300_s17  ;;  %s222_s21 = ssub.s32 %s11138_s16, %s11304_s19 }
  0x14   : > { %15829 = sst [smem:[#allocation12_spill]] %s11304_s19  ;;  %p235_p0 = scmp.ne.s32.totalorder %s11134_s15, %s11130_s14 }
  0x15   : > { %p223_p1 = scmp.eq.s32.totalorder %s222_s21, 0  ;;  %p236_p2 = scmp.eq.s32.totalorder %s11300_s17, 1 }
  0x16   : > { %p241_p3 = scmp.ne.s32.totalorder %s11130_s14, %s11126_s13  ;;  %p242_p4 = scmp.eq.s32.totalorder %s10077_s18, 1 }
  0x17   : > { %s11315_s22 = scalar_select %p223_p1, %s11134_s15, %s225_s20  }
  0x18   : > { %p11317_p5 = por %p236_p2, %p235_p0  ;;  %p11321_p6 = por %p242_p4, %p241_p3 }
  0x19   : > { %15830 = sst [smem:[#allocation13_spill]] %s11315_s22  ;;  %p10080_p7 = scmp.ge.s32.totalorder %s11138_s16, 1 }
  0x1a   : > { %s15831_s23 = scalar_select %p11317_p5, 1, 0 }
  0x1b   : > { %s15833_s24 = scalar_select %p11321_p6, 1, 0 }
  0x1c   : > { %15832 = sst [smem:[#allocation14_spill]] %s15831_s23  ;;  %p318_p8 = scmp.lt.s32.totalorder %s11138_s16, 3 }
  0x1d   : > { %15834 = sst [smem:[#allocation15_spill]] %s15833_s24 }
  0x1e   : > { %p319_p9 = pnand %p10080_p7, %p318_p8 }
  0x20   : > { %322 = sbr.rel (%p319_p9) target bundleno = 4196 (0x1064), region = 56 }
  0x27   : > { %p360_p10 = scmp.lt.s32.totalorder %s11300_s17, 1  ;;  %v15682_v0 = vmov 0   ;;  %s15836_s0 = sld [smem:[#allocation216_spill]]  ;;  %vm452_vm0 = vcmask 1039360   ;;  %vm609_vm1 = vcmask 1031168   ;;  %vm457_vm2 = vcmask 130048  }
  0x28   : > { %496 = vmatprep.mubr.bf16.mxu0 %v15682_v0  ;;  %10969 = vset.pattern.permute.xlu0 %v15682_v0  ;;  %s15614_s30 = smov 127   ;;  %s15622_s11 = smov 126   ;;  %vm702_vm3 = vcmask 1022976   ;;  %vm795_vm4 = vcmask 1014784   ;;  %vm888_vm5 = vcmask 1006592   ;;  %vm981_vm6 = vcmask 998400  }
  0x29   : > { %s11329_s25 = scalar_select %p360_p10, %s11300_s17, 1  ;;  %10970 = vset.pattern.permute.xlu1 %v15682_v0  ;;  %2516 = vmatprep.mubr.bf16.mxu1 %v15682_v0  ;;  %vm1074_vm7 = vcmask 990208   ;;  %vm1167_vm8 = vcmask 982016   ;;  %vm15631_vm9 = vcmask 973824   ;;  %vm1353_vm10 = vcmask 965632  }
  0x2a   : > { %s15604_s12 = smov 125   ;;  %s15620_s18 = smov 124   ;;  %vm15626_vm11 = vcmask 957440   ;;  %vm1539_vm12 = vcmask 949248   ;;  %vm15624_vm13 = vcmask 941056   ;;  %vm1725_vm14 = vcmask 932864  }
  0x2b   : > { %15835 = sst [smem:[#allocation16_spill]] %s11329_s25  ;;  %s10846_s26 = smul.u32 24, %s11329_s25  ;;  %vm15625_vm15 = vcmask 924672  }
  0x2c   : > { %s15602_s20 = smov 123   ;;  %s15598_s21 = smov 122  }
  0x2d   : > { %s364_s29 = scalar_lea.vmem %s15836_s0, %s10846_s26  ;;  %s15584_s26 = smov 121  }
  0x2e   : > { %v11339_v1 = vld [vmem:[%s364_s29 + $0x4] ss:$12 sps:$4 sm:$0xff]   ;;  %v11341_v2 = vld [vmem:[%s364_s29] ss:$12 sps:$4 sm:$0xff]   ;;  %v11345_v3 = vld [vmem:[%s364_s29 + $0x8] ss:$12 sps:$4 sm:$0xff]  }
  0x2f   : > { %448 = vrot.lane.b32.xlu0 %v11339_v1, %s15614_s30  ;;  %446 = vrot.lane.b32.xlu1 %v11341_v2, %s15614_s30  ;;  %s15618_s27 = smov 120   ;;  %s15586_s28 = smov 119  }
  0x30   : > { %s15588_s29 = smov 118   ;;  %s15837_s1 = sld [smem:[#allocation217_spill]] }
  0x31   : > { %s15838_s2 = sld [smem:[#allocation218_spill]]  ;;  %s15840_s4 = sld [smem:[#allocation220_spill]] }
  0x32   : > { %s15841_s3 = sld [smem:[#allocation219_spill]]  ;;  %s15632_s0 = smov 96  }
  0x33   : > { %450 = vrot.lane.b32.xlu0 %v11345_v3, %s15614_s30  ;;  %605 = vrot.lane.b32.xlu1 %v11339_v1, %s15622_s11  ;;  %s11163_s30 = smov 2   ;;  %s15845_s6 = sld [smem:[#allocation222_spill]] }
  0x34   : > { %s15848_s22 = smov 123   ;;  %s15858_s15 = smov 111  }
  0x35   : > { %s15859_s19 = smov 110   ;;  %s15860_s24 = smov 109  }
  0x36   : > { %v10995_v9 = vld [vmem:[%s15837_s1 + $0x10] sm:$0xff]   ;;  %v10996_v13 = vld [vmem:[%s15837_s1 + $0x18] sm:$0xff]   ;;  %v10997_v15 = vld [vmem:[%s15837_s1] sm:$0xff]   ;;  %s15861_s10 = smov 108   ;;  %s15650_s8 = smov 107  }
  0x37   : > { %607 = vrot.lane.b32.xlu0 %v11345_v3, %s15622_s11  ;;  %603 = vrot.lane.b32.xlu1 %v11341_v2, %s15622_s11  ;;  %v10998_v20 = vld [vmem:[%s15837_s1 + $0x8] sm:$0xff]   ;;  %v10999_v22 = vld [vmem:[%s15837_s1 + $0x20] sm:$0xff]   ;;  %s15843_s11 = smov 120   ;;  %s15646_s25 = smov 106  }
  0x38   : > { %v11000_v27 = vld [vmem:[%s15837_s1 + $0x28] sm:$0xff]   ;;  %v11001_v29 = vld [vmem:[%s15837_s1 + $0x30] sm:$0xff]   ;;  %v11002_v34 = vld [vmem:[%s15837_s1 + $0x38] sm:$0xff]   ;;  %s15648_s9 = smov 105   ;;  %s15652_s23 = smov 104  }
  0x39   : > { %v11003_v36 = vld [vmem:[%s15837_s1 + $0x40] sm:$0xff]   ;;  %v11004_v41 = vld [vmem:[%s15837_s1 + $0x48] sm:$0xff]   ;;  %v11005_v43 = vld [vmem:[%s15837_s1 + $0x50] sm:$0xff]   ;;  %s15862_s13 = smov 96   ;;  %s15668_s16 = smov 95  }
  0x3a   : > { %v11006_v48 = vld [vmem:[%s15837_s1 + $0x58] sm:$0xff]   ;;  %v11007_v50 = vld [vmem:[%s15837_s1 + $0x60] sm:$0xff]   ;;  %v11008_v55 = vld [vmem:[%s15837_s1 + $0x68] sm:$0xff]   ;;  %s15719_s17 = smov 82   ;;  %s15721_s14 = smov 63  }
  0x3b   : > { %698 = vrot.lane.b32.xlu0 %v11339_v1, %s15604_s12  ;;  %700 = vrot.lane.b32.xlu1 %v11345_v3, %s15604_s12  ;;  %v11009_v57 = vld [vmem:[%s15837_s1 + $0x70] sm:$0xff]   ;;  %v11010_v62 = vld [vmem:[%s15837_s1 + $0x78] sm:$0xff]   ;;  %s15946_s7 = smov 79   ;;  %s15949_s5 = smov 75  }
  0x3f   : > { %696 = vrot.lane.b32.xlu0 %v11341_v2, %s15604_s12  ;;  %791 = vrot.lane.b32.xlu1 %v11339_v1, %s15620_s18  ;;  %s15608_s12 = smov 110  }
  0x43   : > { %793 = vrot.lane.b32.xlu0 %v11345_v3, %s15620_s18  ;;  %789 = vrot.lane.b32.xlu1 %v11341_v2, %s15620_s18  ;;  %s15854_s18 = smov 116  }
  0x47   : > { %884 = vrot.lane.b32.xlu0 %v11339_v1, %s15602_s20  ;;  %886 = vrot.lane.b32.xlu1 %v11345_v3, %s15602_s20 }
  0x4b   : > { %882 = vrot.lane.b32.xlu0 %v11341_v2, %s15602_s20  ;;  %977 = vrot.lane.b32.xlu1 %v11339_v1, %s15598_s21  ;;  %s11166_s20 = smov 16  }
  0x4f   : > { %979 = vrot.lane.b32.xlu0 %v11345_v3, %s15598_s21  ;;  %975 = vrot.lane.b32.xlu1 %v11341_v2, %s15598_s21  ;;  %s15844_s21 = smov 112  }
  0x53   : > { %1070 = vrot.lane.b32.xlu0 %v11339_v1, %s15584_s26  ;;  %1072 = vrot.lane.b32.xlu1 %v11345_v3, %s15584_s26 }
  0x57   : > { %1068 = vrot.lane.b32.xlu0 %v11341_v2, %s15584_s26  ;;  %1163 = vrot.lane.b32.xlu1 %v11339_v1, %s15618_s27  ;;  %s15590_s26 = smov 117  }
  0x5b   : > { %1165 = vrot.lane.b32.xlu0 %v11345_v3, %s15618_s27  ;;  %1161 = vrot.lane.b32.xlu1 %v11341_v2, %s15618_s27  ;;  %s15839_s27 = smov 126  }
  0x5f   : > { %1256 = vrot.lane.b32.xlu0 %v11339_v1, %s15586_s28  ;;  %1258 = vrot.lane.b32.xlu1 %v11345_v3, %s15586_s28 }
  0x63   : > { %1254 = vrot.lane.b32.xlu0 %v11341_v2, %s15586_s28  ;;  %1349 = vrot.lane.b32.xlu1 %v11339_v1, %s15588_s29  ;;  %s15592_s28 = smov 116  }
  0x67   : > { %1351 = vrot.lane.b32.xlu0 %v11345_v3, %s15588_s29  ;;  %1347 = vrot.lane.b32.xlu1 %v11341_v2, %s15588_s29  ;;  %s15594_s29 = smov 115  }
  0x6b   : > { %1442 = vrot.lane.b32.xlu0 %v11339_v1, %s15590_s26  ;;  %1444 = vrot.lane.b32.xlu1 %v11345_v3, %s15590_s26 }
  0x6f   : > { %1440 = vrot.lane.b32.xlu0 %v11341_v2, %s15590_s26  ;;  %1535 = vrot.lane.b32.xlu1 %v11339_v1, %s15592_s28  ;;  %s15596_s26 = smov 114  }
  0x73   : > { %1537 = vrot.lane.b32.xlu0 %v11345_v3, %s15592_s28  ;;  %1533 = vrot.lane.b32.xlu1 %v11341_v2, %s15592_s28  ;;  %s15600_s28 = smov 113  }
  0x77   : > { %1628 = vrot.lane.b32.xlu0 %v11339_v1, %s15594_s29  ;;  %1630 = vrot.lane.b32.xlu1 %v11345_v3, %s15594_s29 }
  0x7b   : > { %1626 = vrot.lane.b32.xlu0 %v11341_v2, %s15594_s29  ;;  %1721 = vrot.lane.b32.xlu1 %v11339_v1, %s15596_s26  ;;  %s15616_s29 = smov 112  }
  0x7f   : > { %1723 = vrot.lane.b32.xlu0 %v11345_v3, %s15596_s26  ;;  %1719 = vrot.lane.b32.xlu1 %v11341_v2, %s15596_s26  ;;  %s15852_s26 = smov 118  }
  0x83   : > { %1814 = vrot.lane.b32.xlu0 %v11339_v1, %s15600_s28  ;;  %1816 = vrot.lane.b32.xlu1 %v11345_v3, %s15600_s28 }
  0x87   : > { %1812 = vrot.lane.b32.xlu0 %v11341_v2, %s15600_s28  ;;  %1907 = vrot.lane.b32.xlu1 %v11339_v1, %s15616_s29  ;;  %s15606_s28 = smov 111  }
  0x8b   : > { %1909 = vrot.lane.b32.xlu0 %v11345_v3, %s15616_s29  ;;  %1905 = vrot.lane.b32.xlu1 %v11341_v2, %s15616_s29  ;;  %s11164_s29 = smov 4  }
  0x8f   : > { %2000 = vrot.lane.b32.xlu0 %v11339_v1, %s15606_s28  ;;  %2002 = vrot.lane.b32.xlu1 %v11345_v3, %s15606_s28 }
  0x93   : > { %1998 = vrot.lane.b32.xlu0 %v11341_v2, %s15606_s28  ;;  %2093 = vrot.lane.b32.xlu1 %v11339_v1, %s15608_s12  ;;  %s15610_s28 = smov 109  }
  0x97   : > { %2095 = vrot.lane.b32.xlu0 %v11345_v3, %s15608_s12  ;;  %2091 = vrot.lane.b32.xlu1 %v11341_v2, %s15608_s12  ;;  %s15612_s12 = smov 108  }
  0x9b   : > { %2186 = vrot.lane.b32.xlu0 %v11339_v1, %s15610_s28  ;;  %2188 = vrot.lane.b32.xlu1 %v11345_v3, %s15610_s28 }
  0x9f   : > { %2184 = vrot.lane.b32.xlu0 %v11341_v2, %s15610_s28  ;;  %2279 = vrot.lane.b32.xlu1 %v11339_v1, %s15612_s12  ;;  %s15846_s28 = smov 127  }
  0xa1   : > { %v449_v4 = vpop.permute.xlu0 %448  ;;  %v447_v5 = vpop.permute.xlu1 %446 }
  0xa2   : > { %v453_v8 = vsel %vm452_vm0, %v447_v5, %v449_v4 }
  0xa3   : > { %2281 = vrot.lane.b32.xlu0 %v11345_v3, %s15612_s12  ;;  %2277 = vrot.lane.b32.xlu1 %v11341_v2, %s15612_s12  ;;  %s15842_s12 = smov 124  }
  0xa5   : > { %v451_v6 = vpop.permute.xlu0 %450  ;;  %v606_v10 = vpop.permute.xlu1 %605 }
  0xa6   : > { %v454_v7 = vsel %vm452_vm0, %v449_v4, %v451_v6  ;;  %v11012_v6 = vld [vmem:[%s15837_s1 + $0x88] sm:$0xff]  }
  0xa7   : > { %464 = vmatprep.subr.bf16.mxu0 %v454_v7 }
  0xa8   : > { %465 = vmatpush1.bf16.msra.mxu0 %v453_v8  ;;  %v11013_v8 = vld [vmem:[%s15837_s1 + $0x90] sm:$0xff]  }
  0xa9   : > { %535 = vmatprep.subr.bf16.mxu0 %v11339_v1  ;;  %v608_v11 = vpop.permute.xlu0 %607  ;;  %v604_v14 = vpop.permute.xlu1 %603  ;;  %v11011_v1 = vld [vmem:[%s15837_s1 + $0x80] sm:$0xff]  }
  0xaa   : > { %v611_v12 = vsel %vm609_vm1, %v606_v10, %v608_v11  ;;  %v610_v17 = vsel %vm609_vm1, %v604_v14, %v606_v10 }
  0xab   : > { %10093 = vmatmul.mubr.msk.bf16.vlgmr.msra.gmra.mrb[0].mxu0 %vm457_vm2, %v10995_v9 }
  0xac   : > { %536 = vmatpush1.bf16.msra.mxu0 %v11341_v2  ;;  %506 = vmatprep.mubr.bf16.mxu0 %v15682_v0 }
  0xad   : > { %620 = vmatprep.subr.bf16.mxu0 %v611_v12  ;;  %v701_v16 = vpop.permute.xlu1 %700  ;;  %v699_v18 = vpop.permute.xlu0 %698 }
  0xae   : > { %v704_v19 = vsel %vm702_vm3, %v699_v18, %v701_v16 }
  0xb1   : > { %v697_v21 = vpop.permute.xlu0 %696  ;;  %v792_v25 = vpop.permute.xlu1 %791 }
  0xb2   : > { %v703_v24 = vsel %vm702_vm3, %v697_v21, %v699_v18 }
  0xb3   : > { %10094 = vmatmul.mubr.msk.bf16.gmra.mrb[4].mxu0 %vm457_vm2, %v10996_v13  ;;  %v11014_v13 = vld [vmem:[%s15837_s1 + $0x98] sm:$0xff]  }
  0xb4   : > { %567 = vmatprep.mubr.bf16.mxu0 %v15682_v0 }
  0xb5   : > { %v794_v23 = vpop.permute.xlu0 %793  ;;  %v790_v28 = vpop.permute.xlu1 %789 }
  0xb6   : > { %v797_v26 = vsel %vm795_vm4, %v792_v25, %v794_v23  ;;  %v796_v31 = vsel %vm795_vm4, %v790_v28, %v792_v25 }
  0xb9   : > { %v887_v30 = vpop.permute.xlu1 %886  ;;  %v885_v32 = vpop.permute.xlu0 %884 }
  0xba   : > { %v890_v33 = vsel %vm888_vm5, %v885_v32, %v887_v30 }
  0xbb   : > { %10097 = vmatmul.mubr.msk.bf16.vlgmr.msra.gmra.mrb[0].mxu0 %vm457_vm2, %v10997_v15  ;;  %v11015_v15 = vld [vmem:[%s15837_s1 + $0xa0] sm:$0xff]  }
  0xbc   : > { %621 = vmatpush1.bf16.msra.mxu0 %v610_v17  ;;  %577 = vmatprep.mubr.bf16.mxu0 %v15682_v0 }
  0xbd   : > { %713 = vmatprep.subr.bf16.mxu0 %v704_v19  ;;  %v883_v35 = vpop.permute.xlu0 %882  ;;  %v978_v39 = vpop.permute.xlu1 %977 }
  0xbe   : > { %v889_v38 = vsel %vm888_vm5, %v883_v35, %v885_v32 }
  0xc1   : > { %v980_v37 = vpop.permute.xlu0 %979  ;;  %v976_v42 = vpop.permute.xlu1 %975 }
  0xc2   : > { %v983_v40 = vsel %vm981_vm6, %v978_v39, %v980_v37  ;;  %v982_v45 = vsel %vm981_vm6, %v976_v42, %v978_v39  ;;  %v387_v37 = vld [vmem:[%s15838_s2 + $0x8] sm:$0xff]  ;;  %v388_v39 = vld [vmem:[%s15838_s2 + $0x10] sm:$0xff] }
  0xc3   : > { %10098 = vmatmul.mubr.msk.bf16.gmra.mrb[4].mxu0 %vm457_vm2, %v10998_v20  ;;  %v11016_v20 = vld [vmem:[%s15837_s1 + $0xa8] sm:$0xff]   ;;  %397 = vperm.xlu1 %10970, %v387_v37  }
  0xc4   : > { %652 = vmatprep.mubr.bf16.mxu0 %v15682_v0 }
  0xc5   : > { %v1073_v44 = vpop.permute.xlu1 %1072  ;;  %v1071_v46 = vpop.permute.xlu0 %1070 }
  0xc6   : > { %v1076_v47 = vsel %vm1074_vm7, %v1071_v46, %v1073_v44 }
  0xc7   : > { %402 = vperm.xlu1 %10970, %v388_v39  }
  0xc9   : > { %v1069_v49 = vpop.permute.xlu0 %1068  ;;  %v1164_v53 = vpop.permute.xlu1 %1163 }
  0xca   : > { %v1075_v52 = vsel %vm1074_vm7, %v1069_v49, %v1071_v46 }
  0xcb   : > { %10105 = vmatmul.mubr.msk.bf16.vlgmr.msra.gmra.mrb[0].mxu0 %vm457_vm2, %v10999_v22  ;;  %v11017_v22 = vld [vmem:[%s15837_s1 + $0xb0] sm:$0xff]  }
  0xcc   : > { %714 = vmatpush1.bf16.msra.mxu0 %v703_v24  ;;  %662 = vmatprep.mubr.bf16.mxu0 %v15682_v0 }
  0xcd   : > { %806 = vmatprep.subr.bf16.mxu0 %v797_v26  ;;  %v1166_v51 = vpop.permute.xlu0 %1165  ;;  %v1162_v56 = vpop.permute.xlu1 %1161 }
  0xce   : > { %v1169_v54 = vsel %vm1167_vm8, %v1164_v53, %v1166_v51  ;;  %v1168_v59 = vsel %vm1167_vm8, %v1162_v56, %v1164_v53 }
  0xd1   : > { %v1259_v58 = vpop.permute.xlu1 %1258  ;;  %v1257_v60 = vpop.permute.xlu0 %1256 }
  0xd2   : > { %v1262_v61 = vsel %vm15631_vm9, %v1257_v60, %v1259_v58 }
  0xd3   : > { %10106 = vmatmul.mubr.msk.bf16.gmra.mrb[4].mxu0 %vm457_vm2, %v11000_v27  ;;  %v11018_v27 = vld [vmem:[%s15837_s1 + $0xb8] sm:$0xff]  }
  0xd4   : > { %745 = vmatprep.mubr.bf16.mxu0 %v15682_v0 }
  0xd5   : > { %v1255_v63 = vpop.permute.xlu0 %1254  ;;  %v1350_v4 = vpop.permute.xlu1 %1349 }
  0xd6   : > { %v1261_v3 = vsel %vm15631_vm9, %v1255_v63, %v1257_v60  ;;  %vm2477_vm9 = vcmask 261120  }
  0xd9   : > { %v1352_v2 = vpop.permute.xlu0 %1351  ;;  %v1348_v7 = vpop.permute.xlu1 %1347 }
  0xda   : > { %v1355_v5 = vsel %vm1353_vm10, %v1350_v4, %v1352_v2  ;;  %v1354_v10 = vsel %vm1353_vm10, %v1348_v7, %v1350_v4 }
  0xdb   : > { %10113 = vmatmul.mubr.msk.bf16.vlgmr.msra.gmra.mrb[0].mxu0 %vm457_vm2, %v11001_v29  ;;  %v11019_v29 = vld [vmem:[%s15837_s1 + $0xc0] sm:$0xff]  }
  0xdc   : > { %807 = vmatpush1.bf16.msra.mxu0 %v796_v31  ;;  %755 = vmatprep.mubr.bf16.mxu0 %v15682_v0 }
  0xdd   : > { %899 = vmatprep.subr.bf16.mxu0 %v890_v33  ;;  %v1445_v9 = vpop.permute.xlu1 %1444  ;;  %v1443_v11 = vpop.permute.xlu0 %1442 }
  0xde   : > { %v1448_v12 = vsel %vm15626_vm11, %v1443_v11, %v1445_v9 }
  0xe1   : > { %v1441_v14 = vpop.permute.xlu0 %1440  ;;  %v1536_v18 = vpop.permute.xlu1 %1535 }
  0xe2   : > { %v1447_v17 = vsel %vm15626_vm11, %v1441_v14, %v1443_v11  ;;  %vm15628_vm11 = vcmask 900096  }
  0xe3   : > { %10114 = vmatmul.mubr.msk.bf16.gmra.mrb[4].mxu0 %vm457_vm2, %v11002_v34  ;;  %v11020_v34 = vld [vmem:[%s15837_s1 + $0xc8] sm:$0xff]  }
  0xe4   : > { %838 = vmatprep.mubr.bf16.mxu0 %v15682_v0 }
  0xe5   : > { %v1538_v16 = vpop.permute.xlu0 %1537  ;;  %v1534_v21 = vpop.permute.xlu1 %1533 }
  0xe6   : > { %v1541_v19 = vsel %vm1539_vm12, %v1536_v18, %v1538_v16  ;;  %v1540_v24 = vsel %vm1539_vm12, %v1534_v21, %v1536_v18  ;;  %v11034_v21 = vld [vmem:[%s15837_s1 + $0x138] sm:$0xff]  }
  0xe9   : > { %v1631_v23 = vpop.permute.xlu1 %1630  ;;  %v1629_v25 = vpop.permute.xlu0 %1628 }
  0xea   : > { %v1634_v26 = vsel %vm15624_vm13, %v1629_v25, %v1631_v23  ;;  %v11036_v23 = vld [vmem:[%s15837_s1 + $0x148] sm:$0xff]  }
  0xeb   : > { %10121 = vmatmul.mubr.msk.bf16.vlgmr.msra.gmra.mrb[0].mxu0 %vm457_vm2, %v11003_v36  ;;  %v386_v36 = vld [vmem:[%s15838_s2] sm:$0xff] }
  0xec   : > { %900 = vmatpush1.bf16.msra.mxu0 %v889_v38  ;;  %848 = vmatprep.mubr.bf16.mxu0 %v15682_v0  ;;  %v389_v38 = vld [vmem:[%s15838_s2 + $0x18] sm:$0xff]  ;;  %s15850_s2 = smov 121  }
  0xed   : > { %992 = vmatprep.subr.bf16.mxu0 %v983_v40  ;;  %v1627_v28 = vpop.permute.xlu0 %1626  ;;  %v1722_v32 = vpop.permute.xlu1 %1721  ;;  %392 = vperm.xlu0 %10969, %v386_v36   ;;  %v11021_v40 = vld [vmem:[%s15837_s1 + $0xd0] sm:$0xff]  }
  0xee   : > { %v1633_v31 = vsel %vm15624_vm13, %v1627_v28, %v1629_v25  ;;  %vm1911_vm13 = vcmask 916480   ;;  %v15684_v25 = vmov 0.0|0.0  }
  0xef   : > { %2456 = vrot.lane.b32.xlu1 %v15684_v25, %s11163_s30 }
  0xf1   : > { %v1724_v30 = vpop.permute.xlu0 %1723  ;;  %v1720_v35 = vpop.permute.xlu1 %1719  ;;  %407 = vperm.xlu0 %10969, %v389_v38  }
  0xf2   : > { %v1727_v33 = vsel %vm1725_vm14, %v1722_v32, %v1724_v30  ;;  %v1726_v42 = vsel %vm1725_vm14, %v1720_v35, %v1722_v32 }
  0xf3   : > { %10122 = vmatmul.mubr.msk.bf16.gmra.mrb[4].mxu0 %vm457_vm2, %v11004_v41 }
  0xf4   : > { %931 = vmatprep.mubr.bf16.mxu0 %v15682_v0 }
  0xf5   : > { %v1817_v41 = vpop.permute.xlu1 %1816 }
  0xfb   : > { %10129 = vmatmul.mubr.msk.bf16.vlgmr.msra.gmra.mrb[0].mxu0 %vm457_vm2, %v11005_v43  ;;  %v1815_v43 = vpop.permute.xlu0 %1814 }
  0xfc   : > { %993 = vmatpush1.bf16.msra.mxu0 %v982_v45  ;;  %941 = vmatprep.mubr.bf16.mxu0 %v15682_v0  ;;  %v1820_v44 = vsel %vm15625_vm15, %v1815_v43, %v1817_v41  ;;  %v11022_v45 = vld [vmem:[%s15837_s1 + $0xd8] sm:$0xff]  }
  0xfd   : > { %1085 = vmatprep.subr.bf16.mxu0 %v1076_v47  ;;  %v11023_v47 = vld [vmem:[%s15837_s1 + $0xe0] sm:$0xff]  }
  0xff   : > { %v1813_v46 = vpop.permute.xlu0 %1812 }
 0x100   : > { %v1819_v49 = vsel %vm15625_vm15, %v1813_v46, %v1815_v43  ;;  %vm15627_vm15 = vcmask 908288  }
 0x103   : > { %10130 = vmatmul.mubr.msk.bf16.gmra.mrb[4].mxu0 %vm457_vm2, %v11006_v48  ;;  %v1910_v48 = vpop.permute.xlu0 %1909 }
 0x104   : > { %1024 = vmatprep.mubr.bf16.mxu0 %v15682_v0 }
 0x10b   : > { %10137 = vmatmul.mubr.msk.bf16.vlgmr.msra.gmra.mrb[0].mxu0 %vm457_vm2, %v11007_v50  ;;  %v1908_v50 = vpop.permute.xlu1 %1907 }
 0x10c   : > { %1086 = vmatpush1.bf16.msra.mxu0 %v1075_v52  ;;  %1034 = vmatprep.mubr.bf16.mxu0 %v15682_v0  ;;  %v1913_v51 = vsel %vm1911_vm13, %v1908_v50, %v1910_v48  ;;  %v11024_v52 = vld [vmem:[%s15837_s1 + $0xe8] sm:$0xff]  }
 0x10d   : > { %1178 = vmatprep.subr.bf16.mxu0 %v1169_v54  ;;  %v11025_v54 = vld [vmem:[%s15837_s1 + $0xf0] sm:$0xff]  }
 0x10f   : > { %v1906_v53 = vpop.permute.xlu1 %1905 }
 0x110   : > { %v1912_v56 = vsel %vm1911_vm13, %v1906_v53, %v1908_v50 }
 0x113   : > { %10138 = vmatmul.mubr.msk.bf16.gmra.mrb[4].mxu0 %vm457_vm2, %v11008_v55  ;;  %v2003_v55 = vpop.permute.xlu1 %2002 }
 0x114   : > { %1117 = vmatprep.mubr.bf16.mxu0 %v15682_v0 }
 0x11b   : > { %10145 = vmatmul.mubr.msk.bf16.vlgmr.msra.gmra.mrb[0].mxu0 %vm457_vm2, %v11009_v57  ;;  %v2001_v57 = vpop.permute.xlu0 %2000 }
 0x11c   : > { %1179 = vmatpush1.bf16.msra.mxu0 %v1168_v59  ;;  %1127 = vmatprep.mubr.bf16.mxu0 %v15682_v0  ;;  %v2006_v58 = vsel %vm15627_vm15, %v2001_v57, %v2003_v55  ;;  %v11026_v59 = vld [vmem:[%s15837_s1 + $0xf8] sm:$0xff]  }
 0x11d   : > { %1271 = vmatprep.subr.bf16.mxu0 %v1262_v61  ;;  %v11027_v61 = vld [vmem:[%s15837_s1 + $0x100] sm:$0xff]  }
 0x11f   : > { %v1999_v60 = vpop.permute.xlu0 %1998 }
 0x120   : > { %v2005_v63 = vsel %vm15627_vm15, %v1999_v60, %v2001_v57  ;;  %vm15629_vm15 = vcmask 891904  }
 0x123   : > { %10146 = vmatmul.mubr.msk.bf16.gmra.mrb[4].mxu0 %vm457_vm2, %v11010_v62  ;;  %v2096_v62 = vpop.permute.xlu0 %2095 }
 0x124   : > { %1210 = vmatprep.mubr.bf16.mxu0 %v15682_v0 }
 0x12b   : > { %10153 = vmatmul.mubr.msk.bf16.vlgmr.msra.gmra.mrb[0].mxu0 %vm457_vm2, %v11011_v1  ;;  %v2094_v1 = vpop.permute.xlu1 %2093 }
 0x12c   : > { %1272 = vmatpush1.bf16.msra.mxu0 %v1261_v3  ;;  %1220 = vmatprep.mubr.bf16.mxu0 %v15682_v0  ;;  %v2099_v2 = vsel %vm15628_vm11, %v2094_v1, %v2096_v62  ;;  %v11028_v3 = vld [vmem:[%s15837_s1 + $0x108] sm:$0xff]   ;;  %v2398_v62 = vld [vmem:[%s15840_s4] sm:$0xff] }
 0x12d   : > { %1364 = vmatprep.subr.bf16.mxu0 %v1355_v5  ;;  %v11029_v5 = vld [vmem:[%s15837_s1 + $0x110] sm:$0xff]  }
 0x12f   : > { %v2092_v4 = vpop.permute.xlu1 %2091 }
 0x130   : > { %v2098_v7 = vsel %vm15628_vm11, %v2092_v4, %v2094_v1  ;;  %vm15630_vm11 = vcmask 883712   ;;  %v2400_v1 = vld [vmem:[%s15840_s4 + $0x10] sm:$0xff] }
 0x133   : > { %10154 = vmatmul.mubr.msk.bf16.gmra.mrb[4].mxu0 %vm457_vm2, %v11012_v6  ;;  %v2189_v6 = vpop.permute.xlu1 %2188 }
 0x134   : > { %1303 = vmatprep.mubr.bf16.mxu0 %v15682_v0 }
 0x13b   : > { %10161 = vmatmul.mubr.msk.bf16.vlgmr.msra.gmra.mrb[0].mxu0 %vm457_vm2, %v11013_v8  ;;  %v2187_v8 = vpop.permute.xlu0 %2186 }
 0x13c   : > { %1365 = vmatpush1.bf16.msra.mxu0 %v1354_v10  ;;  %1313 = vmatprep.mubr.bf16.mxu0 %v15682_v0  ;;  %v2192_v9 = vsel %vm15629_vm15, %v2187_v8, %v2189_v6  ;;  %v11030_v10 = vld [vmem:[%s15837_s1 + $0x118] sm:$0xff]  }
 0x13d   : > { %1457 = vmatprep.subr.bf16.mxu0 %v1448_v12  ;;  %v11031_v12 = vld [vmem:[%s15837_s1 + $0x120] sm:$0xff]  }
 0x13f   : > { %v2185_v11 = vpop.permute.xlu0 %2184 }
 0x140   : > { %v2191_v14 = vsel %vm15629_vm15, %v2185_v11, %v2187_v8  ;;  %vm2379_vm15 = vcmask 1048416  }
 0x143   : > { %10162 = vmatmul.mubr.msk.bf16.gmra.mrb[4].mxu0 %vm457_vm2, %v11014_v13  ;;  %v2282_v13 = vpop.permute.xlu0 %2281 }
 0x144   : > { %1396 = vmatprep.mubr.bf16.mxu0 %v15682_v0 }
 0x14b   : > { %10169 = vmatmul.mubr.msk.bf16.vlgmr.msra.gmra.mrb[0].mxu0 %vm457_vm2, %v11015_v15  ;;  %v2280_v15 = vpop.permute.xlu1 %2279 }
 0x14c   : > { %1458 = vmatpush1.bf16.msra.mxu0 %v1447_v17  ;;  %1406 = vmatprep.mubr.bf16.mxu0 %v15682_v0  ;;  %v2285_v16 = vsel %vm15630_vm11, %v2280_v15, %v2282_v13  ;;  %v11032_v17 = vld [vmem:[%s15837_s1 + $0x128] sm:$0xff]   ;;  %v11037_v13 = vld [vmem:[%s15841_s3] sm:$0xff]  }
 0x14d   : > { %1550 = vmatprep.subr.bf16.mxu0 %v1541_v19  ;;  %v11033_v19 = vld [vmem:[%s15837_s1 + $0x130] sm:$0xff]  }
 0x14f   : > { %v2278_v18 = vpop.permute.xlu1 %2277 }
 0x153   : > { %10170 = vmatmul.mubr.msk.bf16.gmra.mrb[4].mxu0 %vm457_vm2, %v11016_v20  ;;  %v2284_v20 = vsel %vm15630_vm11, %v2278_v18, %v2280_v15  ;;  %vm2468_vm11 = vcmask 15360  }
 0x154   : > { %1489 = vmatprep.mubr.bf16.mxu0 %v15682_v0 }
 0x15b   : > { %10177 = vmatmul.mubr.msk.bf16.vlgmr.msra.gmra.mrb[0].mxu0 %vm457_vm2, %v11017_v22  ;;  %v11035_v22 = vld [vmem:[%s15837_s1 + $0x140] sm:$0xff]   ;;  %s15851_s1 = smov 119  }
 0x15c   : > { %1551 = vmatpush1.bf16.msra.mxu0 %v1540_v24  ;;  %1499 = vmatprep.mubr.bf16.mxu0 %v15682_v0  ;;  %v11161_v24 = vmov 0.0  }
 0x15d   : > { %1643 = vmatprep.subr.bf16.mxu0 %v1634_v26  ;;  %370 = vst [vmem:[#allocation2] sm:$0xff] %v11161_v24 }
 0x163   : > { %10178 = vmatmul.mubr.msk.bf16.gmra.mrb[4].mxu0 %vm457_vm2, %v11018_v27 }
 0x164   : > { %1582 = vmatprep.mubr.bf16.mxu0 %v15682_v0 }
 0x16b   : > { %10185 = vmatmul.mubr.msk.bf16.vlgmr.msra.gmra.mrb[0].mxu0 %vm457_vm2, %v11019_v29 }
 0x16c   : > { %1644 = vmatpush1.bf16.msra.mxu0 %v1633_v31  ;;  %1592 = vmatprep.mubr.bf16.mxu0 %v15682_v0  ;;  %v393_v26 = vpop.permute.xlu0 %392  ;;  %v398_v31 = vpop.permute.xlu1 %397 }
 0x16d   : > { %1736 = vmatprep.subr.bf16.mxu0 %v1727_v33 }
 0x170   : > { %v408_v46 = vpop.permute.xlu0 %407 }
 0x173   : > { %10186 = vmatmul.mubr.msk.bf16.gmra.mrb[4].mxu0 %vm457_vm2, %v11020_v34 }
 0x174   : > { %1675 = vmatprep.mubr.bf16.mxu0 %v15682_v0 }
 0x17b   : > { %10193 = vmatmul.mubr.msk.bf16.vlgmr.msra.gmra.mrb[0].mxu0 %vm457_vm2, %v11021_v40 }
 0x17c   : > { %1737 = vmatpush1.bf16.msra.mxu0 %v1726_v42  ;;  %1685 = vmatprep.mubr.bf16.mxu0 %v15682_v0  ;;  %v403_v42 = vpop.permute.xlu1 %402 }
 0x17d   : > { %1829 = vmatprep.subr.bf16.mxu0 %v1820_v44 }
 0x183   : > { %10194 = vmatmul.mubr.msk.bf16.gmra.mrb[4].mxu0 %vm457_vm2, %v11022_v45 }
 0x184   : > { %1768 = vmatprep.mubr.bf16.mxu0 %v15682_v0 }
 0x18b   : > { %10201 = vmatmul.mubr.msk.bf16.vlgmr.msra.gmra.mrb[0].mxu0 %vm457_vm2, %v11023_v47 }
 0x18c   : > { %1830 = vmatpush1.bf16.msra.mxu0 %v1819_v49  ;;  %1778 = vmatprep.mubr.bf16.mxu0 %v15682_v0 }
 0x18d   : > { %1922 = vmatprep.subr.bf16.mxu0 %v1913_v51 }
 0x193   : > { %10202 = vmatmul.mubr.msk.bf16.gmra.mrb[4].mxu0 %vm457_vm2, %v11024_v52 }
 0x194   : > { %1861 = vmatprep.mubr.bf16.mxu0 %v15682_v0 }
 0x19b   : > { %10209 = vmatmul.mubr.msk.bf16.vlgmr.msra.gmra.mrb[0].mxu0 %vm457_vm2, %v11025_v54 }
 0x19c   : > { %1923 = vmatpush1.bf16.msra.mxu0 %v1912_v56  ;;  %1871 = vmatprep.mubr.bf16.mxu0 %v15682_v0 }
 0x19d   : > { %2015 = vmatprep.subr.bf16.mxu0 %v2006_v58 }
 0x1a3   : > { %10210 = vmatmul.mubr.msk.bf16.gmra.mrb[4].mxu0 %vm457_vm2, %v11026_v59 }
 0x1a4   : > { %1954 = vmatprep.mubr.bf16.mxu0 %v15682_v0 }
 0x1ab   : > { %10217 = vmatmul.mubr.msk.bf16.vlgmr.msra.gmra.mrb[0].mxu0 %vm457_vm2, %v11027_v61 }
 0x1ac   : > { %2016 = vmatpush1.bf16.msra.mxu0 %v2005_v63  ;;  %1964 = vmatprep.mubr.bf16.mxu0 %v15682_v0  ;;  %v2399_v63 = vld [vmem:[%s15840_s4 + $0x8] sm:$0xff] }
 0x1ad   : > { %2108 = vmatprep.subr.bf16.mxu0 %v2099_v2  ;;  %v2401_v2 = vld [vmem:[%s15840_s4 + $0x18] sm:$0xff] }
 0x1b3   : > { %10218 = vmatmul.mubr.msk.bf16.gmra.mrb[4].mxu0 %vm457_vm2, %v11028_v3  ;;  %v2457_v3 = vpop.permute.xlu1 %2456 }
 0x1b4   : > { %2047 = vmatprep.mubr.bf16.mxu0 %v15682_v0 }
 0x1bb   : > { %10225 = vmatmul.mubr.msk.bf16.vlgmr.msra.gmra.mrb[0].mxu0 %vm457_vm2, %v11029_v5 }
 0x1bc   : > { %2109 = vmatpush1.bf16.msra.mxu0 %v2098_v7  ;;  %2057 = vmatprep.mubr.bf16.mxu0 %v15682_v0 }
 0x1bd   : > { %2201 = vmatprep.subr.bf16.mxu0 %v2192_v9 }
 0x1c3   : > { %10226 = vmatmul.mubr.msk.bf16.gmra.mrb[4].mxu0 %vm457_vm2, %v11030_v10 }
 0x1c4   : > { %2140 = vmatprep.mubr.bf16.mxu0 %v15682_v0 }
 0x1cb   : > { %10233 = vmatmul.mubr.msk.bf16.vlgmr.msra.gmra.mrb[0].mxu0 %vm457_vm2, %v11031_v12 }
 0x1cc   : > { %2202 = vmatpush1.bf16.msra.mxu0 %v2191_v14  ;;  %2150 = vmatprep.mubr.bf16.mxu0 %v15682_v0 }
 0x1cd   : > { %2294 = vmatprep.subr.bf16.mxu0 %v2285_v16 }
 0x1d3   : > { %10234 = vmatmul.mubr.msk.bf16.gmra.mrb[4].mxu0 %vm457_vm2, %v11032_v17  ;;  %v11038_v17 = vld [vmem:[%s15841_s3 + $0x8] sm:$0xff]  }
 0x1d4   : > { %2233 = vmatprep.mubr.bf16.mxu0 %v15682_v0 }
 0x1db   : > { %10241 = vmatmul.mubr.msk.bf16.vlgmr.msra.gmra.mrb[0].mxu0 %vm457_vm2, %v11033_v19 }
 0x1dc   : > { %2295 = vmatpush1.bf16.msra.mxu0 %v2284_v20  ;;  %2243 = vmatprep.mubr.bf16.mxu0 %v15682_v0  ;;  %v11039_v20 = vld [vmem:[%s15841_s3 + $0x10] sm:$0xff]  }
 0x1e3   : > { %10242 = vmatmul.mubr.msk.bf16.gmra.mrb[4].mxu0 %vm457_vm2, %v11034_v21 }
 0x1e4   : > { %2326 = vmatprep.mubr.bf16.mxu0 %v15682_v0 }
 0x1eb   : > { %10249 = vmatmul.mubr.msk.bf16.vlgmr.msra.gmra.mrb[0].mxu0 %vm457_vm2, %v11035_v22 }
 0x1ec   : > { %2336 = vmatprep.mubr.bf16.mxu0 %v15682_v0 }
 0x1f3   : > { %10250 = vmatmul.mubr.msk.bf16.gmra.mrb[4].mxu0 %vm457_vm2, %v11036_v23 }
 0x1f4   : > { %5146 = vmatprep.mubr.bf16.mxu0 %v15682_v0 }
 0x2be   : > { %v2328_v27 = vpop.f32.mrb[0].mxu0 }
 0x2bf   : > { %v11732_v28 = vadd.f32 %v2328_v27, %v393_v26  ;;  %v2330_v29 = vpop.f32.mrb[1].mxu0 }
 0x2c0   : > { %v2356_v30 = vadd.f32 %v2330_v29, %v393_v26  ;;  %v2332_v32 = vpop.f32.mrb[2].mxu0  ;;  %v11040_v29 = vld [vmem:[%s15841_s3 + $0x18] sm:$0xff]  }
 0x2c1   : > { %v11734_v33 = vadd.f32 %v2332_v32, %v398_v31  ;;  %v2334_v34 = vpop.f32.mrb[3].mxu0  ;;  %v2363_v37 = vmax.f32 %v11732_v28, 0.0 }
 0x2c2   : > { %v2364_v35 = vmax.f32 %v2356_v30, 0.0  ;;  %v2358_v36 = vadd.f32 %v2334_v34, %v398_v31  ;;  %v11041_v30 = vld [vmem:[%s15841_s3 + $0x20] sm:$0xff]   ;;  %v11042_v31 = vld [vmem:[%s15841_s3 + $0x28] sm:$0xff]  }
 0x2c3   : > { %v2365_v38 = vmax.f32 %v11734_v33, 0.0 }
 0x2c4   : > { %2372 = vst [vmem:[#allocation2 + $0x10] sm:$0xff] %v2364_v35  ;;  %v2366_v39 = vmax.f32 %v2358_v36, 0.0 }
 0x2c5   : > { %2380 = vst.msk [vmem:[#allocation2 + $0x10] sm:$0xff] %vm2379_vm15, %v11161_v24  ;;  %v11744_v40 = vpack.c.bf16 %v2365_v38, %v2363_v37 }
 0x2c6   : > { %2374 = vst [vmem:[#allocation2 + $0x30] sm:$0xff] %v2366_v39  ;;  %v2338_v41 = vpop.f32.mrb[4].mxu0 }
 0x2c7   : > { %2381 = vst.msk [vmem:[#allocation2 + $0x30] sm:$0xff] %vm2379_vm15, %v11161_v24  ;;  %v2340_v43 = vpop.f32.mrb[5].mxu0  ;;  %2458 = vrot.lane.b32.xlu1 %v11744_v40, %s11163_s30  ;;  %v11754_v53 = vadd.f32 %v2338_v41, %v403_v42 }
 0x2c8   : > { %v2360_v44 = vadd.f32 %v2340_v43, %v403_v42  ;;  %v2342_v45 = vpop.f32.mrb[6].mxu0 }
 0x2c9   : > { %v2344_v47 = vpop.f32.mrb[7].mxu0  ;;  %v11750_v50 = vadd.f32 %v2342_v45, %v408_v46  ;;  %v2367_v57 = vmax.f32 %v11754_v53, 0.0  ;;  %v10283_v53 = vld [vmem:[%s15840_s4 + $0x20] sm:$0xff] }
 0x2ca   : > { %v2368_v48 = vmax.f32 %v2360_v44, 0.0  ;;  %v2362_v49 = vadd.f32 %v2344_v47, %v408_v46 }
 0x2cb   : > { %v2369_v55 = vmax.f32 %v11750_v50, 0.0 }
 0x2cc   : > { %2376 = vst [vmem:[#allocation2 + $0x50] sm:$0xff] %v2368_v48  ;;  %v2370_v51 = vmax.f32 %v2362_v49, 0.0  ;;  %v11752_v52 = vld [vmem:[#allocation2 + $0x10] sm:$0xff] }
 0x2cd   : > { %2382 = vst.msk [vmem:[#allocation2 + $0x50] sm:$0xff] %vm2379_vm15, %v11161_v24  ;;  %v2432_v58 = vpack.c.bf16 %v2369_v55, %v2367_v57 }
 0x2ce   : > { %2378 = vst [vmem:[#allocation2 + $0x70] sm:$0xff] %v2370_v51  ;;  %v11758_v54 = vld [vmem:[#allocation2 + $0x30] sm:$0xff] }
 0x2cf   : > { %2383 = vst.msk [vmem:[#allocation2 + $0x70] sm:$0xff] %vm2379_vm15, %v11161_v24  ;;  %v2431_v56 = vpack.c.bf16 %v11758_v54, %v11752_v52 }
 0x2d1   : > { %2460 = vrot.lane.b32.xlu0 %v2431_v56, %s11163_s30 }
 0x2d4   : > { %v11771_v59 = vld [vmem:[#allocation2 + $0x50] sm:$0xff] }
 0x2d5   : > { %2464 = vrot.lane.b32.xlu0 %v2432_v58, %s11163_s30 }
 0x2d6   : > { %v11774_v60 = vld [vmem:[#allocation2 + $0x70] sm:$0xff] }
 0x2d7   : > { %v2433_v61 = vpack.c.bf16 %v11774_v60, %v11771_v59 }
 0x2d9   : > { %2466 = vrot.lane.b32.xlu1 %v2433_v61, %s11163_s30  ;;  %2462 = vrot.lane.b32.xlu0 %v15684_v25, %s11163_s30  ;;  %s11165_s30 = smov 8  }
 0x2dd   : > { %2642 = vrot.lane.b32.xlu1 %v2431_v56, %s15839_s27  ;;  %2644 = vrot.lane.b32.xlu0 %v15684_v25, %s15839_s27 }
 0x2e1   : > { %2640 = vrot.lane.b32.xlu1 %v11744_v40, %s15839_s27  ;;  %2648 = vrot.lane.b32.xlu0 %v2433_v61, %s15839_s27 }
 0x2e5   : > { %2650 = vrot.lane.b32.xlu1 %v15684_v25, %s15839_s27  ;;  %2646 = vrot.lane.b32.xlu0 %v2432_v58, %s15839_s27 }
 0x2e9   : > { %2404 = vperm.xlu1 %10970, %v2398_v62   ;;  %2409 = vperm.xlu0 %10969, %v2399_v63  }
 0x2ed   : > { %2414 = vperm.xlu1 %10970, %v2400_v1   ;;  %2419 = vperm.xlu0 %10969, %v2401_v2  }
 0x2f1   : > { %2837 = vrot.lane.b32.xlu1 %v15684_v25, %s11164_s29 }
 0x339   : > { %v2459_v4 = vpop.permute.xlu1 %2458 }
 0x33a   : > { %v2469_v7 = vsel %vm2468_vm11, %v2457_v3, %v2459_v4 }
 0x343   : > { %v2461_v5 = vpop.permute.xlu0 %2460 }
 0x344   : > { %v2470_v6 = vsel %vm2468_vm11, %v2459_v4, %v2461_v5 }
 0x345   : > { %2484 = vmatprep.subr.bf16.mxu1 %v2470_v6 }
 0x346   : > { %2485 = vmatpush1.bf16.msra.mxu1 %v2469_v7 }
 0x347   : > { %v2465_v8 = vpop.permute.xlu0 %2464 }
 0x34b   : > { %v2467_v9 = vpop.permute.xlu1 %2466  ;;  %v2463_v10 = vpop.permute.xlu0 %2462 }
 0x34c   : > { %v2472_v11 = vsel %vm2468_vm11, %v2465_v8, %v2467_v9  ;;  %v2471_v12 = vsel %vm2468_vm11, %v2463_v10, %v2465_v8  ;;  %vm2849_vm11 = vcmask 31744  }
 0x34d   : > { %2486 = vmatprep.subr.bf16.mxu1 %v2472_v11 }
 0x34e   : > { %2487 = vmatpush1.bf16.msra.mxu1 %v2471_v12 }
 0x34f   : > { %2553 = vmatprep.subr.bf16.mxu1 %v2431_v56  ;;  %v2643_v14 = vpop.permute.xlu1 %2642  ;;  %v2645_v15 = vpop.permute.xlu0 %2644 }
 0x350   : > { %v2653_v16 = vsel %vm609_vm1, %v2643_v14, %v2645_v15  ;;  %v10286_v15 = vld [vmem:[%s15840_s4 + $0x38] sm:$0xff] }
 0x351   : > { %10261 = vmatmul.mubr.msk.bf16.vlgmr.msra.gmra.mrb[0].mxu1 %vm2477_vm9, %v11037_v13 }
 0x352   : > { %2554 = vmatpush1.bf16.msra.mxu1 %v11744_v40  ;;  %2526 = vmatprep.mubr.bf16.mxu1 %v15682_v0 }
 0x353   : > { %2555 = vmatprep.subr.bf16.mxu1 %v2433_v61  ;;  %v2641_v18 = vpop.permute.xlu1 %2640  ;;  %v2649_v19 = vpop.permute.xlu0 %2648 }
 0x354   : > { %v2652_v23 = vsel %vm609_vm1, %v2641_v18, %v2643_v14  ;;  %v10285_v14 = vld [vmem:[%s15840_s4 + $0x30] sm:$0xff] }
 0x356   : > { %2556 = vmatpush1.bf16.msra.mxu1 %v2432_v58 }
 0x357   : > { %2666 = vmatprep.subr.bf16.mxu1 %v2653_v16  ;;  %v2651_v21 = vpop.permute.xlu1 %2650  ;;  %v2647_v26 = vpop.permute.xlu0 %2646 }
 0x358   : > { %v2655_v22 = vsel %vm609_vm1, %v2649_v19, %v2651_v21  ;;  %v2654_v27 = vsel %vm609_vm1, %v2647_v26, %v2649_v19 }
 0x359   : > { %10262 = vmatmul.mubr.msk.bf16.gmra.mrb[4].mxu1 %vm2477_vm9, %v11038_v17 }
 0x35a   : > { %2585 = vmatprep.mubr.bf16.mxu1 %v15682_v0 }
 0x361   : > { %10265 = vmatmul.mubr.msk.bf16.vlgmr.msra.gmra.mrb[0].mxu1 %vm2477_vm9, %v11039_v20 }
 0x362   : > { %2667 = vmatpush1.bf16.msra.mxu1 %v2652_v23  ;;  %2595 = vmatprep.mubr.bf16.mxu1 %v15682_v0 }
 0x363   : > { %2668 = vmatprep.subr.bf16.mxu1 %v2655_v22 }
 0x366   : > { %2669 = vmatpush1.bf16.msra.mxu1 %v2654_v27 }
 0x368   : > { %v2405_v32 = vpop.permute.xlu1 %2404  ;;  %v2410_v39 = vpop.permute.xlu0 %2409 }
 0x369   : > { %10266 = vmatmul.mubr.msk.bf16.gmra.mrb[4].mxu1 %vm2477_vm9, %v11040_v29  ;;  %v11043_v29 = vld [vmem:[%s15841_s3 + $0x30] sm:$0xff]  }
 0x36a   : > { %2698 = vmatprep.mubr.bf16.mxu1 %v15682_v0 }
 0x36c   : > { %v2415_v62 = vpop.permute.xlu1 %2414  ;;  %v2420_v28 = vpop.permute.xlu0 %2419 }
 0x370   : > { %v2838_v16 = vpop.permute.xlu1 %2837 }
 0x371   : > { %10269 = vmatmul.mubr.msk.bf16.vlgmr.msra.gmra.mrb[0].mxu1 %vm2477_vm9, %v11041_v30 }
 0x372   : > { %2708 = vmatprep.mubr.bf16.mxu1 %v15682_v0 }
 0x379   : > { %10270 = vmatmul.mubr.msk.bf16.gmra.mrb[4].mxu1 %vm2477_vm9, %v11042_v31 }
 0x37a   : > { %2896 = vmatprep.mubr.bf16.mxu1 %v15682_v0 }
 0x444   : > { %v2700_v34 = vpop.f32.mrb[0].mxu1 }
 0x445   : > { %v2727_v35 = vadd.f32 %v2700_v34, %v2405_v32  ;;  %v2702_v36 = vpop.f32.mrb[1].mxu1  ;;  %v11044_v34 = vld [vmem:[%s15841_s3 + $0x38] sm:$0xff]  }
 0x446   : > { %v2728_v40 = vadd.f32 %v2702_v36, %v2405_v32  ;;  %v2704_v41 = vpop.f32.mrb[2].mxu1 }
 0x447   : > { %v2735_v42 = vmax.f32 %v2727_v35, 0.0  ;;  %v2729_v43 = vadd.f32 %v2704_v41, %v2410_v39  ;;  %v2706_v44 = vpop.f32.mrb[3].mxu1 }
 0x448   : > { %v2736_v45 = vmax.f32 %v2728_v40, 0.0  ;;  %v2730_v46 = vadd.f32 %v2706_v44, %v2410_v39  ;;  %v11045_v39 = vld [vmem:[%s15841_s3 + $0x40] sm:$0xff]  }
 0x449   : > { %v2737_v47 = vmax.f32 %v2729_v43, 0.0  ;;  %v11842_v51 = vadd.f32 %v2735_v42, %v2363_v37 }
 0x44a   : > { %v2744_v48 = vadd.f32 %v2736_v45, %v11752_v52  ;;  %v2738_v49 = vmax.f32 %v2730_v46, 0.0  ;;  %v11046_v45 = vld [vmem:[%s15841_s3 + $0x48] sm:$0xff]   ;;  %v11047_v46 = vld [vmem:[%s15841_s3 + $0x50] sm:$0xff]  }
 0x44b   : > { %v11846_v56 = vadd.f32 %v2737_v47, %v2365_v38  ;;  %v11048_v47 = vld [vmem:[%s15841_s3 + $0x58] sm:$0xff]  }
 0x44c   : > { %2752 = vst [vmem:[#allocation3 + $0x10] sm:$0xff] %v2744_v48  ;;  %v2746_v58 = vadd.f32 %v2738_v49, %v11758_v54  ;;  %v2710_v61 = vpop.f32.mrb[4].mxu1 }
 0x44d   : > { %2759 = vst.msk [vmem:[#allocation3 + $0x10] sm:$0xff] %vm2379_vm15, %v11161_v24  ;;  %v2712_v63 = vpop.f32.mrb[5].mxu1  ;;  %v11853_v52 = vpack.c.bf16 %v11846_v56, %v11842_v51  ;;  %v2731_v3 = vadd.f32 %v2710_v61, %v2415_v62 }
 0x44e   : > { %2754 = vst [vmem:[#allocation3 + $0x30] sm:$0xff] %v2746_v58  ;;  %v2732_v37 = vadd.f32 %v2712_v63, %v2415_v62  ;;  %v2714_v1 = vpop.f32.mrb[6].mxu1 }
 0x44f   : > { %2760 = vst.msk [vmem:[#allocation3 + $0x30] sm:$0xff] %vm2379_vm15, %v11161_v24  ;;  %v2733_v33 = vadd.f32 %v2714_v1, %v2420_v28  ;;  %v2716_v38 = vpop.f32.mrb[7].mxu1  ;;  %2839 = vrot.lane.b32.xlu1 %v11853_v52, %s11164_s29  ;;  %v2739_v9 = vmax.f32 %v2731_v3, 0.0 }
 0x450   : > { %v2740_v54 = vmax.f32 %v2732_v37, 0.0  ;;  %v2734_v2 = vadd.f32 %v2716_v38, %v2420_v28 }
 0x451   : > { %v2741_v6 = vmax.f32 %v2733_v33, 0.0 }
 0x452   : > { %v2748_v4 = vadd.f32 %v2740_v54, %v11771_v59  ;;  %v2742_v5 = vmax.f32 %v2734_v2, 0.0 }
 0x453   : > { %v11869_v11 = vadd.f32 %v2741_v6, %v2369_v55 }
 0x454   : > { %2756 = vst [vmem:[#allocation3 + $0x50] sm:$0xff] %v2748_v4  ;;  %v2750_v7 = vadd.f32 %v2742_v5, %v11774_v60  ;;  %v11861_v8 = vld [vmem:[#allocation3 + $0x10] sm:$0xff]  ;;  %v11877_v60 = vadd.f32 %v2739_v9, %v2367_v57  ;;  %v10284_v57 = vld [vmem:[%s15840_s4 + $0x28] sm:$0xff] }
 0x455   : > { %2761 = vst.msk [vmem:[#allocation3 + $0x50] sm:$0xff] %vm2379_vm15, %v11161_v24 }
 0x456   : > { %2758 = vst [vmem:[#allocation3 + $0x70] sm:$0xff] %v2750_v7  ;;  %v11865_v10 = vld [vmem:[#allocation3 + $0x30] sm:$0xff]  ;;  %v2813_v12 = vpack.c.bf16 %v11869_v11, %v11877_v60 }
 0x457   : > { %2762 = vst.msk [vmem:[#allocation3 + $0x70] sm:$0xff] %vm2379_vm15, %v11161_v24  ;;  %v2812_v59 = vpack.c.bf16 %v11865_v10, %v11861_v8 }
 0x459   : > { %2841 = vrot.lane.b32.xlu0 %v2812_v59, %s11164_s29 }
 0x45c   : > { %v11882_v13 = vld [vmem:[#allocation3 + $0x50] sm:$0xff] }
 0x45d   : > { %2845 = vrot.lane.b32.xlu0 %v2813_v12, %s11164_s29 }
 0x45e   : > { %v11885_v50 = vld [vmem:[#allocation3 + $0x70] sm:$0xff] }
 0x45f   : > { %v2814_v55 = vpack.c.bf16 %v11885_v50, %v11882_v13 }
 0x461   : > { %2847 = vrot.lane.b32.xlu1 %v2814_v55, %s11164_s29  ;;  %2843 = vrot.lane.b32.xlu0 %v15684_v25, %s11164_s29  ;;  %s11167_s29 = smov 32  }
 0x465   : > { %3022 = vrot.lane.b32.xlu1 %v2812_v59, %s15842_s12  ;;  %3024 = vrot.lane.b32.xlu0 %v15684_v25, %s15842_s12 }
 0x469   : > { %3020 = vrot.lane.b32.xlu1 %v11853_v52, %s15842_s12  ;;  %3028 = vrot.lane.b32.xlu0 %v2814_v55, %s15842_s12 }
 0x46d   : > { %3030 = vrot.lane.b32.xlu1 %v15684_v25, %s15842_s12  ;;  %3026 = vrot.lane.b32.xlu0 %v2813_v12, %s15842_s12 }
 0x471   : > { %2785 = vperm.xlu1 %10970, %v10283_v53   ;;  %2790 = vperm.xlu0 %10969, %v10284_v57  }
 0x475   : > { %2795 = vperm.xlu1 %10970, %v10285_v14   ;;  %2800 = vperm.xlu0 %10969, %v10286_v15  }
 0x479   : > { %3217 = vrot.lane.b32.xlu1 %v15684_v25, %s11165_s30 }
 0x4c1   : > { %v2840_v17 = vpop.permute.xlu1 %2839 }
 0x4c2   : > { %v2850_v20 = vsel %vm2849_vm11, %v2838_v16, %v2840_v17 }
 0x4cb   : > { %v2842_v18 = vpop.permute.xlu0 %2841 }
 0x4cc   : > { %v2851_v19 = vsel %vm2849_vm11, %v2840_v17, %v2842_v18 }
 0x4cd   : > { %2864 = vmatprep.subr.bf16.mxu1 %v2851_v19 }
 0x4ce   : > { %2865 = vmatpush1.bf16.msra.mxu1 %v2850_v20 }
 0x4cf   : > { %v2846_v21 = vpop.permute.xlu0 %2845 }
 0x4d3   : > { %v2848_v22 = vpop.permute.xlu1 %2847  ;;  %v2844_v23 = vpop.permute.xlu0 %2843 }
 0x4d4   : > { %v2852_v26 = vsel %vm2849_vm11, %v2844_v23, %v2846_v21  ;;  %v2853_v27 = vsel %vm2849_vm11, %v2846_v21, %v2848_v22  ;;  %vm3229_vm11 = vcmask 64512  }
 0x4d5   : > { %2866 = vmatprep.subr.bf16.mxu1 %v2853_v27 }
 0x4d6   : > { %2867 = vmatpush1.bf16.msra.mxu1 %v2852_v26 }
 0x4d7   : > { %2933 = vmatprep.subr.bf16.mxu1 %v2812_v59  ;;  %v3023_v30 = vpop.permute.xlu1 %3022  ;;  %v3025_v31 = vpop.permute.xlu0 %3024 }
 0x4d8   : > { %v3033_v32 = vsel %vm795_vm4, %v3023_v30, %v3025_v31  ;;  %v10314_v31 = vld [vmem:[%s15840_s4 + $0x58] sm:$0xff] }
 0x4d9   : > { %10289 = vmatmul.mubr.msk.bf16.vlgmr.msra.gmra.mrb[8].mxu1 %vm2477_vm9, %v11043_v29  ;;  %v10312_v29 = vld [vmem:[%s15840_s4 + $0x48] sm:$0xff] }
 0x4da   : > { %2934 = vmatpush1.bf16.msra.mxu1 %v11853_v52  ;;  %2906 = vmatprep.mubr.bf16.mxu1 %v15682_v0 }
 0x4db   : > { %2935 = vmatprep.subr.bf16.mxu1 %v2814_v55  ;;  %v3021_v35 = vpop.permute.xlu1 %3020  ;;  %v3029_v36 = vpop.permute.xlu0 %3028 }
 0x4dc   : > { %v3032_v42 = vsel %vm795_vm4, %v3021_v35, %v3023_v30  ;;  %v10313_v30 = vld [vmem:[%s15840_s4 + $0x50] sm:$0xff] }
 0x4de   : > { %2936 = vmatpush1.bf16.msra.mxu1 %v2813_v12 }
 0x4df   : > { %3046 = vmatprep.subr.bf16.mxu1 %v3033_v32  ;;  %v3031_v40 = vpop.permute.xlu1 %3030  ;;  %v3027_v43 = vpop.permute.xlu0 %3026 }
 0x4e0   : > { %v3035_v41 = vsel %vm795_vm4, %v3029_v36, %v3031_v40  ;;  %v3034_v44 = vsel %vm795_vm4, %v3027_v43, %v3029_v36 }
 0x4e1   : > { %10290 = vmatmul.mubr.msk.bf16.gmra.mrb[12].mxu1 %vm2477_vm9, %v11044_v34 }
 0x4e2   : > { %2965 = vmatprep.mubr.bf16.mxu1 %v15682_v0 }
 0x4e9   : > { %10293 = vmatmul.mubr.msk.bf16.vlgmr.msra.gmra.mrb[8].mxu1 %vm2477_vm9, %v11045_v39 }
 0x4ea   : > { %3047 = vmatpush1.bf16.msra.mxu1 %v3032_v42  ;;  %2975 = vmatprep.mubr.bf16.mxu1 %v15682_v0 }
 0x4eb   : > { %3048 = vmatprep.subr.bf16.mxu1 %v3035_v41 }
 0x4ee   : > { %3049 = vmatpush1.bf16.msra.mxu1 %v3034_v44 }
 0x4f0   : > { %v2786_v48 = vpop.permute.xlu1 %2785  ;;  %v2791_v62 = vpop.permute.xlu0 %2790 }
 0x4f1   : > { %10294 = vmatmul.mubr.msk.bf16.gmra.mrb[12].mxu1 %vm2477_vm9, %v11046_v45  ;;  %v11049_v45 = vld [vmem:[%s15841_s3 + $0x60] sm:$0xff]  }
 0x4f2   : > { %3078 = vmatprep.mubr.bf16.mxu1 %v15682_v0 }
 0x4f4   : > { %v2796_v9 = vpop.permute.xlu1 %2795 }
 0x4f8   : > { %v3218_v32 = vpop.permute.xlu1 %3217 }
 0x4f9   : > { %10297 = vmatmul.mubr.msk.bf16.vlgmr.msra.gmra.mrb[8].mxu1 %vm2477_vm9, %v11047_v46 }
 0x4fa   : > { %3088 = vmatprep.mubr.bf16.mxu1 %v15682_v0 }
 0x501   : > { %10298 = vmatmul.mubr.msk.bf16.gmra.mrb[12].mxu1 %vm2477_vm9, %v11048_v47 }
 0x502   : > { %3276 = vmatprep.mubr.bf16.mxu1 %v15682_v0 }
 0x5cc   : > { %v3080_v49 = vpop.f32.mrb[8].mxu1 }
 0x5cd   : > { %v3107_v58 = vadd.f32 %v3080_v49, %v2786_v48  ;;  %v3082_v61 = vpop.f32.mrb[9].mxu1  ;;  %v11050_v49 = vld [vmem:[%s15841_s3 + $0x68] sm:$0xff]  }
 0x5ce   : > { %v3108_v63 = vadd.f32 %v3082_v61, %v2786_v48  ;;  %v3084_v52 = vpop.f32.mrb[10].mxu1 }
 0x5cf   : > { %v3115_v28 = vmax.f32 %v3107_v58, 0.0  ;;  %v3109_v37 = vadd.f32 %v3084_v52, %v2791_v62  ;;  %v3086_v1 = vpop.f32.mrb[11].mxu1 }
 0x5d0   : > { %v3116_v33 = vmax.f32 %v3108_v63, 0.0  ;;  %v3110_v38 = vadd.f32 %v3086_v1, %v2791_v62  ;;  %v11051_v62 = vld [vmem:[%s15841_s3 + $0x70] sm:$0xff]  }
 0x5d1   : > { %v3117_v54 = vmax.f32 %v3109_v37, 0.0  ;;  %v11952_v4 = vadd.f32 %v3115_v28, %v11842_v51 }
 0x5d2   : > { %v3124_v2 = vadd.f32 %v3116_v33, %v11861_v8  ;;  %v3118_v3 = vmax.f32 %v3110_v38, 0.0  ;;  %v2801_v8 = vpop.permute.xlu0 %2800  ;;  %v11052_v33 = vld [vmem:[%s15841_s3 + $0x78] sm:$0xff]   ;;  %v11053_v38 = vld [vmem:[%s15841_s3 + $0x80] sm:$0xff]  }
 0x5d3   : > { %v11955_v5 = vadd.f32 %v3117_v54, %v11846_v56  ;;  %v11054_v54 = vld [vmem:[%s15841_s3 + $0x88] sm:$0xff]  }
 0x5d4   : > { %3132 = vst [vmem:[#allocation2 + $0x10] sm:$0xff] %v3124_v2  ;;  %v3126_v6 = vadd.f32 %v3118_v3, %v11865_v10  ;;  %v3090_v7 = vpop.f32.mrb[12].mxu1 }
 0x5d5   : > { %3139 = vst.msk [vmem:[#allocation2 + $0x10] sm:$0xff] %vm2379_vm15, %v11161_v24  ;;  %v3092_v59 = vpop.f32.mrb[13].mxu1  ;;  %v11962_v12 = vpack.c.bf16 %v11955_v5, %v11952_v4  ;;  %v3111_v14 = vadd.f32 %v3090_v7, %v2796_v9 }
 0x5d6   : > { %3134 = vst [vmem:[#allocation2 + $0x30] sm:$0xff] %v3126_v6  ;;  %v3112_v51 = vadd.f32 %v3092_v59, %v2796_v9  ;;  %v3094_v55 = vpop.f32.mrb[14].mxu1 }
 0x5d7   : > { %3140 = vst.msk [vmem:[#allocation2 + $0x30] sm:$0xff] %vm2379_vm15, %v11161_v24  ;;  %v3113_v56 = vadd.f32 %v3094_v55, %v2801_v8  ;;  %v3096_v53 = vpop.f32.mrb[15].mxu1  ;;  %3219 = vrot.lane.b32.xlu1 %v11962_v12, %s11165_s30  ;;  %v3119_v20 = vmax.f32 %v3111_v14, 0.0 }
 0x5d8   : > { %v3120_v10 = vmax.f32 %v3112_v51, 0.0  ;;  %v3114_v57 = vadd.f32 %v3096_v53, %v2801_v8 }
 0x5d9   : > { %v3121_v17 = vmax.f32 %v3113_v56, 0.0 }
 0x5da   : > { %v3128_v15 = vadd.f32 %v3120_v10, %v11882_v13  ;;  %v3122_v16 = vmax.f32 %v3114_v57, 0.0 }
 0x5db   : > { %v11977_v22 = vadd.f32 %v3121_v17, %v11869_v11 }
 0x5dc   : > { %3136 = vst [vmem:[#allocation2 + $0x50] sm:$0xff] %v3128_v15  ;;  %v3130_v18 = vadd.f32 %v3122_v16, %v11885_v50  ;;  %v11970_v19 = vld [vmem:[#allocation2 + $0x10] sm:$0xff]  ;;  %v11984_v50 = vadd.f32 %v3119_v20, %v11877_v60  ;;  %v10311_v60 = vld [vmem:[%s15840_s4 + $0x40] sm:$0xff] }
 0x5dd   : > { %3141 = vst.msk [vmem:[#allocation2 + $0x50] sm:$0xff] %vm2379_vm15, %v11161_v24 }
 0x5de   : > { %3138 = vst [vmem:[#allocation2 + $0x70] sm:$0xff] %v3130_v18  ;;  %v11974_v21 = vld [vmem:[#allocation2 + $0x30] sm:$0xff]  ;;  %v3193_v23 = vpack.c.bf16 %v11977_v22, %v11984_v50 }
 0x5df   : > { %3142 = vst.msk [vmem:[#allocation2 + $0x70] sm:$0xff] %vm2379_vm15, %v11161_v24  ;;  %v3192_v13 = vpack.c.bf16 %v11974_v21, %v11970_v19 }
 0x5e1   : > { %3221 = vrot.lane.b32.xlu0 %v3192_v13, %s11165_s30 }
 0x5e4   : > { %v11989_v26 = vld [vmem:[#allocation2 + $0x50] sm:$0xff] }
 0x5e5   : > { %3225 = vrot.lane.b32.xlu0 %v3193_v23, %s11165_s30 }
 0x5e6   : > { %v11992_v11 = vld [vmem:[#allocation2 + $0x70] sm:$0xff] }
 0x5e7   : > { %v3194_v27 = vpack.c.bf16 %v11992_v11, %v11989_v26 }
 0x5e9   : > { %3227 = vrot.lane.b32.xlu1 %v3194_v27, %s11165_s30  ;;  %3223 = vrot.lane.b32.xlu0 %v15684_v25, %s11165_s30  ;;  %s15853_s30 = smov 117  }
 0x5ed   : > { %3402 = vrot.lane.b32.xlu1 %v3192_v13, %s15843_s11  ;;  %3404 = vrot.lane.b32.xlu0 %v15684_v25, %s15843_s11 }
 0x5f1   : > { %3400 = vrot.lane.b32.xlu1 %v11962_v12, %s15843_s11  ;;  %3408 = vrot.lane.b32.xlu0 %v3194_v27, %s15843_s11 }
 0x5f5   : > { %3410 = vrot.lane.b32.xlu1 %v15684_v25, %s15843_s11  ;;  %3406 = vrot.lane.b32.xlu0 %v3193_v23, %s15843_s11 }
 0x5f9   : > { %3165 = vperm.xlu1 %10970, %v10311_v60   ;;  %3170 = vperm.xlu0 %10969, %v10312_v29  }
 0x5fd   : > { %3175 = vperm.xlu1 %10970, %v10313_v30   ;;  %3180 = vperm.xlu0 %10969, %v10314_v31  }
 0x601   : > { %3597 = vrot.lane.b32.xlu1 %v15684_v25, %s11166_s20 }
 0x649   : > { %v3220_v34 = vpop.permute.xlu1 %3219 }
 0x64a   : > { %v3230_v39 = vsel %vm3229_vm11, %v3218_v32, %v3220_v34 }
 0x653   : > { %v3222_v35 = vpop.permute.xlu0 %3221 }
 0x654   : > { %v3231_v36 = vsel %vm3229_vm11, %v3220_v34, %v3222_v35 }
 0x655   : > { %3244 = vmatprep.subr.bf16.mxu1 %v3231_v36 }
 0x656   : > { %3245 = vmatpush1.bf16.msra.mxu1 %v3230_v39 }
 0x657   : > { %v3226_v40 = vpop.permute.xlu0 %3225 }
 0x65b   : > { %v3228_v41 = vpop.permute.xlu1 %3227  ;;  %v3224_v42 = vpop.permute.xlu0 %3223 }
 0x65c   : > { %v3232_v43 = vsel %vm3229_vm11, %v3224_v42, %v3226_v40  ;;  %v3233_v44 = vsel %vm3229_vm11, %v3226_v40, %v3228_v41  ;;  %vm4370_vm11 = vcmask 523264  }
 0x65d   : > { %3246 = vmatprep.subr.bf16.mxu1 %v3233_v44  ;;  %v10340_v44 = vld [vmem:[%s15840_s4 + $0x68] sm:$0xff] }
 0x65e   : > { %3247 = vmatpush1.bf16.msra.mxu1 %v3232_v43 }
 0x65f   : > { %3313 = vmatprep.subr.bf16.mxu1 %v3192_v13  ;;  %v3403_v46 = vpop.permute.xlu1 %3402  ;;  %v3405_v47 = vpop.permute.xlu0 %3404 }
 0x660   : > { %v3413_v48 = vsel %vm1167_vm8, %v3403_v46, %v3405_v47 }
 0x661   : > { %10317 = vmatmul.mubr.msk.bf16.vlgmr.msra.gmra.mrb[16].mxu1 %vm2477_vm9, %v11049_v45  ;;  %v10341_v45 = vld [vmem:[%s15840_s4 + $0x70] sm:$0xff] }
 0x662   : > { %3314 = vmatpush1.bf16.msra.mxu1 %v11962_v12  ;;  %3286 = vmatprep.mubr.bf16.mxu1 %v15682_v0 }
 0x663   : > { %3315 = vmatprep.subr.bf16.mxu1 %v3194_v27  ;;  %v3401_v58 = vpop.permute.xlu1 %3400  ;;  %v3409_v61 = vpop.permute.xlu0 %3408 }
 0x664   : > { %v3412_v28 = vsel %vm1167_vm8, %v3401_v58, %v3403_v46  ;;  %v10342_v46 = vld [vmem:[%s15840_s4 + $0x78] sm:$0xff] }
 0x666   : > { %3316 = vmatpush1.bf16.msra.mxu1 %v3193_v23 }
 0x667   : > { %3426 = vmatprep.subr.bf16.mxu1 %v3413_v48  ;;  %v3411_v63 = vpop.permute.xlu1 %3410  ;;  %v3407_v37 = vpop.permute.xlu0 %3406 }
 0x668   : > { %v3415_v52 = vsel %vm1167_vm8, %v3409_v61, %v3411_v63  ;;  %v3414_v1 = vsel %vm1167_vm8, %v3407_v37, %v3409_v61 }
 0x669   : > { %10318 = vmatmul.mubr.msk.bf16.gmra.mrb[20].mxu1 %vm2477_vm9, %v11050_v49 }
 0x66a   : > { %3345 = vmatprep.mubr.bf16.mxu1 %v15682_v0 }
 0x671   : > { %10321 = vmatmul.mubr.msk.bf16.vlgmr.msra.gmra.mrb[16].mxu1 %vm2477_vm9, %v11051_v62 }
 0x672   : > { %3427 = vmatpush1.bf16.msra.mxu1 %v3412_v28  ;;  %3355 = vmatprep.mubr.bf16.mxu1 %v15682_v0 }
 0x673   : > { %3428 = vmatprep.subr.bf16.mxu1 %v3415_v52 }
 0x676   : > { %3429 = vmatpush1.bf16.msra.mxu1 %v3414_v1  ;;  %v11055_v1 = vld [vmem:[%s15841_s3 + $0x90] sm:$0xff]  }
 0x678   : > { %v3166_v2 = vpop.permute.xlu1 %3165  ;;  %v3171_v9 = vpop.permute.xlu0 %3170 }
 0x679   : > { %10322 = vmatmul.mubr.msk.bf16.gmra.mrb[20].mxu1 %vm2477_vm9, %v11052_v33 }
 0x67a   : > { %3458 = vmatprep.mubr.bf16.mxu1 %v15682_v0 }
 0x67c   : > { %v3176_v20 = vpop.permute.xlu1 %3175 }
 0x680   : > { %v3598_v47 = vpop.permute.xlu1 %3597 }
 0x681   : > { %10325 = vmatmul.mubr.msk.bf16.vlgmr.msra.gmra.mrb[16].mxu1 %vm2477_vm9, %v11053_v38 }
 0x682   : > { %3468 = vmatprep.mubr.bf16.mxu1 %v15682_v0 }
 0x689   : > { %10326 = vmatmul.mubr.msk.bf16.gmra.mrb[20].mxu1 %vm2477_vm9, %v11054_v54 }
 0x68a   : > { %3656 = vmatprep.mubr.bf16.mxu1 %v15682_v0 }
 0x754   : > { %v3460_v3 = vpop.f32.mrb[16].mxu1 }
 0x755   : > { %v3487_v6 = vadd.f32 %v3460_v3, %v3166_v2  ;;  %v3462_v7 = vpop.f32.mrb[17].mxu1 }
 0x756   : > { %v3488_v59 = vadd.f32 %v3462_v7, %v3166_v2  ;;  %v3464_v12 = vpop.f32.mrb[18].mxu1  ;;  %v11056_v2 = vld [vmem:[%s15841_s3 + $0x98] sm:$0xff]   ;;  %v11057_v7 = vld [vmem:[%s15841_s3 + $0xa0] sm:$0xff]  }
 0x757   : > { %v3495_v8 = vmax.f32 %v3487_v6, 0.0  ;;  %v3489_v51 = vadd.f32 %v3464_v12, %v3171_v9  ;;  %v3466_v55 = vpop.f32.mrb[19].mxu1 }
 0x758   : > { %v3496_v56 = vmax.f32 %v3488_v59, 0.0  ;;  %v3490_v53 = vadd.f32 %v3466_v55, %v3171_v9  ;;  %v11058_v55 = vld [vmem:[%s15841_s3 + $0xa8] sm:$0xff]  }
 0x759   : > { %v3497_v10 = vmax.f32 %v3489_v51, 0.0  ;;  %v12059_v15 = vadd.f32 %v3495_v8, %v11952_v4 }
 0x75a   : > { %v3504_v57 = vadd.f32 %v3496_v56, %v11970_v19  ;;  %v3498_v14 = vmax.f32 %v3490_v53, 0.0  ;;  %v3181_v19 = vpop.permute.xlu0 %3180  ;;  %v11059_v56 = vld [vmem:[%s15841_s3 + $0xb0] sm:$0xff]   ;;  %v11060_v53 = vld [vmem:[%s15841_s3 + $0xb8] sm:$0xff]  }
 0x75b   : > { %v12062_v16 = vadd.f32 %v3497_v10, %v11955_v5 }
 0x75c   : > { %3512 = vst [vmem:[#allocation3 + $0x10] sm:$0xff] %v3504_v57  ;;  %v3506_v17 = vadd.f32 %v3498_v14, %v11974_v21  ;;  %v3470_v18 = vpop.f32.mrb[20].mxu1 }
 0x75d   : > { %3519 = vst.msk [vmem:[#allocation3 + $0x10] sm:$0xff] %vm2379_vm15, %v11161_v24  ;;  %v3472_v13 = vpop.f32.mrb[21].mxu1  ;;  %v12069_v23 = vpack.c.bf16 %v12062_v16, %v12059_v15  ;;  %v3491_v30 = vadd.f32 %v3470_v18, %v3176_v20 }
 0x75e   : > { %3514 = vst [vmem:[#allocation3 + $0x30] sm:$0xff] %v3506_v17  ;;  %v3492_v4 = vadd.f32 %v3472_v13, %v3176_v20  ;;  %v3474_v27 = vpop.f32.mrb[22].mxu1 }
 0x75f   : > { %3520 = vst.msk [vmem:[#allocation3 + $0x30] sm:$0xff] %vm2379_vm15, %v11161_v24  ;;  %v3493_v5 = vadd.f32 %v3474_v27, %v3181_v19  ;;  %v3476_v60 = vpop.f32.mrb[23].mxu1  ;;  %3599 = vrot.lane.b32.xlu1 %v12069_v23, %s11166_s20  ;;  %v3499_v39 = vmax.f32 %v3491_v30, 0.0 }
 0x760   : > { %v3500_v21 = vmax.f32 %v3492_v4, 0.0  ;;  %v3494_v29 = vadd.f32 %v3476_v60, %v3181_v19 }
 0x761   : > { %v3501_v34 = vmax.f32 %v3493_v5, 0.0 }
 0x762   : > { %v3508_v31 = vadd.f32 %v3500_v21, %v11989_v26  ;;  %v3502_v32 = vmax.f32 %v3494_v29, 0.0 }
 0x763   : > { %v12084_v41 = vadd.f32 %v3501_v34, %v11977_v22 }
 0x764   : > { %3516 = vst [vmem:[#allocation3 + $0x50] sm:$0xff] %v3508_v31  ;;  %v3510_v35 = vadd.f32 %v3502_v32, %v11992_v11  ;;  %v12077_v36 = vld [vmem:[#allocation3 + $0x10] sm:$0xff]  ;;  %v12091_v11 = vadd.f32 %v3499_v39, %v11984_v50  ;;  %v10339_v50 = vld [vmem:[%s15840_s4 + $0x60] sm:$0xff] }
 0x765   : > { %3521 = vst.msk [vmem:[#allocation3 + $0x50] sm:$0xff] %vm2379_vm15, %v11161_v24  ;;  %v12176_v39 = vld [vmem:[#allocation2] sm:$0xff] }
 0x766   : > { %3518 = vst [vmem:[#allocation3 + $0x70] sm:$0xff] %v3510_v35  ;;  %v12081_v40 = vld [vmem:[#allocation3 + $0x30] sm:$0xff]  ;;  %v3573_v42 = vpack.c.bf16 %v12084_v41, %v12091_v11 }
 0x767   : > { %3522 = vst.msk [vmem:[#allocation3 + $0x70] sm:$0xff] %vm2379_vm15, %v11161_v24  ;;  %v3572_v26 = vpack.c.bf16 %v12081_v40, %v12077_v36 }
 0x769   : > { %3601 = vrot.lane.b32.xlu0 %v3572_v26, %s11166_s20 }
 0x76c   : > { %v12096_v43 = vld [vmem:[#allocation3 + $0x50] sm:$0xff] }
 0x76d   : > { %3605 = vrot.lane.b32.xlu0 %v3573_v42, %s11166_s20 }
 0x76e   : > { %v12099_v22 = vld [vmem:[#allocation3 + $0x70] sm:$0xff] }
 0x76f   : > { %v3574_v24 = vpack.c.bf16 %v12099_v22, %v12096_v43 }
 0x771   : > { %3607 = vrot.lane.b32.xlu1 %v3574_v24, %s11166_s20  ;;  %3603 = vrot.lane.b32.xlu0 %v15684_v25, %s11166_s20  ;;  %s15847_s20 = smov 125  }
 0x775   : > { %3782 = vrot.lane.b32.xlu1 %v3572_v26, %s15844_s21  ;;  %3784 = vrot.lane.b32.xlu0 %v15684_v25, %s15844_s21 }
 0x779   : > { %3780 = vrot.lane.b32.xlu1 %v12069_v23, %s15844_s21  ;;  %3788 = vrot.lane.b32.xlu0 %v3574_v24, %s15844_s21 }
 0x77d   : > { %3790 = vrot.lane.b32.xlu1 %v15684_v25, %s15844_s21  ;;  %3786 = vrot.lane.b32.xlu0 %v3573_v42, %s15844_s21 }
 0x781   : > { %3545 = vperm.xlu1 %10970, %v10339_v50   ;;  %3550 = vperm.xlu0 %10969, %v10340_v44  }
 0x785   : > { %3555 = vperm.xlu1 %10970, %v10341_v45   ;;  %3560 = vperm.xlu0 %10969, %v10342_v46  }
 0x789   : > { %3977 = vrot.lane.b32.xlu1 %v15684_v25, %s11167_s29 }
 0x7d1   : > { %v3600_v48 = vpop.permute.xlu1 %3599 }
 0x7d2   : > { %v3610_v61 = vsel %vm457_vm2, %v3598_v47, %v3600_v48 }
 0x7db   : > { %v3602_v49 = vpop.permute.xlu0 %3601 }
 0x7dc   : > { %v3611_v58 = vsel %vm457_vm2, %v3600_v48, %v3602_v49 }
 0x7dd   : > { %3624 = vmatprep.subr.bf16.mxu1 %v3611_v58 }
 0x7de   : > { %3625 = vmatpush1.bf16.msra.mxu1 %v3610_v61 }
 0x7df   : > { %v3606_v62 = vpop.permute.xlu0 %3605 }
 0x7e3   : > { %v3608_v63 = vpop.permute.xlu1 %3607  ;;  %v3604_v52 = vpop.permute.xlu0 %3603 }
 0x7e4   : > { %v3612_v28 = vsel %vm457_vm2, %v3604_v52, %v3606_v62  ;;  %v3613_v37 = vsel %vm457_vm2, %v3606_v62, %v3608_v63  ;;  %vm4172_vm2 = vcmask 785408  }
 0x7e5   : > { %3626 = vmatprep.subr.bf16.mxu1 %v3613_v37 }
 0x7e6   : > { %3627 = vmatpush1.bf16.msra.mxu1 %v3612_v28 }
 0x7e7   : > { %3693 = vmatprep.subr.bf16.mxu1 %v3572_v26  ;;  %v3783_v33 = vpop.permute.xlu1 %3782  ;;  %v3785_v38 = vpop.permute.xlu0 %3784 }
 0x7e8   : > { %v3793_v54 = vsel %vm1911_vm13, %v3783_v33, %v3785_v38  ;;  %v10370_v38 = vld [vmem:[%s15840_s4 + $0x98] sm:$0xff] }
 0x7e9   : > { %10345 = vmatmul.mubr.msk.bf16.vlgmr.msra.gmra.mrb[24].mxu1 %vm2477_vm9, %v11055_v1  ;;  %v10368_v1 = vld [vmem:[%s15840_s4 + $0x88] sm:$0xff] }
 0x7ea   : > { %3694 = vmatpush1.bf16.msra.mxu1 %v12069_v23  ;;  %3666 = vmatprep.mubr.bf16.mxu1 %v15682_v0 }
 0x7eb   : > { %3695 = vmatprep.subr.bf16.mxu1 %v3574_v24  ;;  %v3781_v3 = vpop.permute.xlu1 %3780  ;;  %v3789_v6 = vpop.permute.xlu0 %3788 }
 0x7ec   : > { %v3792_v12 = vsel %vm1911_vm13, %v3781_v3, %v3783_v33  ;;  %v10369_v33 = vld [vmem:[%s15840_s4 + $0x90] sm:$0xff] }
 0x7ed   : > { %v10397_v3 = vld [vmem:[%s15840_s4 + $0xb0] sm:$0xff] }
 0x7ee   : > { %3696 = vmatpush1.bf16.msra.mxu1 %v3573_v42 }
 0x7ef   : > { %3806 = vmatprep.subr.bf16.mxu1 %v3793_v54  ;;  %v3791_v9 = vpop.permute.xlu1 %3790  ;;  %v3787_v8 = vpop.permute.xlu0 %3786  ;;  %v10395_v54 = vld [vmem:[%s15840_s4 + $0xa0] sm:$0xff] }
 0x7f0   : > { %v3795_v59 = vsel %vm1911_vm13, %v3789_v6, %v3791_v9  ;;  %v3794_v51 = vsel %vm1911_vm13, %v3787_v8, %v3789_v6  ;;  %v10398_v6 = vld [vmem:[%s15840_s4 + $0xb8] sm:$0xff] }
 0x7f1   : > { %10346 = vmatmul.mubr.msk.bf16.gmra.mrb[28].mxu1 %vm2477_vm9, %v11056_v2  ;;  %v10396_v2 = vld [vmem:[%s15840_s4 + $0xa8] sm:$0xff] }
 0x7f2   : > { %3725 = vmatprep.mubr.bf16.mxu1 %v15682_v0 }
 0x7f9   : > { %10349 = vmatmul.mubr.msk.bf16.vlgmr.msra.gmra.mrb[24].mxu1 %vm2477_vm9, %v11057_v7  ;;  %v4664_v7 = vld [vmem:[%s15845_s6] sm:$0x3]  ;;  %s15857_s6 = smov 113  }
 0x7fa   : > { %3807 = vmatpush1.bf16.msra.mxu1 %v3792_v12  ;;  %3735 = vmatprep.mubr.bf16.mxu1 %v15682_v0 }
 0x7fb   : > { %3808 = vmatprep.subr.bf16.mxu1 %v3795_v59 }
 0x7fe   : > { %3809 = vmatpush1.bf16.msra.mxu1 %v3794_v51 }
 0x800   : > { %v3546_v10 = vpop.permute.xlu1 %3545  ;;  %v3551_v18 = vpop.permute.xlu0 %3550 }
 0x801   : > { %10350 = vmatmul.mubr.msk.bf16.gmra.mrb[28].mxu1 %vm2477_vm9, %v11058_v55 }
 0x802   : > { %3838 = vmatprep.mubr.bf16.mxu1 %v15682_v0 }
 0x804   : > { %v3556_v35 = vpop.permute.xlu1 %3555 }
 0x808   : > { %v3978_v9 = vpop.permute.xlu1 %3977 }
 0x809   : > { %10353 = vmatmul.mubr.msk.bf16.vlgmr.msra.gmra.mrb[24].mxu1 %vm2477_vm9, %v11059_v56 }
 0x80a   : > { %3848 = vmatprep.mubr.bf16.mxu1 %v15682_v0 }
 0x811   : > { %10354 = vmatmul.mubr.msk.bf16.gmra.mrb[28].mxu1 %vm2477_vm9, %v11060_v53 }
 0x812   : > { %4036 = vmatprep.mubr.bf16.mxu1 %v15682_v0 }
 0x8dc   : > { %v3840_v57 = vpop.f32.mrb[24].mxu1 }
 0x8dd   : > { %v3867_v14 = vadd.f32 %v3840_v57, %v3546_v10  ;;  %v3842_v17 = vpop.f32.mrb[25].mxu1 }
 0x8de   : > { %v3868_v20 = vadd.f32 %v3842_v17, %v3546_v10  ;;  %v3844_v13 = vpop.f32.mrb[26].mxu1 }
 0x8df   : > { %v3875_v23 = vmax.f32 %v3867_v14, 0.0  ;;  %v3869_v19 = vadd.f32 %v3844_v13, %v3551_v18  ;;  %v3846_v4 = vpop.f32.mrb[27].mxu1  ;;  %v11061_v14 = vld [vmem:[%s15841_s3 + $0xc0] sm:$0xff]   ;;  %v11062_v13 = vld [vmem:[%s15841_s3 + $0xc8] sm:$0xff]  }
 0x8e0   : > { %v3876_v27 = vmax.f32 %v3868_v20, 0.0  ;;  %v3870_v5 = vadd.f32 %v3846_v4, %v3551_v18  ;;  %v11063_v4 = vld [vmem:[%s15841_s3 + $0xd0] sm:$0xff]  }
 0x8e1   : > { %v3877_v60 = vmax.f32 %v3869_v19, 0.0  ;;  %v12170_v30 = vadd.f32 %v3875_v23, %v12059_v15  ;;  %v3561_v15 = vpop.permute.xlu0 %3560 }
 0x8e2   : > { %v3884_v21 = vadd.f32 %v3876_v27, %v12077_v36  ;;  %v3878_v29 = vmax.f32 %v3870_v5, 0.0 }
 0x8e3   : > { %v12173_v31 = vadd.f32 %v3877_v60, %v12062_v16 }
 0x8e4   : > { %3892 = vst [vmem:[#allocation2 + $0x10] sm:$0xff] %v3884_v21  ;;  %v3886_v32 = vadd.f32 %v3878_v29, %v12081_v40  ;;  %v3850_v34 = vpop.f32.mrb[28].mxu1 }
 0x8e5   : > { %3899 = vst.msk [vmem:[#allocation2 + $0x10] sm:$0xff] %vm2379_vm15, %v12176_v39  ;;  %v3852_v26 = vpop.f32.mrb[29].mxu1  ;;  %v12182_v36 = vpack.c.bf16 %v12173_v31, %v12170_v30  ;;  %v3871_v45 = vadd.f32 %v3850_v34, %v3556_v35  ;;  %v11065_v34 = vld [vmem:[%s15841_s3 + $0xe0] sm:$0xff]  }
 0x8e6   : > { %3894 = vst [vmem:[#allocation2 + $0x30] sm:$0xff] %v3886_v32  ;;  %v3872_v42 = vadd.f32 %v3852_v26, %v3556_v35  ;;  %v3854_v16 = vpop.f32.mrb[30].mxu1  ;;  %v11064_v32 = vld [vmem:[%s15841_s3 + $0xd8] sm:$0xff]   ;;  %v11066_v35 = vld [vmem:[%s15841_s3 + $0xe8] sm:$0xff]  }
 0x8e7   : > { %3900 = vst.msk [vmem:[#allocation2 + $0x30] sm:$0xff] %vm2379_vm15, %v12176_v39  ;;  %v3873_v40 = vadd.f32 %v3854_v16, %v3561_v15  ;;  %v3856_v24 = vpop.f32.mrb[31].mxu1  ;;  %3979 = vrot.lane.b32.xlu1 %v12182_v36, %s11167_s29  ;;  %v3879_v61 = vmax.f32 %v3871_v45, 0.0 }
 0x8e8   : > { %v3880_v50 = vmax.f32 %v3872_v42, 0.0  ;;  %v3874_v44 = vadd.f32 %v3856_v24, %v3561_v15 }
 0x8e9   : > { %v3881_v48 = vmax.f32 %v3873_v40, 0.0 }
 0x8ea   : > { %v3888_v46 = vadd.f32 %v3880_v50, %v12096_v43  ;;  %v3882_v47 = vmax.f32 %v3874_v44, 0.0 }
 0x8eb   : > { %v12197_v63 = vadd.f32 %v3881_v48, %v12084_v41 }
 0x8ec   : > { %3896 = vst [vmem:[#allocation2 + $0x50] sm:$0xff] %v3888_v46  ;;  %v3890_v49 = vadd.f32 %v3882_v47, %v12099_v22  ;;  %v12190_v58 = vld [vmem:[#allocation2 + $0x10] sm:$0xff]  ;;  %v12206_v22 = vadd.f32 %v3879_v61, %v12091_v11  ;;  %v10367_v11 = vld [vmem:[%s15840_s4 + $0x80] sm:$0xff]  ;;  %s15856_s4 = smov 114  }
 0x8ed   : > { %3901 = vst.msk [vmem:[#allocation2 + $0x50] sm:$0xff] %vm2379_vm15, %v12176_v39 }
 0x8ee   : > { %3898 = vst [vmem:[#allocation2 + $0x70] sm:$0xff] %v3890_v49  ;;  %v12194_v62 = vld [vmem:[#allocation2 + $0x30] sm:$0xff]  ;;  %v12212_v52 = vpack.c.bf16 %v12197_v63, %v12206_v22 }
 0x8ef   : > { %3902 = vst.msk [vmem:[#allocation2 + $0x70] sm:$0xff] %vm2379_vm15, %v12176_v39  ;;  %v12203_v43 = vpack.c.bf16 %v12194_v62, %v12190_v58 }
 0x8f1   : > { %3981 = vrot.lane.b32.xlu0 %v12203_v43, %s11167_s29 }
 0x8f4   : > { %v12214_v28 = vld [vmem:[#allocation2 + $0x50] sm:$0xff] }
 0x8f5   : > { %3985 = vrot.lane.b32.xlu0 %v12212_v52, %s11167_s29 }
 0x8f6   : > { %v12218_v41 = vld [vmem:[#allocation2 + $0x70] sm:$0xff] }
 0x8f7   : > { %v12222_v37 = vpack.c.bf16 %v12218_v41, %v12214_v28 }
 0x8f9   : > { %3987 = vrot.lane.b32.xlu1 %v12222_v37, %s11167_s29  ;;  %3983 = vrot.lane.b32.xlu0 %v15684_v25, %s11167_s29  ;;  %s15855_s29 = smov 115  }
 0x8fd   : > { %4162 = vrot.lane.b32.xlu1 %v12203_v43, %s15632_s0  ;;  %4164 = vrot.lane.b32.xlu0 %v15684_v25, %s15632_s0 }
 0x901   : > { %4160 = vrot.lane.b32.xlu1 %v12182_v36, %s15632_s0  ;;  %4168 = vrot.lane.b32.xlu0 %v12222_v37, %s15632_s0 }
 0x905   : > { %4170 = vrot.lane.b32.xlu1 %v15684_v25, %s15632_s0  ;;  %4166 = vrot.lane.b32.xlu0 %v12212_v52, %s15632_s0  ;;  %s15634_s0 = smov 64  }
 0x909   : > { %3925 = vperm.xlu1 %10970, %v10367_v11   ;;  %3930 = vperm.xlu0 %10969, %v10368_v1  }
 0x90d   : > { %3935 = vperm.xlu1 %10970, %v10369_v33   ;;  %3940 = vperm.xlu0 %10969, %v10370_v38  }
 0x911   : > { %4358 = vrot.lane.b32.xlu1 %v15684_v25, %s15634_s0  ;;  %4364 = vrot.lane.b32.xlu0 %v15684_v25, %s15634_s0 }
 0x915   : > { %4551 = vrot.lane.b32.xlu1 %v15684_v25, %s15634_s0  ;;  %4545 = vrot.lane.b32.xlu0 %v15684_v25, %s15634_s0  ;;  %s15849_s0 = smov 122  }
 0x919   : > { %4306 = vperm.xlu1 %10970, %v10395_v54   ;;  %4311 = vperm.xlu0 %10969, %v10396_v2  }
 0x91d   : > { %4316 = vperm.xlu1 %10970, %v10397_v3   ;;  %4321 = vperm.xlu0 %10969, %v10398_v6  }
 0x921   : > { %4667 = vperm.xlu1 %10970, %v4664_v7   ;;  %4713 = vrot.lane.b32.xlu0 %v15684_v25, %s15846_s28 }
 0x925   : > { %4823 = vrot.lane.b32.xlu0 %v15684_v25, %s15839_s27  ;;  %4719 = vrot.lane.b32.xlu1 %v15684_v25, %s15846_s28 }
 0x929   : > { %4891 = vrot.lane.b32.xlu0 %v15684_v25, %s15847_s20  ;;  %4829 = vrot.lane.b32.xlu1 %v15684_v25, %s15839_s27 }
 0x92d   : > { %4959 = vrot.lane.b32.xlu0 %v15684_v25, %s15842_s12  ;;  %4897 = vrot.lane.b32.xlu1 %v15684_v25, %s15847_s20 }
 0x931   : > { %5027 = vrot.lane.b32.xlu0 %v15684_v25, %s15848_s22  ;;  %4965 = vrot.lane.b32.xlu1 %v15684_v25, %s15842_s12 }
 0x935   : > { %5095 = vrot.lane.b32.xlu0 %v15684_v25, %s15849_s0  ;;  %5033 = vrot.lane.b32.xlu1 %v15684_v25, %s15848_s22 }
 0x939   : > { %5163 = vrot.lane.b32.xlu0 %v15684_v25, %s15850_s2  ;;  %5101 = vrot.lane.b32.xlu1 %v15684_v25, %s15849_s0 }
 0x93d   : > { %5231 = vrot.lane.b32.xlu0 %v15684_v25, %s15843_s11  ;;  %5169 = vrot.lane.b32.xlu1 %v15684_v25, %s15850_s2 }
 0x941   : > { %5299 = vrot.lane.b32.xlu0 %v15684_v25, %s15851_s1  ;;  %5237 = vrot.lane.b32.xlu1 %v15684_v25, %s15843_s11 }
 0x945   : > { %5367 = vrot.lane.b32.xlu0 %v15684_v25, %s15852_s26  ;;  %5305 = vrot.lane.b32.xlu1 %v15684_v25, %s15851_s1 }
 0x949   : > { %5435 = vrot.lane.b32.xlu0 %v15684_v25, %s15853_s30  ;;  %5373 = vrot.lane.b32.xlu1 %v15684_v25, %s15852_s26 }
 0x94d   : > { %5503 = vrot.lane.b32.xlu0 %v15684_v25, %s15854_s18  ;;  %5441 = vrot.lane.b32.xlu1 %v15684_v25, %s15853_s30 }
 0x951   : > { %5571 = vrot.lane.b32.xlu0 %v15684_v25, %s15855_s29  ;;  %5509 = vrot.lane.b32.xlu1 %v15684_v25, %s15854_s18 }
 0x955   : > { %5639 = vrot.lane.b32.xlu0 %v15684_v25, %s15856_s4  ;;  %5577 = vrot.lane.b32.xlu1 %v15684_v25, %s15855_s29 }
 0x959   : > { %5707 = vrot.lane.b32.xlu0 %v15684_v25, %s15857_s6  ;;  %5645 = vrot.lane.b32.xlu1 %v15684_v25, %s15856_s4  ;;  %v3980_v59 = vpop.permute.xlu1 %3979 }
 0x95a   : > { %v3990_v51 = vsel %vm2477_vm9, %v3978_v9, %v3980_v59 }
 0x95d   : > { %5775 = vrot.lane.b32.xlu0 %v15684_v25, %s15844_s21  ;;  %5713 = vrot.lane.b32.xlu1 %v15684_v25, %s15857_s6 }
 0x961   : > { %5843 = vrot.lane.b32.xlu0 %v15684_v25, %s15858_s15  ;;  %5781 = vrot.lane.b32.xlu1 %v15684_v25, %s15844_s21 }
 0x963   : > { %v3982_v12 = vpop.permute.xlu0 %3981 }
 0x964   : > { %v3991_v8 = vsel %vm2477_vm9, %v3980_v59, %v3982_v12 }
 0x965   : > { %4004 = vmatprep.subr.bf16.mxu1 %v3991_v8  ;;  %5911 = vrot.lane.b32.xlu0 %v15684_v25, %s15859_s19 }
 0x966   : > { %4005 = vmatpush1.bf16.msra.mxu1 %v3990_v51  ;;  %5849 = vrot.lane.b32.xlu1 %v15684_v25, %s15858_s15 }
 0x967   : > { %v3986_v55 = vpop.permute.xlu0 %3985 }
 0x969   : > { %5979 = vrot.lane.b32.xlu0 %v15684_v25, %s15860_s24 }
 0x96a   : > { %5917 = vrot.lane.b32.xlu1 %v15684_v25, %s15859_s19 }
 0x96b   : > { %v3988_v56 = vpop.permute.xlu1 %3987  ;;  %v3984_v53 = vpop.permute.xlu0 %3983 }
 0x96c   : > { %v3992_v10 = vsel %vm2477_vm9, %v3984_v53, %v3986_v55  ;;  %v3993_v57 = vsel %vm2477_vm9, %v3986_v55, %v3988_v56 }
 0x96d   : > { %4006 = vmatprep.subr.bf16.mxu1 %v3993_v57  ;;  %6047 = vrot.lane.b32.xlu0 %v15684_v25, %s15861_s10 }
 0x96e   : > { %4007 = vmatpush1.bf16.msra.mxu1 %v3992_v10  ;;  %5985 = vrot.lane.b32.xlu1 %v15684_v25, %s15860_s24 }
 0x96f   : > { %4073 = vmatprep.subr.bf16.mxu1 %v12203_v43  ;;  %v4163_v17 = vpop.permute.xlu1 %4162  ;;  %v4165_v18 = vpop.permute.xlu0 %4164 }
 0x970   : > { %v4174_v20 = vsel %vm4172_vm2, %v4163_v17, %v4165_v18 }
 0x971   : > { %10373 = vmatmul.mubr.msk.bf16.vlgmr.msra.gmra.mrb[32].mxu1 %vm2477_vm9, %v11061_v14  ;;  %6115 = vrot.lane.b32.xlu0 %v15684_v25, %s15650_s8 }
 0x972   : > { %4074 = vmatpush1.bf16.msra.mxu1 %v12182_v36  ;;  %4046 = vmatprep.mubr.bf16.mxu1 %v15682_v0 }
 0x973   : > { %4075 = vmatprep.subr.bf16.mxu1 %v12222_v37  ;;  %6053 = vrot.lane.b32.xlu1 %v15684_v25, %s15861_s10  ;;  %v4161_v23 = vpop.permute.xlu1 %4160  ;;  %v4169_v19 = vpop.permute.xlu0 %4168 }
 0x974   : > { %v4173_v60 = vsel %vm4172_vm2, %v4161_v23, %v4163_v17 }
 0x975   : > { %6184 = vrot.lane.b32.xlu0 %v15684_v25, %s15646_s25 }
 0x976   : > { %4076 = vmatpush1.bf16.msra.mxu1 %v12212_v52 }
 0x977   : > { %4187 = vmatprep.subr.bf16.mxu1 %v4174_v20  ;;  %6121 = vrot.lane.b32.xlu1 %v15684_v25, %s15650_s8  ;;  %v4171_v27 = vpop.permute.xlu1 %4170  ;;  %v4167_v21 = vpop.permute.xlu0 %4166  ;;  %s15658_s8 = smov 101  }
 0x978   : > { %v4176_v5 = vsel %vm4172_vm2, %v4169_v19, %v4171_v27  ;;  %v4175_v29 = vsel %vm4172_vm2, %v4167_v21, %v4169_v19 }
 0x979   : > { %10374 = vmatmul.mubr.msk.bf16.gmra.mrb[36].mxu1 %vm2477_vm9, %v11062_v13  ;;  %6253 = vrot.lane.b32.xlu0 %v15684_v25, %s15648_s9 }
 0x97a   : > { %4105 = vmatprep.mubr.bf16.mxu1 %v15682_v0 }
 0x97b   : > { %6190 = vrot.lane.b32.xlu1 %v15684_v25, %s15646_s25  ;;  %s15654_s25 = smov 103  }
 0x97d   : > { %6322 = vrot.lane.b32.xlu0 %v15684_v25, %s15652_s23 }
 0x97f   : > { %6259 = vrot.lane.b32.xlu1 %v15684_v25, %s15648_s9  ;;  %s15656_s9 = smov 102  }
 0x981   : > { %10377 = vmatmul.mubr.msk.bf16.vlgmr.msra.gmra.mrb[32].mxu1 %vm2477_vm9, %v11063_v4  ;;  %6391 = vrot.lane.b32.xlu0 %v15684_v25, %s15654_s25 }
 0x982   : > { %4188 = vmatpush1.bf16.msra.mxu1 %v4173_v60  ;;  %4115 = vmatprep.mubr.bf16.mxu1 %v15682_v0 }
 0x983   : > { %4189 = vmatprep.subr.bf16.mxu1 %v4176_v5  ;;  %6328 = vrot.lane.b32.xlu1 %v15684_v25, %s15652_s23  ;;  %s15666_s23 = smov 100  }
 0x985   : > { %6460 = vrot.lane.b32.xlu0 %v15684_v25, %s15656_s9 }
 0x986   : > { %4190 = vmatpush1.bf16.msra.mxu1 %v4175_v29 }
 0x987   : > { %6397 = vrot.lane.b32.xlu1 %v15684_v25, %s15654_s25  ;;  %s15660_s25 = smov 99  }
 0x988   : > { %v12469_v26 = vpop.permute.xlu0 %3930  ;;  %v12477_v36 = vpop.permute.xlu1 %3925 }
 0x989   : > { %10378 = vmatmul.mubr.msk.bf16.gmra.mrb[36].mxu1 %vm2477_vm9, %v11064_v32  ;;  %6529 = vrot.lane.b32.xlu0 %v15684_v25, %s15658_s8 }
 0x98a   : > { %4219 = vmatprep.mubr.bf16.mxu1 %v15682_v0 }
 0x98b   : > { %6466 = vrot.lane.b32.xlu1 %v15684_v25, %s15656_s9  ;;  %s15662_s9 = smov 98  }
 0x98c   : > { %v12479_v15 = vpop.permute.xlu0 %3940  ;;  %v12481_v42 = vpop.permute.xlu1 %3935 }
 0x98d   : > { %6598 = vrot.lane.b32.xlu0 %v15684_v25, %s15666_s23 }
 0x98f   : > { %6535 = vrot.lane.b32.xlu1 %v15684_v25, %s15658_s8  ;;  %s15664_s8 = smov 97  }
 0x990   : > { %v12483_v16 = vpop.permute.xlu0 %4364  ;;  %v12485_v40 = vpop.permute.xlu1 %4358 }
 0x991   : > { %10381 = vmatmul.mubr.msk.bf16.vlgmr.msra.gmra.mrb[32].mxu1 %vm2477_vm9, %v11065_v34  ;;  %6667 = vrot.lane.b32.xlu0 %v15684_v25, %s15660_s25 }
 0x992   : > { %4229 = vmatprep.mubr.bf16.mxu1 %v15682_v0 }
 0x993   : > { %6604 = vrot.lane.b32.xlu1 %v15684_v25, %s15666_s23  ;;  %s15699_s23 = smov 89  }
 0x994   : > { %v12487_v24 = vpop.permute.xlu0 %4545  ;;  %v12489_v50 = vpop.permute.xlu1 %4551 }
 0x995   : > { %6736 = vrot.lane.b32.xlu0 %v15684_v25, %s15662_s9 }
 0x997   : > { %6673 = vrot.lane.b32.xlu1 %v15684_v25, %s15660_s25  ;;  %s15687_s25 = smov 94  }
 0x998   : > { %v12491_v44 = vpop.permute.xlu0 %4311  ;;  %v12493_v45 = vpop.permute.xlu1 %4306 }
 0x999   : > { %10382 = vmatmul.mubr.msk.bf16.gmra.mrb[36].mxu1 %vm2477_vm9, %v11066_v35  ;;  %6805 = vrot.lane.b32.xlu0 %v15684_v25, %s15664_s8 }
 0x99a   : > { %4417 = vmatprep.mubr.bf16.mxu1 %v15682_v0 }
 0x99b   : > { %6742 = vrot.lane.b32.xlu1 %v15684_v25, %s15662_s9  ;;  %s15670_s9 = smov 93  }
 0x99c   : > { %v12495_v46 = vpop.permute.xlu0 %4321  ;;  %v12499_v48 = vpop.permute.xlu1 %4316 }
 0x99d   : > { %6874 = vrot.lane.b32.xlu0 %v15684_v25, %s15862_s13 }
 0x99f   : > { %6811 = vrot.lane.b32.xlu1 %v15684_v25, %s15664_s8  ;;  %s15672_s8 = smov 91  }
 0x9a0   : > { %v12497_v47 = vpop.permute.xlu0 %4713  ;;  %v12503_v61 = vpop.permute.xlu1 %4667 }
 0x9a1   : > { %6942 = vrot.lane.b32.xlu0 %v15684_v25, %s15668_s16  ;;  %15863 = vst [vmem:[#allocation17_spill] sm:$0xff] %v12503_v61 }
 0x9a3   : > { %6880 = vrot.lane.b32.xlu1 %v15684_v25, %s15862_s13 }
 0x9a4   : > { %v12501_v49 = vpop.permute.xlu0 %4823  ;;  %v12509_v43 = vpop.permute.xlu1 %4719 }
 0x9a5   : > { %7011 = vrot.lane.b32.xlu0 %v15684_v25, %s15687_s25 }
 0x9a7   : > { %6948 = vrot.lane.b32.xlu1 %v15684_v25, %s15668_s16  ;;  %s15678_s16 = smov 87  }
 0x9a8   : > { %v12515_v52 = vpop.permute.xlu0 %4891  ;;  %v12521_v37 = vpop.permute.xlu1 %4829 }
 0x9a9   : > { %7080 = vrot.lane.b32.xlu0 %v15684_v25, %s15670_s9 }
 0x9ab   : > { %7086 = vrot.lane.b32.xlu1 %v15684_v25, %s15670_s9  ;;  %s15676_s9 = smov 85  }
 0x9ac   : > { %v12523_v11 = vpop.permute.xlu0 %4959  ;;  %v12527_v1 = vpop.permute.xlu1 %4897 }
 0x9ad   : > { %7218 = vrot.lane.b32.xlu0 %v15684_v25, %s15672_s8 }
 0x9af   : > { %7224 = vrot.lane.b32.xlu1 %v15684_v25, %s15672_s8  ;;  %s15674_s8 = smov 83  }
 0x9b0   : > { %v12529_v33 = vpop.permute.xlu0 %5027  ;;  %v12533_v38 = vpop.permute.xlu1 %4965 }
 0x9b1   : > { %7356 = vrot.lane.b32.xlu0 %v15684_v25, %s15699_s23 }
 0x9b3   : > { %7362 = vrot.lane.b32.xlu1 %v15684_v25, %s15699_s23  ;;  %s15707_s23 = smov 69  }
 0x9b4   : > { %v12535_v54 = vpop.permute.xlu0 %5095  ;;  %v12537_v2 = vpop.permute.xlu1 %5033 }
 0x9b5   : > { %7494 = vrot.lane.b32.xlu0 %v15684_v25, %s15678_s16 }
 0x9b7   : > { %7500 = vrot.lane.b32.xlu1 %v15684_v25, %s15678_s16  ;;  %s15689_s16 = smov 77  }
 0x9b8   : > { %v12539_v3 = vpop.permute.xlu0 %5163  ;;  %v12541_v6 = vpop.permute.xlu1 %5101 }
 0x9b9   : > { %7632 = vrot.lane.b32.xlu0 %v15684_v25, %s15676_s9 }
 0x9bb   : > { %7638 = vrot.lane.b32.xlu1 %v15684_v25, %s15676_s9  ;;  %s15691_s9 = smov 79  }
 0x9bc   : > { %v12543_v7 = vpop.permute.xlu0 %5231  ;;  %v12545_v9 = vpop.permute.xlu1 %5169 }
 0x9bd   : > { %7770 = vrot.lane.b32.xlu0 %v15684_v25, %s15674_s8 }
 0x9bf   : > { %7776 = vrot.lane.b32.xlu1 %v15684_v25, %s15674_s8  ;;  %s15680_s8 = smov 81  }
 0x9c0   : > { %v12547_v59 = vpop.permute.xlu0 %5299  ;;  %v12549_v12 = vpop.permute.xlu1 %5237 }
 0x9c1   : > { %7908 = vrot.lane.b32.xlu0 %v15684_v25, %s15680_s8 }
 0x9c3   : > { %7914 = vrot.lane.b32.xlu1 %v15684_v25, %s15680_s8  ;;  %s15693_s8 = smov 75  }
 0x9c4   : > { %v12551_v8 = vpop.permute.xlu0 %5367  ;;  %v12553_v51 = vpop.permute.xlu1 %5305 }
 0x9c5   : > { %8046 = vrot.lane.b32.xlu0 %v15684_v25, %s15691_s9 }
 0x9c7   : > { %8052 = vrot.lane.b32.xlu1 %v15684_v25, %s15691_s9  ;;  %s15697_s9 = smov 73  }
 0x9c8   : > { %v12555_v55 = vpop.permute.xlu0 %5435  ;;  %v12557_v56 = vpop.permute.xlu1 %5373 }
 0x9c9   : > { %8184 = vrot.lane.b32.xlu0 %v15684_v25, %s15689_s16  ;;  %15864 = vst [vmem:[#allocation18_spill] sm:$0xff] %v12555_v55 }
 0x9cb   : > { %8190 = vrot.lane.b32.xlu1 %v15684_v25, %s15689_s16  ;;  %s15695_s16 = smov 92  }
 0x9cc   : > { %v12559_v53 = vpop.permute.xlu0 %5503  ;;  %v12561_v10 = vpop.permute.xlu1 %5441 }
 0x9cd   : > { %8322 = vrot.lane.b32.xlu0 %v15684_v25, %s15693_s8  ;;  %15865 = vst [vmem:[#allocation19_spill] sm:$0xff] %v12561_v10 }
 0x9d0   : > { %v12563_v57 = vpop.permute.xlu0 %5571  ;;  %v12565_v14 = vpop.permute.xlu1 %5509 }
 0x9d1   : > { %7017 = vrot.lane.b32.xlu0 %v15684_v25, %s15687_s25  ;;  %15866 = vst [vmem:[#allocation20_spill] sm:$0xff] %v12563_v57  ;;  %s15887_s25 = smov 64  }
 0x9d4   : > { %v12567_v17 = vpop.permute.xlu0 %5639  ;;  %v12569_v18 = vpop.permute.xlu1 %5577 }
 0x9d5   : > { %15867 = vst [vmem:[#allocation21_spill] sm:$0xff] %v12569_v18 }
 0x9d8   : > { %v12571_v20 = vpop.permute.xlu0 %5707  ;;  %v12573_v13 = vpop.permute.xlu1 %5645 }
 0x9d9   : > { %15868 = vst [vmem:[#allocation22_spill] sm:$0xff] %v12571_v20 }
 0x9dc   : > { %v12575_v23 = vpop.permute.xlu0 %5775  ;;  %v12577_v19 = vpop.permute.xlu1 %5713 }
 0x9dd   : > { %15869 = vst [vmem:[#allocation23_spill] sm:$0xff] %v12577_v19 }
 0x9e0   : > { %v12579_v4 = vpop.permute.xlu0 %5843  ;;  %v12581_v27 = vpop.permute.xlu1 %5781 }
 0x9e1   : > { %15870 = vst [vmem:[#allocation24_spill] sm:$0xff] %v12579_v4  ;;  %15871 = vst [vmem:[#allocation25_spill] sm:$0xff] %v12581_v27 }
 0x9e4   : > { %v12583_v5 = vpop.permute.xlu0 %5911  ;;  %v12585_v60 = vpop.permute.xlu1 %5849 }
 0x9e5   : > { %15872 = vst [vmem:[#allocation26_spill] sm:$0xff] %v12583_v5  ;;  %15873 = vst [vmem:[#allocation27_spill] sm:$0xff] %v12585_v60 }
 0x9e8   : > { %v12587_v21 = vpop.permute.xlu0 %5979  ;;  %v12589_v29 = vpop.permute.xlu1 %5917 }
 0x9e9   : > { %15874 = vst [vmem:[#allocation28_spill] sm:$0xff] %v12587_v21  ;;  %15875 = vst [vmem:[#allocation29_spill] sm:$0xff] %v12589_v29 }
 0x9ec   : > { %v12591_v32 = vpop.permute.xlu0 %6047  ;;  %v12593_v34 = vpop.permute.xlu1 %5985 }
 0x9ed   : > { %15876 = vst [vmem:[#allocation30_spill] sm:$0xff] %v12591_v32  ;;  %15877 = vst [vmem:[#allocation31_spill] sm:$0xff] %v12593_v34 }
 0x9f0   : > { %v12595_v35 = vpop.permute.xlu0 %6115  ;;  %v12597_v0 = vpop.permute.xlu1 %6053 }
 0x9f1   : > { %15878 = vst [vmem:[#allocation32_spill] sm:$0xff] %v12595_v35  ;;  %15879 = vst [vmem:[#allocation33_spill] sm:$0xff] %v12597_v0 }
 0x9f4   : > { %v12599_v25 = vpop.permute.xlu0 %6184  ;;  %v12601_v61 = vpop.permute.xlu1 %6121 }
 0x9f5   : > { %15880 = vst [vmem:[#allocation34_spill] sm:$0xff] %v12599_v25  ;;  %15881 = vst [vmem:[#allocation35_spill] sm:$0xff] %v12601_v61 }
 0x9f8   : > { %v12603_v4 = vpop.permute.xlu0 %6253  ;;  %v12607_v32 = vpop.permute.xlu1 %6190 }
 0x9f9   : > { %15882 = vst [vmem:[#allocation36_spill] sm:$0xff] %v12603_v4  ;;  %15883 = vst [vmem:[#allocation37_spill] sm:$0xff] %v12607_v32 }
 0x9fc   : > { %v12610_v0 = vpop.permute.xlu0 %6322 }
 0x9fd   : > { %15884 = vst [vmem:[#allocation38_spill] sm:$0xff] %v12610_v0 }
 0xa64   : > { %v4221_v19 = vpop.f32.mrb[32].mxu1 }
 0xa65   : > { %v4248_v60 = vadd.f32 %v4221_v19, %v12477_v36  ;;  %v4223_v21 = vpop.f32.mrb[33].mxu1 }
 0xa66   : > { %v4249_v20 = vadd.f32 %v4223_v21, %v12477_v36  ;;  %v4225_v18 = vpop.f32.mrb[34].mxu1  ;;  %v12621_v21 = vpop.permute.xlu1 %6259 }
 0xa67   : > { %v4256_v34 = vmax.f32 %v4248_v60, 0.0  ;;  %v4250_v35 = vadd.f32 %v4225_v18, %v12469_v26  ;;  %v4227_v29 = vpop.f32.mrb[35].mxu1  ;;  %15885 = vst [vmem:[#allocation39_spill] sm:$0xff] %v12621_v21 }
 0xa68   : > { %v4257_v25 = vmax.f32 %v4249_v20, 0.0  ;;  %v4251_v61 = vadd.f32 %v4227_v29, %v12469_v26 }
 0xa69   : > { %v12614_v4 = vadd.f32 %v4256_v34, %v12170_v30  ;;  %v4258_v57 = vmax.f32 %v4250_v35, 0.0 }
 0xa6a   : > { %v4265_v19 = vadd.f32 %v4257_v25, %v12190_v58  ;;  %v4259_v5 = vmax.f32 %v4251_v61, 0.0  ;;  %v12630_v25 = vpop.permute.xlu0 %6391 }
 0xa6b   : > { %v12618_v36 = vadd.f32 %v4258_v57, %v12173_v31  ;;  %15886 = vst [vmem:[#allocation40_spill] sm:$0xff] %v12630_v25 }
 0xa6c   : > { %4273 = vst [vmem:[#allocation3 + $0x10] sm:$0xff] %v4265_v19  ;;  %v4267_v60 = vadd.f32 %v4259_v5, %v12194_v62  ;;  %v4231_v18 = vpop.f32.mrb[36].mxu1 }
 0xa6d   : > { %4280 = vst.msk [vmem:[#allocation3 + $0x10] sm:$0xff] %vm2379_vm15, %v12176_v39  ;;  %v4252_v26 = vadd.f32 %v4231_v18, %v12481_v42  ;;  %v4233_v30 = vpop.f32.mrb[37].mxu1  ;;  %v12628_v20 = vpack.c.bf16 %v12618_v36, %v12614_v4 }
 0xa6e   : > { %4275 = vst [vmem:[#allocation3 + $0x30] sm:$0xff] %v4267_v60  ;;  %v4253_v31 = vadd.f32 %v4233_v30, %v12481_v42  ;;  %v4235_v58 = vpop.f32.mrb[38].mxu1  ;;  %v12648_v18 = vpop.permute.xlu0 %6460 }
 0xa6f   : > { %4281 = vst.msk [vmem:[#allocation3 + $0x30] sm:$0xff] %vm2379_vm15, %v12176_v39  ;;  %v4260_v62 = vmax.f32 %v4252_v26, 0.0  ;;  %v4254_v61 = vadd.f32 %v4235_v58, %v12479_v15  ;;  %v4237_v57 = vpop.f32.mrb[39].mxu1  ;;  %4360 = vrot.lane.b32.xlu1 %v12628_v20, %s15887_s25  ;;  %15888 = vst [vmem:[#allocation41_spill] sm:$0xff] %v12648_v18  ;;  %v12650_v26 = vpop.permute.xlu1 %6328 }
 0xa70   : > { %v4261_v5 = vmax.f32 %v4253_v31, 0.0  ;;  %v4255_v29 = vadd.f32 %v4237_v57, %v12479_v15  ;;  %15889 = vst [vmem:[#allocation42_spill] sm:$0xff] %v12650_v26 }
 0xa71   : > { %v12640_v34 = vadd.f32 %v4260_v62, %v12206_v22  ;;  %v4262_v35 = vmax.f32 %v4254_v61, 0.0 }
 0xa72   : > { %v4269_v42 = vadd.f32 %v4261_v5, %v12214_v28  ;;  %v4263_v19 = vmax.f32 %v4255_v29, 0.0  ;;  %v12669_v28 = vpop.permute.xlu0 %6529  ;;  %v15894_v29 = vmov 0.0|0.0  }
 0xa73   : > { %v12644_v60 = vadd.f32 %v4262_v35, %v12197_v63  ;;  %4541 = vrot.lane.b32.xlu1 %v12628_v20, %s15887_s25  ;;  %15890 = vst [vmem:[#allocation43_spill] sm:$0xff] %v12669_v28 }
 0xa74   : > { %4277 = vst [vmem:[#allocation3 + $0x50] sm:$0xff] %v4269_v42  ;;  %v4271_v15 = vadd.f32 %v4263_v19, %v12218_v41  ;;  %v12653_v30 = vld [vmem:[#allocation3 + $0x10] sm:$0xff]  ;;  %v12671_v41 = vpop.permute.xlu1 %6397 }
 0xa75   : > { %4282 = vst.msk [vmem:[#allocation3 + $0x50] sm:$0xff] %vm2379_vm15, %v12176_v39  ;;  %15891 = vst [vmem:[#allocation44_spill] sm:$0xff] %v12671_v41  ;;  %v12675_v31 = vpack.c.bf16 %v12644_v60, %v12640_v34 }
 0xa76   : > { %4279 = vst [vmem:[#allocation3 + $0x70] sm:$0xff] %v4271_v15  ;;  %v12657_v22 = vld [vmem:[#allocation3 + $0x30] sm:$0xff]  ;;  %v12687_v57 = vpop.permute.xlu0 %6598 }
 0xa77   : > { %4283 = vst.msk [vmem:[#allocation3 + $0x70] sm:$0xff] %vm2379_vm15, %v12176_v39  ;;  %v12663_v63 = vpack.c.bf16 %v12657_v22, %v12653_v30  ;;  %15892 = vst [vmem:[#allocation45_spill] sm:$0xff] %v12687_v57 }
 0xa78   : > { %v12689_v5 = vpop.permute.xlu1 %6466 }
 0xa79   : > { %4362 = vrot.lane.b32.xlu0 %v12663_v63, %s15887_s25  ;;  %4543 = vrot.lane.b32.xlu1 %v12663_v63, %s15887_s25  ;;  %15893 = vst [vmem:[#allocation46_spill] sm:$0xff] %v12689_v5 }
 0xa7a   : > { %v12697_v35 = vpop.permute.xlu0 %6667 }
 0xa7b   : > { %15895 = vst [vmem:[#allocation47_spill] sm:$0xff] %v12697_v35 }
 0xa7c   : > { %v12677_v58 = vld [vmem:[#allocation3 + $0x50] sm:$0xff]  ;;  %v12699_v42 = vpop.permute.xlu1 %6535 }
 0xa7d   : > { %4366 = vrot.lane.b32.xlu0 %v12675_v31, %s15887_s25  ;;  %15896 = vst [vmem:[#allocation48_spill] sm:$0xff] %v12699_v42 }
 0xa7e   : > { %v12681_v62 = vld [vmem:[#allocation3 + $0x70] sm:$0xff]  ;;  %v12703_v19 = vpop.permute.xlu0 %6736 }
 0xa7f   : > { %v12685_v61 = vpack.c.bf16 %v12681_v62, %v12677_v58  ;;  %15897 = vst [vmem:[#allocation49_spill] sm:$0xff] %v12703_v19 }
 0xa80   : > { %v12705_v15 = vpop.permute.xlu1 %6604 }
 0xa81   : > { %8328 = vrot.lane.b32.xlu0 %v15894_v29, %s15693_s8  ;;  %4368 = vrot.lane.b32.xlu1 %v12685_v61, %s15887_s25  ;;  %15898 = vst [vmem:[#allocation50_spill] sm:$0xff] %v12705_v15  ;;  %s15701_s8 = smov 90  }
 0xa82   : > { %v12711_v28 = vpop.permute.xlu0 %6805 }
 0xa83   : > { %15899 = vst [vmem:[#allocation51_spill] sm:$0xff] %v12711_v28 }
 0xa84   : > { %v12713_v41 = vpop.permute.xlu1 %6673 }
 0xa85   : > { %7149 = vrot.lane.b32.xlu0 %v15894_v29, %s15695_s16  ;;  %15900 = vst [vmem:[#allocation52_spill] sm:$0xff] %v12713_v41 }
 0xa86   : > { %v12717_v35 = vpop.permute.xlu0 %6874 }
 0xa87   : > { %15901 = vst [vmem:[#allocation53_spill] sm:$0xff] %v12717_v35 }
 0xa88   : > { %v12719_v42 = vpop.permute.xlu1 %6742 }
 0xa89   : > { %8460 = vrot.lane.b32.xlu0 %v15894_v29, %s15697_s9  ;;  %15902 = vst [vmem:[#allocation54_spill] sm:$0xff] %v12719_v42 }
 0xa8a   : > { %v12725_v25 = vpop.permute.xlu0 %6942 }
 0xa8b   : > { %15903 = vst [vmem:[#allocation55_spill] sm:$0xff] %v12725_v25 }
 0xa8c   : > { %v12727_v19 = vpop.permute.xlu1 %6811 }
 0xa8d   : > { %7155 = vrot.lane.b32.xlu0 %v15894_v29, %s15695_s16  ;;  %15904 = vst [vmem:[#allocation56_spill] sm:$0xff] %v12727_v19  ;;  %s15703_s16 = smov 71  }
 0xa8e   : > { %v12731_v28 = vpop.permute.xlu0 %7011 }
 0xa8f   : > { %15905 = vst [vmem:[#allocation57_spill] sm:$0xff] %v12731_v28 }
 0xa90   : > { %v12733_v41 = vpop.permute.xlu1 %6880 }
 0xa91   : > { %8466 = vrot.lane.b32.xlu0 %v15894_v29, %s15697_s9  ;;  %15906 = vst [vmem:[#allocation58_spill] sm:$0xff] %v12733_v41  ;;  %s15705_s9 = smov 88  }
 0xa92   : > { %v12737_v35 = vpop.permute.xlu0 %7080 }
 0xa93   : > { %15907 = vst [vmem:[#allocation59_spill] sm:$0xff] %v12737_v35 }
 0xa94   : > { %v12739_v42 = vpop.permute.xlu1 %6948 }
 0xa95   : > { %7287 = vrot.lane.b32.xlu0 %v15894_v29, %s15701_s8  ;;  %15908 = vst [vmem:[#allocation60_spill] sm:$0xff] %v12739_v42 }
 0xa96   : > { %v12745_v25 = vpop.permute.xlu0 %7218 }
 0xa97   : > { %15909 = vst [vmem:[#allocation61_spill] sm:$0xff] %v12745_v25 }
 0xa98   : > { %v12747_v19 = vpop.permute.xlu1 %7086 }
 0xa99   : > { %4547 = vrot.lane.b32.xlu0 %v12675_v31, %s15887_s25  ;;  %15910 = vst [vmem:[#allocation62_spill] sm:$0xff] %v12747_v19 }
 0xa9a   : > { %v12751_v28 = vpop.permute.xlu0 %7356 }
 0xa9b   : > { %15911 = vst [vmem:[#allocation63_spill] sm:$0xff] %v12751_v28 }
 0xa9c   : > { %v12753_v35 = vpop.permute.xlu1 %7224 }
 0xa9d   : > { %4549 = vrot.lane.b32.xlu0 %v12685_v61, %s15887_s25  ;;  %15912 = vst [vmem:[#allocation64_spill] sm:$0xff] %v12753_v35  ;;  %s15948_s25 = smov 77  }
 0xa9e   : > { %v12759_v42 = vpop.permute.xlu0 %7494 }
 0xa9f   : > { %15913 = vst [vmem:[#allocation65_spill] sm:$0xff] %v12759_v42 }
 0xaa0   : > { %v12761_v41 = vpop.permute.xlu1 %7362 }
 0xaa1   : > { %8598 = vrot.lane.b32.xlu0 %v15894_v29, %s15703_s16  ;;  %15914 = vst [vmem:[#allocation66_spill] sm:$0xff] %v12761_v41 }
 0xaa2   : > { %v12765_v25 = vpop.permute.xlu0 %7632 }
 0xaa3   : > { %15915 = vst [vmem:[#allocation67_spill] sm:$0xff] %v12765_v25 }
 0xaa4   : > { %v12767_v19 = vpop.permute.xlu1 %7500 }
 0xaa5   : > { %7293 = vrot.lane.b32.xlu0 %v15894_v29, %s15701_s8  ;;  %s15711_s8 = smov 86   ;;  %15916 = vst [vmem:[#allocation68_spill] sm:$0xff] %v12767_v19 }
 0xaa6   : > { %v12773_v28 = vpop.permute.xlu0 %7770 }
 0xaa7   : > { %15917 = vst [vmem:[#allocation69_spill] sm:$0xff] %v12773_v28 }
 0xaa8   : > { %v12775_v42 = vpop.permute.xlu1 %7638 }
 0xaa9   : > { %8604 = vrot.lane.b32.xlu0 %v15894_v29, %s15703_s16  ;;  %s15715_s16 = smov 67   ;;  %15918 = vst [vmem:[#allocation70_spill] sm:$0xff] %v12775_v42 }
 0xaaa   : > { %v12779_v41 = vpop.permute.xlu0 %7908 }
 0xaab   : > { %15919 = vst [vmem:[#allocation71_spill] sm:$0xff] %v12779_v41 }
 0xaac   : > { %v12781_v35 = vpop.permute.xlu1 %7776 }
 0xaad   : > { %7425 = vrot.lane.b32.xlu0 %v15894_v29, %s15705_s9  ;;  %15920 = vst [vmem:[#allocation72_spill] sm:$0xff] %v12781_v35 }
 0xaae   : > { %v12787_v25 = vpop.permute.xlu0 %8046 }
 0xaaf   : > { %15921 = vst [vmem:[#allocation73_spill] sm:$0xff] %v12787_v25 }
 0xab0   : > { %v12789_v28 = vpop.permute.xlu1 %7914 }
 0xab1   : > { %8736 = vrot.lane.b32.xlu0 %v15894_v29, %s15707_s23  ;;  %15922 = vst [vmem:[#allocation74_spill] sm:$0xff] %v12789_v28 }
 0xab2   : > { %v12793_v42 = vpop.permute.xlu0 %8184 }
 0xab3   : > { %15923 = vst [vmem:[#allocation75_spill] sm:$0xff] %v12793_v42 }
 0xab4   : > { %v12795_v41 = vpop.permute.xlu1 %8052 }
 0xab5   : > { %7431 = vrot.lane.b32.xlu0 %v15894_v29, %s15705_s9  ;;  %s15709_s9 = smov 84   ;;  %15924 = vst [vmem:[#allocation76_spill] sm:$0xff] %v12795_v41 }
 0xab6   : > { %v12799_v35 = vpop.permute.xlu0 %8322 }
 0xab7   : > { %15925 = vst [vmem:[#allocation77_spill] sm:$0xff] %v12799_v35 }
 0xab8   : > { %v12801_v19 = vpop.permute.xlu1 %8190 }
 0xab9   : > { %8742 = vrot.lane.b32.xlu0 %v15894_v29, %s15707_s23  ;;  %s15713_s23 = smov 65   ;;  %15926 = vst [vmem:[#allocation78_spill] sm:$0xff] %v12801_v19 }
 0xaba   : > { %v12803_v21 = vpop.permute.xlu0 %7017 }
 0xabb   : > { %15927 = vst [vmem:[#allocation79_spill] sm:$0xff] %v12803_v21 }
 0xabd   : > { %7563 = vrot.lane.b32.xlu0 %v15894_v29, %s15711_s8 }
 0xac1   : > { %8874 = vrot.lane.b32.xlu0 %v15894_v29, %s15715_s16 }
 0xac5   : > { %7569 = vrot.lane.b32.xlu0 %v15894_v29, %s15711_s8  ;;  %s15935_s8 = smov 93  }
 0xac9   : > { %8880 = vrot.lane.b32.xlu0 %v15894_v29, %s15715_s16  ;;  %s15939_s16 = smov 87  }
 0xacd   : > { %7701 = vrot.lane.b32.xlu0 %v15894_v29, %s15709_s9 }
 0xad1   : > { %9012 = vrot.lane.b32.xlu0 %v15894_v29, %s15713_s23 }
 0xad5   : > { %7707 = vrot.lane.b32.xlu0 %v15894_v29, %s15709_s9  ;;  %s15936_s9 = smov 91  }
 0xad9   : > { %9018 = vrot.lane.b32.xlu0 %v15894_v29, %s15713_s23  ;;  %s15938_s23 = smov 89  }
 0xadd   : > { %7839 = vrot.lane.b32.xlu0 %v15894_v29, %s15719_s17 }
 0xae1   : > { %v4361_v15 = vpop.permute.xlu1 %4360  ;;  %9149 = vrot.lane.b32.xlu0 %v15894_v29, %s15721_s14  ;;  %s15943_s14 = smov 83  }
 0xae2   : > { %v4371_v42 = vsel %vm4370_vm11, %v12485_v40, %v4361_v15  ;;  %v15930_v40 = vmov 0  }
 0xae5   : > { %v4542_v28 = vpop.permute.xlu1 %4541  ;;  %7845 = vrot.lane.b32.xlu0 %v15894_v29, %s15719_s17  ;;  %s15941_s17 = smov 85  }
 0xaeb   : > { %v4363_v25 = vpop.permute.xlu0 %4362  ;;  %v4544_v5 = vpop.permute.xlu1 %4543 }
 0xaec   : > { %v4372_v57 = vsel %vm4370_vm11, %v4361_v15, %v4363_v25  ;;  %v11067_v25 = vld [vmem:[%s15841_s3 + $0xf0] sm:$0xff]  }
 0xaed   : > { %4385 = vmatprep.subr.bf16.mxu1 %v4372_v57 }
 0xaee   : > { %4386 = vmatpush1.bf16.msra.mxu1 %v4371_v42  ;;  %v11070_v42 = vld [vmem:[%s15841_s3 + $0x108] sm:$0xff]  }
 0xaef   : > { %v4367_v41 = vpop.permute.xlu0 %4366 }
 0xaf0   : > { %v4373_v21 = vsel %vm4370_vm11, %v12483_v16, %v4367_v41  ;;  %v11068_v16 = vld [vmem:[%s15841_s3 + $0xf8] sm:$0xff]  }
 0xaf3   : > { %v12808_v18 = vpop.permute.xlu0 %8328  ;;  %v4369_v35 = vpop.permute.xlu1 %4368 }
 0xaf4   : > { %15928 = vst [vmem:[#allocation80_spill] sm:$0xff] %v12808_v18  ;;  %v4374_v19 = vsel %vm4370_vm11, %v4367_v41, %v4369_v35  ;;  %v11069_v41 = vld [vmem:[%s15841_s3 + $0x100] sm:$0xff]  }
 0xaf5   : > { %4387 = vmatprep.subr.bf16.mxu1 %v4374_v19 }
 0xaf6   : > { %4388 = vmatpush1.bf16.msra.mxu1 %v4373_v21  ;;  %v4554_v21 = vsel %vm4370_vm11, %v4544_v5, %v12487_v24 }
 0xaf7   : > { %v12816_v57 = vpop.permute.xlu0 %7149  ;;  %4454 = vmatprep.subr.bf16.mxu1 %v12663_v63 }
 0xaf8   : > { %15929 = vst [vmem:[#allocation81_spill] sm:$0xff] %v12816_v57 }
 0xaf9   : > { %10401 = vmatmul.mubr.msk.bf16.vlgmr.msra.gmra.mrb[40].mxu1 %vm2477_vm9, %v11067_v25 }
 0xafa   : > { %4455 = vmatpush1.bf16.msra.mxu1 %v12628_v20  ;;  %4427 = vmatprep.mubr.bf16.mxu1 %v15930_v40 }
 0xafb   : > { %v12822_v35 = vpop.permute.xlu0 %8460  ;;  %4456 = vmatprep.subr.bf16.mxu1 %v12685_v61 }
 0xafc   : > { %15931 = vst [vmem:[#allocation82_spill] sm:$0xff] %v12822_v35 }
 0xafe   : > { %4457 = vmatpush1.bf16.msra.mxu1 %v12675_v31  ;;  %v4553_v31 = vsel %vm4370_vm11, %v4542_v28, %v4544_v5  ;;  %v11071_v28 = vld [vmem:[%s15841_s3 + $0x110] sm:$0xff]  }
 0xaff   : > { %v12831_v63 = vpop.permute.xlu0 %7155  ;;  %4567 = vmatprep.subr.bf16.mxu1 %v4554_v21 }
 0xb00   : > { %15932 = vst [vmem:[#allocation83_spill] sm:$0xff] %v12831_v63 }
 0xb01   : > { %10402 = vmatmul.mubr.msk.bf16.gmra.mrb[44].mxu1 %vm2477_vm9, %v11068_v16 }
 0xb02   : > { %4486 = vmatprep.mubr.bf16.mxu1 %v15930_v40 }
 0xb03   : > { %v12835_v20 = vpop.permute.xlu0 %8466 }
 0xb04   : > { %15933 = vst [vmem:[#allocation84_spill] sm:$0xff] %v12835_v20 }
 0xb07   : > { %v12840_v61 = vpop.permute.xlu0 %7287 }
 0xb08   : > { %15934 = vst [vmem:[#allocation85_spill] sm:$0xff] %v12840_v61 }
 0xb09   : > { %10405 = vmatmul.mubr.msk.bf16.vlgmr.msra.gmra.mrb[40].mxu1 %vm2477_vm9, %v11069_v41 }
 0xb0a   : > { %4568 = vmatpush1.bf16.msra.mxu1 %v4553_v31  ;;  %4496 = vmatprep.mubr.bf16.mxu1 %v15930_v40 }
 0xb0b   : > { %v4548_v24 = vpop.permute.xlu0 %4547 }
 0xb0f   : > { %v4550_v19 = vpop.permute.xlu0 %4549 }
 0xb10   : > { %v4556_v15 = vsel %vm4370_vm11, %v4550_v19, %v12489_v50  ;;  %v4555_v25 = vsel %vm4370_vm11, %v4548_v24, %v4550_v19  ;;  %v11072_v50 = vld [vmem:[%s15841_s3 + $0x118] sm:$0xff]   ;;  %s15944_s3 = smov 81  }
 0xb11   : > { %10406 = vmatmul.mubr.msk.bf16.gmra.mrb[44].mxu1 %vm2477_vm9, %v11070_v42  ;;  %4569 = vmatprep.subr.bf16.mxu1 %v4556_v15 }
 0xb12   : > { %4570 = vmatpush1.bf16.msra.mxu1 %v4555_v25  ;;  %4599 = vmatprep.mubr.bf16.mxu1 %v15930_v40 }
 0xb19   : > { %10409 = vmatmul.mubr.msk.bf16.vlgmr.msra.gmra.mrb[40].mxu1 %vm2477_vm9, %v11071_v28 }
 0xb1a   : > { %4609 = vmatprep.mubr.bf16.mxu1 %v15930_v40 }
 0xb21   : > { %10410 = vmatmul.mubr.msk.bf16.gmra.mrb[44].mxu1 %vm2477_vm9, %v11072_v50 }
 0xb22   : > { %4764 = vmatprep.mubr.bf16.mxu1 %v15930_v40 }
 0xbec   : > { %v4601_v5 = vpop.f32.mrb[40].mxu1 }
 0xbed   : > { %v4628_v16 = vadd.f32 %v4601_v5, %v12493_v45  ;;  %v4603_v21 = vpop.f32.mrb[41].mxu1 }
 0xbee   : > { %v4629_v41 = vadd.f32 %v4603_v21, %v12493_v45  ;;  %v4605_v31 = vpop.f32.mrb[42].mxu1 }
 0xbef   : > { %v4636_v24 = vmax.f32 %v4628_v16, 0.0  ;;  %v4630_v42 = vadd.f32 %v4605_v31, %v12491_v44  ;;  %v4607_v19 = vpop.f32.mrb[43].mxu1 }
 0xbf0   : > { %v4637_v15 = vmax.f32 %v4629_v41, 0.0  ;;  %v4631_v25 = vadd.f32 %v4607_v19, %v12491_v44 }
 0xbf1   : > { %v4644_v28 = vadd.f32 %v4636_v24, %v12614_v4  ;;  %v4638_v50 = vmax.f32 %v4630_v42, 0.0 }
 0xbf2   : > { %v4645_v20 = vadd.f32 %v4637_v15, %v12653_v30  ;;  %v4639_v61 = vmax.f32 %v4631_v25, 0.0  ;;  %v11074_v25 = vld [vmem:[#allocation2] sm:$0xff] }
 0xbf3   : > { %4652 = vst [vmem:[#allocation2 + $0x8] sm:$0xff] %v4644_v28  ;;  %v4646_v5 = vadd.f32 %v4638_v50, %v12618_v36 }
 0xbf4   : > { %4653 = vst [vmem:[#allocation2 + $0x10] sm:$0xff] %v4645_v20  ;;  %v4647_v45 = vadd.f32 %v4639_v61, %v12657_v22  ;;  %v4611_v21 = vpop.f32.mrb[44].mxu1 }
 0xbf5   : > { %4660 = vst.msk [vmem:[#allocation2 + $0x10] sm:$0xff] %vm2379_vm15, %v12176_v39  ;;  %4654 = vst [vmem:[#allocation2 + $0x28] sm:$0xff] %v4646_v5  ;;  %v12879_v16 = vpack.c.bf16 %v4646_v5, %v4644_v28  ;;  %v4632_v44 = vadd.f32 %v4611_v21, %v12499_v48  ;;  %v4613_v4 = vpop.f32.mrb[45].mxu1 }
 0xbf6   : > { %4655 = vst [vmem:[#allocation2 + $0x30] sm:$0xff] %v4647_v45  ;;  %v4633_v30 = vadd.f32 %v4613_v4, %v12499_v48  ;;  %v4615_v41 = vpop.f32.mrb[46].mxu1 }
 0xbf7   : > { %4661 = vst.msk [vmem:[#allocation2 + $0x30] sm:$0xff] %vm2379_vm15, %v12176_v39  ;;  %v4640_v36 = vmax.f32 %v4632_v44, 0.0  ;;  %v4634_v22 = vadd.f32 %v4615_v41, %v12495_v46  ;;  %v4617_v20 = vpop.f32.mrb[47].mxu1  ;;  %7076 = vrot.lane.b32.xlu1 %v12879_v16, %s15935_s8  ;;  %4709 = vrot.lane.b32.xlu0 %v12879_v16, %s15846_s28 }
 0xbf8   : > { %v4641_v61 = vmax.f32 %v4633_v30, 0.0  ;;  %v4635_v31 = vadd.f32 %v4617_v20, %v12495_v46 }
 0xbf9   : > { %v4648_v24 = vadd.f32 %v4640_v36, %v12640_v34  ;;  %v4642_v48 = vmax.f32 %v4634_v22, 0.0  ;;  %v12902_v34 = vpop.permute.xlu0 %8598 }
 0xbfa   : > { %v4649_v42 = vadd.f32 %v4641_v61, %v12677_v58  ;;  %v4643_v19 = vmax.f32 %v4635_v31, 0.0  ;;  %15937 = vst [vmem:[#allocation86_spill] sm:$0xff] %v12902_v34 }
 0xbfb   : > { %4656 = vst [vmem:[#allocation2 + $0x48] sm:$0xff] %v4648_v24  ;;  %v4650_v39 = vadd.f32 %v4642_v48, %v12644_v60  ;;  %7214 = vrot.lane.b32.xlu1 %v12879_v16, %s15936_s9  ;;  %4819 = vrot.lane.b32.xlu0 %v12879_v16, %s15839_s27 }
 0xbfc   : > { %4657 = vst [vmem:[#allocation2 + $0x50] sm:$0xff] %v4649_v42  ;;  %v4651_v15 = vadd.f32 %v4643_v19, %v12681_v62  ;;  %v4686_v44 = vld [vmem:[#allocation2 + $0x10] sm:$0xff] }
 0xbfd   : > { %4662 = vst.msk [vmem:[#allocation2 + $0x50] sm:$0xff] %vm2379_vm15, %v11074_v25  ;;  %4658 = vst [vmem:[#allocation2 + $0x68] sm:$0xff] %v4650_v39  ;;  %v12900_v46 = vpack.c.bf16 %v4650_v39, %v4648_v24  ;;  %v12913_v60 = vpop.permute.xlu0 %7293 }
 0xbfe   : > { %4659 = vst [vmem:[#allocation2 + $0x70] sm:$0xff] %v4651_v15  ;;  %15940 = vst [vmem:[#allocation87_spill] sm:$0xff] %v12913_v60  ;;  %v4689_v4 = vld [vmem:[#allocation2 + $0x30] sm:$0xff] }
 0xbff   : > { %4663 = vst.msk [vmem:[#allocation2 + $0x70] sm:$0xff] %vm2379_vm15, %v11074_v25  ;;  %7352 = vrot.lane.b32.xlu1 %v12879_v16, %s15938_s23  ;;  %4887 = vrot.lane.b32.xlu0 %v12879_v16, %s15847_s20  ;;  %v12973_v30 = vpack.c.bf16 %v4689_v4, %v4686_v44 }
 0xc01   : > { %v12919_v58 = vpop.permute.xlu0 %8604 }
 0xc02   : > { %15942 = vst [vmem:[#allocation88_spill] sm:$0xff] %v12919_v58 }
 0xc03   : > { %7490 = vrot.lane.b32.xlu1 %v12879_v16, %s15939_s16  ;;  %4955 = vrot.lane.b32.xlu0 %v12879_v16, %s15842_s12 }
 0xc05   : > { %v12929_v62 = vpop.permute.xlu0 %7425 }
 0xc06   : > { %15945 = vst [vmem:[#allocation89_spill] sm:$0xff] %v12929_v62 }
 0xc07   : > { %7628 = vrot.lane.b32.xlu1 %v12879_v16, %s15941_s17  ;;  %5023 = vrot.lane.b32.xlu0 %v12879_v16, %s15848_s22 }
 0xc09   : > { %v12935_v28 = vpop.permute.xlu0 %8736 }
 0xc0a   : > { %15947 = vst [vmem:[#allocation90_spill] sm:$0xff] %v12935_v28 }
 0xc0b   : > { %7766 = vrot.lane.b32.xlu1 %v12879_v16, %s15943_s14  ;;  %5091 = vrot.lane.b32.xlu0 %v12879_v16, %s15849_s0 }
 0xc0d   : > { %v12945_v50 = vpop.permute.xlu0 %7431 }
 0xc0e   : > { %15950 = vst [vmem:[#allocation91_spill] sm:$0xff] %v12945_v50 }
 0xc0f   : > { %7904 = vrot.lane.b32.xlu1 %v12879_v16, %s15944_s3  ;;  %5159 = vrot.lane.b32.xlu0 %v12879_v16, %s15850_s2 }
 0xc11   : > { %v12951_v5 = vpop.permute.xlu0 %8742 }
 0xc12   : > { %15952 = vst [vmem:[#allocation92_spill] sm:$0xff] %v12951_v5 }
 0xc13   : > { %8042 = vrot.lane.b32.xlu1 %v12879_v16, %s15946_s7  ;;  %5227 = vrot.lane.b32.xlu0 %v12879_v16, %s15843_s11  ;;  %s15951_s7 = smov 73  }
 0xc15   : > { %v12961_v45 = vpop.permute.xlu0 %7563 }
 0xc16   : > { %15955 = vst [vmem:[#allocation93_spill] sm:$0xff] %v12961_v45 }
 0xc17   : > { %8180 = vrot.lane.b32.xlu1 %v12879_v16, %s15948_s25  ;;  %5295 = vrot.lane.b32.xlu0 %v12879_v16, %s15851_s1  ;;  %s15953_s25 = smov 71  }
 0xc19   : > { %v12967_v21 = vpop.permute.xlu0 %8874 }
 0xc1a   : > { %15957 = vst [vmem:[#allocation94_spill] sm:$0xff] %v12967_v21 }
 0xc1b   : > { %8318 = vrot.lane.b32.xlu1 %v12879_v16, %s15949_s5  ;;  %5363 = vrot.lane.b32.xlu0 %v12879_v16, %s15852_s26  ;;  %s15954_s5 = smov 69  }
 0xc1d   : > { %v12979_v41 = vpop.permute.xlu0 %7569 }
 0xc1e   : > { %15960 = vst [vmem:[#allocation95_spill] sm:$0xff] %v12979_v41 }
 0xc1f   : > { %8456 = vrot.lane.b32.xlu1 %v12879_v16, %s15951_s7  ;;  %5431 = vrot.lane.b32.xlu0 %v12879_v16, %s15853_s30  ;;  %s15956_s7 = smov 67  }
 0xc21   : > { %v12985_v36 = vpop.permute.xlu0 %8880 }
 0xc22   : > { %15961 = vst [vmem:[#allocation96_spill] sm:$0xff] %v12985_v36 }
 0xc23   : > { %8594 = vrot.lane.b32.xlu1 %v12879_v16, %s15953_s25  ;;  %5499 = vrot.lane.b32.xlu0 %v12879_v16, %s15854_s18  ;;  %s15958_s25 = smov 65  }
 0xc25   : > { %v12995_v22 = vpop.permute.xlu0 %7701 }
 0xc26   : > { %15962 = vst [vmem:[#allocation97_spill] sm:$0xff] %v12995_v22 }
 0xc27   : > { %8732 = vrot.lane.b32.xlu1 %v12879_v16, %s15954_s5  ;;  %5567 = vrot.lane.b32.xlu0 %v12879_v16, %s15855_s29  ;;  %s15959_s5 = smov 63  }
 0xc29   : > { %v13001_v20 = vpop.permute.xlu0 %9012 }
 0xc2a   : > { %15963 = vst [vmem:[#allocation98_spill] sm:$0xff] %v13001_v20 }
 0xc2b   : > { %8870 = vrot.lane.b32.xlu1 %v12879_v16, %s15956_s7  ;;  %5635 = vrot.lane.b32.xlu0 %v12879_v16, %s15856_s4  ;;  %s15965_s7 = smov 106  }
 0xc2d   : > { %v13011_v61 = vpop.permute.xlu0 %7707 }
 0xc2e   : > { %15966 = vst [vmem:[#allocation99_spill] sm:$0xff] %v13011_v61 }
 0xc2f   : > { %9008 = vrot.lane.b32.xlu1 %v12879_v16, %s15958_s25  ;;  %5703 = vrot.lane.b32.xlu0 %v12879_v16, %s15857_s6  ;;  %s15964_s25 = smov 107  }
 0xc31   : > { %v13017_v31 = vpop.permute.xlu0 %9018 }
 0xc32   : > { %15968 = vst [vmem:[#allocation100_spill] sm:$0xff] %v13017_v31 }
 0xc33   : > { %9145 = vrot.lane.b32.xlu1 %v12879_v16, %s15959_s5  ;;  %5771 = vrot.lane.b32.xlu0 %v12879_v16, %s15844_s21 }
 0xc35   : > { %v13027_v24 = vpop.permute.xlu0 %7839 }
 0xc36   : > { %15971 = vst [vmem:[#allocation101_spill] sm:$0xff] %v13027_v24 }
 0xc37   : > { %5839 = vrot.lane.b32.xlu0 %v12879_v16, %s15858_s15  ;;  %4711 = vrot.lane.b32.xlu1 %v12973_v30, %s15846_s28 }
 0xc39   : > { %v13033_v48 = vpop.permute.xlu0 %9149 }
 0xc3a   : > { %15973 = vst [vmem:[#allocation102_spill] sm:$0xff] %v13033_v48 }
 0xc3b   : > { %5907 = vrot.lane.b32.xlu0 %v12879_v16, %s15859_s19  ;;  %4821 = vrot.lane.b32.xlu1 %v12973_v30, %s15839_s27 }
 0xc3d   : > { %v13043_v42 = vpop.permute.xlu0 %7845 }
 0xc3e   : > { %15976 = vst [vmem:[#allocation103_spill] sm:$0xff] %v13043_v42 }
 0xc3f   : > { %5975 = vrot.lane.b32.xlu0 %v12879_v16, %s15860_s24  ;;  %4889 = vrot.lane.b32.xlu1 %v12973_v30, %s15847_s20  ;;  %s15967_s20 = smov 105  }
 0xc43   : > { %6043 = vrot.lane.b32.xlu0 %v12879_v16, %s15861_s10  ;;  %4957 = vrot.lane.b32.xlu1 %v12973_v30, %s15842_s12  ;;  %s15969_s12 = smov 104  }
 0xc47   : > { %6111 = vrot.lane.b32.xlu0 %v12879_v16, %s15964_s25  ;;  %5025 = vrot.lane.b32.xlu1 %v12973_v30, %s15848_s22  ;;  %s15970_s22 = smov 103  }
 0xc4b   : > { %6180 = vrot.lane.b32.xlu0 %v12879_v16, %s15965_s7  ;;  %5093 = vrot.lane.b32.xlu1 %v12973_v30, %s15849_s0  ;;  %s15972_s0 = smov 102  }
 0xc4f   : > { %6249 = vrot.lane.b32.xlu0 %v12879_v16, %s15967_s20  ;;  %5161 = vrot.lane.b32.xlu1 %v12973_v30, %s15850_s2  ;;  %s15974_s2 = smov 101  }
 0xc53   : > { %6318 = vrot.lane.b32.xlu0 %v12879_v16, %s15969_s12  ;;  %5229 = vrot.lane.b32.xlu1 %v12973_v30, %s15843_s11  ;;  %s15975_s11 = smov 100  }
 0xc57   : > { %6387 = vrot.lane.b32.xlu0 %v12879_v16, %s15970_s22  ;;  %5297 = vrot.lane.b32.xlu1 %v12973_v30, %s15851_s1  ;;  %s15977_s1 = smov 99  }
 0xc5b   : > { %6456 = vrot.lane.b32.xlu0 %v12879_v16, %s15972_s0  ;;  %5365 = vrot.lane.b32.xlu1 %v12973_v30, %s15852_s26  ;;  %s15979_s26 = smov 98  }
 0xc5f   : > { %6525 = vrot.lane.b32.xlu0 %v12879_v16, %s15974_s2  ;;  %5433 = vrot.lane.b32.xlu1 %v12973_v30, %s15853_s30 }
 0xc63   : > { %6594 = vrot.lane.b32.xlu0 %v12879_v16, %s15975_s11  ;;  %5501 = vrot.lane.b32.xlu1 %v12973_v30, %s15854_s18  ;;  %s15981_s18 = smov 97  }
 0xc67   : > { %6663 = vrot.lane.b32.xlu0 %v12879_v16, %s15977_s1  ;;  %5569 = vrot.lane.b32.xlu1 %v12973_v30, %s15855_s29 }
 0xc69   : > { %v13049_v19 = vpop.permute.xlu1 %7076  ;;  %v13051_v39 = vpop.permute.xlu0 %4709 }
 0xc6a   : > { %15978 = vst [vmem:[#allocation104_spill] sm:$0xff] %v13049_v19 }
 0xc6b   : > { %6732 = vrot.lane.b32.xlu0 %v12879_v16, %s15979_s26  ;;  %5637 = vrot.lane.b32.xlu1 %v12973_v30, %s15856_s4  ;;  %s15984_s4 = smov 95  }
 0xc6d   : > { %v13057_v15 = vpop.permute.xlu1 %7214  ;;  %v13059_v25 = vpop.permute.xlu0 %4819 }
 0xc6e   : > { %15980 = vst [vmem:[#allocation105_spill] sm:$0xff] %v13057_v15 }
 0xc6f   : > { %6801 = vrot.lane.b32.xlu0 %v12879_v16, %s15981_s18  ;;  %5705 = vrot.lane.b32.xlu1 %v12973_v30, %s15857_s6  ;;  %s15986_s6 = smov 94  }
 0xc71   : > { %v13065_v44 = vpop.permute.xlu1 %7352  ;;  %v13067_v4 = vpop.permute.xlu0 %4887 }
 0xc72   : > { %15982 = vst [vmem:[#allocation106_spill] sm:$0xff] %v13065_v44 }
 0xc73   : > { %6870 = vrot.lane.b32.xlu0 %v12879_v16, %s15862_s13  ;;  %5773 = vrot.lane.b32.xlu1 %v12973_v30, %s15844_s21  ;;  %s15988_s21 = smov 92  }
 0xc75   : > { %v13073_v42 = vpop.permute.xlu1 %7490  ;;  %v13075_v48 = vpop.permute.xlu0 %4955 }
 0xc76   : > { %15983 = vst [vmem:[#allocation107_spill] sm:$0xff] %v13073_v42 }
 0xc77   : > { %6938 = vrot.lane.b32.xlu0 %v12879_v16, %s15984_s4  ;;  %5841 = vrot.lane.b32.xlu1 %v12973_v30, %s15858_s15  ;;  %s15990_s15 = smov 90  }
 0xc79   : > { %v13081_v31 = vpop.permute.xlu1 %7628  ;;  %v13083_v24 = vpop.permute.xlu0 %5023 }
 0xc7a   : > { %15985 = vst [vmem:[#allocation108_spill] sm:$0xff] %v13081_v31 }
 0xc7b   : > { %7007 = vrot.lane.b32.xlu0 %v12879_v16, %s15986_s6  ;;  %5909 = vrot.lane.b32.xlu1 %v12973_v30, %s15859_s19  ;;  %s15992_s19 = smov 88  }
 0xc7d   : > { %v13089_v61 = vpop.permute.xlu1 %7766  ;;  %v13091_v20 = vpop.permute.xlu0 %5091 }
 0xc7e   : > { %15987 = vst [vmem:[#allocation109_spill] sm:$0xff] %v13089_v61 }
 0xc7f   : > { %7145 = vrot.lane.b32.xlu0 %v12879_v16, %s15988_s21  ;;  %5977 = vrot.lane.b32.xlu1 %v12973_v30, %s15860_s24  ;;  %s15994_s24 = smov 86  }
 0xc81   : > { %v13097_v36 = vpop.permute.xlu1 %7904  ;;  %v13099_v22 = vpop.permute.xlu0 %5159 }
 0xc82   : > { %15989 = vst [vmem:[#allocation110_spill] sm:$0xff] %v13097_v36 }
 0xc83   : > { %7283 = vrot.lane.b32.xlu0 %v12879_v16, %s15990_s15  ;;  %6045 = vrot.lane.b32.xlu1 %v12973_v30, %s15861_s10  ;;  %s15996_s10 = smov 84  }
 0xc85   : > { %v13105_v41 = vpop.permute.xlu1 %8042  ;;  %v13107_v21 = vpop.permute.xlu0 %5227 }
 0xc86   : > { %15991 = vst [vmem:[#allocation111_spill] sm:$0xff] %v13105_v41 }
 0xc87   : > { %7421 = vrot.lane.b32.xlu0 %v12879_v16, %s15992_s19  ;;  %6113 = vrot.lane.b32.xlu1 %v12973_v30, %s15964_s25  ;;  %s15999_s25 = smov 82  }
 0xc89   : > { %v13113_v5 = vpop.permute.xlu1 %8180  ;;  %v13115_v45 = vpop.permute.xlu0 %5295 }
 0xc8a   : > { %15993 = vst [vmem:[#allocation112_spill] sm:$0xff] %v13113_v5 }
 0xc8b   : > { %7559 = vrot.lane.b32.xlu0 %v12879_v16, %s15994_s24  ;;  %6182 = vrot.lane.b32.xlu1 %v12973_v30, %s15965_s7 }
 0xc8d   : > { %v13121_v50 = vpop.permute.xlu1 %8318  ;;  %v13123_v28 = vpop.permute.xlu0 %5363 }
 0xc8e   : > { %15995 = vst [vmem:[#allocation113_spill] sm:$0xff] %v13121_v50 }
 0xc8f   : > { %7697 = vrot.lane.b32.xlu0 %v12879_v16, %s15996_s10  ;;  %6251 = vrot.lane.b32.xlu1 %v12973_v30, %s15967_s20 }
 0xc91   : > { %v13129_v58 = vpop.permute.xlu1 %8456  ;;  %v13131_v62 = vpop.permute.xlu0 %5431 }
 0xc92   : > { %15997 = vst [vmem:[#allocation114_spill] sm:$0xff] %v13129_v58  ;;  %15998 = vst [vmem:[#allocation115_spill] sm:$0xff] %v13131_v62 }
 0xc93   : > { %7835 = vrot.lane.b32.xlu0 %v12879_v16, %s15999_s25  ;;  %6320 = vrot.lane.b32.xlu1 %v12973_v30, %s15969_s12 }
 0xc95   : > { %v13137_v60 = vpop.permute.xlu1 %8594  ;;  %v13139_v34 = vpop.permute.xlu0 %5499 }
 0xc96   : > { %16000 = vst [vmem:[#allocation116_spill] sm:$0xff] %v13137_v60 }
 0xc97   : > { %6389 = vrot.lane.b32.xlu1 %v12973_v30, %s15970_s22  ;;  %7082 = vrot.lane.b32.xlu0 %v12900_v46, %s15935_s8 }
 0xc99   : > { %v13145_v63 = vpop.permute.xlu1 %8732  ;;  %v13147_v58 = vpop.permute.xlu0 %5567 }
 0xc9a   : > { %16001 = vst [vmem:[#allocation117_spill] sm:$0xff] %v13145_v63  ;;  %16002 = vst [vmem:[#allocation118_spill] sm:$0xff] %v13147_v58 }
 0xc9b   : > { %6458 = vrot.lane.b32.xlu1 %v12973_v30, %s15972_s0  ;;  %7220 = vrot.lane.b32.xlu0 %v12900_v46, %s15936_s9 }
 0xc9d   : > { %v13153_v35 = vpop.permute.xlu1 %8870  ;;  %v13155_v60 = vpop.permute.xlu0 %5635 }
 0xc9e   : > { %16003 = vst [vmem:[#allocation119_spill] sm:$0xff] %v13153_v35 }
 0xc9f   : > { %6527 = vrot.lane.b32.xlu1 %v12973_v30, %s15974_s2  ;;  %7358 = vrot.lane.b32.xlu0 %v12900_v46, %s15938_s23 }
 0xca1   : > { %v13161_v18 = vpop.permute.xlu1 %9008  ;;  %v13163_v63 = vpop.permute.xlu0 %5703 }
 0xca2   : > { %16004 = vst [vmem:[#allocation120_spill] sm:$0xff] %v13161_v18  ;;  %16005 = vst [vmem:[#allocation121_spill] sm:$0xff] %v13163_v63 }
 0xca3   : > { %6596 = vrot.lane.b32.xlu1 %v12973_v30, %s15975_s11  ;;  %7496 = vrot.lane.b32.xlu0 %v12900_v46, %s15939_s16 }
 0xca5   : > { %v13169_v57 = vpop.permute.xlu1 %9145  ;;  %v13171_v35 = vpop.permute.xlu0 %5771 }
 0xca6   : > { %16006 = vst [vmem:[#allocation122_spill] sm:$0xff] %v13169_v57  ;;  %16007 = vst [vmem:[#allocation123_spill] sm:$0xff] %v13171_v35 }
 0xca7   : > { %6665 = vrot.lane.b32.xlu1 %v12973_v30, %s15977_s1  ;;  %7634 = vrot.lane.b32.xlu0 %v12900_v46, %s15941_s17 }
 0xca9   : > { %v13177_v50 = vpop.permute.xlu0 %5839  ;;  %v4712_v18 = vpop.permute.xlu1 %4711 }
 0xcaa   : > { %16008 = vst [vmem:[#allocation124_spill] sm:$0xff] %v13177_v50  ;;  %v4722_v5 = vsel %vm452_vm0, %v4712_v18, %v12497_v47  ;;  %v4721_v41 = vsel %vm452_vm0, %v13051_v39, %v4712_v18 }
 0xcab   : > { %6734 = vrot.lane.b32.xlu1 %v12973_v30, %s15979_s26  ;;  %4732 = vmatprep.subr.bf16.mxu1 %v4722_v5  ;;  %s16011_s26 = smov 79  }
 0xcac   : > { %7772 = vrot.lane.b32.xlu0 %v12900_v46, %s15943_s14  ;;  %4733 = vmatpush1.bf16.msra.mxu1 %v4721_v41 }
 0xcad   : > { %v13187_v57 = vpop.permute.xlu0 %5907  ;;  %v13189_v36 = vpop.permute.xlu1 %4821 }
 0xcae   : > { %16009 = vst [vmem:[#allocation125_spill] sm:$0xff] %v13187_v57 }
 0xcaf   : > { %6803 = vrot.lane.b32.xlu1 %v12973_v30, %s15981_s18  ;;  %s16013_s18 = smov 77  }
 0xcb0   : > { %7910 = vrot.lane.b32.xlu0 %v12900_v46, %s15944_s3 }
 0xcb1   : > { %v13195_v47 = vpop.permute.xlu0 %5975  ;;  %v13197_v18 = vpop.permute.xlu1 %4889 }
 0xcb2   : > { %16010 = vst [vmem:[#allocation126_spill] sm:$0xff] %v13195_v47  ;;  %v4692_v47 = vld [vmem:[#allocation2 + $0x50] sm:$0xff] }
 0xcb3   : > { %6872 = vrot.lane.b32.xlu1 %v12973_v30, %s15862_s13 }
 0xcb4   : > { %8048 = vrot.lane.b32.xlu0 %v12900_v46, %s16011_s26 }
 0xcb5   : > { %v13203_v5 = vpop.permute.xlu0 %6043  ;;  %v13205_v41 = vpop.permute.xlu1 %4957 }
 0xcb6   : > { %16012 = vst [vmem:[#allocation127_spill] sm:$0xff] %v13203_v5 }
 0xcb7   : > { %6940 = vrot.lane.b32.xlu1 %v12973_v30, %s15984_s4 }
 0xcb8   : > { %8186 = vrot.lane.b32.xlu0 %v12900_v46, %s16013_s18 }
 0xcb9   : > { %v13211_v39 = vpop.permute.xlu0 %6111  ;;  %v13213_v61 = vpop.permute.xlu1 %5025 }
 0xcba   : > { %16014 = vst [vmem:[#allocation128_spill] sm:$0xff] %v13211_v39 }
 0xcbb   : > { %7009 = vrot.lane.b32.xlu1 %v12973_v30, %s15986_s6 }
 0xcbc   : > { %7013 = vrot.lane.b32.xlu0 %v12900_v46, %s15986_s6  ;;  %s15749_s6 = smov 80  }
 0xcbd   : > { %v13219_v31 = vpop.permute.xlu0 %6180  ;;  %v5094_v42 = vpop.permute.xlu1 %5093 }
 0xcbe   : > { %16015 = vst [vmem:[#allocation129_spill] sm:$0xff] %v13219_v31  ;;  %v5104_v44 = vsel %vm981_vm6, %v5094_v42, %v12535_v54  ;;  %v5103_v15 = vsel %vm981_vm6, %v13091_v20, %v5094_v42 }
 0xcbf   : > { %7078 = vrot.lane.b32.xlu1 %v12973_v30, %s15935_s8  ;;  %5114 = vmatprep.subr.bf16.mxu0 %v5104_v44 }
 0xcc0   : > { %7151 = vrot.lane.b32.xlu0 %v12900_v46, %s15988_s21  ;;  %5115 = vmatpush1.bf16.msra.mxu0 %v5103_v15 }
 0xcc1   : > { %v13229_v19 = vpop.permute.xlu0 %6249  ;;  %v13231_v39 = vpop.permute.xlu1 %5161 }
 0xcc2   : > { %16016 = vst [vmem:[#allocation130_spill] sm:$0xff] %v13229_v19 }
 0xcc3   : > { %7216 = vrot.lane.b32.xlu1 %v12973_v30, %s15936_s9 }
 0xcc4   : > { %7289 = vrot.lane.b32.xlu0 %v12900_v46, %s15990_s15 }
 0xcc5   : > { %v13237_v54 = vpop.permute.xlu0 %6318  ;;  %v13239_v20 = vpop.permute.xlu1 %5229 }
 0xcc6   : > { %16017 = vst [vmem:[#allocation131_spill] sm:$0xff] %v13237_v54 }
 0xcc7   : > { %7354 = vrot.lane.b32.xlu1 %v12973_v30, %s15938_s23 }
 0xcc8   : > { %7427 = vrot.lane.b32.xlu0 %v12900_v46, %s15992_s19 }
 0xcc9   : > { %v13245_v42 = vpop.permute.xlu0 %6387  ;;  %v13247_v15 = vpop.permute.xlu1 %5297 }
 0xcca   : > { %16018 = vst [vmem:[#allocation132_spill] sm:$0xff] %v13245_v42  ;;  %v4695_v42 = vld [vmem:[#allocation2 + $0x70] sm:$0xff] }
 0xccb   : > { %7492 = vrot.lane.b32.xlu1 %v12973_v30, %s15939_s16  ;;  %v13267_v0 = vpack.c.bf16 %v4695_v42, %v4692_v47 }
 0xccc   : > { %7565 = vrot.lane.b32.xlu0 %v12900_v46, %s15994_s24 }
 0xccd   : > { %v13253_v44 = vpop.permute.xlu0 %6456  ;;  %v13255_v19 = vpop.permute.xlu1 %5365 }
 0xcce   : > { %16019 = vst [vmem:[#allocation133_spill] sm:$0xff] %v13253_v44 }
 0xccf   : > { %7630 = vrot.lane.b32.xlu1 %v12973_v30, %s15941_s17 }
 0xcd0   : > { %7703 = vrot.lane.b32.xlu0 %v12900_v46, %s15996_s10 }
 0xcd1   : > { %v13261_v26 = vpop.permute.xlu0 %6525  ;;  %v13263_v54 = vpop.permute.xlu1 %5433 }
 0xcd2   : > { %16020 = vst [vmem:[#allocation134_spill] sm:$0xff] %v13261_v26  ;;  %16021 = vst [vmem:[#allocation135_spill] sm:$0xff] %v13263_v54 }
 0xcd3   : > { %7768 = vrot.lane.b32.xlu1 %v12973_v30, %s15943_s14  ;;  %s16040_s14 = smov 80  }
 0xcd4   : > { %7841 = vrot.lane.b32.xlu0 %v12900_v46, %s15999_s25 }
 0xcd5   : > { %v13271_v44 = vpop.permute.xlu0 %6594  ;;  %v13273_v50 = vpop.permute.xlu1 %5501 }
 0xcd6   : > { %16022 = vst [vmem:[#allocation136_spill] sm:$0xff] %v13271_v44 }
 0xcd7   : > { %7906 = vrot.lane.b32.xlu1 %v12973_v30, %s15944_s3  ;;  %s16028_s3 = smov 75  }
 0xcd8   : > { %4717 = vrot.lane.b32.xlu0 %v13267_v0, %s15846_s28 }
 0xcd9   : > { %v13279_v26 = vpop.permute.xlu0 %6663  ;;  %v13281_v32 = vpop.permute.xlu1 %5569 }
 0xcda   : > { %16023 = vst [vmem:[#allocation137_spill] sm:$0xff] %v13279_v26  ;;  %16024 = vst [vmem:[#allocation138_spill] sm:$0xff] %v13281_v32 }
 0xcdb   : > { %8044 = vrot.lane.b32.xlu1 %v12973_v30, %s16011_s26  ;;  %s15754_s26 = smov 61  }
 0xcdc   : > { %9155 = vrot.lane.b32.xlu0 %v15894_v29, %s15959_s5 }
 0xcdd   : > { %v13287_v47 = vpop.permute.xlu0 %6732  ;;  %v13289_v42 = vpop.permute.xlu1 %5637 }
 0xcde   : > { %16025 = vst [vmem:[#allocation139_spill] sm:$0xff] %v13287_v47 }
 0xcdf   : > { %8182 = vrot.lane.b32.xlu1 %v12973_v30, %s16013_s18  ;;  %s16033_s18 = smov 73  }
 0xce0   : > { %7977 = vrot.lane.b32.xlu0 %v15894_v29, %s15749_s6 }
 0xce1   : > { %v13295_v26 = vpop.permute.xlu0 %6801  ;;  %v13297_v44 = vpop.permute.xlu1 %5705 }
 0xce2   : > { %16026 = vst [vmem:[#allocation140_spill] sm:$0xff] %v13295_v26  ;;  %16027 = vst [vmem:[#allocation141_spill] sm:$0xff] %v13297_v44 }
 0xce3   : > { %8320 = vrot.lane.b32.xlu1 %v12973_v30, %s16028_s3 }
 0xce4   : > { %7973 = vrot.lane.b32.xlu0 %v12879_v16, %s15749_s6  ;;  %s16036_s6 = smov 125  }
 0xce5   : > { %v13303_v47 = vpop.permute.xlu0 %6870  ;;  %v13305_v31 = vpop.permute.xlu1 %5773 }
 0xce6   : > { %16029 = vst [vmem:[#allocation142_spill] sm:$0xff] %v13303_v47  ;;  %16030 = vst [vmem:[#allocation143_spill] sm:$0xff] %v13305_v31  ;;  %v4831_v31 = vsel %vm609_vm1, %v13059_v25, %v13189_v36 }
 0xce7   : > { %7147 = vrot.lane.b32.xlu1 %v12973_v30, %s15988_s21  ;;  %s16039_s21 = smov 71  }
 0xce8   : > { %4827 = vrot.lane.b32.xlu0 %v13267_v0, %s15839_s27 }
 0xce9   : > { %v13311_v63 = vpop.permute.xlu0 %6938  ;;  %v13313_v26 = vpop.permute.xlu1 %5841 }
 0xcea   : > { %16031 = vst [vmem:[#allocation144_spill] sm:$0xff] %v13311_v63  ;;  %16032 = vst [vmem:[#allocation145_spill] sm:$0xff] %v13313_v26 }
 0xceb   : > { %8458 = vrot.lane.b32.xlu1 %v12973_v30, %s16033_s18 }
 0xcec   : > { %9287 = vrot.lane.b32.xlu0 %v15894_v29, %s15754_s26  ;;  %s16043_s26 = smov 124  }
 0xced   : > { %v13319_v47 = vpop.permute.xlu0 %7007  ;;  %v13321_v44 = vpop.permute.xlu1 %5909 }
 0xcee   : > { %16034 = vst [vmem:[#allocation146_spill] sm:$0xff] %v13319_v47  ;;  %16035 = vst [vmem:[#allocation147_spill] sm:$0xff] %v13321_v44 }
 0xcef   : > { %7285 = vrot.lane.b32.xlu1 %v12973_v30, %s15990_s15  ;;  %s16046_s15 = smov 69  }
 0xcf0   : > { %4895 = vrot.lane.b32.xlu0 %v13267_v0, %s16036_s6 }
 0xcf1   : > { %v13327_v63 = vpop.permute.xlu0 %7145  ;;  %v13329_v26 = vpop.permute.xlu1 %5977 }
 0xcf2   : > { %16037 = vst [vmem:[#allocation148_spill] sm:$0xff] %v13327_v63  ;;  %16038 = vst [vmem:[#allocation149_spill] sm:$0xff] %v13329_v26 }
 0xcf3   : > { %8596 = vrot.lane.b32.xlu1 %v12973_v30, %s16039_s21  ;;  %s16052_s21 = smov 67  }
 0xcf4   : > { %7983 = vrot.lane.b32.xlu0 %v15894_v29, %s16040_s14 }
 0xcf5   : > { %v13335_v5 = vpop.permute.xlu0 %7283  ;;  %v13337_v47 = vpop.permute.xlu1 %6045 }
 0xcf6   : > { %16041 = vst [vmem:[#allocation150_spill] sm:$0xff] %v13335_v5  ;;  %16042 = vst [vmem:[#allocation151_spill] sm:$0xff] %v13337_v47 }
 0xcf7   : > { %7423 = vrot.lane.b32.xlu1 %v12973_v30, %s15992_s19  ;;  %s16049_s19 = smov 123  }
 0xcf8   : > { %4963 = vrot.lane.b32.xlu0 %v13267_v0, %s16043_s26 }
 0xcf9   : > { %v13343_v58 = vpop.permute.xlu0 %7421  ;;  %v13345_v63 = vpop.permute.xlu1 %6113 }
 0xcfa   : > { %16044 = vst [vmem:[#allocation152_spill] sm:$0xff] %v13343_v58  ;;  %16045 = vst [vmem:[#allocation153_spill] sm:$0xff] %v13345_v63 }
 0xcfb   : > { %8734 = vrot.lane.b32.xlu1 %v12973_v30, %s16046_s15  ;;  %s16053_s15 = smov 122  }
 0xcfc   : > { %7979 = vrot.lane.b32.xlu0 %v12900_v46, %s16040_s14  ;;  %s16059_s14 = smov 65  }
 0xcfd   : > { %v13351_v26 = vpop.permute.xlu0 %7559  ;;  %v13353_v5 = vpop.permute.xlu1 %6182 }
 0xcfe   : > { %16047 = vst [vmem:[#allocation154_spill] sm:$0xff] %v13351_v26  ;;  %16048 = vst [vmem:[#allocation155_spill] sm:$0xff] %v13353_v5 }
 0xcff   : > { %7561 = vrot.lane.b32.xlu1 %v12973_v30, %s15994_s24  ;;  %s16056_s24 = smov 121  }
 0xd00   : > { %5031 = vrot.lane.b32.xlu0 %v13267_v0, %s16049_s19 }
 0xd01   : > { %v13359_v47 = vpop.permute.xlu0 %7697  ;;  %v13361_v58 = vpop.permute.xlu1 %6251 }
 0xd02   : > { %16050 = vst [vmem:[#allocation156_spill] sm:$0xff] %v13359_v47  ;;  %16051 = vst [vmem:[#allocation157_spill] sm:$0xff] %v13361_v58 }
 0xd03   : > { %8872 = vrot.lane.b32.xlu1 %v12973_v30, %s16052_s21  ;;  %s16060_s21 = smov 120  }
 0xd04   : > { %5099 = vrot.lane.b32.xlu0 %v13267_v0, %s16053_s15 }
 0xd05   : > { %v13367_v63 = vpop.permute.xlu0 %7835  ;;  %v13369_v26 = vpop.permute.xlu1 %6320 }
 0xd06   : > { %16054 = vst [vmem:[#allocation158_spill] sm:$0xff] %v13367_v63  ;;  %16055 = vst [vmem:[#allocation159_spill] sm:$0xff] %v13369_v26 }
 0xd07   : > { %7699 = vrot.lane.b32.xlu1 %v12973_v30, %s15996_s10  ;;  %s16063_s10 = smov 119  }
 0xd08   : > { %5167 = vrot.lane.b32.xlu0 %v13267_v0, %s16056_s24 }
 0xd09   : > { %v13375_v5 = vpop.permute.xlu1 %6389  ;;  %v13377_v47 = vpop.permute.xlu0 %7082 }
 0xd0a   : > { %16057 = vst [vmem:[#allocation160_spill] sm:$0xff] %v13375_v5  ;;  %16058 = vst [vmem:[#allocation161_spill] sm:$0xff] %v13377_v47 }
 0xd0b   : > { %9010 = vrot.lane.b32.xlu1 %v12973_v30, %s16059_s14  ;;  %s16066_s14 = smov 118  }
 0xd0c   : > { %5235 = vrot.lane.b32.xlu0 %v13267_v0, %s16060_s21 }
 0xd0d   : > { %v13383_v58 = vpop.permute.xlu1 %6458  ;;  %v13385_v63 = vpop.permute.xlu0 %7220 }
 0xd0e   : > { %16061 = vst [vmem:[#allocation162_spill] sm:$0xff] %v13383_v58  ;;  %16062 = vst [vmem:[#allocation163_spill] sm:$0xff] %v13385_v63 }
 0xd0f   : > { %7837 = vrot.lane.b32.xlu1 %v12973_v30, %s15999_s25  ;;  %s16071_s25 = smov 116  }
 0xd10   : > { %5303 = vrot.lane.b32.xlu0 %v13267_v0, %s16063_s10 }
 0xd11   : > { %v13391_v26 = vpop.permute.xlu1 %6527  ;;  %v13393_v5 = vpop.permute.xlu0 %7358 }
 0xd12   : > { %16064 = vst [vmem:[#allocation164_spill] sm:$0xff] %v13391_v26  ;;  %16065 = vst [vmem:[#allocation165_spill] sm:$0xff] %v13393_v5 }
 0xd13   : > { %9147 = vrot.lane.b32.xlu1 %v12973_v30, %s15959_s5 }
 0xd14   : > { %5371 = vrot.lane.b32.xlu0 %v13267_v0, %s16066_s14 }
 0xd15   : > { %v13399_v47 = vpop.permute.xlu1 %6596  ;;  %v13401_v58 = vpop.permute.xlu0 %7496 }
 0xd16   : > { %16067 = vst [vmem:[#allocation166_spill] sm:$0xff] %v13399_v47  ;;  %16068 = vst [vmem:[#allocation167_spill] sm:$0xff] %v13401_v58 }
 0xd17   : > { %4715 = vrot.lane.b32.xlu1 %v12900_v46, %s15846_s28  ;;  %s16082_s28 = smov 112  }
 0xd18   : > { %5439 = vrot.lane.b32.xlu0 %v13267_v0, %s15853_s30 }
 0xd19   : > { %v13407_v63 = vpop.permute.xlu1 %6665  ;;  %v13409_v26 = vpop.permute.xlu0 %7634 }
 0xd1a   : > { %16069 = vst [vmem:[#allocation168_spill] sm:$0xff] %v13407_v63  ;;  %16070 = vst [vmem:[#allocation169_spill] sm:$0xff] %v13409_v26 }
 0xd1b   : > { %4825 = vrot.lane.b32.xlu1 %v12900_v46, %s15839_s27  ;;  %s16076_s27 = smov 114  }
 0xd1c   : > { %5507 = vrot.lane.b32.xlu0 %v13267_v0, %s16071_s25 }
 0xd1d   : > { %v13415_v5 = vpop.permute.xlu1 %6734 }
 0xd1e   : > { %16072 = vst [vmem:[#allocation170_spill] sm:$0xff] %v13415_v5  ;;  %v13417_v47 = vpop.permute.xlu0 %7772 }
 0xd1f   : > { %16073 = vst [vmem:[#allocation171_spill] sm:$0xff] %v13417_v47  ;;  %4893 = vrot.lane.b32.xlu1 %v12900_v46, %s16036_s6  ;;  %s16079_s6 = smov 113  }
 0xd20   : > { %5575 = vrot.lane.b32.xlu0 %v13267_v0, %s15855_s29 }
 0xd21   : > { %v13423_v58 = vpop.permute.xlu1 %6803 }
 0xd22   : > { %16074 = vst [vmem:[#allocation172_spill] sm:$0xff] %v13423_v58  ;;  %v13425_v63 = vpop.permute.xlu0 %7910 }
 0xd23   : > { %16075 = vst [vmem:[#allocation173_spill] sm:$0xff] %v13425_v63  ;;  %4961 = vrot.lane.b32.xlu1 %v12900_v46, %s16043_s26  ;;  %s16130_s26 = smov 83  }
 0xd24   : > { %5643 = vrot.lane.b32.xlu0 %v13267_v0, %s16076_s27 }
 0xd25   : > { %v13431_v26 = vpop.permute.xlu1 %6872 }
 0xd26   : > { %16077 = vst [vmem:[#allocation174_spill] sm:$0xff] %v13431_v26  ;;  %v13433_v5 = vpop.permute.xlu0 %8048 }
 0xd27   : > { %16078 = vst [vmem:[#allocation175_spill] sm:$0xff] %v13433_v5  ;;  %5029 = vrot.lane.b32.xlu1 %v12900_v46, %s16049_s19  ;;  %s16085_s19 = smov 111  }
 0xd28   : > { %5711 = vrot.lane.b32.xlu0 %v13267_v0, %s16079_s6 }
 0xd29   : > { %v13439_v47 = vpop.permute.xlu1 %6940 }
 0xd2a   : > { %16080 = vst [vmem:[#allocation176_spill] sm:$0xff] %v13439_v47  ;;  %v13441_v58 = vpop.permute.xlu0 %8186 }
 0xd2b   : > { %16081 = vst [vmem:[#allocation177_spill] sm:$0xff] %v13441_v58  ;;  %5097 = vrot.lane.b32.xlu1 %v12900_v46, %s16053_s15  ;;  %s16088_s15 = smov 110  }
 0xd2c   : > { %5779 = vrot.lane.b32.xlu0 %v13267_v0, %s16082_s28 }
 0xd2d   : > { %v13447_v63 = vpop.permute.xlu1 %7009 }
 0xd2e   : > { %16083 = vst [vmem:[#allocation178_spill] sm:$0xff] %v13447_v63  ;;  %v13449_v26 = vpop.permute.xlu0 %7013 }
 0xd2f   : > { %16084 = vst [vmem:[#allocation179_spill] sm:$0xff] %v13449_v26  ;;  %5165 = vrot.lane.b32.xlu1 %v12900_v46, %s16056_s24  ;;  %s16091_s24 = smov 109  }
 0xd30   : > { %5847 = vrot.lane.b32.xlu0 %v13267_v0, %s16085_s19 }
 0xd31   : > { %v13455_v5 = vpop.permute.xlu1 %7078 }
 0xd32   : > { %16086 = vst [vmem:[#allocation180_spill] sm:$0xff] %v13455_v5  ;;  %v13457_v47 = vpop.permute.xlu0 %7151 }
 0xd33   : > { %16087 = vst [vmem:[#allocation181_spill] sm:$0xff] %v13457_v47  ;;  %5233 = vrot.lane.b32.xlu1 %v12900_v46, %s16060_s21  ;;  %s16094_s21 = smov 108  }
 0xd34   : > { %5915 = vrot.lane.b32.xlu0 %v13267_v0, %s16088_s15 }
 0xd35   : > { %v13463_v58 = vpop.permute.xlu1 %7216 }
 0xd36   : > { %16089 = vst [vmem:[#allocation182_spill] sm:$0xff] %v13463_v58  ;;  %v13465_v63 = vpop.permute.xlu0 %7289 }
 0xd37   : > { %16090 = vst [vmem:[#allocation183_spill] sm:$0xff] %v13465_v63  ;;  %5301 = vrot.lane.b32.xlu1 %v12900_v46, %s16063_s10  ;;  %s16097_s10 = smov 107  }
 0xd38   : > { %5983 = vrot.lane.b32.xlu0 %v13267_v0, %s16091_s24 }
 0xd39   : > { %v13471_v26 = vpop.permute.xlu1 %7354 }
 0xd3a   : > { %16092 = vst [vmem:[#allocation184_spill] sm:$0xff] %v13471_v26  ;;  %v13473_v5 = vpop.permute.xlu0 %7427 }
 0xd3b   : > { %16093 = vst [vmem:[#allocation185_spill] sm:$0xff] %v13473_v5  ;;  %5369 = vrot.lane.b32.xlu1 %v12900_v46, %s16066_s14  ;;  %s16113_s14 = smov 98  }
 0xd3c   : > { %6051 = vrot.lane.b32.xlu0 %v13267_v0, %s16094_s21 }
 0xd3d   : > { %v13479_v47 = vpop.permute.xlu1 %7492 }
 0xd3e   : > { %16095 = vst [vmem:[#allocation186_spill] sm:$0xff] %v13479_v47  ;;  %v13481_v58 = vpop.permute.xlu0 %7565 }
 0xd3f   : > { %16096 = vst [vmem:[#allocation187_spill] sm:$0xff] %v13481_v58  ;;  %5437 = vrot.lane.b32.xlu1 %v12900_v46, %s15853_s30  ;;  %s11214_s30 = smov 70  }
 0xd40   : > { %6119 = vrot.lane.b32.xlu0 %v13267_v0, %s16097_s10 }
 0xd41   : > { %v13487_v63 = vpop.permute.xlu1 %7630 }
 0xd42   : > { %16098 = vst [vmem:[#allocation188_spill] sm:$0xff] %v13487_v63  ;;  %v13489_v26 = vpop.permute.xlu0 %7703 }
 0xd43   : > { %16099 = vst [vmem:[#allocation189_spill] sm:$0xff] %v13489_v26  ;;  %5505 = vrot.lane.b32.xlu1 %v12900_v46, %s16071_s25  ;;  %s16116_s25 = smov 97  }
 0xd44   : > { %6188 = vrot.lane.b32.xlu0 %v13267_v0, %s15965_s7 }
 0xd45   : > { %v13495_v5 = vpop.permute.xlu1 %7768 }
 0xd46   : > { %16100 = vst [vmem:[#allocation190_spill] sm:$0xff] %v13495_v5  ;;  %v13497_v47 = vpop.permute.xlu0 %7841 }
 0xd47   : > { %16101 = vst [vmem:[#allocation191_spill] sm:$0xff] %v13497_v47  ;;  %5573 = vrot.lane.b32.xlu1 %v12900_v46, %s15855_s29  ;;  %s11210_s29 = smov 57  }
 0xd48   : > { %6257 = vrot.lane.b32.xlu0 %v13267_v0, %s15967_s20 }
 0xd49   : > { %v13503_v58 = vpop.permute.xlu1 %7906 }
 0xd4a   : > { %16102 = vst [vmem:[#allocation192_spill] sm:$0xff] %v13503_v58  ;;  %v13505_v63 = vpop.permute.xlu0 %4717 }
 0xd4b   : > { %5641 = vrot.lane.b32.xlu1 %v12900_v46, %s16076_s27  ;;  %v4724_v26 = vsel %vm452_vm0, %v13505_v63, %v12509_v43  ;;  %s11218_s27 = smov 60  }
 0xd4c   : > { %6326 = vrot.lane.b32.xlu0 %v13267_v0, %s15969_s12  ;;  %4734 = vmatprep.subr.bf16.mxu1 %v4724_v26 }
 0xd4d   : > { %v13514_v47 = vpop.permute.xlu1 %8044 }
 0xd4e   : > { %16103 = vst [vmem:[#allocation193_spill] sm:$0xff] %v13514_v47  ;;  %v13516_v5 = vpop.permute.xlu0 %9155 }
 0xd4f   : > { %16104 = vst [vmem:[#allocation194_spill] sm:$0xff] %v13516_v5  ;;  %5709 = vrot.lane.b32.xlu1 %v12900_v46, %s16079_s6  ;;  %s11221_s6 = smov 54  }
 0xd50   : > { %6395 = vrot.lane.b32.xlu0 %v13267_v0, %s15970_s22 }
 0xd51   : > { %v13522_v58 = vpop.permute.xlu1 %8182 }
 0xd52   : > { %16105 = vst [vmem:[#allocation195_spill] sm:$0xff] %v13522_v58  ;;  %v13524_v32 = vpop.permute.xlu0 %7977 }
 0xd53   : > { %16106 = vst [vmem:[#allocation196_spill] sm:$0xff] %v13524_v32  ;;  %5777 = vrot.lane.b32.xlu1 %v12900_v46, %s16082_s28  ;;  %s16134_s28 = smov 67  }
 0xd54   : > { %6464 = vrot.lane.b32.xlu0 %v13267_v0, %s15972_s0 }
 0xd55   : > { %v13530_v43 = vpop.permute.xlu1 %8320 }
 0xd56   : > { %16107 = vst [vmem:[#allocation197_spill] sm:$0xff] %v13530_v43  ;;  %v13532_v26 = vpop.permute.xlu0 %7973 }
 0xd57   : > { %16108 = vst [vmem:[#allocation198_spill] sm:$0xff] %v13532_v26  ;;  %5845 = vrot.lane.b32.xlu1 %v12900_v46, %s16085_s19  ;;  %s11213_s19 = smov 72  }
 0xd58   : > { %6533 = vrot.lane.b32.xlu0 %v13267_v0, %s15974_s2 }
 0xd59   : > { %v13538_v5 = vpop.permute.xlu1 %7147 }
 0xd5a   : > { %16109 = vst [vmem:[#allocation199_spill] sm:$0xff] %v13538_v5  ;;  %v13540_v58 = vpop.permute.xlu0 %4827 }
 0xd5b   : > { %5913 = vrot.lane.b32.xlu1 %v12900_v46, %s16088_s15  ;;  %s16257_s15 = smov 64  }
 0xd5c   : > { %6602 = vrot.lane.b32.xlu0 %v13267_v0, %s15975_s11 }
 0xd5d   : > { %v13546_v32 = vpop.permute.xlu1 %8458 }
 0xd5e   : > { %16110 = vst [vmem:[#allocation200_spill] sm:$0xff] %v13546_v32  ;;  %v13548_v43 = vpop.permute.xlu0 %9287 }
 0xd5f   : > { %16111 = vst [vmem:[#allocation201_spill] sm:$0xff] %v13548_v43  ;;  %5981 = vrot.lane.b32.xlu1 %v12900_v46, %s16091_s24  ;;  %s11209_s24 = smov 76  }
 0xd60   : > { %6671 = vrot.lane.b32.xlu0 %v13267_v0, %s15977_s1 }
 0xd61   : > { %v13554_v26 = vpop.permute.xlu1 %7285 }
 0xd62   : > { %16112 = vst [vmem:[#allocation202_spill] sm:$0xff] %v13554_v26  ;;  %v13556_v5 = vpop.permute.xlu0 %4895 }
 0xd63   : > { %6049 = vrot.lane.b32.xlu1 %v12900_v46, %s16094_s21  ;;  %s16135_s21 = smov 65  }
 0xd64   : > { %6740 = vrot.lane.b32.xlu0 %v13267_v0, %s16113_s14 }
 0xd65   : > { %v13562_v47 = vpop.permute.xlu1 %8596 }
 0xd66   : > { %16114 = vst [vmem:[#allocation203_spill] sm:$0xff] %v13562_v47  ;;  %v13564_v32 = vpop.permute.xlu0 %7983 }
 0xd67   : > { %16115 = vst [vmem:[#allocation204_spill] sm:$0xff] %v13564_v32  ;;  %6117 = vrot.lane.b32.xlu1 %v12900_v46, %s16097_s10  ;;  %s16136_s10 = smov 79  }
 0xd68   : > { %6809 = vrot.lane.b32.xlu0 %v13267_v0, %s16116_s25 }
 0xd69   : > { %v13570_v43 = vpop.permute.xlu1 %7423 }
 0xd6a   : > { %16117 = vst [vmem:[#allocation205_spill] sm:$0xff] %v13570_v43  ;;  %v13572_v26 = vpop.permute.xlu0 %4963 }
 0xd6b   : > { %6186 = vrot.lane.b32.xlu1 %v12900_v46, %s15965_s7  ;;  %s16121_s7 = smov 61  }
 0xd6c   : > { %6878 = vrot.lane.b32.xlu0 %v13267_v0, %s15862_s13 }
 0xd6d   : > { %v13578_v57 = vpop.permute.xlu1 %8734 }
 0xd6e   : > { %16118 = vst [vmem:[#allocation206_spill] sm:$0xff] %v13578_v57  ;;  %v13580_v47 = vpop.permute.xlu0 %7979 }
 0xd6f   : > { %16119 = vst [vmem:[#allocation207_spill] sm:$0xff] %v13580_v47  ;;  %6255 = vrot.lane.b32.xlu1 %v12900_v46, %s15967_s20  ;;  %s11215_s20 = smov 68  }
 0xd70   : > { %6946 = vrot.lane.b32.xlu0 %v13267_v0, %s15984_s4 }
 0xd71   : > { %v13586_v32 = vpop.permute.xlu1 %7561 }
 0xd72   : > { %16120 = vst [vmem:[#allocation208_spill] sm:$0xff] %v13586_v32  ;;  %v13588_v43 = vpop.permute.xlu0 %5031 }
 0xd73   : > { %6324 = vrot.lane.b32.xlu1 %v12900_v46, %s15969_s12  ;;  %s11207_s12 = smov 78  }
 0xd74   : > { %9293 = vrot.lane.b32.xlu0 %v15894_v29, %s16121_s7 }
 0xd75   : > { %v13594_v44 = vpop.permute.xlu1 %8872 }
 0xd76   : > { %16122 = vst [vmem:[#allocation209_spill] sm:$0xff] %v13594_v44  ;;  %v13596_v57 = vpop.permute.xlu0 %5099 }
 0xd77   : > { %6393 = vrot.lane.b32.xlu1 %v12900_v46, %s15970_s22  ;;  %v5106_v47 = vsel %vm981_vm6, %v13596_v57, %v12541_v6  ;;  %s16128_s22 = sld [smem:[#allocation221_spill]] }
 0xd78   : > { %7084 = vrot.lane.b32.xlu0 %v13267_v0, %s15935_s8  ;;  %5116 = vmatprep.subr.bf16.mxu0 %v5106_v47  ;;  %s11216_s8 = smov 66  }
 0xd79   : > { %v13605_v32 = vpop.permute.xlu1 %7699 }
 0xd7a   : > { %16123 = vst [vmem:[#allocation210_spill] sm:$0xff] %v13605_v32  ;;  %v13607_v10 = vpop.permute.xlu0 %5167 }
 0xd7b   : > { %6462 = vrot.lane.b32.xlu1 %v12900_v46, %s15972_s0  ;;  %s11208_s0 = smov 59  }
 0xd7c   : > { %8115 = vrot.lane.b32.xlu0 %v15894_v29, %s11207_s12 }
 0xd7d   : > { %v13613_v44 = vpop.permute.xlu1 %9010 }
 0xd7e   : > { %16124 = vst [vmem:[#allocation211_spill] sm:$0xff] %v13613_v44  ;;  %v13615_v62 = vpop.permute.xlu0 %5235 }
 0xd7f   : > { %6531 = vrot.lane.b32.xlu1 %v12900_v46, %s15974_s2  ;;  %s16263_s2 = smov 94  }
 0xd80   : > { %7222 = vrot.lane.b32.xlu0 %v13267_v0, %s15936_s9  ;;  %s11220_s9 = smov 56  }
 0xd81   : > { %v13621_v6 = vpop.permute.xlu1 %7837 }
 0xd82   : > { %16125 = vst [vmem:[#allocation212_spill] sm:$0xff] %v13621_v6  ;;  %v13623_v47 = vpop.permute.xlu0 %5303 }
 0xd83   : > { %6600 = vrot.lane.b32.xlu1 %v12900_v46, %s15975_s11  ;;  %s16137_s11 = smov 80  }
 0xd84   : > { %8111 = vrot.lane.b32.xlu0 %v12879_v16, %s11207_s12 }
 0xd85   : > { %v13629_v32 = vpop.permute.xlu1 %9147 }
 0xd86   : > { %16126 = vst [vmem:[#allocation213_spill] sm:$0xff] %v13629_v32  ;;  %v13631_v44 = vpop.permute.xlu0 %5371  ;;  %v10411_v32 = vld [vmem:[%s16128_s22 + $0x1] sm:$0x1] }
 0xd87   : > { %6669 = vrot.lane.b32.xlu1 %v12900_v46, %s15977_s1  ;;  %s16138_s1 = smov 77  }
 0xd88   : > { %7360 = vrot.lane.b32.xlu0 %v13267_v0, %s15938_s23  ;;  %s16132_s23 = smov 69  }
 0xd89   : > { %v4716_v27 = vpop.permute.xlu1 %4715 }
 0xd8a   : > { %v4723_v6 = vsel %vm452_vm0, %v4716_v27, %v13505_v63  ;;  %v13639_v54 = vpop.permute.xlu0 %5439  ;;  %vm16139_vm0 = vcmask 973824  }
 0xd8b   : > { %16127 = vst [vmem:[#allocation214_spill] sm:$0xff] %v13639_v54  ;;  %6738 = vrot.lane.b32.xlu1 %v12900_v46, %s16113_s14  ;;  %4735 = vmatpush1.bf16.msra.mxu1 %v4723_v6  ;;  %v4670_v6 = vld [vmem:[%s16128_s22] sm:$0x1]  ;;  %s11211_s14 = smov 74  }
 0xd8c   : > { %9425 = vrot.lane.b32.xlu0 %v15894_v29, %s11208_s0  ;;  %4776 = vmatprep.subr.bf16.mxu1 %v12973_v30 }
 0xd8d   : > { %v4826_v55 = vpop.permute.xlu1 %4825 }
 0xd8e   : > { %v13649_v35 = vpop.permute.xlu0 %5507  ;;  %10412 = vmatmul.mubr.msk.bf16.vlgmr.msra.gmra.mrb[48].mxu1 %vm2477_vm9, %v10411_v32  ;;  %v4832_v32 = vsel %vm609_vm1, %v13189_v36, %v12501_v49  ;;  %v4834_v49 = vsel %vm609_vm1, %v13540_v58, %v12521_v37  ;;  %v4900_v37 = vsel %vm702_vm3, %v13197_v18, %v12515_v52  ;;  %v4899_v52 = vsel %vm702_vm3, %v13067_v4, %v13197_v18  ;;  %v10422_v4 = vld [vmem:[%s16128_s22 + $0x6] sm:$0x1] }
 0xd8f   : > { %6807 = vrot.lane.b32.xlu1 %v12900_v46, %s16116_s25  ;;  %4777 = vmatpush1.bf16.msra.mxu1 %v12879_v16  ;;  %s11219_s25 = smov 58  }
 0xd90   : > { %7498 = vrot.lane.b32.xlu0 %v13267_v0, %s15939_s16  ;;  %4778 = vmatprep.subr.bf16.mxu1 %v13267_v0  ;;  %s16133_s16 = smov 81  }
 0xd91   : > { %v4894_v27 = vpop.permute.xlu1 %4893  ;;  %4808 = vmatprep.mubr.bf16.mxu1 %v15930_v40 }
 0xd92   : > { %v13659_v63 = vpop.permute.xlu0 %5575  ;;  %v4901_v18 = vsel %vm702_vm3, %v4894_v27, %v13556_v5  ;;  %v5242_v27 = vsel %vm1167_vm8, %v13615_v62, %v12549_v12  ;;  %v5376_v12 = vsel %vm1353_vm10, %v13255_v19, %v12551_v8  ;;  %v10418_v8 = vld [vmem:[%s16128_s22 + $0x4] sm:$0x1] }
 0xd93   : > { %16129 = vst [vmem:[#allocation215_spill] sm:$0xff] %v13659_v63  ;;  %6876 = vrot.lane.b32.xlu1 %v12900_v46, %s15862_s13  ;;  %4779 = vmatpush1.bf16.msra.mxu1 %v12900_v46  ;;  %s16131_s13 = smov 71  }
 0xd94   : > { %8121 = vrot.lane.b32.xlu0 %v15894_v29, %s11207_s12  ;;  %4842 = vmatprep.subr.bf16.mxu1 %v4832_v32 }
 0xd95   : > { %v13672_v54 = vpop.permute.xlu1 %4961 }
 0xd96   : > { %v13674_v63 = vpop.permute.xlu0 %5643  ;;  %10413 = vmatmul.mubr.msk.bf16.vlgmr.msra.gmra.mrb[52].mxu1 %vm2477_vm9, %v4670_v6  ;;  %v4833_v6 = vsel %vm609_vm1, %v4826_v55, %v13540_v58  ;;  %vm16140_vm1 = vmmov %vm16139_vm0 }
 0xd97   : > { %6944 = vrot.lane.b32.xlu1 %v12900_v46, %s15984_s4  ;;  %4843 = vmatpush1.bf16.msra.mxu1 %v4831_v31  ;;  %v10414_v31 = vld [vmem:[%s16128_s22 + $0x2] sm:$0x1]  ;;  %s11212_s4 = smov 55  }
 0xd98   : > { %7636 = vrot.lane.b32.xlu0 %v13267_v0, %s15941_s17  ;;  %4844 = vmatprep.subr.bf16.mxu1 %v4834_v49  ;;  %v5240_v49 = vsel %vm1167_vm8, %v13239_v20, %v12543_v7  ;;  %v5239_v7 = vsel %vm1167_vm8, %v13107_v21, %v13239_v20  ;;  %v4967_v21 = vsel %vm795_vm4, %v13075_v48, %v13205_v41  ;;  %v10426_v48 = vld [vmem:[%s16128_s22 + $0x8] sm:$0x1] }
 0xd99   : > { %v13687_v32 = vpop.permute.xlu1 %5029  ;;  %4874 = vmatprep.mubr.bf16.mxu1 %v15930_v40  ;;  %v5036_v20 = vsel %vm888_vm5, %v13213_v61, %v12529_v33  ;;  %v5038_v33 = vsel %vm888_vm5, %v13588_v43, %v12537_v2 }
 0xd9a   : > { %v13692_v36 = vpop.permute.xlu0 %5711  ;;  %v5037_v2 = vsel %vm888_vm5, %v13687_v32, %v13588_v43  ;;  %v5172_v43 = vsel %vm1074_vm7, %v13231_v39, %v12539_v3  ;;  %v5514_v32 = vsel %vm1539_vm12, %v13649_v35, %v12565_v14  ;;  %v5174_v3 = vsel %vm1074_vm7, %v13607_v10, %v12545_v9 }
 0xd9b   : > { %8324 = vrot.lane.b32.xlu1 %v12900_v46, %s16028_s3  ;;  %4845 = vmatpush1.bf16.msra.mxu1 %v4833_v6  ;;  %v5648_v14 = vsel %vm1725_vm14, %v13289_v42, %v12567_v17  ;;  %v10424_v17 = vld [vmem:[%s16128_s22 + $0x7] sm:$0x1] }
 0xd9c   : > { %8117 = vrot.lane.b32.xlu0 %v12900_v46, %s11207_s12  ;;  %4910 = vmatprep.subr.bf16.mxu1 %v4900_v37 }
 0xd9d   : > { %v5098_v25 = vpop.permute.xlu1 %5097 }
 0xd9e   : > { %v5105_v55 = vsel %vm981_vm6, %v5098_v25, %v13596_v57  ;;  %v13706_v58 = vpop.permute.xlu0 %5779  ;;  %10415 = vmatmul.mubr.msk.bf16.vlgmr.msra.gmra.mrb[56].mxu1 %vm2477_vm9, %v10414_v31  ;;  %v4902_v57 = vsel %vm702_vm3, %v13556_v5, %v12527_v1  ;;  %v10416_v1 = vld [vmem:[%s16128_s22 + $0x3] sm:$0x1]  ;;  %v4968_v5 = vsel %vm795_vm4, %v13205_v41, %v12523_v11  ;;  %v4970_v11 = vsel %vm795_vm4, %v13572_v26, %v12533_v38  ;;  %vm16141_vm3 = vmmov %vm16139_vm0 }
 0xd9f   : > { %8462 = vrot.lane.b32.xlu1 %v12900_v46, %s16033_s18  ;;  %4911 = vmatpush1.bf16.msra.mxu1 %v4899_v52  ;;  %v4969_v38 = vsel %vm795_vm4, %v13672_v54, %v13572_v26  ;;  %v5375_v54 = vsel %vm1353_vm10, %v13123_v28, %v13255_v19  ;;  %v5378_v26 = vsel %vm1353_vm10, %v13631_v44, %v12557_v56  ;;  %vm16143_vm4 = vmmov %vm16139_vm0 }
 0xda0   : > { %7774 = vrot.lane.b32.xlu0 %v13267_v0, %s16130_s26  ;;  %5117 = vmatpush1.bf16.msra.mxu0 %v5105_v55  ;;  %v5035_v28 = vsel %vm888_vm5, %v13083_v24, %v13213_v61  ;;  %v5512_v56 = vsel %vm1539_vm12, %v13273_v50, %v12559_v53  ;;  %v10430_v61 = vld [vmem:[%s16128_s22 + $0xa] sm:$0x1]  ;;  %v10420_v53 = vld [vmem:[%s16128_s22 + $0x5] sm:$0x1]  ;;  %vm16147_vm5 = vcmask 957440  }
 0xda1   : > { %4912 = vmatprep.subr.bf16.mxu1 %v4902_v57  ;;  %5250 = vmatprep.subr.bf16.mxu0 %v5240_v49  ;;  %v13722_v6 = vpop.permute.xlu1 %5165  ;;  %vm16150_vm6 = vmmov %vm16147_vm5 }
 0xda2   : > { %v13729_v37 = vpop.permute.xlu0 %5847  ;;  %4942 = vmatprep.mubr.bf16.mxu1 %v15930_v40  ;;  %v5173_v9 = vsel %vm1074_vm7, %v13722_v6, %v13607_v10  ;;  %v5647_v10 = vsel %vm1725_vm14, %v13155_v60, %v13289_v42  ;;  %v5650_v6 = vsel %vm1725_vm14, %v13674_v63, %v12573_v13  ;;  %v5307_v60 = vsel %vm16140_vm1, %v13115_v45, %v13247_v15  ;;  %v16142_v13 = vld [vmem:[#allocation143_spill] sm:$0xff]  ;;  %v10438_v45 = vld [vmem:[%s16128_s22 + $0xe] sm:$0x1] }
 0xda3   : > { %8600 = vrot.lane.b32.xlu1 %v12900_v46, %s16131_s13  ;;  %4913 = vmatpush1.bf16.msra.mxu1 %v4901_v18  ;;  %v5784_v42 = vsel %vm1911_vm13, %v16142_v13, %v12575_v23  ;;  %v10428_v23 = vld [vmem:[%s16128_s22 + $0x9] sm:$0x1] }
 0xda4   : > { %9431 = vrot.lane.b32.xlu0 %v15894_v29, %s11208_s0  ;;  %10423 = vmatmul.mubr.msk.bf16.vlgmr.msra.gmra.mrb[8].mxu0 %vm2477_vm9, %v10422_v4 }
 0xda5   : > { %5251 = vmatpush1.bf16.msra.mxu0 %v5239_v7  ;;  %4978 = vmatprep.subr.bf16.mxu1 %v4968_v5  ;;  %v5234_v31 = vpop.permute.xlu1 %5233 }
 0xda6   : > { %5252 = vmatprep.subr.bf16.mxu0 %v5242_v27  ;;  %v5241_v25 = vsel %vm1167_vm8, %v5234_v31, %v13615_v62  ;;  %v13751_v55 = vpop.permute.xlu0 %5915  ;;  %10417 = vmatmul.mubr.msk.bf16.vlgmr.msra.gmra.mrb[60].mxu1 %vm2477_vm9, %v10416_v1  ;;  %vm16156_vm8 = vcmask 900096  }
 0xda7   : > { %8738 = vrot.lane.b32.xlu1 %v12900_v46, %s16132_s23  ;;  %4979 = vmatpush1.bf16.msra.mxu1 %v4967_v21  ;;  %v16146_v21 = vld [vmem:[#allocation135_spill] sm:$0xff]  ;;  %vm16165_vm15 = vmmov %vm16156_vm8 }
 0xda8   : > { %7912 = vrot.lane.b32.xlu0 %v13267_v0, %s16133_s16  ;;  %4980 = vmatprep.subr.bf16.mxu1 %v4970_v11 }
 0xda9   : > { %5253 = vmatpush1.bf16.msra.mxu0 %v5241_v25  ;;  %v13767_v62 = vpop.permute.xlu1 %5301  ;;  %5282 = vmatprep.mubr.bf16.mxu0 %v15930_v40  ;;  %v16145_v25 = vld [vmem:[#allocation18_spill] sm:$0xff] }
 0xdaa   : > { %5386 = vmatprep.subr.bf16.mxu0 %v5376_v12  ;;  %v13776_v41 = vpop.permute.xlu0 %5983  ;;  %5010 = vmatprep.mubr.bf16.mxu1 %v15930_v40  ;;  %v5444_v11 = vsel %vm16147_vm5, %v16146_v21, %v16145_v25  ;;  %v16148_v12 = vld [vmem:[#allocation25_spill] sm:$0xff] }
 0xdab   : > { %8876 = vrot.lane.b32.xlu1 %v12900_v46, %s16134_s28  ;;  %4981 = vmatpush1.bf16.msra.mxu1 %v4969_v38 }
 0xdac   : > { %8253 = vrot.lane.b32.xlu0 %v15894_v29, %s11209_s24  ;;  %10427 = vmatmul.mubr.msk.bf16.vlgmr.msra.gmra.mrb[12].mxu0 %vm2477_vm9, %v10426_v48 }
 0xdad   : > { %5387 = vmatpush1.bf16.msra.mxu0 %v5375_v54  ;;  %5046 = vmatprep.subr.bf16.mxu1 %v5036_v20  ;;  %v5370_v52 = vpop.permute.xlu1 %5369  ;;  %v16149_v54 = vld [vmem:[#allocation115_spill] sm:$0xff] }
 0xdae   : > { %5388 = vmatprep.subr.bf16.mxu0 %v5378_v26  ;;  %v5377_v57 = vsel %vm1353_vm10, %v5370_v52, %v13631_v44  ;;  %v13798_v49 = vpop.permute.xlu0 %6051  ;;  %10419 = vmatmul.mubr.msk.bf16.vlgmr.msra.gmra.mrb[64].mxu1 %vm2477_vm9, %v10418_v8  ;;  %v5511_v44 = vsel %vm1539_vm12, %v13139_v34, %v13273_v50  ;;  %v5171_v34 = vsel %vm1074_vm7, %v13099_v22, %v13231_v39  ;;  %v10434_v50 = vld [vmem:[%s16128_s22 + $0xc] sm:$0x1]  ;;  %v16151_v26 = vld [vmem:[#allocation19_spill] sm:$0xff]  ;;  %v16152_v52 = vld [vmem:[#allocation214_spill] sm:$0xff] }
 0xdaf   : > { %9014 = vrot.lane.b32.xlu1 %v12900_v46, %s16135_s21  ;;  %5047 = vmatpush1.bf16.msra.mxu1 %v5035_v28  ;;  %v5308_v39 = vsel %vm16139_vm0, %v13247_v15, %v12547_v59  ;;  %v5310_v59 = vsel %vm16141_vm3, %v13623_v47, %v12553_v51  ;;  %v5309_v51 = vsel %vm16143_vm4, %v13767_v62, %v13623_v47  ;;  %v16144_v47 = vld [vmem:[#allocation123_spill] sm:$0xff]  ;;  %vm16153_vm7 = vmmov %vm16147_vm5  ;;  %vm16173_vm3 = vcmask 883712  }
 0xdb0   : > { %8050 = vrot.lane.b32.xlu0 %v13267_v0, %s16136_s10  ;;  %5048 = vmatprep.subr.bf16.mxu1 %v5038_v33  ;;  %v5783_v31 = vsel %vm1911_vm13, %v16144_v47, %v16142_v13  ;;  %v5786_v62 = vsel %vm1911_vm13, %v13706_v58, %v16148_v12  ;;  %v5443_v20 = vsel %vm16150_vm6, %v16149_v54, %v16146_v21  ;;  %v16155_v28 = vld [vmem:[#allocation147_spill] sm:$0xff]  ;;  %vm16157_vm10 = vmmov %vm16147_vm5  ;;  %v10446_v13 = vld [vmem:[%s16128_s22 + $0x12] sm:$0x1]  ;;  %vm16179_vm6 = vcmask 924672  }
 0xdb1   : > { %5389 = vmatpush1.bf16.msra.mxu0 %v5377_v57  ;;  %v13814_v19 = vpop.permute.xlu1 %5437  ;;  %5418 = vmatprep.mubr.bf16.mxu0 %v15930_v40  ;;  %v5446_v57 = vsel %vm16153_vm7, %v16152_v52, %v16151_v26  ;;  %vm16176_vm5 = vmmov %vm16173_vm3  ;;  %v16177_v47 = vld [vmem:[#allocation22_spill] sm:$0xff]  ;;  %v16180_v21 = vld [vmem:[#allocation33_spill] sm:$0xff] }
 0xdb2   : > { %5522 = vmatprep.subr.bf16.mxu0 %v5512_v56  ;;  %v13823_v24 = vpop.permute.xlu0 %6119  ;;  %5078 = vmatprep.mubr.bf16.mxu1 %v15930_v40  ;;  %vm16181_vm7 = vmmov %vm16173_vm3 }
 0xdb3   : > { %7975 = vrot.lane.b32.xlu1 %v12973_v30, %s16137_s11  ;;  %5049 = vmatpush1.bf16.msra.mxu1 %v5037_v2  ;;  %v5445_v2 = vsel %vm16157_vm10, %v13814_v19, %v16152_v52  ;;  %v16158_v19 = vld [vmem:[#allocation125_spill] sm:$0xff]  ;;  %vm16184_vm10 = vmmov %vm16179_vm6  ;;  %v16188_v52 = vld [vmem:[#allocation155_spill] sm:$0xff] }
 0xdb4   : > { %8249 = vrot.lane.b32.xlu0 %v12879_v16, %s11209_s24  ;;  %10431 = vmatmul.mubr.msk.bf16.vlgmr.msra.gmra.mrb[16].mxu0 %vm2477_vm9, %v10430_v61  ;;  %v10442_v61 = vld [vmem:[%s16128_s22 + $0x10] sm:$0x1] }
 0xdb5   : > { %5523 = vmatpush1.bf16.msra.mxu0 %v5511_v44  ;;  %5182 = vmatprep.subr.bf16.mxu1 %v5172_v43  ;;  %v5506_v4 = vpop.permute.xlu1 %5505  ;;  %v10432_v44 = vld [vmem:[%s16128_s22 + $0xb] sm:$0x1] }
 0xdb6   : > { %5524 = vmatprep.subr.bf16.mxu0 %v5514_v32  ;;  %v5513_v18 = vsel %vm1539_vm12, %v5506_v4, %v13649_v35  ;;  %v13845_v1 = vpop.permute.xlu0 %6188  ;;  %10421 = vmatmul.mubr.msk.bf16.vlgmr.msra.gmra.mrb[68].mxu1 %vm2477_vm9, %v10420_v53  ;;  %vm16159_vm12 = vmmov %vm16156_vm8  ;;  %v16160_v32 = vld [vmem:[#allocation20_spill] sm:$0xff]  ;;  %v16161_v4 = vld [vmem:[#allocation138_spill] sm:$0xff] }
 0xdb7   : > { %9151 = vrot.lane.b32.xlu1 %v12900_v46, %s15959_s5  ;;  %5183 = vmatpush1.bf16.msra.mxu1 %v5171_v34  ;;  %v5919_v43 = vsel %vm16159_vm12, %v16158_v19, %v16155_v28  ;;  %v16163_v34 = vld [vmem:[#allocation29_spill] sm:$0xff]  ;;  %vm6192_vm12 = vcmask 867328  }
 0xdb8   : > { %8188 = vrot.lane.b32.xlu0 %v13267_v0, %s16138_s1  ;;  %5184 = vmatprep.subr.bf16.mxu1 %v5174_v3  ;;  %v16192_v19 = vld [vmem:[#allocation145_spill] sm:$0xff]  ;;  %s11217_s1 = smov 62  }
 0xdb9   : > { %5525 = vmatpush1.bf16.msra.mxu0 %v5513_v18  ;;  %v13861_v35 = vpop.permute.xlu1 %5573  ;;  %5554 = vmatprep.mubr.bf16.mxu0 %v15930_v40 }
 0xdba   : > { %5658 = vmatprep.subr.bf16.mxu0 %v5648_v14  ;;  %v13870_v22 = vpop.permute.xlu0 %6257  ;;  %5214 = vmatprep.mubr.bf16.mxu1 %v15930_v40 }
 0xdbb   : > { %9285 = vrot.lane.b32.xlu1 %v12973_v30, %s16121_s7  ;;  %5185 = vmatpush1.bf16.msra.mxu1 %v5173_v9 }
 0xdbc   : > { %9563 = vrot.lane.b32.xlu0 %v15894_v29, %s11210_s29  ;;  %10435 = vmatmul.mubr.msk.bf16.vlgmr.msra.gmra.mrb[20].mxu0 %vm2477_vm9, %v10434_v50 }
 0xdbd   : > { %5659 = vmatpush1.bf16.msra.mxu0 %v5647_v10  ;;  %5318 = vmatprep.subr.bf16.mxu1 %v5308_v39  ;;  %v5642_v7 = vpop.permute.xlu1 %5641  ;;  %v16168_v39 = vld [vmem:[#allocation21_spill] sm:$0xff] }
 0xdbe   : > { %5660 = vmatprep.subr.bf16.mxu0 %v5650_v6  ;;  %v5649_v5 = vsel %vm1725_vm14, %v5642_v7, %v13674_v63  ;;  %v13892_v27 = vpop.permute.xlu0 %6326  ;;  %10425 = vmatmul.mubr.msk.bf16.vlgmr.msra.gmra.mrb[72].mxu1 %vm2477_vm9, %v10424_v17  ;;  %vm16164_vm14 = vmmov %vm16156_vm8  ;;  %v16166_v17 = vld [vmem:[#allocation118_spill] sm:$0xff]  ;;  %v16169_v6 = vld [vmem:[#allocation215_spill] sm:$0xff] }
 0xdbf   : > { %9283 = vrot.lane.b32.xlu1 %v12879_v16, %s16121_s7  ;;  %5319 = vmatpush1.bf16.msra.mxu1 %v5307_v60  ;;  %v5922_v3 = vsel %vm16164_vm14, %v13751_v55, %v16163_v34  ;;  %vm16189_vm14 = vmmov %vm16179_vm6 }
 0xdc0   : > { %8259 = vrot.lane.b32.xlu0 %v15894_v29, %s11209_s24  ;;  %5320 = vmatprep.subr.bf16.mxu1 %v5310_v59 }
 0xdc1   : > { %5661 = vmatpush1.bf16.msra.mxu0 %v5649_v5  ;;  %v13908_v63 = vpop.permute.xlu1 %5709  ;;  %5690 = vmatprep.mubr.bf16.mxu0 %v15930_v40  ;;  %v16172_v5 = vld [vmem:[#allocation151_spill] sm:$0xff] }
 0xdc2   : > { %5794 = vmatprep.subr.bf16.mxu0 %v5784_v42  ;;  %v13917_v15 = vpop.permute.xlu0 %6395  ;;  %5350 = vmatprep.mubr.bf16.mxu1 %v15930_v40 }
 0xdc3   : > { %8113 = vrot.lane.b32.xlu1 %v12973_v30, %s11207_s12  ;;  %5321 = vmatpush1.bf16.msra.mxu1 %v5309_v51  ;;  %v10436_v51 = vld [vmem:[%s16128_s22 + $0xd] sm:$0x1] }
 0xdc4   : > { %8255 = vrot.lane.b32.xlu0 %v12900_v46, %s11209_s24  ;;  %10439 = vmatmul.mubr.msk.bf16.vlgmr.msra.gmra.mrb[24].mxu0 %vm2477_vm9, %v10438_v45 }
 0xdc5   : > { %5795 = vmatpush1.bf16.msra.mxu0 %v5783_v31  ;;  %5454 = vmatprep.subr.bf16.mxu1 %v5444_v11  ;;  %v5778_v48 = vpop.permute.xlu1 %5777  ;;  %v16178_v31 = vld [vmem:[#allocation141_spill] sm:$0xff]  ;;  %v6058_v11 = vsel %vm16181_vm7, %v13798_v49, %v16180_v21  ;;  %vm6468_vm7 = vcmask 834560  }
 0xdc6   : > { %5796 = vmatprep.subr.bf16.mxu0 %v5786_v62  ;;  %v5785_v38 = vsel %vm1911_vm13, %v5778_v48, %v13706_v58  ;;  %v13939_v8 = vpop.permute.xlu0 %6464  ;;  %10429 = vmatmul.mubr.msk.bf16.vlgmr.msra.gmra.mrb[76].mxu1 %vm2477_vm9, %v10428_v23  ;;  %v16154_v58 = vld [vmem:[#allocation26_spill] sm:$0xff]  ;;  %vm16162_vm13 = vcmask 941056   ;;  %v5716_v25 = vsel %vm16179_vm6, %v16178_v31, %v16177_v47 }
 0xdc7   : > { %9289 = vrot.lane.b32.xlu1 %v12900_v46, %s16121_s7  ;;  %5455 = vmatpush1.bf16.msra.mxu1 %v5443_v20  ;;  %v5920_v33 = vsel %vm16156_vm8, %v16155_v28, %v16154_v58  ;;  %v5580_v18 = vsel %vm16162_vm13, %v16161_v4, %v16160_v32  ;;  %vm16167_vm0 = vmmov %vm16162_vm13  ;;  %v16185_v20 = vld [vmem:[#allocation23_spill] sm:$0xff]  ;;  %v10450_v28 = vld [vmem:[%s16128_s22 + $0x14] sm:$0x1] }
 0xdc8   : > { %9569 = vrot.lane.b32.xlu0 %v15894_v29, %s11210_s29  ;;  %5456 = vmatprep.subr.bf16.mxu1 %v5446_v57  ;;  %v5579_v10 = vsel %vm16167_vm0, %v16166_v17, %v16161_v4  ;;  %vm16170_vm1 = vmmov %vm16167_vm0  ;;  %v16194_v32 = vld [vmem:[#allocation37_spill] sm:$0xff]  ;;  %v16197_v17 = vld [vmem:[#allocation27_spill] sm:$0xff] }
 0xdc9   : > { %5797 = vmatpush1.bf16.msra.mxu0 %v5785_v38  ;;  %v13955_v56 = vpop.permute.xlu1 %5845  ;;  %5826 = vmatprep.mubr.bf16.mxu0 %v15930_v40  ;;  %v5582_v7 = vsel %vm16170_vm1, %v16169_v6, %v16168_v39  ;;  %vm16174_vm4 = vmmov %vm16167_vm0  ;;  %v16183_v38 = vld [vmem:[#allocation121_spill] sm:$0xff]  ;;  %v6196_v4 = vsel %vm6192_vm12, %v13845_v1, %v16194_v32  ;;  %vm6330_vm1 = vcmask 850944   ;;  %v16200_v39 = vld [vmem:[#allocation159_spill] sm:$0xff] }
 0xdca   : > { %5930 = vmatprep.subr.bf16.mxu0 %v5920_v33  ;;  %v13964_v53 = vpop.permute.xlu0 %6533  ;;  %5486 = vmatprep.mubr.bf16.mxu1 %v15930_v40  ;;  %v5581_v42 = vsel %vm16174_vm4, %v13861_v35, %v16169_v6  ;;  %v16175_v35 = vld [vmem:[#allocation127_spill] sm:$0xff]  ;;  %vm16182_vm8 = vmmov %vm16173_vm3  ;;  %v5715_v54 = vsel %vm16184_vm10, %v16183_v38, %v16178_v31  ;;  %v5717_v33 = vsel %vm16189_vm14, %v13908_v63, %v13692_v36  ;;  %vm6123_vm10 = vcmask 875520  }
 0xdcb   : > { %9423 = vrot.lane.b32.xlu1 %v12973_v30, %s11208_s0  ;;  %5457 = vmatpush1.bf16.msra.mxu1 %v5445_v2  ;;  %v6055_v23 = vsel %vm16176_vm5, %v16175_v35, %v16172_v5  ;;  %vm16186_vm13 = vmmov %vm16179_vm6  ;;  %v10440_v2 = vld [vmem:[%s16128_s22 + $0xf] sm:$0x1]  ;;  %vm16205_vm5 = vcmask 891904   ;;  %vm6261_vm14 = vcmask 859136  }
 0xdcc   : > { %8391 = vrot.lane.b32.xlu0 %v15894_v29, %s11211_s14  ;;  %10443 = vmatmul.mubr.msk.bf16.vlgmr.msra.gmra.mrb[28].mxu0 %vm2477_vm9, %v10442_v61  ;;  %v5718_v26 = vsel %vm16186_vm13, %v13692_v36, %v16185_v20  ;;  %v16190_v36 = vld [vmem:[#allocation129_spill] sm:$0xff]  ;;  %vm16208_vm6 = vmmov %vm16205_vm5  ;;  %v16212_v20 = vld [vmem:[#allocation162_spill] sm:$0xff]  ;;  %vm6606_vm13 = vcmask 818176  }
 0xdcd   : > { %5931 = vmatpush1.bf16.msra.mxu0 %v5919_v43  ;;  %5590 = vmatprep.subr.bf16.mxu1 %v5580_v18  ;;  %v5914_v14 = vpop.permute.xlu1 %5913  ;;  %v6193_v63 = vsel %vm6192_vm12, %v16190_v36, %v16188_v52  ;;  %v10448_v36 = vld [vmem:[%s16128_s22 + $0x13] sm:$0x1] }
 0xdce   : > { %5932 = vmatprep.subr.bf16.mxu0 %v5922_v3  ;;  %v5921_v50 = vsel %vm16165_vm15, %v5914_v14, %v13751_v55  ;;  %v13986_v9 = vpop.permute.xlu0 %6602  ;;  %10433 = vmatmul.mubr.msk.bf16.vlgmr.msra.gmra.mrb[80].mxu1 %vm2477_vm9, %v10432_v44  ;;  %v16171_v55 = vld [vmem:[#allocation30_spill] sm:$0xff]  ;;  %v16191_v44 = vld [vmem:[#allocation24_spill] sm:$0xff]  ;;  %vm16193_vm15 = vcmask 908288  }
 0xdcf   : > { %9421 = vrot.lane.b32.xlu1 %v12879_v16, %s11208_s0  ;;  %5591 = vmatpush1.bf16.msra.mxu1 %v5579_v10  ;;  %v6056_v60 = vsel %vm16173_vm3, %v16172_v5, %v16171_v55  ;;  %v5852_v43 = vsel %vm16193_vm15, %v16192_v19, %v16191_v44  ;;  %v16195_v14 = vld [vmem:[#allocation124_spill] sm:$0xff]  ;;  %vm16196_vm0 = vmmov %vm16193_vm15  ;;  %v10454_v55 = vld [vmem:[%s16128_s22 + $0x16] sm:$0x1]  ;;  %vm6744_vm15 = vcmask 801792  }
 0xdd0   : > { %8387 = vrot.lane.b32.xlu0 %v12879_v16, %s11211_s14  ;;  %5592 = vmatprep.subr.bf16.mxu1 %v5582_v7  ;;  %vm16198_vm3 = vmmov %vm16196_vm0  ;;  %v16216_v44 = vld [vmem:[#allocation153_spill] sm:$0xff] }
 0xdd1   : > { %5933 = vmatpush1.bf16.msra.mxu0 %v5921_v50  ;;  %v14002_v59 = vpop.permute.xlu1 %5981  ;;  %5962 = vmatprep.mubr.bf16.mxu0 %v15930_v40  ;;  %v5851_v50 = vsel %vm16196_vm0, %v16195_v14, %v16192_v19  ;;  %v5854_v10 = vsel %vm16198_vm3, %v13729_v37, %v16197_v17  ;;  %vm16201_vm4 = vmmov %vm16196_vm0  ;;  %v16218_v14 = vld [vmem:[#allocation128_spill] sm:$0xff]  ;;  %v16219_v17 = vld [vmem:[#allocation35_spill] sm:$0xff]  ;;  %vm6399_vm0 = vcmask 842752   ;;  %vm7019_vm3 = vcmask 769024  }
 0xdd2   : > { %6066 = vmatprep.subr.bf16.mxu0 %v6056_v60  ;;  %v14011_v45 = vpop.permute.xlu0 %6671  ;;  %5622 = vmatprep.mubr.bf16.mxu1 %v15930_v40  ;;  %v5853_v5 = vsel %vm16201_vm4, %v13955_v56, %v13729_v37  ;;  %v16202_v37 = vld [vmem:[#allocation131_spill] sm:$0xff]  ;;  %vm6813_vm4 = vcmask 793600  }
 0xdd3   : > { %8251 = vrot.lane.b32.xlu1 %v12973_v30, %s11209_s24  ;;  %5593 = vmatpush1.bf16.msra.mxu1 %v5581_v42  ;;  %v6331_v56 = vsel %vm6330_vm1, %v16202_v37, %v16200_v39  ;;  %v16203_v42 = vld [vmem:[#allocation28_spill] sm:$0xff] }
 0xdd4   : > { %9701 = vrot.lane.b32.xlu0 %v15894_v29, %s11212_s4  ;;  %10447 = vmatmul.mubr.msk.bf16.vlgmr.msra.gmra.mrb[32].mxu0 %vm2477_vm9, %v10446_v13  ;;  %v10444_v13 = vld [vmem:[%s16128_s22 + $0x11] sm:$0x1] }
 0xdd5   : > { %6067 = vmatpush1.bf16.msra.mxu0 %v6055_v23  ;;  %5726 = vmatprep.subr.bf16.mxu1 %v5716_v25  ;;  %v6050_v12 = vpop.permute.xlu1 %6049  ;;  %v16206_v23 = vld [vmem:[#allocation42_spill] sm:$0xff] }
 0xdd6   : > { %6068 = vmatprep.subr.bf16.mxu0 %v6058_v11  ;;  %v6057_v62 = vsel %vm16182_vm8, %v6050_v12, %v13798_v49  ;;  %v14033_v48 = vpop.permute.xlu0 %6740  ;;  %10437 = vmatmul.mubr.msk.bf16.vlgmr.msra.gmra.mrb[84].mxu1 %vm2477_vm9, %v10436_v51  ;;  %v16187_v49 = vld [vmem:[#allocation34_spill] sm:$0xff]  ;;  %v16204_v51 = vld [vmem:[#allocation149_spill] sm:$0xff]  ;;  %v6334_v47 = vsel %vm6330_vm1, %v13892_v27, %v16206_v23  ;;  %vm16210_vm8 = vmmov %vm16205_vm5 }
 0xdd7   : > { %9427 = vrot.lane.b32.xlu1 %v12900_v46, %s11208_s0  ;;  %5727 = vmatpush1.bf16.msra.mxu1 %v5715_v54  ;;  %v6194_v57 = vsel %vm6192_vm12, %v16188_v52, %v16187_v49  ;;  %v5988_v35 = vsel %vm16205_vm5, %v16204_v51, %v16203_v42  ;;  %v16207_v11 = vld [vmem:[#allocation126_spill] sm:$0xff]  ;;  %v9849_v52 = vld [vmem:[#allocation2 + $0x28] sm:$0xff] }
 0xdd8   : > { %8397 = vrot.lane.b32.xlu0 %v15894_v29, %s11211_s14  ;;  %5728 = vmatprep.subr.bf16.mxu1 %v5718_v26  ;;  %v5987_v12 = vsel %vm16208_vm6, %v16207_v11, %v16204_v51  ;;  %v9850_v54 = vld [vmem:[#allocation2 + $0x30] sm:$0xff]  ;;  %v16224_v23 = vld [vmem:[#allocation157_spill] sm:$0xff]  ;;  %vm7088_vm6 = vcmask 760832  }
 0xdd9   : > { %6069 = vmatpush1.bf16.msra.mxu0 %v6057_v62  ;;  %v14049_v58 = vpop.permute.xlu1 %6117  ;;  %6098 = vmatprep.mubr.bf16.mxu0 %v15930_v40  ;;  %v16209_v62 = vld [vmem:[#allocation31_spill] sm:$0xff]  ;;  %v10452_v51 = vld [vmem:[%s16128_s22 + $0x15] sm:$0x1] }
 0xdda   : > { %6204 = vmatprep.subr.bf16.mxu0 %v6194_v57  ;;  %v14058_v61 = vpop.permute.xlu0 %6809  ;;  %5758 = vmatprep.mubr.bf16.mxu1 %v15930_v40  ;;  %v5990_v38 = vsel %vm16210_vm8, %v13776_v41, %v16209_v62  ;;  %v10458_v57 = vld [vmem:[%s16128_s22 + $0x18] sm:$0x1]  ;;  %v6126_v37 = vsel %vm6123_vm10, %v14049_v58, %v13823_v24  ;;  %vm7364_vm8 = vcmask 728064  }
 0xddb   : > { %9561 = vrot.lane.b32.xlu1 %v12973_v30, %s11210_s29  ;;  %5729 = vmatpush1.bf16.msra.mxu1 %v5717_v33 }
 0xddc   : > { %8393 = vrot.lane.b32.xlu0 %v12900_v46, %s11211_s14  ;;  %10451 = vmatmul.mubr.msk.bf16.vlgmr.msra.gmra.mrb[36].mxu0 %vm2477_vm9, %v10450_v28 }
 0xddd   : > { %6205 = vmatpush1.bf16.msra.mxu0 %v6193_v63  ;;  %5862 = vmatprep.subr.bf16.mxu1 %v5852_v43  ;;  %v6187_v18 = vpop.permute.xlu1 %6186  ;;  %v16215_v63 = vld [vmem:[#allocation32_spill] sm:$0xff]  ;;  %v16217_v43 = vld [vmem:[#allocation46_spill] sm:$0xff] }
 0xdde   : > { %6206 = vmatprep.subr.bf16.mxu0 %v6196_v4  ;;  %v6195_v34 = vsel %vm6192_vm12, %v6187_v18, %v13845_v1  ;;  %v14080_v3 = vpop.permute.xlu0 %6878  ;;  %10441 = vmatmul.mubr.msk.bf16.vlgmr.msra.gmra.mrb[88].mxu1 %vm2477_vm9, %v10440_v2  ;;  %v16199_v1 = vld [vmem:[#allocation38_spill] sm:$0xff]  ;;  %vm16213_vm12 = vmmov %vm16205_vm5  ;;  %v10976_v2 = vpack.i.bf16 %v9850_v54, %v9849_v52  ;;  %v6125_v19 = vsel %vm6123_vm10, %v16216_v44, %v16215_v63  ;;  %v16228_v52 = vld [vmem:[#allocation49_spill] sm:$0xff]  ;;  %vm6950_vm5 = vcmask 777216  }
 0xddf   : > { %9559 = vrot.lane.b32.xlu1 %v12879_v16, %s11210_s29  ;;  %5863 = vmatpush1.bf16.msra.mxu1 %v5851_v50  ;;  %v6332_v6 = vsel %vm6330_vm1, %v16200_v39, %v16199_v1  ;;  %v5989_v28 = vsel %vm16213_vm12, %v14002_v59, %v13776_v41  ;;  %v16214_v41 = vld [vmem:[#allocation133_spill] sm:$0xff]  ;;  %v6472_v32 = vsel %vm6468_vm7, %v13939_v8, %v16217_v43  ;;  %v9852_v1 = vld [vmem:[#allocation2 + $0x50] sm:$0xff]  ;;  %v16232_v43 = vld [vmem:[#allocation160_spill] sm:$0xff]  ;;  %vm7640_vm12 = vcmask 695296  }
 0xde0   : > { %9707 = vrot.lane.b32.xlu0 %v15894_v29, %s11212_s4  ;;  %5864 = vmatprep.subr.bf16.mxu1 %v5854_v10  ;;  %v6469_v59 = vsel %vm6468_vm7, %v16214_v41, %v16212_v20  ;;  %v6124_v50 = vsel %vm6123_vm10, %v16218_v14, %v16216_v44  ;;  %v6127_v10 = vsel %vm6123_vm10, %v13823_v24, %v16219_v17  ;;  %v16221_v39 = vld [vmem:[#allocation166_spill] sm:$0xff]  ;;  %v16222_v24 = vld [vmem:[#allocation136_spill] sm:$0xff]  ;;  %v10466_v41 = vld [vmem:[%s16128_s22 + $0x1c] sm:$0x1]  ;;  %vm7502_vm10 = vcmask 711680  }
 0xde1   : > { %6207 = vmatpush1.bf16.msra.mxu0 %v6195_v34  ;;  %v14096_v7 = vpop.permute.xlu1 %6255  ;;  %6236 = vmatprep.mubr.bf16.mxu0 %v15930_v40  ;;  %v6607_v58 = vsel %vm6606_vm13, %v16222_v24, %v16221_v39  ;;  %v10456_v44 = vld [vmem:[%s16128_s22 + $0x17] sm:$0x1]  ;;  %v10470_v24 = vld [vmem:[%s16128_s22 + $0x1e] sm:$0x1] }
 0xde2   : > { %6342 = vmatprep.subr.bf16.mxu0 %v6332_v6  ;;  %v14105_v60 = vpop.permute.xlu0 %6946  ;;  %5894 = vmatprep.mubr.bf16.mxu1 %v15930_v40 }
 0xde3   : > { %8389 = vrot.lane.b32.xlu1 %v12973_v30, %s11211_s14  ;;  %5865 = vmatpush1.bf16.msra.mxu1 %v5853_v5  ;;  %v9851_v5 = vld [vmem:[#allocation2 + $0x48] sm:$0xff] }
 0xde4   : > { %8529 = vrot.lane.b32.xlu0 %v15894_v29, %s11213_s19  ;;  %10455 = vmatmul.mubr.msk.bf16.vlgmr.msra.gmra.mrb[40].mxu0 %vm2477_vm9, %v10454_v55  ;;  %v10981_v42 = vpack.i.bf16 %v9852_v1, %v9851_v5  ;;  %v16236_v5 = vld [vmem:[#allocation53_spill] sm:$0xff] }
 0xde5   : > { %6343 = vmatpush1.bf16.msra.mxu0 %v6331_v56  ;;  %5998 = vmatprep.subr.bf16.mxu1 %v5988_v35  ;;  %v6325_v31 = vpop.permute.xlu1 %6324  ;;  %v16223_v35 = vld [vmem:[#allocation36_spill] sm:$0xff] }
 0xde6   : > { %6344 = vmatprep.subr.bf16.mxu0 %v6334_v47  ;;  %v6333_v25 = vsel %vm6330_vm1, %v6325_v31, %v13892_v27  ;;  %v14127_v21 = vpop.permute.xlu0 %9293  ;;  %10445 = vmatmul.mubr.msk.bf16.vlgmr.msra.gmra.mrb[92].mxu1 %vm2477_vm9, %v10444_v13  ;;  %v16211_v27 = vld [vmem:[#allocation41_spill] sm:$0xff]  ;;  %v10462_v13 = vld [vmem:[%s16128_s22 + $0x1a] sm:$0x1]  ;;  %v6263_v47 = vsel %vm6261_vm14, %v16224_v23, %v16223_v35  ;;  %v16225_v31 = vld [vmem:[#allocation50_spill] sm:$0xff]  ;;  %vm6537_vm1 = vcmask 826368  }
 0xde7   : > { %9565 = vrot.lane.b32.xlu1 %v12900_v46, %s11210_s29  ;;  %5999 = vmatpush1.bf16.msra.mxu1 %v5987_v12  ;;  %v6470_v26 = vsel %vm6468_vm7, %v16212_v20, %v16211_v27  ;;  %v9848_v27 = vld [vmem:[#allocation2 + $0x10] sm:$0xff]  ;;  %v16227_v20 = vld [vmem:[#allocation39_spill] sm:$0xff] }
 0xde8   : > { %8525 = vrot.lane.b32.xlu0 %v12879_v16, %s11213_s19  ;;  %6000 = vmatprep.subr.bf16.mxu1 %v5990_v38  ;;  %v16226_v38 = vld [vmem:[#allocation130_spill] sm:$0xff] }
 0xde9   : > { %6345 = vmatpush1.bf16.msra.mxu0 %v6333_v25  ;;  %v14143_v49 = vpop.permute.xlu1 %6393  ;;  %6374 = vmatprep.mubr.bf16.mxu0 %v15930_v40  ;;  %v6610_v25 = vsel %vm6606_vm13, %v13986_v9, %v16225_v31  ;;  %v6262_v54 = vsel %vm6261_vm14, %v16226_v38, %v16224_v23  ;;  %v10460_v23 = vld [vmem:[%s16128_s22 + $0x19] sm:$0x1]  ;;  %v16240_v31 = vld [vmem:[#allocation164_spill] sm:$0xff] }
 0xdea   : > { %6480 = vmatprep.subr.bf16.mxu0 %v6470_v26  ;;  %v14152_v33 = vpop.permute.xlu0 %7084  ;;  %6030 = vmatprep.mubr.bf16.mxu1 %v15930_v40  ;;  %v6265_v26 = vsel %vm6261_vm14, %v13870_v22, %v16227_v20  ;;  %v16242_v20 = vld [vmem:[#allocation134_spill] sm:$0xff] }
 0xdeb   : > { %9699 = vrot.lane.b32.xlu1 %v12973_v30, %s11212_s4  ;;  %6001 = vmatpush1.bf16.msra.mxu1 %v5989_v28 }
 0xdec   : > { %10977 = vrot.lane.b32.xlu0 %v10976_v2, %s11211_s14  ;;  %10459 = vmatmul.mubr.msk.bf16.vlgmr.msra.gmra.mrb[44].mxu0 %vm2477_vm9, %v10458_v57  ;;  %v16229_v57 = vld [vmem:[#allocation170_spill] sm:$0xff] }
 0xded   : > { %6481 = vmatpush1.bf16.msra.mxu0 %v6469_v59  ;;  %6135 = vmatprep.subr.bf16.mxu1 %v6125_v19  ;;  %v6463_v4 = vpop.permute.xlu1 %6462  ;;  %v6746_v28 = vsel %vm6744_vm15, %v16229_v57, %v16228_v52  ;;  %v6264_v59 = vsel %vm6261_vm14, %v14096_v7, %v13870_v22  ;;  %v16230_v19 = vld [vmem:[#allocation139_spill] sm:$0xff]  ;;  %v16231_v7 = vld [vmem:[#allocation40_spill] sm:$0xff]  ;;  %vm7916_vm14 = vcmask 662528  }
 0xdee   : > { %6482 = vmatprep.subr.bf16.mxu0 %v6472_v32  ;;  %v6471_v18 = vsel %vm6468_vm7, %v6463_v4, %v13939_v8  ;;  %v14173_v34 = vpop.permute.xlu0 %8115  ;;  %10449 = vmatmul.mubr.msk.bf16.vlgmr.msra.gmra.mrb[96].mxu1 %vm2477_vm9, %v10448_v36  ;;  %v16220_v8 = vld [vmem:[#allocation45_spill] sm:$0xff]  ;;  %v6745_v22 = vsel %vm6744_vm15, %v16230_v19, %v16229_v57  ;;  %v6401_v32 = vsel %vm6399_vm0, %v16232_v43, %v16231_v7  ;;  %v16233_v4 = vld [vmem:[#allocation54_spill] sm:$0xff]  ;;  %v10464_v19 = vld [vmem:[%s16128_s22 + $0x1b] sm:$0x1]  ;;  %vm7226_vm7 = vcmask 744448  }
 0xdef   : > { %9697 = vrot.lane.b32.xlu1 %v12879_v16, %s11212_s4  ;;  %6136 = vmatpush1.bf16.msra.mxu1 %v6124_v50  ;;  %v6608_v6 = vsel %vm6606_vm13, %v16221_v39, %v16220_v8  ;;  %v9854_v8 = vld [vmem:[#allocation2 + $0x70] sm:$0xff]  ;;  %v16235_v39 = vld [vmem:[#allocation44_spill] sm:$0xff] }
 0xdf0   : > { %8535 = vrot.lane.b32.xlu0 %v15894_v29, %s11213_s19  ;;  %6137 = vmatprep.subr.bf16.mxu1 %v6127_v10  ;;  %v16234_v10 = vld [vmem:[#allocation132_spill] sm:$0xff]  ;;  %v16245_v57 = vld [vmem:[#allocation178_spill] sm:$0xff] }
 0xdf1   : > { %6483 = vmatpush1.bf16.msra.mxu0 %v6471_v18  ;;  %v14189_v55 = vpop.permute.xlu1 %6531  ;;  %6512 = vmatprep.mubr.bf16.mxu0 %v15930_v40  ;;  %v6748_v18 = vsel %vm6744_vm15, %v14033_v48, %v16233_v4  ;;  %v6400_v1 = vsel %vm6399_vm0, %v16234_v10, %v16232_v43  ;;  %v16248_v7 = vld [vmem:[#allocation168_spill] sm:$0xff] }
 0xdf2   : > { %6618 = vmatprep.subr.bf16.mxu0 %v6608_v6  ;;  %v14198_v56 = vpop.permute.xlu0 %7222  ;;  %6167 = vmatprep.mubr.bf16.mxu1 %v15930_v40  ;;  %v6403_v6 = vsel %vm6399_vm0, %v13917_v15, %v16235_v39 }
 0xdf3   : > { %8527 = vrot.lane.b32.xlu1 %v12973_v30, %s11213_s19  ;;  %6138 = vmatpush1.bf16.msra.mxu1 %v6126_v37 }
 0xdf4   : > { %10982 = vrot.lane.b32.xlu0 %v10981_v42, %s11211_s14  ;;  %10463 = vmatmul.mubr.msk.bf16.vlgmr.msra.gmra.mrb[48].mxu0 %vm2477_vm9, %v10462_v13  ;;  %v16237_v13 = vld [vmem:[#allocation174_spill] sm:$0xff] }
 0xdf5   : > { %6619 = vmatpush1.bf16.msra.mxu0 %v6607_v58  ;;  %6273 = vmatprep.subr.bf16.mxu1 %v6263_v47  ;;  %v6601_v11 = vpop.permute.xlu1 %6600  ;;  %v6883_v37 = vsel %vm4172_vm2, %v16237_v13, %v16236_v5  ;;  %v6402_v58 = vsel %vm6399_vm0, %v14143_v49, %v13917_v15  ;;  %v16238_v15 = vld [vmem:[#allocation142_spill] sm:$0xff]  ;;  %v16239_v47 = vld [vmem:[#allocation43_spill] sm:$0xff]  ;;  %vm8192_vm0 = vcmask 629760  }
 0xdf6   : > { %6620 = vmatprep.subr.bf16.mxu0 %v6610_v25  ;;  %v6609_v12 = vsel %vm6606_vm13, %v6601_v11, %v13986_v9  ;;  %v14219_v62 = vpop.permute.xlu0 %8111  ;;  %10453 = vmatmul.mubr.msk.bf16.vlgmr.msra.gmra.mrb[100].mxu1 %vm2477_vm9, %v10452_v51  ;;  %v9847_v9 = vld [vmem:[#allocation2 + $0x8] sm:$0xff]  ;;  %v6882_v49 = vsel %vm4172_vm2, %v16238_v15, %v16237_v13  ;;  %v6539_v25 = vsel %vm6537_vm1, %v16240_v31, %v16239_v47  ;;  %v16241_v11 = vld [vmem:[#allocation58_spill] sm:$0xff]  ;;  %v10468_v13 = vld [vmem:[%s16128_s22 + $0x1d] sm:$0x1]  ;;  %vm7778_vm13 = vcmask 678912  }
 0xdf7   : > { %9703 = vrot.lane.b32.xlu1 %v12900_v46, %s11212_s4  ;;  %6274 = vmatpush1.bf16.msra.mxu1 %v6262_v54  ;;  %v10971_v36 = vpack.i.bf16 %v9848_v27, %v9847_v9  ;;  %v16243_v9 = vld [vmem:[#allocation48_spill] sm:$0xff]  ;;  %v16255_v47 = vld [vmem:[#allocation55_spill] sm:$0xff] }
 0xdf8   : > { %8665 = vrot.lane.b32.xlu0 %v12973_v30, %s11214_s30  ;;  %6275 = vmatprep.subr.bf16.mxu1 %v6265_v26  ;;  %v6538_v26 = vsel %vm6537_vm1, %v16242_v20, %v16240_v31  ;;  %v6541_v52 = vsel %vm6537_vm1, %v13964_v53, %v16243_v9  ;;  %v16256_v31 = vld [vmem:[#allocation176_spill] sm:$0xff] }
 0xdf9   : > { %6621 = vmatpush1.bf16.msra.mxu0 %v6609_v12  ;;  %v14235_v2 = vpop.permute.xlu1 %6669  ;;  %6650 = vmatprep.mubr.bf16.mxu0 %v15930_v40  ;;  %v6885_v12 = vsel %vm4172_vm2, %v14080_v3, %v16241_v11  ;;  %v10472_v11 = vld [vmem:[%s16128_s22 + $0x1f] sm:$0x1] }
 0xdfa   : > { %6756 = vmatprep.subr.bf16.mxu0 %v6746_v28  ;;  %v14244_v63 = vpop.permute.xlu0 %7360  ;;  %6305 = vmatprep.mubr.bf16.mxu1 %v15930_v40 }
 0xdfb   : > { %10972 = vrot.lane.b32.xlu1 %v10971_v36, %s11211_s14  ;;  %6276 = vmatpush1.bf16.msra.mxu1 %v6264_v59  ;;  %v6540_v59 = vsel %vm6537_vm1, %v14189_v55, %v13964_v53  ;;  %v16246_v53 = vld [vmem:[#allocation146_spill] sm:$0xff]  ;;  %vm8330_vm1 = vcmask 613376  }
 0xdfc   : > { %8663 = vrot.lane.b32.xlu0 %v12879_v16, %s11214_s30  ;;  %10467 = vmatmul.mubr.msk.bf16.vlgmr.msra.gmra.mrb[52].mxu0 %vm2477_vm9, %v10466_v41  ;;  %v10474_v41 = vld [vmem:[%s16128_s22 + $0x20] sm:$0x1]  ;;  %v7020_v55 = vsel %vm7019_vm3, %v16246_v53, %v16245_v57  ;;  %v16264_v53 = vld [vmem:[#allocation62_spill] sm:$0xff] }
 0xdfd   : > { %6757 = vmatpush1.bf16.msra.mxu0 %v6745_v22  ;;  %6411 = vmatprep.subr.bf16.mxu1 %v6401_v32  ;;  %v6739_v14 = vpop.permute.xlu1 %6738  ;;  %v16247_v22 = vld [vmem:[#allocation47_spill] sm:$0xff] }
 0xdfe   : > { %6758 = vmatprep.subr.bf16.mxu0 %v6748_v18  ;;  %v6747_v50 = vsel %vm6744_vm15, %v6739_v14, %v14033_v48  ;;  %v14265_v17 = vpop.permute.xlu0 %9425  ;;  %10457 = vmatmul.mubr.msk.bf16.vlgmr.msra.gmra.mrb[104].mxu1 %vm2477_vm9, %v10456_v44  ;;  %v9853_v48 = vld [vmem:[#allocation2 + $0x68] sm:$0xff]  ;;  %vm8054_vm15 = vcmask 646144  }
 0xdff   : > { %8531 = vrot.lane.b32.xlu1 %v12900_v46, %s11213_s19  ;;  %6412 = vmatpush1.bf16.msra.mxu1 %v6400_v1  ;;  %v10986_v51 = vpack.i.bf16 %v9854_v8, %v9853_v48  ;;  %v16249_v18 = vld [vmem:[#allocation137_spill] sm:$0xff]  ;;  %v16252_v48 = vld [vmem:[#allocation172_spill] sm:$0xff] }
 0xe00   : > { %8673 = vrot.lane.b32.xlu0 %v15894_v29, %s11214_s30  ;;  %6413 = vmatprep.subr.bf16.mxu1 %v6403_v6  ;;  %v16251_v6 = vld [vmem:[#allocation51_spill] sm:$0xff] }
 0xe01   : > { %6759 = vmatpush1.bf16.msra.mxu0 %v6747_v50  ;;  %v14281_v42 = vpop.permute.xlu1 %6807  ;;  %6788 = vmatprep.mubr.bf16.mxu0 %v15930_v40  ;;  %v16250_v50 = vld [vmem:[#allocation52_spill] sm:$0xff]  ;;  %v6815_v5 = vsel %vm6813_vm4, %v16252_v48, %v16251_v6 }
 0xe02   : > { %6893 = vmatprep.subr.bf16.mxu0 %v6883_v37  ;;  %v14290_v35 = vpop.permute.xlu0 %7498  ;;  %6443 = vmatprep.mubr.bf16.mxu1 %v15930_v40  ;;  %v6816_v15 = vsel %vm6813_vm4, %v14281_v42, %v14058_v61  ;;  %v16258_v42 = vld [vmem:[#allocation144_spill] sm:$0xff] }
 0xe03   : > { %10987 = vrot.lane.b32.xlu1 %v10986_v51, %s11211_s14  ;;  %6414 = vmatpush1.bf16.msra.mxu1 %v6402_v58 }
 0xe04   : > { %8803 = vrot.lane.b32.xlu0 %v12973_v30, %s11215_s20  ;;  %10471 = vmatmul.mubr.msk.bf16.vlgmr.msra.gmra.mrb[56].mxu0 %vm2477_vm9, %v10470_v24  ;;  %v16254_v24 = vld [vmem:[#allocation56_spill] sm:$0xff] }
 0xe05   : > { %6894 = vmatpush1.bf16.msra.mxu0 %v6882_v49  ;;  %6549 = vmatprep.subr.bf16.mxu1 %v6539_v25  ;;  %v6877_v38 = vpop.permute.xlu1 %6876  ;;  %v6817_v58 = vsel %vm6813_vm4, %v14058_v61, %v16254_v24  ;;  %v6952_v25 = vsel %vm6950_vm5, %v16256_v31, %v16255_v47  ;;  %v16272_v47 = vld [vmem:[#allocation63_spill] sm:$0xff] }
 0xe06   : > { %6895 = vmatprep.subr.bf16.mxu0 %v6885_v12  ;;  %v6884_v54 = vsel %vm4172_vm2, %v6877_v38, %v14080_v3  ;;  %v14311_v27 = vpop.permute.xlu0 %8121  ;;  %10461 = vmatmul.mubr.msk.bf16.vlgmr.msra.gmra.mrb[108].mxu1 %vm2477_vm9, %v10460_v23  ;;  %vm6675_vm2 = vcmask 809984   ;;  %v16244_v3 = vld [vmem:[#allocation57_spill] sm:$0xff]  ;;  %v6951_v38 = vsel %vm6950_vm5, %v16258_v42, %v16256_v31  ;;  %v16273_v31 = vld [vmem:[#allocation184_spill] sm:$0xff] }
 0xe07   : > { %8667 = vrot.lane.b32.xlu1 %v15894_v29, %s11214_s30  ;;  %6550 = vmatpush1.bf16.msra.mxu1 %v6538_v26  ;;  %v7021_v28 = vsel %vm7019_vm3, %v16245_v57, %v16244_v3  ;;  %v6677_v43 = vsel %vm6675_vm2, %v16248_v7, %v16247_v22  ;;  %v6676_v14 = vsel %vm6675_vm2, %v16249_v18, %v16248_v7  ;;  %v16260_v3 = vld [vmem:[#allocation59_spill] sm:$0xff]  ;;  %v16261_v57 = vld [vmem:[#allocation180_spill] sm:$0xff] }
 0xe08   : > { %8801 = vrot.lane.b32.xlu0 %v12879_v16, %s11215_s20  ;;  %6551 = vmatprep.subr.bf16.mxu1 %v6541_v52  ;;  %v6679_v10 = vsel %vm6675_vm2, %v14011_v45, %v16250_v50  ;;  %v6678_v8 = vsel %vm6675_vm2, %v14235_v2, %v14011_v45  ;;  %v16253_v2 = vld [vmem:[#allocation140_spill] sm:$0xff]  ;;  %v16267_v50 = vld [vmem:[#allocation182_spill] sm:$0xff]  ;;  %vm7157_vm2 = vcmask 752640  }
 0xe09   : > { %6896 = vmatpush1.bf16.msra.mxu0 %v6884_v54  ;;  %v14327_v36 = vpop.permute.xlu1 %6944  ;;  %6925 = vmatprep.mubr.bf16.mxu0 %v15930_v40  ;;  %v6814_v51 = vsel %vm6813_vm4, %v16253_v2, %v16252_v48  ;;  %v16259_v54 = vld [vmem:[#allocation60_spill] sm:$0xff]  ;;  %vm7295_vm4 = vcmask 736256  }
 0xe0a   : > { %7031 = vmatprep.subr.bf16.mxu0 %v7021_v28  ;;  %v14336_v44 = vpop.permute.xlu0 %7636  ;;  %6581 = vmatprep.mubr.bf16.mxu1 %v15930_v40  ;;  %v6954_v20 = vsel %vm6950_vm5, %v14105_v60, %v16259_v54  ;;  %v6953_v9 = vsel %vm6950_vm5, %v14327_v36, %v14105_v60  ;;  %v7090_v28 = vsel %vm7088_vm6, %v16261_v57, %v16260_v3  ;;  %v16262_v36 = vld [vmem:[#allocation104_spill] sm:$0xff]  ;;  %v16276_v54 = vld [vmem:[#allocation66_spill] sm:$0xff]  ;;  %vm8606_vm5 = vcmask 580608  }
 0xe0b   : > { %8669 = vrot.lane.b32.xlu1 %v12900_v46, %s11214_s30  ;;  %6552 = vmatpush1.bf16.msra.mxu1 %v6540_v59 }
 0xe0c   : > { %8811 = vrot.lane.b32.xlu0 %v15894_v29, %s11215_s20  ;;  %10475 = vmatmul.mubr.msk.bf16.vlgmr.msra.gmra.mrb[60].mxu0 %vm2477_vm9, %v10474_v41  ;;  %v10476_v41 = vld [vmem:[%s16128_s22 + $0x21] sm:$0x1] }
 0xe0d   : > { %7032 = vmatpush1.bf16.msra.mxu0 %v7020_v55  ;;  %6687 = vmatprep.subr.bf16.mxu1 %v6677_v43  ;;  %v14353_v32 = vpop.permute.xlu1 %8324  ;;  %v7092_v55 = vsel %vm7088_vm6, %v14152_v33, %v16264_v53  ;;  %v16265_v43 = vld [vmem:[#allocation161_spill] sm:$0xff]  ;;  %v10488_v53 = vld [vmem:[%s16128_s22 + $0x27] sm:$0x1] }
 0xe0e   : > { %v14355_v4 = vpop.permute.xlu0 %8117  ;;  %10465 = vmatmul.mubr.msk.bf16.vlgmr.msra.gmra.mrb[112].mxu1 %vm2477_vm9, %v10464_v19  ;;  %7063 = vmatprep.mubr.bf16.mxu0 %v15930_v40  ;;  %v7089_v19 = vsel %vm7088_vm6, %v16262_v36, %v16261_v57  ;;  %v7091_v18 = vsel %vm7088_vm6, %v16265_v43, %v14152_v33  ;;  %v16268_v33 = vld [vmem:[#allocation105_spill] sm:$0xff]  ;;  %v16279_v36 = vld [vmem:[#allocation186_spill] sm:$0xff]  ;;  %vm7433_vm6 = vcmask 719872  }
 0xe0f   : > { %8805 = vrot.lane.b32.xlu1 %v15894_v29, %s11215_s20  ;;  %6688 = vmatpush1.bf16.msra.mxu1 %v6676_v14  ;;  %v16266_v14 = vld [vmem:[#allocation61_spill] sm:$0xff] }
 0xe10   : > { %8941 = vrot.lane.b32.xlu0 %v12973_v30, %s11216_s8  ;;  %6689 = vmatprep.subr.bf16.mxu1 %v6679_v10  ;;  %v7228_v10 = vsel %vm7226_vm7, %v16267_v50, %v16266_v14  ;;  %v16277_v57 = vld [vmem:[#allocation165_spill] sm:$0xff]  ;;  %v16282_v14 = vld [vmem:[#allocation68_spill] sm:$0xff] }
 0xe11   : > { %v14369_v1 = vpop.permute.xlu1 %8462  ;;  %6719 = vmatprep.mubr.bf16.mxu1 %v15930_v40 }
 0xe12   : > { %v14375_v39 = vpop.permute.xlu0 %7774 }
 0xe13   : > { %8807 = vrot.lane.b32.xlu1 %v12900_v46, %s11215_s20  ;;  %6690 = vmatpush1.bf16.msra.mxu1 %v6678_v8  ;;  %v10480_v8 = vld [vmem:[%s16128_s22 + $0x23] sm:$0x1] }
 0xe14   : > { %8939 = vrot.lane.b32.xlu0 %v12879_v16, %s11216_s8  ;;  %6825 = vmatprep.subr.bf16.mxu1 %v6815_v5  ;;  %v7227_v5 = vsel %vm7226_vm7, %v16268_v33, %v16267_v50  ;;  %v7506_v50 = vsel %vm7502_vm10, %v14290_v35, %v16282_v14 }
 0xe15   : > { %v14387_v37 = vpop.permute.xlu1 %8600 }
 0xe16   : > { %v14389_v45 = vpop.permute.xlu0 %9431  ;;  %10469 = vmatmul.mubr.msk.bf16.vlgmr.msra.gmra.mrb[116].mxu1 %vm2477_vm9, %v10468_v13  ;;  %v16270_v13 = vld [vmem:[#allocation64_spill] sm:$0xff] }
 0xe17   : > { %8943 = vrot.lane.b32.xlu1 %v15894_v29, %s11216_s8  ;;  %6826 = vmatpush1.bf16.msra.mxu1 %v6814_v51  ;;  %v7230_v2 = vsel %vm7226_vm7, %v14198_v56, %v16270_v13  ;;  %v16285_v13 = vld [vmem:[#allocation188_spill] sm:$0xff] }
 0xe18   : > { %8949 = vrot.lane.b32.xlu0 %v15894_v29, %s11216_s8  ;;  %6827 = vmatprep.subr.bf16.mxu1 %v6817_v58  ;;  %v16271_v58 = vld [vmem:[#allocation163_spill] sm:$0xff] }
 0xe19   : > { %v14402_v23 = vpop.permute.xlu1 %8738  ;;  %6857 = vmatprep.mubr.bf16.mxu1 %v15930_v40 }
 0xe1a   : > { %v14408_v49 = vpop.permute.xlu0 %7912 }
 0xe1b   : > { %8945 = vrot.lane.b32.xlu1 %v12900_v46, %s11216_s8  ;;  %6828 = vmatpush1.bf16.msra.mxu1 %v6816_v15  ;;  %v7229_v15 = vsel %vm7226_vm7, %v16271_v58, %v14198_v56  ;;  %v16274_v56 = vld [vmem:[#allocation106_spill] sm:$0xff]  ;;  %v10492_v58 = vld [vmem:[%s16128_s22 + $0x29] sm:$0x1]  ;;  %vm8744_vm7 = vcmask 564224  }
 0xe1c   : > { %9079 = vrot.lane.b32.xlu0 %v12973_v30, %s16257_s15  ;;  %6962 = vmatprep.subr.bf16.mxu1 %v6952_v25  ;;  %v7366_v25 = vsel %vm7364_vm8, %v16273_v31, %v16272_v47 }
 0xe1d   : > { %v14420_v12 = vpop.permute.xlu1 %8876 }
 0xe1e   : > { %v14422_v61 = vpop.permute.xlu0 %8253  ;;  %10473 = vmatmul.mubr.msk.bf16.vlgmr.msra.gmra.mrb[120].mxu1 %vm2477_vm9, %v10472_v11  ;;  %v10484_v11 = vld [vmem:[%s16128_s22 + $0x25] sm:$0x1] }
 0xe1f   : > { %9081 = vrot.lane.b32.xlu1 %v15894_v29, %s16257_s15  ;;  %6963 = vmatpush1.bf16.msra.mxu1 %v6951_v38  ;;  %v7365_v38 = vsel %vm7364_vm8, %v16274_v56, %v16273_v31 }
 0xe20   : > { %9077 = vrot.lane.b32.xlu0 %v12879_v16, %s16257_s15  ;;  %6964 = vmatprep.subr.bf16.mxu1 %v6954_v20  ;;  %v7368_v20 = vsel %vm7364_vm8, %v14244_v63, %v16276_v54  ;;  %v16289_v54 = vld [vmem:[#allocation169_spill] sm:$0xff] }
 0xe21   : > { %v14435_v26 = vpop.permute.xlu1 %9014  ;;  %6994 = vmatprep.mubr.bf16.mxu1 %v15930_v40 }
 0xe22   : > { %v14441_v52 = vpop.permute.xlu0 %8050 }
 0xe23   : > { %9083 = vrot.lane.b32.xlu1 %v12900_v46, %s16257_s15  ;;  %6965 = vmatpush1.bf16.msra.mxu1 %v6953_v9 }
 0xe24   : > { %9087 = vrot.lane.b32.xlu0 %v15894_v29, %s16257_s15  ;;  %7100 = vmatprep.subr.bf16.mxu1 %v7090_v28  ;;  %v7367_v28 = vsel %vm7364_vm8, %v16277_v57, %v14244_v63  ;;  %v16280_v63 = vld [vmem:[#allocation107_spill] sm:$0xff]  ;;  %v16290_v57 = vld [vmem:[#allocation69_spill] sm:$0xff]  ;;  %vm7571_vm8 = vcmask 703488  }
 0xe25   : > { %v14453_v59 = vpop.permute.xlu1 %7975 }
 0xe26   : > { %v14455_v60 = vpop.permute.xlu0 %8249  ;;  %10477 = vmatmul.mubr.msk.bf16.vlgmr.msra.gmra.mrb[124].mxu1 %vm2477_vm9, %v10476_v41  ;;  %v16278_v41 = vld [vmem:[#allocation65_spill] sm:$0xff] }
 0xe27   : > { %7015 = vrot.lane.b32.xlu1 %v13267_v0, %s16263_s2  ;;  %7101 = vmatpush1.bf16.msra.mxu1 %v7089_v19  ;;  %v7504_v19 = vsel %vm7502_vm10, %v16279_v36, %v16278_v41 }
 0xe28   : > { %9216 = vrot.lane.b32.xlu0 %v12973_v30, %s11217_s1  ;;  %7102 = vmatprep.subr.bf16.mxu1 %v7092_v55 }
 0xe29   : > { %v14468_v22 = vpop.permute.xlu1 %9151  ;;  %7132 = vmatprep.mubr.bf16.mxu1 %v15930_v40 }
 0xe2a   : > { %v14471_v7 = vpop.permute.xlu0 %8188 }
 0xe2b   : > { %8326 = vrot.lane.b32.xlu1 %v13267_v0, %s16028_s3  ;;  %7103 = vmatpush1.bf16.msra.mxu1 %v7091_v18  ;;  %s16269_s3 = smov 92   ;;  %v7503_v18 = vsel %vm7502_vm10, %v16280_v63, %v16279_v36  ;;  %v10496_v36 = vld [vmem:[%s16128_s22 + $0x2b] sm:$0x1]  ;;  %v16294_v63 = vld [vmem:[#allocation72_spill] sm:$0xff] }
 0xe2c   : > { %9214 = vrot.lane.b32.xlu0 %v12879_v16, %s11217_s1  ;;  %7238 = vmatprep.subr.bf16.mxu1 %v7228_v10 }
 0xe2d   : > { %v14486_v6 = vpop.permute.xlu1 %9285 }
 0xe2e   : > { %v14488_v48 = vpop.permute.xlu0 %9563  ;;  %10481 = vmatmul.mubr.msk.bf16.vlgmr.msra.gmra.mrb[128].mxu1 %vm2477_vm9, %v10480_v8  ;;  %v16283_v8 = vld [vmem:[#allocation167_spill] sm:$0xff] }
 0xe2f   : > { %7153 = vrot.lane.b32.xlu1 %v13267_v0, %s16269_s3  ;;  %7239 = vmatpush1.bf16.msra.mxu1 %v7227_v5  ;;  %v7505_v33 = vsel %vm7502_vm10, %v16283_v8, %v14290_v35  ;;  %v16284_v5 = vld [vmem:[#allocation67_spill] sm:$0xff]  ;;  %v16286_v35 = vld [vmem:[#allocation108_spill] sm:$0xff]  ;;  %vm8882_vm10 = vcmask 547840   ;;  %s16434_s3 = sld [smem:[#allocation225_spill]] }
 0xe30   : > { %9224 = vrot.lane.b32.xlu0 %v15894_v29, %s11217_s1  ;;  %7240 = vmatprep.subr.bf16.mxu1 %v7230_v2  ;;  %v7642_v2 = vsel %vm7640_vm12, %v16285_v13, %v16284_v5  ;;  %v7641_v31 = vsel %vm7640_vm12, %v16286_v35, %v16285_v13  ;;  %v16295_v8 = vld [vmem:[#allocation171_spill] sm:$0xff]  ;;  %v16297_v13 = vld [vmem:[#allocation192_spill] sm:$0xff] }
 0xe31   : > { %v14501_v51 = vpop.permute.xlu1 %9283  ;;  %7270 = vmatprep.mubr.bf16.mxu1 %v15930_v40  ;;  %v16296_v5 = vld [vmem:[#allocation71_spill] sm:$0xff] }
 0xe32   : > { %v14504_v24 = vpop.permute.xlu0 %8259 }
 0xe33   : > { %8464 = vrot.lane.b32.xlu1 %v13267_v0, %s16033_s18  ;;  %7241 = vmatpush1.bf16.msra.mxu1 %v7229_v15  ;;  %s16275_s18 = smov 90  }
 0xe34   : > { %9354 = vrot.lane.b32.xlu0 %v12973_v30, %s11218_s27  ;;  %7376 = vmatprep.subr.bf16.mxu1 %v7366_v25  ;;  %v16288_v25 = vld [vmem:[#allocation70_spill] sm:$0xff] }
 0xe35   : > { %v14519_v42 = vpop.permute.xlu1 %8113 }
 0xe36   : > { %10485 = vmatmul.mubr.msk.bf16.vlgmr.msra.gmra.mrb[132].mxu1 %vm2477_vm9, %v10484_v11  ;;  %v14530_v9 = vpop.permute.xlu0 %8255  ;;  %v7644_v11 = vsel %vm7640_vm12, %v14336_v44, %v16288_v25 }
 0xe37   : > { %7291 = vrot.lane.b32.xlu1 %v13267_v0, %s16275_s18  ;;  %7377 = vmatpush1.bf16.msra.mxu1 %v7365_v38  ;;  %s11223_s18 = smov [#allocation4]  }
 0xe38   : > { %9352 = vrot.lane.b32.xlu0 %v12879_v16, %s11218_s27  ;;  %7378 = vmatprep.subr.bf16.mxu1 %v7368_v20  ;;  %v7643_v20 = vsel %vm7640_vm12, %v16289_v54, %v14336_v44  ;;  %v16292_v44 = vld [vmem:[#allocation109_spill] sm:$0xff]  ;;  %vm7709_vm12 = vcmask 687104  }
 0xe39   : > { %v14534_v3 = vpop.permute.xlu1 %9289  ;;  %7408 = vmatprep.mubr.bf16.mxu1 %v15930_v40 }
 0xe3a   : > { %v14552_v43 = vpop.permute.xlu0 %9569 }
 0xe3b   : > { %8602 = vrot.lane.b32.xlu1 %v13267_v0, %s16131_s13  ;;  %7379 = vmatpush1.bf16.msra.mxu1 %v7367_v28  ;;  %s16281_s13 = smov 88   ;;  %v16291_v28 = vld [vmem:[#allocation190_spill] sm:$0xff] }
 0xe3c   : > { %9362 = vrot.lane.b32.xlu0 %v15894_v29, %s11218_s27  ;;  %7514 = vmatprep.subr.bf16.mxu1 %v7504_v19  ;;  %v7780_v41 = vsel %vm7778_vm13, %v16291_v28, %v16290_v57  ;;  %v16302_v57 = vld [vmem:[#allocation173_spill] sm:$0xff] }
 0xe3d   : > { %v14550_v55 = vpop.permute.xlu1 %9423 }
 0xe3e   : > { %10489 = vmatmul.mubr.msk.bf16.vlgmr.msra.gmra.mrb[136].mxu1 %vm2477_vm9, %v10488_v53  ;;  %v14579_v15 = vpop.permute.xlu0 %8391  ;;  %v7779_v53 = vsel %vm7778_vm13, %v16292_v44, %v16291_v28  ;;  %v7919_v28 = vsel %vm7916_vm14, %v16302_v57, %v14408_v49  ;;  %v10508_v57 = vld [vmem:[%s16128_s22 + $0x31] sm:$0x1] }
 0xe3f   : > { %7429 = vrot.lane.b32.xlu1 %v13267_v0, %s16281_s13  ;;  %7515 = vmatpush1.bf16.msra.mxu1 %v7503_v18  ;;  %v7782_v18 = vsel %vm7778_vm13, %v14375_v39, %v16294_v63 }
 0xe40   : > { %9492 = vrot.lane.b32.xlu0 %v12973_v30, %s11219_s25  ;;  %7516 = vmatprep.subr.bf16.mxu1 %v7506_v50 }
 0xe41   : > { %v14565_v10 = vpop.permute.xlu1 %9421  ;;  %7546 = vmatprep.mubr.bf16.mxu1 %v15930_v40 }
 0xe42   : > { %v14599_v38 = vpop.permute.xlu0 %8387 }
 0xe43   : > { %8740 = vrot.lane.b32.xlu1 %v13267_v0, %s16132_s23  ;;  %7517 = vmatpush1.bf16.msra.mxu1 %v7505_v33  ;;  %s16287_s23 = smov 86   ;;  %v7781_v33 = vsel %vm7778_vm13, %v16295_v8, %v14375_v39  ;;  %v16299_v39 = vld [vmem:[#allocation110_spill] sm:$0xff]  ;;  %v16307_v8 = vld [vmem:[#allocation76_spill] sm:$0xff]  ;;  %vm9020_vm13 = vcmask 531456  }
 0xe44   : > { %9490 = vrot.lane.b32.xlu0 %v12879_v16, %s11219_s25  ;;  %7652 = vmatprep.subr.bf16.mxu1 %v7642_v2  ;;  %v7918_v2 = vsel %vm7916_vm14, %v16297_v13, %v16296_v5  ;;  %v7917_v25 = vsel %vm7916_vm14, %v16299_v39, %v16297_v13  ;;  %v16309_v13 = vld [vmem:[#allocation175_spill] sm:$0xff] }
 0xe45   : > { %v14583_v47 = vpop.permute.xlu1 %8251 }
 0xe46   : > { %10493 = vmatmul.mubr.msk.bf16.vlgmr.msra.gmra.mrb[140].mxu1 %vm2477_vm9, %v10492_v58  ;;  %v14625_v14 = vpop.permute.xlu0 %9701  ;;  %v10500_v58 = vld [vmem:[%s16128_s22 + $0x2d] sm:$0x1] }
 0xe47   : > { %7567 = vrot.lane.b32.xlu1 %v13267_v0, %s16287_s23  ;;  %7653 = vmatpush1.bf16.msra.mxu1 %v7641_v31 }
 0xe48   : > { %9500 = vrot.lane.b32.xlu0 %v15894_v29, %s11219_s25  ;;  %7654 = vmatprep.subr.bf16.mxu1 %v7644_v11  ;;  %v16301_v11 = vld [vmem:[#allocation74_spill] sm:$0xff] }
 0xe49   : > { %v14596_v56 = vpop.permute.xlu1 %9427  ;;  %7684 = vmatprep.mubr.bf16.mxu1 %v15930_v40  ;;  %v7920_v54 = vsel %vm7916_vm14, %v14408_v49, %v16301_v11  ;;  %v16306_v49 = vld [vmem:[#allocation111_spill] sm:$0xff]  ;;  %vm7847_vm14 = vcmask 670720  }
 0xe4a   : > { %v14647_v31 = vpop.permute.xlu0 %8397  ;;  %v16312_v11 = vld [vmem:[#allocation195_spill] sm:$0xff] }
 0xe4b   : > { %8878 = vrot.lane.b32.xlu1 %v13267_v0, %s16134_s28  ;;  %7655 = vmatpush1.bf16.msra.mxu1 %v7643_v20  ;;  %s16293_s28 = smov 84   ;;  %16298 = vst [vmem:[#allocation143_spill] sm:$0xff] %v14647_v31 }
 0xe4c   : > { %9630 = vrot.lane.b32.xlu0 %v12973_v30, %s11220_s9  ;;  %7790 = vmatprep.subr.bf16.mxu1 %v7780_v41  ;;  %v16303_v41 = vld [vmem:[#allocation73_spill] sm:$0xff] }
 0xe4d   : > { %v14614_v19 = vpop.permute.xlu1 %9561 }
 0xe4e   : > { %10497 = vmatmul.mubr.msk.bf16.vlgmr.msra.gmra.mrb[144].mxu1 %vm2477_vm9, %v10496_v36  ;;  %v16304_v36 = vld [vmem:[#allocation193_spill] sm:$0xff] }
 0xe4f   : > { %7705 = vrot.lane.b32.xlu1 %v13267_v0, %s16293_s28  ;;  %7791 = vmatpush1.bf16.msra.mxu1 %v7779_v53  ;;  %v8056_v44 = vsel %vm8054_vm15, %v16304_v36, %v16303_v41  ;;  %v14674_v53 = vpop.permute.xlu0 %8393 }
 0xe50   : > { %9628 = vrot.lane.b32.xlu0 %v12879_v16, %s11220_s9  ;;  %7792 = vmatprep.subr.bf16.mxu1 %v7782_v18  ;;  %16305 = vst [vmem:[#allocation123_spill] sm:$0xff] %v14674_v53  ;;  %v8055_v18 = vsel %vm8054_vm15, %v16306_v49, %v16304_v36 }
 0xe51   : > { %v14629_v50 = vpop.permute.xlu1 %9559  ;;  %7822 = vmatprep.mubr.bf16.mxu1 %v15930_v40 }
 0xe53   : > { %9016 = vrot.lane.b32.xlu1 %v13267_v0, %s16135_s21  ;;  %7793 = vmatpush1.bf16.msra.mxu1 %v7781_v33  ;;  %s16300_s21 = smov 82   ;;  %v8058_v33 = vsel %vm8054_vm15, %v14441_v52, %v16307_v8 }
 0xe54   : > { %9638 = vrot.lane.b32.xlu0 %v15894_v29, %s11220_s9  ;;  %7928 = vmatprep.subr.bf16.mxu1 %v7918_v2  ;;  %v8057_v2 = vsel %vm8054_vm15, %v16309_v13, %v14441_v52  ;;  %v16314_v52 = vld [vmem:[#allocation112_spill] sm:$0xff]  ;;  %v16318_v13 = vld [vmem:[#allocation177_spill] sm:$0xff]  ;;  %vm9157_vm15 = vcmask 515072  }
 0xe55   : > { %v14645_v35 = vpop.permute.xlu1 %8389 }
 0xe56   : > { %10501 = vmatmul.mubr.msk.bf16.vlgmr.msra.gmra.mrb[148].mxu1 %vm2477_vm9, %v10500_v58  ;;  %v14697_v58 = vpop.permute.xlu0 %9707 }
 0xe57   : > { %7843 = vrot.lane.b32.xlu1 %v13267_v0, %s16300_s21  ;;  %7929 = vmatpush1.bf16.msra.mxu1 %v7917_v25  ;;  %16310 = vst [vmem:[#allocation135_spill] sm:$0xff] %v14697_v58  ;;  %v16311_v25 = vld [vmem:[#allocation75_spill] sm:$0xff]  ;;  %s11080_s21 = sshll.u32 %s11223_s18, 4  ;;  %s11081_s21 = int_to_ptr.vmem [resolvable:$false] %s11080_s21 }
 0xe58   : > { %9768 = vrot.lane.b32.xlu0 %v12973_v30, %s11221_s6  ;;  %7930 = vmatprep.subr.bf16.mxu1 %v7920_v54  ;;  %v10504_v30 = vld [vmem:[%s16128_s22 + $0x2f] sm:$0x1]  ;;  %v8194_v54 = vsel %vm8192_vm0, %v16312_v11, %v16311_v25  ;;  %s11082_s10 = scalar_lea.vmem %s11081_s21, 128 }
 0xe59   : > { %v14660_v20 = vpop.permute.xlu1 %9565  ;;  %7960 = vmatprep.mubr.bf16.mxu1 %v15930_v40 }
 0xe5b   : > { %9153 = vrot.lane.b32.xlu1 %v13267_v0, %s15959_s5  ;;  %7931 = vmatpush1.bf16.msra.mxu1 %v7919_v28 }
 0xe5c   : > { %9766 = vrot.lane.b32.xlu0 %v12879_v16, %s11221_s6  ;;  %8066 = vmatprep.subr.bf16.mxu1 %v8056_v44  ;;  %v8193_v44 = vsel %vm8192_vm0, %v16314_v52, %v16312_v11 }
 0xe5d   : > { %v14678_v63 = vpop.permute.xlu1 %9699 }
 0xe5e   : > { %10505 = vmatmul.mubr.msk.bf16.vlgmr.msra.gmra.mrb[152].mxu1 %vm2477_vm9, %v10504_v30  ;;  %v16315_v30 = vld [vmem:[#allocation78_spill] sm:$0xff] }
 0xe5f   : > { %7981 = vrot.lane.b32.xlu1 %v13267_v0, %s16137_s11  ;;  %8067 = vmatpush1.bf16.msra.mxu1 %v8055_v18  ;;  %v8196_v49 = vsel %vm8192_vm0, %v14471_v7, %v16315_v30  ;;  %v14718_v18 = vpop.permute.xlu0 %8529 }
 0xe60   : > { %8068 = vmatprep.subr.bf16.mxu1 %v8058_v33  ;;  %8098 = vmatprep.mubr.bf16.mxu1 %v15930_v40  ;;  %16316 = vst [vmem:[#allocation115_spill] sm:$0xff] %v14718_v18 }
 0xe61   : > { %v14690_v16 = vpop.permute.xlu1 %9697  ;;  %v4766_v5 = vpop.f32.mrb[48].mxu1  ;;  %9776 = vrot.lane.b32.xlu0 %v15894_v29, %s11221_s6 }
 0xe62   : > { %16308 = vst [vmem:[#allocation18_spill] sm:$0xff] %v14690_v16  ;;  %v4768_v39 = vpop.f32.mrb[49].mxu1 }
 0xe63   : > { %9291 = vrot.lane.b32.xlu1 %v13267_v0, %s16121_s7  ;;  %8069 = vmatpush1.bf16.msra.mxu1 %v8057_v2  ;;  %v4770_v28 = vpop.f32.mrb[50].mxu1  ;;  %v8195_v2 = vsel %vm8192_vm0, %v16318_v13, %v14471_v7  ;;  %v14736_v7 = vpop.permute.xlu0 %8525  ;;  %vm7985_vm0 = vcmask 654336  }
 0xe64   : > { %8204 = vmatprep.subr.bf16.mxu1 %v8194_v54  ;;  %v4771_v41 = vpop.f32.mrb[51].mxu1  ;;  %v16319_v54 = vld [vmem:[#allocation77_spill] sm:$0xff]  ;;  %16322 = vst [vmem:[#allocation26_spill] sm:$0xff] %v14736_v7 }
 0xe65   : > { %v14707_v36 = vpop.permute.xlu1 %8527  ;;  %v10512_v41 = vld [vmem:[%s16128_s22 + $0x33] sm:$0x1] }
 0xe66   : > { %16313 = vst [vmem:[#allocation25_spill] sm:$0xff] %v14707_v36  ;;  %10509 = vmatmul.mubr.msk.bf16.vlgmr.msra.gmra.mrb[156].mxu1 %vm2477_vm9, %v10508_v57  ;;  %v16320_v57 = vld [vmem:[#allocation197_spill] sm:$0xff] }
 0xe67   : > { %8119 = vrot.lane.b32.xlu1 %v13267_v0, %s11207_s12  ;;  %8205 = vmatpush1.bf16.msra.mxu1 %v8193_v44  ;;  %v8332_v28 = vsel %vm8330_vm1, %v16320_v57, %v16319_v54 }
 0xe68   : > { %8206 = vmatprep.subr.bf16.mxu1 %v8196_v49  ;;  %8236 = vmatprep.mubr.bf16.mxu1 %v15930_v40 }
 0xe69   : > { %v14721_v8 = vpop.permute.xlu1 %9703  ;;  %v4810_v33 = vpop.f32.mrb[52].mxu1 }
 0xe6a   : > { %16317 = vst [vmem:[#allocation19_spill] sm:$0xff] %v14721_v8  ;;  %v4811_v25 = vadd.f32 %v4810_v33, %v4766_v5  ;;  %v4812_v11 = vpop.f32.mrb[53].mxu1  ;;  %v16323_v5 = vld [vmem:[#allocation113_spill] sm:$0xff] }
 0xe6b   : > { %9429 = vrot.lane.b32.xlu1 %v13267_v0, %s11208_s0  ;;  %8207 = vmatpush1.bf16.msra.mxu1 %v8195_v2  ;;  %v4813_v52 = vadd.f32 %v4812_v11, %v4768_v39  ;;  %v4814_v44 = vpop.f32.mrb[54].mxu1  ;;  %v8331_v33 = vsel %vm8330_vm1, %v16323_v5, %v16320_v57 }
 0xe6c   : > { %8342 = vmatprep.subr.bf16.mxu1 %v8332_v28  ;;  %v4815_v30 = vpop.f32.mrb[55].mxu1 }
 0xe6d   : > { %v14734_v49 = vpop.permute.xlu1 %10972 }
 0xe6e   : > { %16321 = vst [vmem:[#allocation214_spill] sm:$0xff] %v14734_v49  ;;  %10513 = vmatmul.mubr.msk.bf16.vlgmr.msra.gmra.mrb[160].mxu1 %vm2477_vm9, %v10512_v41  ;;  %v14749_v41 = vpop.permute.xlu0 %10977 }
 0xe6f   : > { %8257 = vrot.lane.b32.xlu1 %v13267_v0, %s11209_s24  ;;  %8343 = vmatpush1.bf16.msra.mxu1 %v8331_v33  ;;  %16325 = vst [vmem:[#allocation125_spill] sm:$0xff] %v14749_v41 }
 0xe70   : > { %8374 = vmatprep.mubr.bf16.mxu1 %v15930_v40 }
 0xe71   : > { %v14745_v39 = vpop.permute.xlu1 %8531  ;;  %v4876_v13 = vpop.f32.mrb[56].mxu1 }
 0xe72   : > { %16324 = vst [vmem:[#allocation147_spill] sm:$0xff] %v14745_v39  ;;  %v4883_v2 = vadd.f32 %v4876_v13, %v4811_v25  ;;  %v4878_v11 = vpop.f32.mrb[57].mxu1  ;;  %v14757_v25 = vpop.permute.xlu0 %8535 }
 0xe73   : > { %9567 = vrot.lane.b32.xlu1 %v13267_v0, %s11210_s29  ;;  %v4884_v54 = vadd.f32 %v4878_v11, %v4813_v52  ;;  %v4880_v28 = vpop.f32.mrb[58].mxu1  ;;  %16328 = vst [vmem:[#allocation29_spill] sm:$0xff] %v14757_v25 }
 0xe74   : > { %v4881_v44 = vpop.f32.mrb[59].mxu1 }
 0xe75   : > { %v14751_v57 = vpop.permute.xlu1 %10987 }
 0xe76   : > { %16326 = vst [vmem:[#allocation20_spill] sm:$0xff] %v14751_v57 }
 0xe77   : > { %8395 = vrot.lane.b32.xlu1 %v13267_v0, %s11211_s14  ;;  %v5148_v30 = vpop.f32.mrb[8].mxu0 }
 0xe78   : > { %v5150_v5 = vpop.f32.mrb[9].mxu0 }
 0xe79   : > { %v14755_v33 = vpop.permute.xlu1 %8667  ;;  %v4944_v39 = vpop.f32.mrb[60].mxu1 }
 0xe7a   : > { %16327 = vst [vmem:[#allocation138_spill] sm:$0xff] %v14755_v33  ;;  %v4951_v13 = vadd.f32 %v4944_v39, %v4883_v2  ;;  %v4946_v7 = vpop.f32.mrb[61].mxu1  ;;  %v5152_v28 = vpop.f32.mrb[10].mxu0 }
 0xe7b   : > { %9705 = vrot.lane.b32.xlu1 %v13267_v0, %s11212_s4  ;;  %v4952_v52 = vadd.f32 %v4946_v7, %v4884_v54  ;;  %v4948_v11 = vpop.f32.mrb[62].mxu1  ;;  %v5153_v57 = vpop.f32.mrb[11].mxu0 }
 0xe7c   : > { %v4949_v44 = vpop.f32.mrb[63].mxu1  ;;  %v14767_v39 = vpop.permute.xlu0 %10982 }
 0xe7d   : > { %v14761_v58 = vpop.permute.xlu1 %8669  ;;  %16331 = vst [vmem:[#allocation215_spill] sm:$0xff] %v14767_v39 }
 0xe7e   : > { %16329 = vst [vmem:[#allocation118_spill] sm:$0xff] %v14761_v58 }
 0xe7f   : > { %8533 = vrot.lane.b32.xlu1 %v13267_v0, %s11213_s19  ;;  %v5284_v8 = vpop.f32.mrb[12].mxu0 }
 0xe80   : > { %v5286_v33 = vpop.f32.mrb[13].mxu0 }
 0xe81   : > { %v14765_v41 = vpop.permute.xlu1 %8805  ;;  %v5012_v25 = vpop.f32.mrb[64].mxu1 }
 0xe82   : > { %16330 = vst [vmem:[#allocation21_spill] sm:$0xff] %v14765_v41  ;;  %v5019_v2 = vadd.f32 %v5012_v25, %v4951_v13  ;;  %v5014_v36 = vpop.f32.mrb[65].mxu1  ;;  %v5288_v57 = vpop.f32.mrb[14].mxu0 }
 0xe83   : > { %9218 = vrot.lane.b32.xlu1 %v15894_v29, %s11217_s1  ;;  %v5020_v7 = vadd.f32 %v5014_v36, %v4952_v52  ;;  %v5016_v54 = vpop.f32.mrb[66].mxu1  ;;  %v5289_v28 = vpop.f32.mrb[15].mxu0 }
 0xe84   : > { %v5017_v11 = vpop.f32.mrb[67].mxu1  ;;  %v14777_v25 = vpop.permute.xlu0 %8665 }
 0xe85   : > { %v14771_v44 = vpop.permute.xlu1 %8807  ;;  %16334 = vst [vmem:[#allocation127_spill] sm:$0xff] %v14777_v25 }
 0xe86   : > { %16332 = vst [vmem:[#allocation30_spill] sm:$0xff] %v14771_v44 }
 0xe87   : > { %8671 = vrot.lane.b32.xlu1 %v13267_v0, %s11214_s30  ;;  %v5420_v58 = vpop.f32.mrb[16].mxu0 }
 0xe88   : > { %v5422_v41 = vpop.f32.mrb[17].mxu0  ;;  %v14791_v31 = vpop.permute.xlu0 %8663 }
 0xe89   : > { %v14775_v18 = vpop.permute.xlu1 %8943  ;;  %v5080_v39 = vpop.f32.mrb[68].mxu1  ;;  %16337 = vst [vmem:[#allocation33_spill] sm:$0xff] %v14791_v31 }
 0xe8a   : > { %16333 = vst [vmem:[#allocation151_spill] sm:$0xff] %v14775_v18  ;;  %v5087_v13 = vadd.f32 %v5080_v39, %v5019_v2  ;;  %v5082_v49 = vpop.f32.mrb[69].mxu1  ;;  %v5424_v54 = vpop.f32.mrb[18].mxu0 }
 0xe8b   : > { %9220 = vrot.lane.b32.xlu1 %v12900_v46, %s11217_s1  ;;  %v5088_v36 = vadd.f32 %v5082_v49, %v5020_v7  ;;  %v5084_v52 = vpop.f32.mrb[70].mxu1  ;;  %v5425_v28 = vpop.f32.mrb[19].mxu0 }
 0xe8c   : > { %v5155_v57 = vadd.f32 %v5148_v30, %v5087_v13  ;;  %v5085_v11 = vpop.f32.mrb[71].mxu1  ;;  %v14803_v31 = vpop.permute.xlu0 %8673 }
 0xe8d   : > { %v14781_v44 = vpop.permute.xlu1 %8945  ;;  %v5156_v16 = vadd.f32 %v5150_v5, %v5088_v36  ;;  %16339 = vst [vmem:[#allocation23_spill] sm:$0xff] %v14803_v31 }
 0xe8e   : > { %16335 = vst [vmem:[#allocation22_spill] sm:$0xff] %v14781_v44 }
 0xe8f   : > { %8809 = vrot.lane.b32.xlu1 %v13267_v0, %s11215_s20  ;;  %v14785_v18 = vpop.f32.mrb[20].mxu0  ;;  %s16430_s20 = sld [smem:[#allocation8_spill]] }
 0xe90   : > { %v14787_v25 = vpop.f32.mrb[21].mxu0 }
 0xe91   : > { %v14789_v39 = vpop.permute.xlu1 %9081  ;;  %v5216_v2 = vpop.f32.mrb[72].mxu1 }
 0xe92   : > { %16336 = vst [vmem:[#allocation141_spill] sm:$0xff] %v14789_v39  ;;  %v5223_v49 = vadd.f32 %v5216_v2, %v5155_v57  ;;  %v5218_v7 = vpop.f32.mrb[73].mxu1  ;;  %v5560_v5 = vpop.f32.mrb[22].mxu0 }
 0xe93   : > { %9356 = vrot.lane.b32.xlu1 %v15894_v29, %s11218_s27  ;;  %v5224_v30 = vadd.f32 %v5218_v7, %v5156_v16  ;;  %v5220_v13 = vpop.f32.mrb[74].mxu1  ;;  %v5561_v54 = vpop.f32.mrb[23].mxu0  ;;  %v16340_v16 = vld [vmem:[#allocation179_spill] sm:$0xff] }
 0xe94   : > { %v5291_v36 = vadd.f32 %v5284_v8, %v5223_v49  ;;  %v5221_v52 = vpop.f32.mrb[75].mxu1  ;;  %v16341_v49 = vld [vmem:[#allocation79_spill] sm:$0xff]  ;;  %v16342_v54 = vld [vmem:[#allocation81_spill] sm:$0xff] }
 0xe95   : > { %v14795_v11 = vpop.permute.xlu1 %9083  ;;  %v5292_v28 = vadd.f32 %v5286_v33, %v5224_v30 }
 0xe96   : > { %16338 = vst [vmem:[#allocation121_spill] sm:$0xff] %v14795_v11  ;;  %v16343_v11 = vld [vmem:[#allocation199_spill] sm:$0xff] }
 0xe97   : > { %8947 = vrot.lane.b32.xlu1 %v13267_v0, %s11216_s8  ;;  %v14799_v39 = vpop.f32.mrb[24].mxu0  ;;  %v7159_v31 = vsel %vm7157_vm2, %v16343_v11, %v16342_v54  ;;  %s16431_s8 = sld [smem:[#allocation11_spill]] }
 0xe98   : > { %v14801_v44 = vpop.f32.mrb[25].mxu0 }
 0xe99   : > { %v7016_v57 = vpop.permute.xlu1 %7015  ;;  %v5352_v2 = vpop.f32.mrb[76].mxu1 }
 0xe9a   : > { %v7022_v8 = vsel %vm7019_vm3, %v16340_v16, %v7016_v57  ;;  %v7023_v7 = vsel %vm7019_vm3, %v7016_v57, %v16341_v49  ;;  %v5359_v13 = vadd.f32 %v5352_v2, %v5291_v36  ;;  %v5354_v33 = vpop.f32.mrb[77].mxu1  ;;  %v5696_v52 = vpop.f32.mrb[26].mxu0  ;;  %v10478_v16 = vld [vmem:[%s16128_s22 + $0x22] sm:$0x1]  ;;  %vm8468_vm3 = vcmask 596992  }
 0xe9b   : > { %9358 = vrot.lane.b32.xlu1 %v12900_v46, %s11218_s27  ;;  %7033 = vmatprep.subr.bf16.mxu0 %v7023_v7  ;;  %v5360_v30 = vadd.f32 %v5354_v33, %v5292_v28  ;;  %v5356_v5 = vpop.f32.mrb[78].mxu1  ;;  %v5697_v36 = vpop.f32.mrb[27].mxu0  ;;  %v16344_v7 = vld [vmem:[#allocation80_spill] sm:$0xff]  ;;  %v10516_v52 = vld [vmem:[%s16128_s22 + $0x35] sm:$0x1] }
 0xe9c   : > { %7034 = vmatpush1.bf16.msra.mxu0 %v7022_v8  ;;  %v5427_v53 = vadd.f32 %v5420_v58, %v5359_v13  ;;  %v5357_v57 = vpop.f32.mrb[79].mxu1  ;;  %v16345_v33 = vld [vmem:[#allocation148_spill] sm:$0xff]  ;;  %v16350_v36 = vld [vmem:[#allocation83_spill] sm:$0xff] }
 0xe9d   : > { %v8327_v2 = vpop.permute.xlu1 %8326  ;;  %7169 = vmatprep.subr.bf16.mxu0 %v7159_v31  ;;  %v5428_v49 = vadd.f32 %v5422_v41, %v5360_v30  ;;  %v7158_v58 = vsel %vm7157_vm2, %v16345_v33, %v16343_v11  ;;  %v16346_v41 = vld [vmem:[#allocation82_spill] sm:$0xff]  ;;  %v16347_v30 = vld [vmem:[#allocation200_spill] sm:$0xff]  ;;  %v14838_v11 = vpop.permute.xlu0 %8803  ;;  %s10567_s2 = sshll.u32 %s16431_s8, 6 }
 0xe9e   : > { %v8333_v28 = vsel %vm8330_vm1, %v14353_v32, %v8327_v2  ;;  %v8334_v8 = vsel %vm8330_vm1, %v8327_v2, %v16344_v7  ;;  %v8470_v5 = vsel %vm8468_vm3, %v16347_v30, %v16346_v41  ;;  %16348 = vst [vmem:[#allocation34_spill] sm:$0xff] %v14838_v11  ;;  %v16351_v41 = vld [vmem:[#allocation114_spill] sm:$0xff]  ;;  %vm9295_vm1 = vcmask 498688  }
 0xe9f   : > { %9085 = vrot.lane.b32.xlu1 %v13267_v0, %s16257_s15  ;;  %10479 = vmatmul.mubr.msk.bf16.vlgmr.msra.gmra.mrb[64].mxu0 %vm2477_vm9, %v10478_v16  ;;  %v14827_v13 = vpop.f32.mrb[28].mxu0  ;;  %v16349_v16 = vld [vmem:[#allocation181_spill] sm:$0xff]  ;;  %v16353_v11 = vld [vmem:[#allocation202_spill] sm:$0xff]  ;;  %s351_s15 = sand.u32 1, %s16430_s20  }
 0xea0   : > { %8344 = vmatprep.subr.bf16.mxu1 %v8334_v8  ;;  %7170 = vmatpush1.bf16.msra.mxu0 %v7158_v58  ;;  %v14829_v31 = vpop.f32.mrb[29].mxu0  ;;  %s9973_s28 = scalar_lea.sflag [#allocation5], %s351_s15 }
 0xea1   : > { %8345 = vmatpush1.bf16.msra.mxu1 %v8333_v28  ;;  %v7154_v32 = vpop.permute.xlu1 %7153  ;;  %v5488_v54 = vpop.f32.mrb[80].mxu1  ;;  %7201 = vmatprep.mubr.bf16.mxu0 %v15930_v40 }
 0xea2   : > { %v7160_v57 = vsel %vm7157_vm2, %v16349_v16, %v7154_v32  ;;  %8480 = vmatprep.subr.bf16.mxu1 %v8470_v5  ;;  %v7161_v2 = vsel %vm7157_vm2, %v7154_v32, %v16350_v36  ;;  %v5495_v28 = vadd.f32 %v5488_v54, %v5427_v53  ;;  %v5490_v7 = vpop.f32.mrb[81].mxu1  ;;  %v5832_v58 = vpop.f32.mrb[30].mxu0  ;;  %v8469_v16 = vsel %vm8468_vm3, %v16351_v41, %v16347_v30  ;;  %v16352_v5 = vld [vmem:[#allocation85_spill] sm:$0xff]  ;;  %v10482_v53 = vld [vmem:[%s16128_s22 + $0x24] sm:$0x1] }
 0xea3   : > { %9494 = vrot.lane.b32.xlu1 %v15894_v29, %s11219_s25  ;;  %7171 = vmatprep.subr.bf16.mxu0 %v7161_v2  ;;  %v5496_v8 = vadd.f32 %v5490_v7, %v5428_v49  ;;  %v5492_v33 = vpop.f32.mrb[82].mxu1  ;;  %v7297_v32 = vsel %vm7295_vm4, %v16353_v11, %v16352_v5  ;;  %v5833_v36 = vpop.f32.mrb[31].mxu0  ;;  %v16354_v2 = vld [vmem:[#allocation84_spill] sm:$0xff]  ;;  %v16357_v58 = vld [vmem:[#allocation203_spill] sm:$0xff]  ;;  %v10520_v5 = vld [vmem:[%s16128_s22 + $0x37] sm:$0x1] }
 0xea4   : > { %7172 = vmatpush1.bf16.msra.mxu0 %v7160_v57  ;;  %10517 = vmatmul.mubr.msk.bf16.vlgmr.msra.gmra.mrb[164].mxu1 %vm2477_vm9, %v10516_v52  ;;  %v5563_v54 = vadd.f32 %v14785_v18, %v5495_v28  ;;  %v5493_v49 = vpop.f32.mrb[83].mxu1  ;;  %v16355_v18 = vld [vmem:[#allocation150_spill] sm:$0xff]  ;;  %vm8123_vm2 = vcmask 637952  }
 0xea5   : > { %8481 = vmatpush1.bf16.msra.mxu1 %v8469_v16  ;;  %v8465_v57 = vpop.permute.xlu1 %8464  ;;  %7307 = vmatprep.subr.bf16.mxu0 %v7297_v32  ;;  %v5564_v52 = vadd.f32 %v14787_v25, %v5496_v8  ;;  %v7296_v28 = vsel %vm7295_vm4, %v16355_v18, %v16353_v11  ;;  %v16356_v8 = vld [vmem:[#allocation86_spill] sm:$0xff]  ;;  %v14880_v11 = vpop.permute.xlu0 %8801  ;;  %v16358_v32 = vld [vmem:[#allocation183_spill] sm:$0xff] }
 0xea6   : > { %v8471_v30 = vsel %vm8468_vm3, %v14369_v1, %v8465_v57  ;;  %v8472_v7 = vsel %vm8468_vm3, %v8465_v57, %v16354_v2  ;;  %8512 = vmatprep.mubr.bf16.mxu1 %v15930_v40  ;;  %v8608_v41 = vsel %vm8606_vm5, %v16357_v58, %v16356_v8  ;;  %v16359_v57 = vld [vmem:[#allocation87_spill] sm:$0xff]  ;;  %v16360_v8 = vld [vmem:[#allocation116_spill] sm:$0xff]  ;;  %vm9433_vm3 = vcmask 482304  }
 0xea7   : > { %9222 = vrot.lane.b32.xlu1 %v13267_v0, %s11217_s1  ;;  %10483 = vmatmul.mubr.msk.bf16.vlgmr.msra.gmra.mrb[68].mxu0 %vm2477_vm9, %v10482_v53  ;;  %v14869_v33 = vpop.f32.mrb[32].mxu0  ;;  %s10081_s1 = sshll.u32 %s351_s15, 2 }
 0xea8   : > { %8482 = vmatprep.subr.bf16.mxu1 %v8472_v7  ;;  %7308 = vmatpush1.bf16.msra.mxu0 %v7296_v28  ;;  %v14871_v1 = vpop.f32.mrb[33].mxu0  ;;  %s353_s17 = scalar_lea.vmem [#allocation4], %s10081_s1 }
 0xea9   : > { %8483 = vmatpush1.bf16.msra.mxu1 %v8471_v30  ;;  %v7292_v25 = vpop.permute.xlu1 %7291  ;;  %v5624_v16 = vpop.f32.mrb[84].mxu1  ;;  %7339 = vmatprep.mubr.bf16.mxu0 %v15930_v40 }
 0xeaa   : > { %v7298_v53 = vsel %vm7295_vm4, %v16358_v32, %v7292_v25  ;;  %8618 = vmatprep.subr.bf16.mxu1 %v8608_v41  ;;  %v5631_v49 = vadd.f32 %v5624_v16, %v5563_v54  ;;  %v5626_v36 = vpop.f32.mrb[85].mxu1  ;;  %v7299_v30 = vsel %vm7295_vm4, %v7292_v25, %v16359_v57  ;;  %v5968_v18 = vpop.f32.mrb[34].mxu0  ;;  %v8607_v54 = vsel %vm8606_vm5, %v16360_v8, %v16357_v58  ;;  %v16361_v41 = vld [vmem:[#allocation89_spill] sm:$0xff]  ;;  %v16366_v8 = vld [vmem:[#allocation206_spill] sm:$0xff] }
 0xeab   : > { %9496 = vrot.lane.b32.xlu1 %v12900_v46, %s11219_s25  ;;  %v5632_v2 = vadd.f32 %v5626_v36, %v5564_v52  ;;  %7309 = vmatprep.subr.bf16.mxu0 %v7299_v30  ;;  %v5628_v7 = vpop.f32.mrb[86].mxu1  ;;  %v16362_v16 = vld [vmem:[#allocation205_spill] sm:$0xff]  ;;  %v10486_v52 = vld [vmem:[%s16128_s22 + $0x26] sm:$0x1]  ;;  %v5969_v36 = vpop.f32.mrb[35].mxu0  ;;  %v16365_v18 = vld [vmem:[#allocation90_spill] sm:$0xff] }
 0xeac   : > { %v5699_v28 = vadd.f32 %v14799_v39, %v5631_v49  ;;  %7310 = vmatpush1.bf16.msra.mxu0 %v7298_v53  ;;  %10521 = vmatmul.mubr.msk.bf16.vlgmr.msra.gmra.mrb[168].mxu1 %vm2477_vm9, %v10520_v5  ;;  %v7435_v25 = vsel %vm7433_vm6, %v16362_v16, %v16361_v41  ;;  %v5629_v32 = vpop.f32.mrb[87].mxu1  ;;  %v16363_v53 = vld [vmem:[#allocation88_spill] sm:$0xff]  ;;  %v10524_v41 = vld [vmem:[%s16128_s22 + $0x39] sm:$0x1]  ;;  %vm8261_vm4 = vcmask 621568  }
 0xead   : > { %8619 = vmatpush1.bf16.msra.mxu1 %v8607_v54  ;;  %v8603_v57 = vpop.permute.xlu1 %8602  ;;  %v5700_v39 = vadd.f32 %v14801_v44, %v5632_v2  ;;  %7445 = vmatprep.subr.bf16.mxu0 %v7435_v25  ;;  %v16364_v49 = vld [vmem:[#allocation152_spill] sm:$0xff]  ;;  %v8746_v54 = vsel %vm8744_vm7, %v16366_v8, %v16365_v18  ;;  %v16367_v25 = vld [vmem:[#allocation185_spill] sm:$0xff] }
 0xeae   : > { %v8609_v5 = vsel %vm8606_vm5, %v14387_v37, %v8603_v57  ;;  %v8610_v58 = vsel %vm8606_vm5, %v8603_v57, %v16363_v53  ;;  %8650 = vmatprep.mubr.bf16.mxu1 %v15930_v40  ;;  %v7434_v30 = vsel %vm7433_vm6, %v16364_v49, %v16362_v16  ;;  %v14922_v16 = vpop.permute.xlu0 %8811  ;;  %v16368_v57 = vld [vmem:[#allocation91_spill] sm:$0xff]  ;;  %v16369_v18 = vld [vmem:[#allocation117_spill] sm:$0xff]  ;;  %vm9571_vm5 = vcmask 465920  }
 0xeaf   : > { %9360 = vrot.lane.b32.xlu1 %v13267_v0, %s11218_s27  ;;  %10487 = vmatmul.mubr.msk.bf16.vlgmr.msra.gmra.mrb[72].mxu0 %vm2477_vm9, %v10486_v52  ;;  %v14911_v44 = vpop.f32.mrb[36].mxu0 }
 0xeb0   : > { %8620 = vmatprep.subr.bf16.mxu1 %v8610_v58  ;;  %7446 = vmatpush1.bf16.msra.mxu0 %v7434_v30  ;;  %v14913_v37 = vpop.f32.mrb[37].mxu0 }
 0xeb1   : > { %8621 = vmatpush1.bf16.msra.mxu1 %v8609_v5  ;;  %v7430_v2 = vpop.permute.xlu1 %7429  ;;  %v5760_v7 = vpop.f32.mrb[88].mxu1  ;;  %7477 = vmatprep.mubr.bf16.mxu0 %v15930_v40 }
 0xeb2   : > { %v7436_v52 = vsel %vm7433_vm6, %v16367_v25, %v7430_v2  ;;  %v5767_v32 = vadd.f32 %v5760_v7, %v5699_v28  ;;  %8756 = vmatprep.subr.bf16.mxu1 %v8746_v54  ;;  %v5762_v36 = vpop.f32.mrb[89].mxu1  ;;  %v7437_v5 = vsel %vm7433_vm6, %v7430_v2, %v16368_v57  ;;  %v6104_v49 = vpop.f32.mrb[38].mxu0  ;;  %v8745_v28 = vsel %vm8744_vm7, %v16369_v18, %v16366_v8  ;;  %v16370_v7 = vld [vmem:[#allocation93_spill] sm:$0xff]  ;;  %v16371_v54 = vld [vmem:[#allocation208_spill] sm:$0xff] }
 0xeb3   : > { %v5768_v53 = vadd.f32 %v5762_v36, %v5700_v39  ;;  %9632 = vrot.lane.b32.xlu1 %v15894_v29, %s11220_s9  ;;  %7447 = vmatprep.subr.bf16.mxu0 %v7437_v5  ;;  %v5764_v58 = vpop.f32.mrb[90].mxu1  ;;  %v7573_v2 = vsel %vm7571_vm8, %v16371_v54, %v16370_v7  ;;  %v10490_v39 = vld [vmem:[%s16128_s22 + $0x28] sm:$0x1]  ;;  %v6105_v36 = vpop.f32.mrb[39].mxu0  ;;  %v16374_v49 = vld [vmem:[#allocation94_spill] sm:$0xff]  ;;  %vm8399_vm6 = vcmask 605184  }
 0xeb4   : > { %v5835_v30 = vadd.f32 %v14827_v13, %v5767_v32  ;;  %7448 = vmatpush1.bf16.msra.mxu0 %v7436_v52  ;;  %10525 = vmatmul.mubr.msk.bf16.vlgmr.msra.gmra.mrb[172].mxu1 %vm2477_vm9, %v10524_v41  ;;  %v5765_v25 = vpop.f32.mrb[91].mxu1  ;;  %v16372_v52 = vld [vmem:[#allocation92_spill] sm:$0xff]  ;;  %v16373_v32 = vld [vmem:[#allocation154_spill] sm:$0xff]  ;;  %v16375_v18 = vld [vmem:[#allocation209_spill] sm:$0xff] }
 0xeb5   : > { %v5836_v57 = vadd.f32 %v14829_v31, %v5768_v53  ;;  %8757 = vmatpush1.bf16.msra.mxu1 %v8745_v28  ;;  %v8741_v13 = vpop.permute.xlu1 %8740  ;;  %7583 = vmatprep.subr.bf16.mxu0 %v7573_v2  ;;  %v7572_v31 = vsel %vm7571_vm8, %v16373_v32, %v16371_v54  ;;  %v8884_v28 = vsel %vm8882_vm10, %v16375_v18, %v16374_v49  ;;  %v10528_v7 = vld [vmem:[%s16128_s22 + $0x3b] sm:$0x1]  ;;  %v14964_v54 = vpop.permute.xlu0 %8941 }
 0xeb6   : > { %v8747_v41 = vsel %vm8744_vm7, %v14402_v23, %v8741_v13  ;;  %v8748_v8 = vsel %vm8744_vm7, %v8741_v13, %v16372_v52  ;;  %8788 = vmatprep.mubr.bf16.mxu1 %v15930_v40  ;;  %v16376_v2 = vld [vmem:[#allocation187_spill] sm:$0xff]  ;;  %vm9709_vm7 = vcmask 449536  }
 0xeb7   : > { %9498 = vrot.lane.b32.xlu1 %v13267_v0, %s11219_s25  ;;  %10491 = vmatmul.mubr.msk.bf16.vlgmr.msra.gmra.mrb[76].mxu0 %vm2477_vm9, %v10490_v39  ;;  %v14953_v5 = vpop.f32.mrb[40].mxu0  ;;  %v16377_v13 = vld [vmem:[#allocation95_spill] sm:$0xff]  ;;  %s9991_s25 = sshll.u32 %s353_s17, 4  ;;  %s15526_s25 = int_to_ptr.vmem [resolvable:$true] %s9991_s25 }
 0xeb8   : > { %8758 = vmatprep.subr.bf16.mxu1 %v8748_v8  ;;  %7584 = vmatpush1.bf16.msra.mxu0 %v7572_v31  ;;  %v14955_v23 = vpop.f32.mrb[41].mxu0  ;;  %v16378_v49 = vld [vmem:[#allocation119_spill] sm:$0xff]  ;;  %s11076_s16 = scalar_lea.vmem %s15526_s25, 64  ;;  %p11083_p0 = scmp.lt.s32.totalorder %s15526_s25, %s11081_s21 }
 0xeb9   : > { %8759 = vmatpush1.bf16.msra.mxu1 %v8747_v41  ;;  %v7568_v53 = vpop.permute.xlu1 %7567  ;;  %v5896_v58 = vpop.f32.mrb[92].mxu1  ;;  %7615 = vmatprep.mubr.bf16.mxu0 %v15930_v40  ;;  %p11077_p11 = scmp.ne.s32.totalorder %s15526_s25, %s11076_s16  ;;  %p11084_p1 = scmp.lt.s32.totalorder %s11082_s10, %s11076_s16 }
 0xeba   : > { %v7574_v39 = vsel %vm7571_vm8, %v16376_v2, %v7568_v53  ;;  %v5903_v25 = vadd.f32 %v5896_v58, %v5835_v30  ;;  %8894 = vmatprep.subr.bf16.mxu1 %v8884_v28  ;;  %v5898_v36 = vpop.f32.mrb[93].mxu1  ;;  %v7575_v41 = vsel %vm7571_vm8, %v7568_v53, %v16377_v13  ;;  %v6242_v32 = vpop.f32.mrb[42].mxu0  ;;  %v8883_v30 = vsel %vm8882_vm10, %v16378_v49, %v16375_v18  ;;  %v16379_v58 = vld [vmem:[#allocation97_spill] sm:$0xff]  ;;  %v16380_v28 = vld [vmem:[#allocation210_spill] sm:$0xff]  ;;  %v16384_v49 = vld [vmem:[#allocation211_spill] sm:$0xff] }
 0xebb   : > { %v5904_v52 = vadd.f32 %v5898_v36, %v5836_v57  ;;  %9634 = vrot.lane.b32.xlu1 %v12900_v46, %s11220_s9  ;;  %7585 = vmatprep.subr.bf16.mxu0 %v7575_v41  ;;  %v5900_v8 = vpop.f32.mrb[94].mxu1  ;;  %v7711_v53 = vsel %vm7709_vm12, %v16380_v28, %v16379_v58  ;;  %v10494_v57 = vld [vmem:[%s16128_s22 + $0x2a] sm:$0x1]  ;;  %v6243_v36 = vpop.f32.mrb[43].mxu0  ;;  %v16383_v32 = vld [vmem:[#allocation98_spill] sm:$0xff]  ;;  %vm8537_vm8 = vcmask 588800   ;;  %p11078_p12 = pnand %p11077_p11, %p11317_p5  ;;  %p11085_p2 = por %p11084_p1, %p11083_p0 }
 0xebc   : > { %v5971_v31 = vadd.f32 %v14869_v33, %v5903_v25  ;;  %7586 = vmatpush1.bf16.msra.mxu0 %v7574_v39  ;;  %10529 = vmatmul.mubr.msk.bf16.vlgmr.msra.gmra.mrb[176].mxu1 %vm2477_vm9, %v10528_v7  ;;  %v5901_v2 = vpop.f32.mrb[95].mxu1  ;;  %v16381_v39 = vld [vmem:[#allocation96_spill] sm:$0xff]  ;;  %v10532_v58 = vld [vmem:[%s16128_s22 + $0x3d] sm:$0x1] }
 0xebd   : > { %v5972_v13 = vadd.f32 %v14871_v1, %v5904_v52  ;;  %8895 = vmatpush1.bf16.msra.mxu1 %v8883_v30  ;;  %v8879_v33 = vpop.permute.xlu1 %8878  ;;  %7721 = vmatprep.subr.bf16.mxu0 %v7711_v53  ;;  %v16382_v25 = vld [vmem:[#allocation156_spill] sm:$0xff]  ;;  %v9022_v30 = vsel %vm9020_vm13, %v16384_v49, %v16383_v32  ;;  %v16385_v53 = vld [vmem:[#allocation189_spill] sm:$0xff]  ;;  %p11079_p13 = pneg %p11078_p12 }
 0xebe   : > { %v8885_v7 = vsel %vm8882_vm10, %v14420_v12, %v8879_v33  ;;  %v8886_v18 = vsel %vm8882_vm10, %v8879_v33, %v16381_v39  ;;  %8926 = vmatprep.mubr.bf16.mxu1 %v15930_v40  ;;  %v7710_v1 = vsel %vm7709_vm12, %v16382_v25, %v16380_v28  ;;  %v15006_v28 = vpop.permute.xlu0 %8939  ;;  %v16386_v33 = vld [vmem:[#allocation99_spill] sm:$0xff]  ;;  %v16387_v32 = vld [vmem:[#allocation120_spill] sm:$0xff]  ;;  %vm8675_vm10 = vcmask 572416  }
 0xebf   : > { %9636 = vrot.lane.b32.xlu1 %v13267_v0, %s11220_s9  ;;  %10495 = vmatmul.mubr.msk.bf16.vlgmr.msra.gmra.mrb[80].mxu0 %vm2477_vm9, %v10494_v57  ;;  %v14995_v41 = vpop.f32.mrb[44].mxu0  ;;  %s16420_s9 = sld [smem:[#allocation223_spill]]  ;;  %p11086_p3 = pnand %p11085_p2, %p11079_p13 }
 0xec0   : > { %8896 = vmatprep.subr.bf16.mxu1 %v8886_v18  ;;  %7722 = vmatpush1.bf16.msra.mxu0 %v7710_v1  ;;  %v14997_v12 = vpop.f32.mrb[45].mxu0 }
 0xec1   : > { %8897 = vmatpush1.bf16.msra.mxu1 %v8885_v7  ;;  %v7706_v52 = vpop.permute.xlu1 %7705  ;;  %v6032_v8 = vpop.f32.mrb[96].mxu1  ;;  %7753 = vmatprep.mubr.bf16.mxu0 %v15930_v40 }
 0xec2   : > { %v7712_v57 = vsel %vm7709_vm12, %v16385_v53, %v7706_v52  ;;  %v6039_v2 = vadd.f32 %v6032_v8, %v5971_v31  ;;  %9032 = vmatprep.subr.bf16.mxu1 %v9022_v30  ;;  %v6034_v36 = vpop.f32.mrb[97].mxu1  ;;  %v7713_v7 = vsel %vm7709_vm12, %v7706_v52, %v16386_v33  ;;  %v6380_v25 = vpop.f32.mrb[46].mxu0  ;;  %v9021_v31 = vsel %vm9020_vm13, %v16387_v32, %v16384_v49  ;;  %v16388_v8 = vld [vmem:[#allocation101_spill] sm:$0xff]  ;;  %v16389_v30 = vld [vmem:[#allocation212_spill] sm:$0xff] }
 0xec3   : > { %v6040_v39 = vadd.f32 %v6034_v36, %v5972_v13  ;;  %9770 = vrot.lane.b32.xlu1 %v15894_v29, %s11221_s6  ;;  %7723 = vmatprep.subr.bf16.mxu0 %v7713_v7  ;;  %v6036_v18 = vpop.f32.mrb[98].mxu1  ;;  %v7849_v52 = vsel %vm7847_vm14, %v16389_v30, %v16388_v8  ;;  %v10498_v13 = vld [vmem:[%s16128_s22 + $0x2c] sm:$0x1]  ;;  %v6381_v36 = vpop.f32.mrb[47].mxu0  ;;  %v16392_v25 = vld [vmem:[#allocation102_spill] sm:$0xff]  ;;  %vm11222_vm12 = vmmov 0  }
 0xec4   : > { %v6107_v1 = vadd.f32 %v14911_v44, %v6039_v2  ;;  %7724 = vmatpush1.bf16.msra.mxu0 %v7712_v57  ;;  %10533 = vmatmul.mubr.msk.bf16.vlgmr.msra.gmra.mrb[180].mxu1 %vm2477_vm9, %v10532_v58  ;;  %v6037_v53 = vpop.f32.mrb[99].mxu1  ;;  %v16390_v57 = vld [vmem:[#allocation100_spill] sm:$0xff]  ;;  %v16391_v2 = vld [vmem:[#allocation158_spill] sm:$0xff]  ;;  %v16393_v32 = vld [vmem:[#allocation213_spill] sm:$0xff]  ;;  %v15048_v8 = vpop.permute.xlu0 %8949 }
 0xec5   : > { %v6108_v33 = vadd.f32 %v14913_v37, %v6040_v39  ;;  %9033 = vmatpush1.bf16.msra.mxu1 %v9021_v31  ;;  %v9017_v44 = vpop.permute.xlu1 %9016  ;;  %7859 = vmatprep.subr.bf16.mxu0 %v7849_v52  ;;  %v7848_v37 = vsel %vm7847_vm14, %v16391_v2, %v16389_v30  ;;  %v9159_v31 = vsel %vm9157_vm15, %v16393_v32, %v16392_v25  ;;  %v16394_v30 = vld [vmem:[#allocation191_spill] sm:$0xff] }
 0xec6   : > { %v9023_v58 = vsel %vm9020_vm13, %v14435_v26, %v9017_v44  ;;  %v9024_v49 = vsel %vm9020_vm13, %v9017_v44, %v16390_v57  ;;  %9064 = vmatprep.mubr.bf16.mxu1 %v15930_v40  ;;  %v16395_v36 = vld [vmem:[#allocation103_spill] sm:$0xff]  ;;  %vm8813_vm13 = vcmask 556032  }
 0xec7   : > { %9774 = vrot.lane.b32.xlu1 %v13267_v0, %s11221_s6  ;;  %10499 = vmatmul.mubr.msk.bf16.vlgmr.msra.gmra.mrb[84].mxu0 %vm2477_vm9, %v10498_v13  ;;  %v15037_v7 = vpop.f32.mrb[48].mxu0  ;;  %v10536_v0 = vld [vmem:[%s16128_s22 + $0x3f] sm:$0x1] }
 0xec8   : > { %9034 = vmatprep.subr.bf16.mxu1 %v9024_v49  ;;  %7860 = vmatpush1.bf16.msra.mxu0 %v7848_v37  ;;  %v15039_v26 = vpop.f32.mrb[49].mxu0  ;;  %v16396_v37 = vld [vmem:[#allocation122_spill] sm:$0xff] }
 0xec9   : > { %9035 = vmatpush1.bf16.msra.mxu1 %v9023_v58  ;;  %v7844_v39 = vpop.permute.xlu1 %7843  ;;  %v6169_v18 = vpop.f32.mrb[100].mxu1  ;;  %7891 = vmatprep.mubr.bf16.mxu0 %v15930_v40 }
 0xeca   : > { %v7850_v52 = vsel %vm7847_vm14, %v16394_v30, %v7844_v39  ;;  %v6176_v13 = vadd.f32 %v6169_v18, %v6107_v1  ;;  %9169 = vmatprep.subr.bf16.mxu1 %v9159_v31  ;;  %v6171_v53 = vpop.f32.mrb[101].mxu1  ;;  %v7851_v44 = vsel %vm7847_vm14, %v7844_v39, %v16395_v36  ;;  %v6518_v49 = vpop.f32.mrb[50].mxu0  ;;  %v9158_v1 = vsel %vm9157_vm15, %v16396_v37, %v16393_v32  ;;  %v16397_v18 = vld [vmem:[#allocation196_spill] sm:$0xff]  ;;  %v16398_v32 = vld [vmem:[#allocation194_spill] sm:$0xff] }
 0xecb   : > { %v6177_v58 = vadd.f32 %v6171_v53, %v6108_v33  ;;  %9772 = vrot.lane.b32.xlu1 %v12900_v46, %s11221_s6  ;;  %7861 = vmatprep.subr.bf16.mxu0 %v7851_v44  ;;  %v6173_v57 = vpop.f32.mrb[102].mxu1  ;;  %v7987_v39 = vsel %vm7985_vm0, %v14453_v59, %v16397_v18  ;;  %v10502_v46 = vld [vmem:[%s16128_s22 + $0x2e] sm:$0x1]  ;;  %v6519_v25 = vpop.f32.mrb[51].mxu0  ;;  %v16401_v49 = vld [vmem:[#allocation207_spill] sm:$0xff]  ;;  %vm8951_vm14 = vcmask 539648  }
 0xecc   : > { %v6245_v2 = vadd.f32 %v14953_v5, %v6176_v13  ;;  %7862 = vmatpush1.bf16.msra.mxu0 %v7850_v52  ;;  %10537 = vmatmul.mubr.msk.bf16.vlgmr.msra.gmra.mrb[184].mxu1 %vm2477_vm9, %v10536_v0  ;;  %v6174_v33 = vpop.f32.mrb[103].mxu1  ;;  %v16399_v52 = vld [vmem:[#allocation198_spill] sm:$0xff]  ;;  %v15079_v53 = vpop.permute.xlu0 %9079 }
 0xecd   : > { %v6246_v31 = vadd.f32 %v14955_v23, %v6177_v58  ;;  %9170 = vmatpush1.bf16.msra.mxu1 %v9158_v1  ;;  %v9154_v5 = vpop.permute.xlu1 %9153  ;;  %7997 = vmatprep.subr.bf16.mxu0 %v7987_v39  ;;  %v7986_v13 = vsel %vm7985_vm0, %v16399_v52, %v14453_v59  ;;  %v16400_v58 = vld [vmem:[#allocation201_spill] sm:$0xff]  ;;  %v10540_v59 = vld [vmem:[%s16128_s22 + $0x41] sm:$0x1] }
 0xece   : > { %v9160_v0 = vsel %vm9157_vm15, %v14468_v22, %v9154_v5  ;;  %v9161_v30 = vsel %vm9157_vm15, %v9154_v5, %v16398_v32  ;;  %9201 = vmatprep.mubr.bf16.mxu1 %v15930_v40  ;;  %v9297_v57 = vsel %vm9295_vm1, %v14486_v6, %v16400_v58  ;;  %v16402_v39 = vld [vmem:[#allocation204_spill] sm:$0xff]  ;;  %v9296_v32 = vsel %vm9295_vm1, %v14501_v51, %v14486_v6 }
 0xecf   : > { %10503 = vmatmul.mubr.msk.bf16.vlgmr.msra.gmra.mrb[88].mxu0 %vm2477_vm9, %v10502_v46  ;;  %9171 = vmatprep.subr.bf16.mxu1 %v9161_v30  ;;  %v15077_v23 = vpop.f32.mrb[52].mxu0  ;;  %v9435_v58 = vsel %vm9433_vm3, %v14550_v55, %v14265_v17  ;;  %v9434_v17 = vsel %vm9433_vm3, %v14565_v10, %v14550_v55  ;;  %vm9226_vm15 = vcmask 506880  }
 0xed0   : > { %7998 = vmatpush1.bf16.msra.mxu0 %v7986_v13  ;;  %8029 = vmatprep.mubr.bf16.mxu0 %v15930_v40  ;;  %v15082_v22 = vpop.f32.mrb[53].mxu0 }
 0xed1   : > { %9172 = vmatpush1.bf16.msra.mxu1 %v9160_v0  ;;  %v7982_v36 = vpop.permute.xlu1 %7981  ;;  %v6307_v44 = vpop.f32.mrb[104].mxu1 }
 0xed2   : > { %v7988_v37 = vsel %vm7985_vm0, %v16401_v49, %v7982_v36  ;;  %v6314_v1 = vadd.f32 %v6307_v44, %v6245_v2  ;;  %9307 = vmatprep.subr.bf16.mxu1 %v9297_v57  ;;  %v6309_v18 = vpop.f32.mrb[105].mxu1  ;;  %v7989_v46 = vsel %vm7985_vm0, %v7982_v36, %v16402_v39  ;;  %v6656_v33 = vpop.f32.mrb[54].mxu0  ;;  %v8125_v2 = vsel %vm8123_vm2, %v14519_v42, %v14173_v34 }
 0xed3   : > { %v6315_v25 = vadd.f32 %v6309_v18, %v6246_v31  ;;  %7999 = vmatprep.subr.bf16.mxu0 %v7989_v46  ;;  %v6311_v5 = vpop.f32.mrb[106].mxu1  ;;  %v6657_v0 = vpop.f32.mrb[55].mxu0  ;;  %v10506_v31 = vld [vmem:[%s16128_s22 + $0x30] sm:$0x1]  ;;  %v8124_v34 = vsel %vm8123_vm2, %v14219_v62, %v14519_v42  ;;  %v10544_v62 = vld [vmem:[%s16128_s22 + $0x43] sm:$0x1] }
 0xed4   : > { %v6383_v30 = vadd.f32 %v14995_v41, %v6314_v1  ;;  %8000 = vmatpush1.bf16.msra.mxu0 %v7988_v37  ;;  %10541 = vmatmul.mubr.msk.bf16.vlgmr.msra.gmra.mrb[188].mxu1 %vm2477_vm9, %v10540_v59  ;;  %v6312_v52 = vpop.f32.mrb[107].mxu1  ;;  %vm9502_vm0 = vcmask 474112  }
 0xed5   : > { %v6384_v13 = vadd.f32 %v14997_v12, %v6315_v25  ;;  %9308 = vmatpush1.bf16.msra.mxu1 %v9296_v32  ;;  %v9292_v36 = vpop.permute.xlu1 %9291  ;;  %8135 = vmatprep.subr.bf16.mxu0 %v8125_v2  ;;  %v15117_v12 = vpop.permute.xlu0 %9077  ;;  %v9573_v32 = vsel %vm9571_vm5, %v14614_v19, %v14488_v48  ;;  %v9572_v48 = vsel %vm9571_vm5, %v14629_v50, %v14614_v19 }
 0xed6   : > { %v9298_v6 = vsel %vm9295_vm1, %v14534_v3, %v9292_v36  ;;  %v9299_v51 = vsel %vm9295_vm1, %v9292_v36, %v14127_v21  ;;  %9339 = vmatprep.mubr.bf16.mxu1 %v15930_v40  ;;  %vm9640_vm1 = vcmask 457728  }
 0xed7   : > { %10507 = vmatmul.mubr.msk.bf16.vlgmr.msra.gmra.mrb[92].mxu0 %vm2477_vm9, %v10506_v31  ;;  %9309 = vmatprep.subr.bf16.mxu1 %v9299_v51  ;;  %v15115_v41 = vpop.f32.mrb[56].mxu0 }
 0xed8   : > { %8136 = vmatpush1.bf16.msra.mxu0 %v8124_v34  ;;  %8167 = vmatprep.mubr.bf16.mxu0 %v15930_v40  ;;  %v15120_v3 = vpop.f32.mrb[57].mxu0 }
 0xed9   : > { %9310 = vmatpush1.bf16.msra.mxu1 %v9298_v6  ;;  %v8120_v21 = vpop.permute.xlu1 %8119  ;;  %v6445_v44 = vpop.f32.mrb[108].mxu1 }
 0xeda   : > { %v8126_v42 = vsel %vm8123_vm2, %v14355_v4, %v8120_v21  ;;  %v6452_v57 = vadd.f32 %v6445_v44, %v6383_v30  ;;  %9445 = vmatprep.subr.bf16.mxu1 %v9435_v58  ;;  %v6447_v59 = vpop.f32.mrb[109].mxu1  ;;  %v8127_v49 = vsel %vm8123_vm2, %v8120_v21, %v14311_v27  ;;  %v6794_v37 = vpop.f32.mrb[58].mxu0  ;;  %v8263_v4 = vsel %vm8261_vm4, %v14583_v47, %v14422_v61  ;;  %v10510_v27 = vld [vmem:[%s16128_s22 + $0x32] sm:$0x1]  ;;  %v10548_v30 = vld [vmem:[%s16128_s22 + $0x45] sm:$0x1] }
 0xedb   : > { %v6453_v1 = vadd.f32 %v6447_v59, %v6384_v13  ;;  %8137 = vmatprep.subr.bf16.mxu0 %v8127_v49  ;;  %v6449_v18 = vpop.f32.mrb[110].mxu1  ;;  %v6795_v39 = vpop.f32.mrb[59].mxu0  ;;  %v8262_v61 = vsel %vm8261_vm4, %v14455_v60, %v14583_v47  ;;  %v16404_v59 = vld [vmem:[#allocation143_spill] sm:$0xff]  ;;  %v16405_v37 = vld [vmem:[#allocation18_spill] sm:$0xff]  ;;  %vm9778_vm2 = vcmask 441344  }
 0xedc   : > { %v6521_v46 = vadd.f32 %v15037_v7, %v6452_v57  ;;  %8138 = vmatpush1.bf16.msra.mxu0 %v8126_v42  ;;  %10545 = vmatmul.mubr.msk.bf16.vlgmr.msra.gmra.mrb[192].mxu1 %vm2477_vm9, %v10544_v62  ;;  %v6450_v33 = vpop.f32.mrb[111].mxu1  ;;  %v15144_v55 = vpop.permute.xlu0 %9087  ;;  %v16403_v42 = vld [vmem:[#allocation123_spill] sm:$0xff]  ;;  %v16406_v39 = vld [vmem:[#allocation214_spill] sm:$0xff] }
 0xedd   : > { %v6522_v25 = vadd.f32 %v15039_v26, %v6453_v1  ;;  %9446 = vmatpush1.bf16.msra.mxu1 %v9434_v17  ;;  %v9430_v5 = vpop.permute.xlu1 %9429  ;;  %8273 = vmatprep.subr.bf16.mxu0 %v8263_v4  ;;  %v10975_v17 = vunpack.i.h.bf16 %v16406_v39  ;;  %v16408_v33 = vld [vmem:[#allocation25_spill] sm:$0xff] }
 0xede   : > { %v9436_v10 = vsel %vm9433_vm3, %v14596_v56, %v9430_v5  ;;  %v9437_v7 = vsel %vm9433_vm3, %v9430_v5, %v14389_v45  ;;  %9477 = vmatprep.mubr.bf16.mxu1 %v15930_v40 }
 0xedf   : > { %10511 = vmatmul.mubr.msk.bf16.vlgmr.msra.gmra.mrb[96].mxu0 %vm2477_vm9, %v10510_v27  ;;  %9447 = vmatprep.subr.bf16.mxu1 %v9437_v7  ;;  %v15155_v26 = vpop.f32.mrb[60].mxu0  ;;  %v16407_v27 = vld [vmem:[#allocation115_spill] sm:$0xff] }
 0xee0   : > { %8274 = vmatpush1.bf16.msra.mxu0 %v8262_v61  ;;  %8305 = vmatprep.mubr.bf16.mxu0 %v15930_v40  ;;  %v15158_v0 = vpop.f32.mrb[61].mxu0  ;;  %v15173_v51 = vpop.permute.xlu0 %9216 }
 0xee1   : > { %9448 = vmatpush1.bf16.msra.mxu1 %v9436_v10  ;;  %v8258_v56 = vpop.permute.xlu1 %8257  ;;  %v6583_v45 = vpop.f32.mrb[112].mxu1  ;;  %v16409_v10 = vld [vmem:[#allocation125_spill] sm:$0xff] }
 0xee2   : > { %v8264_v60 = vsel %vm8261_vm4, %v14530_v9, %v8258_v56  ;;  %v6590_v47 = vadd.f32 %v6583_v45, %v6521_v46  ;;  %9583 = vmatprep.subr.bf16.mxu1 %v9573_v32  ;;  %v6585_v2 = vpop.f32.mrb[113].mxu1  ;;  %v8265_v31 = vsel %vm8261_vm4, %v8258_v56, %v14504_v24  ;;  %v6931_v52 = vpop.f32.mrb[62].mxu0  ;;  %v8401_v24 = vsel %vm8399_vm6, %v14645_v35, %v14579_v15  ;;  %v10514_v9 = vld [vmem:[%s16128_s22 + $0x34] sm:$0x1]  ;;  %v16410_v45 = vld [vmem:[#allocation19_spill] sm:$0xff] }
 0xee3   : > { %v6591_v13 = vadd.f32 %v6585_v2, %v6522_v25  ;;  %8275 = vmatprep.subr.bf16.mxu0 %v8265_v31  ;;  %v6587_v36 = vpop.f32.mrb[114].mxu1  ;;  %v6932_v6 = vpop.f32.mrb[63].mxu0  ;;  %v8400_v15 = vsel %vm8399_vm6, %v14599_v38, %v14645_v35  ;;  %v10974_v46 = vunpack.i.l.bf16 %v16406_v39  ;;  %v8539_v25 = vsel %vm8537_vm8, %v16408_v33, %v16407_v27  ;;  %v16413_v31 = vld [vmem:[#allocation20_spill] sm:$0xff] }
 0xee4   : > { %v6659_v34 = vadd.f32 %v15077_v23, %v6590_v47  ;;  %8276 = vmatpush1.bf16.msra.mxu0 %v8264_v60  ;;  %10549 = vmatmul.mubr.msk.bf16.vlgmr.msra.gmra.mrb[196].mxu1 %vm2477_vm9, %v10548_v30  ;;  %v6588_v21 = vpop.f32.mrb[115].mxu1  ;;  %v15200_v62 = vpop.permute.xlu0 %9214  ;;  %v10980_v7 = vunpack.i.h.bf16 %v16409_v10  ;;  %v10979_v61 = vunpack.i.l.bf16 %v16409_v10  ;;  %v16411_v30 = vld [vmem:[#allocation135_spill] sm:$0xff]  ;;  %v16412_v47 = vld [vmem:[#allocation26_spill] sm:$0xff]  ;;  %v10990_v52 = vunpack.i.h.bf16 %v16413_v31 }
 0xee5   : > { %v6660_v44 = vadd.f32 %v15082_v22, %v6591_v13  ;;  %9584 = vmatpush1.bf16.msra.mxu1 %v9572_v48  ;;  %v9568_v19 = vpop.permute.xlu1 %9567  ;;  %8411 = vmatprep.subr.bf16.mxu0 %v8401_v24  ;;  %v8538_v2 = vsel %vm8537_vm8, %v16412_v47, %v16408_v33  ;;  %v10989_v13 = vunpack.i.l.bf16 %v16413_v31  ;;  %v16414_v48 = vld [vmem:[#allocation215_spill] sm:$0xff]  ;;  %v10556_v21 = vld [vmem:[%s16128_s22 + $0x49] sm:$0x1] }
 0xee6   : > { %v9574_v50 = vsel %vm9571_vm5, %v14660_v20, %v9568_v19  ;;  %v9575_v23 = vsel %vm9571_vm5, %v9568_v19, %v14552_v43  ;;  %9615 = vmatprep.mubr.bf16.mxu1 %v15930_v40  ;;  %v9711_v20 = vsel %vm9709_vm7, %v14678_v63, %v14625_v14  ;;  %v10552_v43 = vld [vmem:[%s16128_s22 + $0x47] sm:$0x1]  ;;  %v9710_v14 = vsel %vm9709_vm7, %v16405_v37, %v14678_v63  ;;  %v10518_v63 = vld [vmem:[%s16128_s22 + $0x36] sm:$0x1]  ;;  %v16415_v19 = vld [vmem:[#allocation147_spill] sm:$0xff] }
 0xee7   : > { %10515 = vmatmul.mubr.msk.bf16.vlgmr.msra.gmra.mrb[100].mxu0 %vm2477_vm9, %v10514_v9  ;;  %9585 = vmatprep.subr.bf16.mxu1 %v9575_v23  ;;  %v9882_v6 = vsel %vm8399_vm6, %v10979_v61, %v10980_v7  ;;  %v10522_v37 = vld [vmem:[%s16128_s22 + $0x38] sm:$0x1]  ;;  %v10526_v47 = vld [vmem:[%s16128_s22 + $0x3a] sm:$0x1] }
 0xee8   : > { %8412 = vmatpush1.bf16.msra.mxu0 %v8400_v15  ;;  %8443 = vmatprep.mubr.bf16.mxu0 %v15930_v40  ;;  %v15234_v36 = vpop.permute.xlu0 %9224  ;;  %v16422_v7 = vld [vmem:[#allocation23_spill] sm:$0xff] }
 0xee9   : > { %9586 = vmatpush1.bf16.msra.mxu1 %v9574_v50  ;;  %v8396_v22 = vpop.permute.xlu1 %8395  ;;  %v6721_v58 = vpop.f32.mrb[116].mxu1 }
 0xeea   : > { %v8402_v38 = vsel %vm8399_vm6, %v16403_v42, %v8396_v22  ;;  %v6728_v35 = vadd.f32 %v6721_v58, %v6659_v34  ;;  %9721 = vmatprep.subr.bf16.mxu1 %v9711_v20  ;;  %v6723_v57 = vpop.f32.mrb[117].mxu1  ;;  %v8403_v49 = vsel %vm8399_vm6, %v8396_v22, %v16404_v59  ;;  %v10985_v34 = vunpack.i.h.bf16 %v16414_v48  ;;  %v16416_v22 = vld [vmem:[#allocation29_spill] sm:$0xff]  ;;  %v16418_v59 = vld [vmem:[#allocation127_spill] sm:$0xff] }
 0xeeb   : > { %v6729_v1 = vadd.f32 %v6723_v57, %v6660_v44  ;;  %8413 = vmatprep.subr.bf16.mxu0 %v8403_v49  ;;  %v6725_v18 = vpop.f32.mrb[118].mxu1  ;;  %v10984_v44 = vunpack.i.l.bf16 %v16414_v48  ;;  %v16417_v57 = vld [vmem:[#allocation138_spill] sm:$0xff] }
 0xeec   : > { %v6797_v4 = vadd.f32 %v15115_v41, %v6728_v35  ;;  %8414 = vmatpush1.bf16.msra.mxu0 %v8402_v38  ;;  %10553 = vmatmul.mubr.msk.bf16.vlgmr.msra.gmra.mrb[200].mxu1 %vm2477_vm9, %v10552_v43  ;;  %v6726_v5 = vpop.f32.mrb[119].mxu1  ;;  %v9884_v38 = vsel %vm8399_vm6, %v10989_v13, %v10990_v52  ;;  %v8677_v49 = vsel %vm8675_vm10, %v16418_v59, %v16417_v57  ;;  %v15261_v39 = vpop.permute.xlu0 %9354  ;;  %v16425_v48 = vld [vmem:[#allocation30_spill] sm:$0xff]  ;;  %v10534_v57 = vld [vmem:[%s16128_s22 + $0x3e] sm:$0x1] }
 0xeed   : > { %v6798_v56 = vadd.f32 %v15120_v3, %v6729_v1  ;;  %9722 = vmatpush1.bf16.msra.mxu1 %v9710_v14  ;;  %v9706_v41 = vpop.permute.xlu1 %9705  ;;  %8549 = vmatprep.subr.bf16.mxu0 %v8539_v25  ;;  %v9881_v3 = vsel %vm8399_vm6, %v10974_v46, %v10975_v17  ;;  %v11075_v17 = vld [vmem:[#allocation2] sm:$0xff]  ;;  %v16419_v46 = vld [vmem:[#allocation33_spill] sm:$0xff]  ;;  %v16421_v25 = vld [vmem:[#allocation118_spill] sm:$0xff] }
 0xeee   : > { %v9712_v32 = vsel %vm9709_vm7, %v16410_v45, %v9706_v41  ;;  %v9713_v60 = vsel %vm9709_vm7, %v9706_v41, %v16411_v30  ;;  %9753 = vmatprep.mubr.bf16.mxu1 %v15930_v40  ;;  %v10585_v43 = vpack.c.bf16 %v9882_v6, %v9881_v3  ;;  %v16424_v30 = vld [vmem:[#allocation34_spill] sm:$0xff] }
 0xeef   : > { %10519 = vmatmul.mubr.msk.bf16.vlgmr.msra.gmra.mrb[104].mxu0 %vm2477_vm9, %v10518_v63  ;;  %9723 = vmatprep.subr.bf16.mxu1 %v9713_v60  ;;  %v8814_v31 = vsel %vm8813_vm13, %v14880_v11, %v16424_v30 }
 0xef0   : > { %8550 = vmatpush1.bf16.msra.mxu0 %v8538_v2  ;;  %8581 = vmatprep.mubr.bf16.mxu0 %v15930_v40  ;;  %v15280_v45 = vpop.permute.xlu0 %9352 }
 0xef1   : > { %9724 = vmatpush1.bf16.msra.mxu1 %v9712_v32  ;;  %v8534_v24 = vpop.permute.xlu1 %8533  ;;  %v6859_v9 = vpop.f32.mrb[120].mxu1  ;;  %v16423_v32 = vld [vmem:[#allocation21_spill] sm:$0xff] }
 0xef2   : > { %v8540_v50 = vsel %vm8537_vm8, %v16415_v19, %v8534_v24  ;;  %v6866_v23 = vadd.f32 %v6859_v9, %v6797_v4  ;;  %v6861_v15 = vpop.f32.mrb[121].mxu1  ;;  %v8541_v58 = vsel %vm8537_vm8, %v8534_v24, %v16416_v22  ;;  %10584 = vmatprep.subr.bf16.mxu1 %v15894_v29  ;;  %v8676_v4 = vsel %vm8675_vm10, %v16419_v46, %v16418_v59  ;;  %v10530_v19 = vld [vmem:[%s16128_s22 + $0x3c] sm:$0x1] }
 0xef3   : > { %v6867_v20 = vadd.f32 %v6861_v15, %v6798_v56  ;;  %8551 = vmatprep.subr.bf16.mxu0 %v8541_v58  ;;  %v6863_v42 = vpop.f32.mrb[122].mxu1  ;;  %v8815_v60 = vsel %vm8813_vm13, %v16424_v30, %v16423_v32 }
 0xef4   : > { %v6934_v35 = vadd.f32 %v15155_v26, %v6866_v23  ;;  %8552 = vmatpush1.bf16.msra.mxu0 %v8540_v50  ;;  %10557 = vmatmul.mubr.msk.bf16.vlgmr.msra.gmra.mrb[204].mxu1 %vm2477_vm9, %v10556_v21  ;;  %v6864_v14 = vpop.f32.mrb[123].mxu1  ;;  %v9883_v26 = vsel %vm8399_vm6, %v10984_v44, %v10985_v34  ;;  %v15298_v6 = vpop.permute.xlu0 %9362  ;;  %v16426_v21 = vld [vmem:[#allocation151_spill] sm:$0xff] }
 0xef5   : > { %v6935_v1 = vadd.f32 %v15158_v0, %v6867_v20  ;;  %10586 = vmatpush3.bf16.msra.mxu1 %v10585_v43  ;;  %v15258_v18 = vpop.permute.xlu1 %9218  ;;  %8687 = vmatprep.subr.bf16.mxu0 %v8677_v49  ;;  %v10588_v0 = vpack.c.bf16 %v9884_v38, %v9883_v26  ;;  %v8953_v44 = vsel %vm8951_vm14, %v14964_v54, %v16426_v21  ;;  %v16427_v20 = vld [vmem:[#allocation22_spill] sm:$0xff]  ;;  %v16429_v26 = vld [vmem:[#allocation121_spill] sm:$0xff] }
 0xef6   : > { %10587 = vmatprep.subr.bf16.mxu1 %v15894_v29  ;;  %10581 = vmatprep.mubr.msk.f32.mxu1 %vm11222_vm12, %v11075_v17  ;;  %v9855_v29 = vld [vmem:[%s16420_s9] sm:$0x3]  ;;  %s15524_s9 = scalar_lea.hbm %s16434_s3, %s10567_s2 }
 0xef7   : > { %10523 = vmatmul.mubr.msk.bf16.vlgmr.msra.gmra.mrb[108].mxu0 %vm2477_vm9, %v10522_v37 }
 0xef8   : > { %8688 = vmatpush1.bf16.msra.mxu0 %v8676_v4  ;;  %8719 = vmatprep.mubr.bf16.mxu0 %v15930_v40  ;;  %v15316_v15 = vpop.permute.xlu0 %9492  ;;  %v9228_v4 = vsel %vm9226_vm15, %v15173_v51, %v15258_v18 }
 0xef9   : > { %10589 = vmatpush3.bf16.msra.mxu1 %v10588_v0  ;;  %v8672_v27 = vpop.permute.xlu1 %8671  ;;  %v6996_v33 = vpop.f32.mrb[124].mxu1 }
 0xefa   : > { %v8678_v63 = vsel %vm8675_vm10, %v16421_v25, %v8672_v27  ;;  %v15274_v5 = vadd.f32 %v6996_v33, %v6934_v35  ;;  %v6998_v10 = vpop.f32.mrb[125].mxu1  ;;  %v8679_v61 = vsel %vm8675_vm10, %v8672_v27, %v16422_v7  ;;  %v10538_v27 = vld [vmem:[%s16128_s22 + $0x40] sm:$0x1] }
 0xefb   : > { %v15278_v56 = vadd.f32 %v6998_v10, %v6935_v1  ;;  %8689 = vmatprep.subr.bf16.mxu0 %v8679_v61  ;;  %v7000_v41 = vpop.f32.mrb[126].mxu1 }
 0xefc   : > { %8690 = vmatpush1.bf16.msra.mxu0 %v8678_v63  ;;  %10582 = vmatmul.mubr.msk.f32.vlgmr.msra.gmra.mrb[208].mxu1 %vm2477_vm9, %v9855_v29  ;;  %v7001_v2 = vpop.f32.mrb[127].mxu1  ;;  %v9491_v37 = vpop.permute.xlu0 %9490  ;;  %v10542_v41 = vld [vmem:[%s16128_s22 + $0x42] sm:$0x1] }
 0xefd   : > { %v15289_v3 = vpop.permute.xlu1 %9220  ;;  %8825 = vmatprep.subr.bf16.mxu0 %v8815_v60 }
 0xeff   : > { %10527 = vmatmul.mubr.msk.bf16.vlgmr.msra.gmra.mrb[112].mxu0 %vm2477_vm9, %v10526_v47 }
 0xf00   : > { %8826 = vmatpush1.bf16.msra.mxu0 %v8814_v31  ;;  %8857 = vmatprep.mubr.bf16.mxu0 %v15930_v40  ;;  %v9501_v0 = vpop.permute.xlu0 %9500 }
 0xf01   : > { %v8810_v52 = vpop.permute.xlu1 %8809  ;;  %v15296_v13 = vpop.f32.mrb[128].mxu1 }
 0xf02   : > { %v8816_v34 = vsel %vm8813_vm13, %v16425_v48, %v8810_v52  ;;  %v8817_v24 = vsel %vm8813_vm13, %v8810_v52, %v14922_v16  ;;  %v15304_v9 = vpop.f32.mrb[129].mxu1  ;;  %v8952_v16 = vsel %vm8951_vm14, %v15006_v28, %v14964_v54  ;;  %v16428_v28 = vld [vmem:[#allocation141_spill] sm:$0xff] }
 0xf03   : > { %8827 = vmatprep.subr.bf16.mxu0 %v8817_v24  ;;  %v7138_v11 = vpop.f32.mrb[130].mxu1  ;;  %v9090_v35 = vsel %vm4370_vm11, %v15079_v53, %v16428_v28 }
 0xf04   : > { %8828 = vmatpush1.bf16.msra.mxu0 %v8816_v34  ;;  %v7139_v50 = vpop.f32.mrb[131].mxu1  ;;  %v9631_v63 = vpop.permute.xlu0 %9630  ;;  %v9503_v11 = vsel %vm9502_vm0, %v9491_v37, %v15316_v15 }
 0xf05   : > { %v9357_v23 = vpop.permute.xlu1 %9356  ;;  %8963 = vmatprep.subr.bf16.mxu0 %v8953_v44 }
 0xf07   : > { %10531 = vmatmul.mubr.msk.bf16.vlgmr.msra.gmra.mrb[116].mxu0 %vm2477_vm9, %v10530_v19 }
 0xf08   : > { %8964 = vmatpush1.bf16.msra.mxu0 %v8952_v16  ;;  %8995 = vmatprep.mubr.bf16.mxu0 %v15930_v40 }
 0xf09   : > { %v8948_v22 = vpop.permute.xlu1 %8947  ;;  %v15319_v58 = vpop.f32.mrb[132].mxu1 }
 0xf0a   : > { %v8954_v43 = vsel %vm8951_vm14, %v16427_v20, %v8948_v22  ;;  %v8955_v42 = vsel %vm8951_vm14, %v8948_v22, %v15048_v8  ;;  %v15325_v38 = vpop.f32.mrb[133].mxu1  ;;  %v9089_v8 = vsel %vm4370_vm11, %v15117_v12, %v15079_v53  ;;  %v10550_v22 = vld [vmem:[%s16128_s22 + $0x46] sm:$0x1] }
 0xf0b   : > { %8965 = vmatprep.subr.bf16.mxu0 %v8955_v42  ;;  %v7276_v54 = vpop.f32.mrb[134].mxu1 }
 0xf0c   : > { %8966 = vmatpush1.bf16.msra.mxu0 %v8954_v43  ;;  %v7277_v59 = vpop.f32.mrb[135].mxu1 }
 0xf0d   : > { %v9359_v49 = vpop.permute.xlu1 %9358  ;;  %9100 = vmatprep.subr.bf16.mxu0 %v9090_v35 }
 0xf0f   : > { %10535 = vmatmul.mubr.msk.bf16.vlgmr.msra.gmra.mrb[120].mxu0 %vm2477_vm9, %v10534_v57 }
 0xf10   : > { %9101 = vmatpush1.bf16.msra.mxu0 %v9089_v8  ;;  %9132 = vmatprep.mubr.bf16.mxu0 %v15930_v40 }
 0xf11   : > { %v9086_v14 = vpop.permute.xlu1 %9085  ;;  %v15338_v1 = vpop.f32.mrb[136].mxu1 }
 0xf12   : > { %v9091_v17 = vsel %vm4370_vm11, %v16429_v26, %v9086_v14  ;;  %v9092_v46 = vsel %vm4370_vm11, %v9086_v14, %v15144_v55  ;;  %v15347_v53 = vpop.f32.mrb[137].mxu1  ;;  %v9227_v55 = vsel %vm9226_vm15, %v15200_v62, %v15173_v51  ;;  %vm9364_vm11 = vcmask 490496   ;;  %v10554_v14 = vld [vmem:[%s16128_s22 + $0x48] sm:$0x1] }
 0xf13   : > { %9102 = vmatprep.subr.bf16.mxu0 %v9092_v46  ;;  %v7414_v12 = vpop.f32.mrb[138].mxu1  ;;  %v9366_v61 = vsel %vm9364_vm11, %v15261_v39, %v9357_v23  ;;  %v9365_v60 = vsel %vm9364_vm11, %v15280_v45, %v15261_v39  ;;  %v10546_v45 = vld [vmem:[%s16128_s22 + $0x44] sm:$0x1] }
 0xf14   : > { %9103 = vmatpush1.bf16.msra.mxu0 %v9091_v17  ;;  %v7415_v33 = vpop.f32.mrb[139].mxu1 }
 0xf15   : > { %v9495_v29 = vpop.permute.xlu1 %9494  ;;  %9238 = vmatprep.subr.bf16.mxu0 %v9228_v4 }
 0xf16   : > { %v9504_v52 = vsel %vm9502_vm0, %v15316_v15, %v9495_v29 }
 0xf17   : > { %10539 = vmatmul.mubr.msk.bf16.vlgmr.msra.gmra.mrb[124].mxu0 %vm2477_vm9, %v10538_v27 }
 0xf18   : > { %9239 = vmatpush1.bf16.msra.mxu0 %v9227_v55  ;;  %9270 = vmatprep.mubr.bf16.mxu0 %v15930_v40 }
 0xf19   : > { %v9223_v18 = vpop.permute.xlu1 %9222  ;;  %v15357_v25 = vpop.f32.mrb[140].mxu1 }
 0xf1a   : > { %v9229_v10 = vsel %vm9226_vm15, %v15289_v3, %v9223_v18  ;;  %v9230_v7 = vsel %vm9226_vm15, %v9223_v18, %v15234_v36  ;;  %v15365_v51 = vpop.f32.mrb[141].mxu1  ;;  %v9629_v36 = vpop.permute.xlu0 %9628 }
 0xf1b   : > { %9240 = vmatprep.subr.bf16.mxu0 %v9230_v7  ;;  %v7552_v62 = vpop.f32.mrb[142].mxu1  ;;  %v9641_v54 = vsel %vm9640_vm1, %v9629_v36, %v9631_v63  ;;  %v10558_v7 = vld [vmem:[%s16128_s22 + $0x4a] sm:$0x1] }
 0xf1c   : > { %9241 = vmatpush1.bf16.msra.mxu0 %v9229_v10  ;;  %v7553_v32 = vpop.f32.mrb[143].mxu1 }
 0xf1d   : > { %v9497_v30 = vpop.permute.xlu1 %9496  ;;  %9376 = vmatprep.subr.bf16.mxu0 %v9366_v61 }
 0xf1e   : > { %v9639_v21 = vpop.permute.xlu0 %9638 }
 0xf1f   : > { %10543 = vmatmul.mubr.msk.bf16.vlgmr.msra.gmra.mrb[128].mxu0 %vm2477_vm9, %v10542_v41 }
 0xf20   : > { %9377 = vmatpush1.bf16.msra.mxu0 %v9365_v60  ;;  %9408 = vmatprep.mubr.bf16.mxu0 %v15930_v40 }
 0xf21   : > { %v9361_v47 = vpop.permute.xlu1 %9360  ;;  %v15375_v2 = vpop.f32.mrb[144].mxu1 }
 0xf22   : > { %v9367_v3 = vsel %vm9364_vm11, %v9359_v49, %v9361_v47  ;;  %v9368_v31 = vsel %vm9364_vm11, %v9361_v47, %v15298_v6  ;;  %v15382_v48 = vpop.f32.mrb[145].mxu1  ;;  %v9769_v43 = vpop.permute.xlu0 %9768 }
 0xf23   : > { %9378 = vmatprep.subr.bf16.mxu0 %v9368_v31  ;;  %v7690_v39 = vpop.f32.mrb[146].mxu1 }
 0xf24   : > { %9379 = vmatpush1.bf16.msra.mxu0 %v9367_v3  ;;  %v7691_v34 = vpop.f32.mrb[147].mxu1 }
 0xf25   : > { %v9633_v24 = vpop.permute.xlu1 %9632  ;;  %9514 = vmatprep.subr.bf16.mxu0 %v9504_v52 }
 0xf26   : > { %v9642_v23 = vsel %vm9640_vm1, %v9631_v63, %v9633_v24  ;;  %v9767_v37 = vpop.permute.xlu0 %9766 }
 0xf27   : > { %10547 = vmatmul.mubr.msk.bf16.vlgmr.msra.gmra.mrb[132].mxu0 %vm2477_vm9, %v10546_v45  ;;  %v9779_v4 = vsel %vm9778_vm2, %v9767_v37, %v9769_v43 }
 0xf28   : > { %9515 = vmatpush1.bf16.msra.mxu0 %v9503_v11  ;;  %9546 = vmatprep.mubr.bf16.mxu0 %v15930_v40 }
 0xf29   : > { %v9499_v6 = vpop.permute.xlu1 %9498  ;;  %v15391_v44 = vpop.f32.mrb[148].mxu1 }
 0xf2a   : > { %v9505_v19 = vsel %vm9502_vm0, %v9497_v30, %v9499_v6  ;;  %v9506_v50 = vsel %vm9502_vm0, %v9499_v6, %v9501_v0  ;;  %v15396_v16 = vpop.f32.mrb[149].mxu1  ;;  %v9777_v12 = vpop.permute.xlu0 %9776 }
 0xf2b   : > { %9516 = vmatprep.subr.bf16.mxu0 %v9506_v50  ;;  %v7828_v15 = vpop.f32.mrb[150].mxu1 }
 0xf2c   : > { %9517 = vmatpush1.bf16.msra.mxu0 %v9505_v19  ;;  %v7829_v20 = vpop.f32.mrb[151].mxu1 }
 0xf2d   : > { %v9635_v42 = vpop.permute.xlu1 %9634  ;;  %9652 = vmatprep.subr.bf16.mxu0 %v9642_v23 }
 0xf2f   : > { %10551 = vmatmul.mubr.msk.bf16.vlgmr.msra.gmra.mrb[136].mxu0 %vm2477_vm9, %v10550_v22 }
 0xf30   : > { %9653 = vmatpush1.bf16.msra.mxu0 %v9641_v54  ;;  %9684 = vmatprep.mubr.bf16.mxu0 %v15930_v40 }
 0xf31   : > { %v9637_v28 = vpop.permute.xlu1 %9636  ;;  %v15404_v35 = vpop.f32.mrb[152].mxu1 }
 0xf32   : > { %v9643_v57 = vsel %vm9640_vm1, %v9635_v42, %v9637_v28  ;;  %v9644_v59 = vsel %vm9640_vm1, %v9637_v28, %v9639_v21  ;;  %v15408_v49 = vpop.f32.mrb[153].mxu1 }
 0xf33   : > { %9654 = vmatprep.subr.bf16.mxu0 %v9644_v59  ;;  %v7966_v8 = vpop.f32.mrb[154].mxu1 }
 0xf34   : > { %9655 = vmatpush1.bf16.msra.mxu0 %v9643_v57  ;;  %v7967_v26 = vpop.f32.mrb[155].mxu1 }
 0xf35   : > { %v9771_v17 = vpop.permute.xlu1 %9770 }
 0xf36   : > { %v9780_v46 = vsel %vm9778_vm2, %v9769_v43, %v9771_v17 }
 0xf37   : > { %10555 = vmatmul.mubr.msk.bf16.vlgmr.msra.gmra.mrb[140].mxu0 %vm2477_vm9, %v10554_v14  ;;  %9790 = vmatprep.subr.bf16.mxu0 %v9780_v46 }
 0xf38   : > { %9791 = vmatpush1.bf16.msra.mxu0 %v9779_v4  ;;  %9822 = vmatprep.mubr.bf16.mxu0 %v15930_v40 }
 0xf39   : > { %v9775_v0 = vpop.permute.xlu1 %9774  ;;  %v15417_v27 = vpop.f32.mrb[156].mxu1 }
 0xf3a   : > { %v9782_v33 = vsel %vm9778_vm2, %v9775_v0, %v9777_v12  ;;  %v15420_v29 = vpop.f32.mrb[157].mxu1 }
 0xf3b   : > { %9792 = vmatprep.subr.bf16.mxu0 %v9782_v33  ;;  %v8104_v55 = vpop.f32.mrb[158].mxu1 }
 0xf3c   : > { %v8105_v18 = vpop.f32.mrb[159].mxu1 }
 0xf3d   : > { %v9773_v63 = vpop.permute.xlu1 %9772 }
 0xf3e   : > { %v9781_v10 = vsel %vm9778_vm2, %v9773_v63, %v9775_v0 }
 0xf3f   : > { %9793 = vmatpush1.bf16.msra.mxu0 %v9781_v10 }
 0xf41   : > { %v15426_v61 = vpop.f32.mrb[160].mxu1 }
 0xf42   : > { %10559 = vmatmul.mubr.msk.bf16.vlgmr.msra.gmra.mrb[144].mxu0 %vm2477_vm9, %v10558_v7  ;;  %v15429_v40 = vpop.f32.mrb[161].mxu1  ;;  %vm9962_vm9 = vcmask 1041408  }
 0xf43   : > { %v8242_v62 = vpop.f32.mrb[162].mxu1 }
 0xf44   : > { %v8243_v41 = vpop.f32.mrb[163].mxu1 }
 0xf72   : > { %v7065_v32 = vpop.f32.mrb[64].mxu0 }
 0xf73   : > { %v7072_v30 = vadd.f32 %v7065_v32, %v15274_v5  ;;  %v7067_v60 = vpop.f32.mrb[65].mxu0 }
 0xf74   : > { %v7073_v36 = vadd.f32 %v7067_v60, %v15278_v56  ;;  %v7069_v47 = vpop.f32.mrb[66].mxu0 }
 0xf75   : > { %v7070_v3 = vpop.f32.mrb[67].mxu0  ;;  %v7141_v31 = vadd.f32 %v15296_v13, %v7072_v30 }
 0xf76   : > { %v7142_v52 = vadd.f32 %v15304_v9, %v7073_v36 }
 0xf77   : > { %v15435_v39 = vpop.f32.mrb[164].mxu1 }
 0xf78   : > { %v15437_v45 = vpop.f32.mrb[165].mxu1 }
 0xf79   : > { %v8380_v34 = vpop.f32.mrb[166].mxu1 }
 0xf7a   : > { %v7203_v24 = vpop.f32.mrb[68].mxu0  ;;  %v8381_v11 = vpop.f32.mrb[167].mxu1 }
 0xf7b   : > { %v7210_v21 = vadd.f32 %v7203_v24, %v7141_v31  ;;  %v7205_v6 = vpop.f32.mrb[69].mxu0 }
 0xf7c   : > { %v7211_v19 = vadd.f32 %v7205_v6, %v7142_v52  ;;  %v7207_v5 = vpop.f32.mrb[70].mxu0 }
 0xf7d   : > { %v7208_v50 = vpop.f32.mrb[71].mxu0  ;;  %v7279_v56 = vadd.f32 %v15319_v58, %v7210_v21 }
 0xf7e   : > { %v7280_v23 = vadd.f32 %v15325_v38, %v7211_v19 }
 0xf7f   : > { %v15441_v15 = vpop.f32.mrb[168].mxu1 }
 0xf80   : > { %v15443_v13 = vpop.f32.mrb[169].mxu1 }
 0xf81   : > { %v8518_v9 = vpop.f32.mrb[170].mxu1 }
 0xf82   : > { %v7341_v22 = vpop.f32.mrb[72].mxu0  ;;  %v8519_v20 = vpop.f32.mrb[171].mxu1 }
 0xf83   : > { %v7348_v43 = vadd.f32 %v7341_v22, %v7279_v56  ;;  %v7343_v42 = vpop.f32.mrb[73].mxu0 }
 0xf84   : > { %v7349_v54 = vadd.f32 %v7343_v42, %v7280_v23  ;;  %v7345_v28 = vpop.f32.mrb[74].mxu0 }
 0xf85   : > { %v7346_v57 = vpop.f32.mrb[75].mxu0  ;;  %v7417_v59 = vadd.f32 %v15338_v1, %v7348_v43 }
 0xf86   : > { %v7418_v37 = vadd.f32 %v15347_v53, %v7349_v54 }
 0xf87   : > { %v15447_v8 = vpop.f32.mrb[172].mxu1 }
 0xf88   : > { %v15449_v58 = vpop.f32.mrb[173].mxu1 }
 0xf89   : > { %v8656_v38 = vpop.f32.mrb[174].mxu1 }
 0xf8a   : > { %v7479_v14 = vpop.f32.mrb[76].mxu0  ;;  %v8657_v26 = vpop.f32.mrb[175].mxu1 }
 0xf8b   : > { %v7486_v17 = vadd.f32 %v7479_v14, %v7417_v59  ;;  %v7481_v46 = vpop.f32.mrb[77].mxu0 }
 0xf8c   : > { %v7487_v4 = vadd.f32 %v7481_v46, %v7418_v37  ;;  %v7483_v12 = vpop.f32.mrb[78].mxu0 }
 0xf8d   : > { %v7484_v0 = vpop.f32.mrb[79].mxu0  ;;  %v7555_v33 = vadd.f32 %v15357_v25, %v7486_v17 }
 0xf8e   : > { %v7556_v55 = vadd.f32 %v15365_v51, %v7487_v4 }
 0xf8f   : > { %v15453_v18 = vpop.f32.mrb[176].mxu1 }
 0xf90   : > { %v15455_v1 = vpop.f32.mrb[177].mxu1 }
 0xf91   : > { %v8794_v53 = vpop.f32.mrb[178].mxu1 }
 0xf92   : > { %v7617_v63 = vpop.f32.mrb[80].mxu0  ;;  %v8795_v10 = vpop.f32.mrb[179].mxu1 }
 0xf93   : > { %v7624_v7 = vadd.f32 %v7617_v63, %v7555_v33  ;;  %v7619_v62 = vpop.f32.mrb[81].mxu0 }
 0xf94   : > { %v7625_v41 = vadd.f32 %v7619_v62, %v7556_v55  ;;  %v7621_v32 = vpop.f32.mrb[82].mxu0 }
 0xf95   : > { %v7622_v30 = vpop.f32.mrb[83].mxu0  ;;  %v7693_v60 = vadd.f32 %v15375_v2, %v7624_v7 }
 0xf96   : > { %v7694_v36 = vadd.f32 %v15382_v48, %v7625_v41 }
 0xf97   : > { %v15459_v47 = vpop.f32.mrb[180].mxu1 }
 0xf98   : > { %v15461_v25 = vpop.f32.mrb[181].mxu1 }
 0xf99   : > { %v8932_v51 = vpop.f32.mrb[182].mxu1 }
 0xf9a   : > { %v7755_v3 = vpop.f32.mrb[84].mxu0  ;;  %v8933_v31 = vpop.f32.mrb[183].mxu1 }
 0xf9b   : > { %v7762_v52 = vadd.f32 %v7755_v3, %v7693_v60  ;;  %v7757_v34 = vpop.f32.mrb[85].mxu0 }
 0xf9c   : > { %v7763_v24 = vadd.f32 %v7757_v34, %v7694_v36  ;;  %v7759_v11 = vpop.f32.mrb[86].mxu0 }
 0xf9d   : > { %v7760_v21 = vpop.f32.mrb[87].mxu0  ;;  %v7831_v6 = vadd.f32 %v15391_v44, %v7762_v52 }
 0xf9e   : > { %v7832_v19 = vadd.f32 %v15396_v16, %v7763_v24 }
 0xf9f   : > { %v15465_v5 = vpop.f32.mrb[184].mxu1 }
 0xfa0   : > { %v15467_v2 = vpop.f32.mrb[185].mxu1 }
 0xfa1   : > { %v9070_v48 = vpop.f32.mrb[186].mxu1 }
 0xfa2   : > { %v7893_v50 = vpop.f32.mrb[88].mxu0  ;;  %v9071_v56 = vpop.f32.mrb[187].mxu1 }
 0xfa3   : > { %v7900_v23 = vadd.f32 %v7893_v50, %v7831_v6  ;;  %v7895_v9 = vpop.f32.mrb[89].mxu0 }
 0xfa4   : > { %v7901_v22 = vadd.f32 %v7895_v9, %v7832_v19  ;;  %v7897_v20 = vpop.f32.mrb[90].mxu0 }
 0xfa5   : > { %v7898_v43 = vpop.f32.mrb[91].mxu0  ;;  %v7969_v42 = vadd.f32 %v15404_v35, %v7900_v23 }
 0xfa6   : > { %v7970_v54 = vadd.f32 %v15408_v49, %v7901_v22 }
 0xfa7   : > { %v15471_v28 = vpop.f32.mrb[188].mxu1 }
 0xfa8   : > { %v15473_v44 = vpop.f32.mrb[189].mxu1 }
 0xfa9   : > { %v9207_v16 = vpop.f32.mrb[190].mxu1 }
 0xfaa   : > { %v8031_v57 = vpop.f32.mrb[92].mxu0  ;;  %v9208_v59 = vpop.f32.mrb[191].mxu1 }
 0xfab   : > { %v8038_v37 = vadd.f32 %v8031_v57, %v7969_v42  ;;  %v8033_v38 = vpop.f32.mrb[93].mxu0 }
 0xfac   : > { %v8039_v14 = vadd.f32 %v8033_v38, %v7970_v54  ;;  %v8035_v26 = vpop.f32.mrb[94].mxu0 }
 0xfad   : > { %v8036_v17 = vpop.f32.mrb[95].mxu0  ;;  %v8107_v46 = vadd.f32 %v15417_v27, %v8038_v37 }
 0xfae   : > { %v8108_v4 = vadd.f32 %v15420_v29, %v8039_v14 }
 0xfaf   : > { %v15477_v12 = vpop.f32.mrb[192].mxu1 }
 0xfb0   : > { %v15479_v35 = vpop.f32.mrb[193].mxu1 }
 0xfb1   : > { %v9345_v49 = vpop.f32.mrb[194].mxu1 }
 0xfb2   : > { %v8169_v0 = vpop.f32.mrb[96].mxu0  ;;  %v9346_v33 = vpop.f32.mrb[195].mxu1 }
 0xfb3   : > { %v8176_v55 = vadd.f32 %v8169_v0, %v8107_v46  ;;  %v8171_v53 = vpop.f32.mrb[97].mxu0 }
 0xfb4   : > { %v8177_v63 = vadd.f32 %v8171_v53, %v8108_v4  ;;  %v8173_v10 = vpop.f32.mrb[98].mxu0 }
 0xfb5   : > { %v8174_v7 = vpop.f32.mrb[99].mxu0  ;;  %v8245_v62 = vadd.f32 %v15426_v61, %v8176_v55 }
 0xfb6   : > { %v8246_v41 = vadd.f32 %v15429_v40, %v8177_v63 }
 0xfb7   : > { %v15483_v32 = vpop.f32.mrb[196].mxu1 }
 0xfb8   : > { %v15485_v27 = vpop.f32.mrb[197].mxu1 }
 0xfb9   : > { %v9483_v29 = vpop.f32.mrb[198].mxu1 }
 0xfba   : > { %v8307_v30 = vpop.f32.mrb[100].mxu0  ;;  %v9484_v60 = vpop.f32.mrb[199].mxu1 }
 0xfbb   : > { %v8314_v36 = vadd.f32 %v8307_v30, %v8245_v62  ;;  %v8309_v51 = vpop.f32.mrb[101].mxu0 }
 0xfbc   : > { %v8315_v3 = vadd.f32 %v8309_v51, %v8246_v41  ;;  %v8311_v31 = vpop.f32.mrb[102].mxu0 }
 0xfbd   : > { %v8312_v52 = vpop.f32.mrb[103].mxu0  ;;  %v8383_v34 = vadd.f32 %v15435_v39, %v8314_v36 }
 0xfbe   : > { %v8384_v24 = vadd.f32 %v15437_v45, %v8315_v3 }
 0xfbf   : > { %v15489_v11 = vpop.f32.mrb[200].mxu1 }
 0xfc0   : > { %v15491_v61 = vpop.f32.mrb[201].mxu1 }
 0xfc1   : > { %v9621_v40 = vpop.f32.mrb[202].mxu1 }
 0xfc2   : > { %v8445_v21 = vpop.f32.mrb[104].mxu0  ;;  %v9622_v6 = vpop.f32.mrb[203].mxu1 }
 0xfc3   : > { %v8452_v19 = vadd.f32 %v8445_v21, %v8383_v34  ;;  %v8447_v48 = vpop.f32.mrb[105].mxu0 }
 0xfc4   : > { %v8453_v50 = vadd.f32 %v8447_v48, %v8384_v24  ;;  %v8449_v56 = vpop.f32.mrb[106].mxu0 }
 0xfc5   : > { %v8450_v23 = vpop.f32.mrb[107].mxu0  ;;  %v8521_v9 = vadd.f32 %v15441_v15, %v8452_v19 }
 0xfc6   : > { %v8522_v22 = vadd.f32 %v15443_v13, %v8453_v50 }
 0xfc7   : > { %v15495_v20 = vpop.f32.mrb[204].mxu1 }
 0xfc8   : > { %v15497_v39 = vpop.f32.mrb[205].mxu1 }
 0xfc9   : > { %v9759_v45 = vpop.f32.mrb[206].mxu1 }
 0xfca   : > { %v8583_v43 = vpop.f32.mrb[108].mxu0  ;;  %v9760_v42 = vpop.f32.mrb[207].mxu1 }
 0xfcb   : > { %v8590_v54 = vadd.f32 %v8583_v43, %v8521_v9  ;;  %v8585_v16 = vpop.f32.mrb[109].mxu0 }
 0xfcc   : > { %v8591_v57 = vadd.f32 %v8585_v16, %v8522_v22  ;;  %v8587_v59 = vpop.f32.mrb[110].mxu0 }
 0xfcd   : > { %v8588_v37 = vpop.f32.mrb[111].mxu0  ;;  %v8659_v38 = vadd.f32 %v15447_v8, %v8590_v54 }
 0xfce   : > { %v8660_v14 = vadd.f32 %v15449_v58, %v8591_v57 }
 0xfcf   : > { %v9958_v15 = vpop.f32.mrb[208].mxu1 }
 0xfd0   : > { %v9963_v26 = vsel %vm9962_vm9, %v9958_v15, 0.0  ;;  %v10583_v13 = vpop.f32.mrb[209].mxu1 }
 0xfd1   : > { %9964 = vadd.xlane.f32.xlu0 %v9963_v26 }
 0xfd2   : > { %v8721_v17 = vpop.f32.mrb[112].mxu0 }
 0xfd3   : > { %v8728_v46 = vadd.f32 %v8721_v17, %v8659_v38  ;;  %v8723_v4 = vpop.f32.mrb[113].mxu0 }
 0xfd4   : > { %v8729_v49 = vadd.f32 %v8723_v4, %v8660_v14  ;;  %v8725_v0 = vpop.f32.mrb[114].mxu0 }
 0xfd5   : > { %v8726_v33 = vpop.f32.mrb[115].mxu0  ;;  %v8797_v55 = vadd.f32 %v15453_v18, %v8728_v46 }
 0xfd6   : > { %v8798_v53 = vadd.f32 %v15455_v1, %v8729_v49 }
 0xfda   : > { %v8859_v63 = vpop.f32.mrb[116].mxu0 }
 0xfdb   : > { %v8866_v10 = vadd.f32 %v8859_v63, %v8797_v55  ;;  %v8861_v8 = vpop.f32.mrb[117].mxu0 }
 0xfdc   : > { %v8867_v7 = vadd.f32 %v8861_v8, %v8798_v53  ;;  %v8863_v62 = vpop.f32.mrb[118].mxu0 }
 0xfdd   : > { %v8864_v58 = vpop.f32.mrb[119].mxu0  ;;  %v8935_v41 = vadd.f32 %v15459_v47, %v8866_v10 }
 0xfde   : > { %v8936_v29 = vadd.f32 %v15461_v25, %v8867_v7 }
 0xfe2   : > { %v8997_v30 = vpop.f32.mrb[120].mxu0 }
 0xfe3   : > { %v9004_v60 = vadd.f32 %v8997_v30, %v8935_v41  ;;  %v8999_v36 = vpop.f32.mrb[121].mxu0 }
 0xfe4   : > { %v9005_v51 = vadd.f32 %v8999_v36, %v8936_v29  ;;  %v9001_v3 = vpop.f32.mrb[122].mxu0 }
 0xfe5   : > { %v9002_v31 = vpop.f32.mrb[123].mxu0  ;;  %v9073_v18 = vadd.f32 %v15465_v5, %v9004_v60 }
 0xfe6   : > { %v9074_v1 = vadd.f32 %v15467_v2, %v9005_v51 }
 0xfea   : > { %v9134_v52 = vpop.f32.mrb[124].mxu0 }
 0xfeb   : > { %v9141_v34 = vadd.f32 %v9134_v52, %v9073_v18  ;;  %v9136_v24 = vpop.f32.mrb[125].mxu0 }
 0xfec   : > { %v9142_v40 = vadd.f32 %v9136_v24, %v9074_v1  ;;  %v9138_v21 = vpop.f32.mrb[126].mxu0 }
 0xfed   : > { %v9139_v6 = vpop.f32.mrb[127].mxu0  ;;  %v9210_v47 = vadd.f32 %v15471_v28, %v9141_v34 }
 0xfee   : > { %v9211_v25 = vadd.f32 %v15473_v44, %v9142_v40 }
 0xff2   : > { %v9272_v19 = vpop.f32.mrb[128].mxu0 }
 0xff3   : > { %v9279_v48 = vadd.f32 %v9272_v19, %v9210_v47  ;;  %v9274_v50 = vpop.f32.mrb[129].mxu0 }
 0xff4   : > { %v9280_v56 = vadd.f32 %v9274_v50, %v9211_v25  ;;  %v9276_v23 = vpop.f32.mrb[130].mxu0 }
 0xff5   : > { %v9277_v9 = vpop.f32.mrb[131].mxu0  ;;  %v9348_v5 = vadd.f32 %v15477_v12, %v9279_v48 }
 0xff6   : > { %v9349_v2 = vadd.f32 %v15479_v35, %v9280_v56 }
 0xffa   : > { %v9410_v22 = vpop.f32.mrb[132].mxu0 }
 0xffb   : > { %v9417_v45 = vadd.f32 %v9410_v22, %v9348_v5  ;;  %v9412_v43 = vpop.f32.mrb[133].mxu0 }
 0xffc   : > { %v9418_v42 = vadd.f32 %v9412_v43, %v9349_v2  ;;  %v9414_v54 = vpop.f32.mrb[134].mxu0 }
 0xffd   : > { %v9415_v16 = vpop.f32.mrb[135].mxu0  ;;  %v9486_v28 = vadd.f32 %v15483_v32, %v9417_v45 }
 0xffe   : > { %v9487_v44 = vadd.f32 %v15485_v27, %v9418_v42 }
0x1002   : > { %v9548_v57 = vpop.f32.mrb[136].mxu0 }
0x1003   : > { %v9555_v59 = vadd.f32 %v9548_v57, %v9486_v28  ;;  %v9550_v37 = vpop.f32.mrb[137].mxu0 }
0x1004   : > { %v9556_v38 = vadd.f32 %v9550_v37, %v9487_v44  ;;  %v9552_v14 = vpop.f32.mrb[138].mxu0 }
0x1005   : > { %v9553_v15 = vpop.f32.mrb[139].mxu0  ;;  %v9624_v12 = vadd.f32 %v15489_v11, %v9555_v59 }
0x1006   : > { %v9625_v35 = vadd.f32 %v15491_v61, %v9556_v38  ;;  %v16433_v61 = vld [vmem:[#allocation17_spill] sm:$0xff] }
0x100a   : > { %v9686_v26 = vpop.f32.mrb[140].mxu0 }
0x100b   : > { %v9693_v13 = vadd.f32 %v9686_v26, %v9624_v12  ;;  %v9688_v17 = vpop.f32.mrb[141].mxu0 }
0x100c   : > { %v9694_v46 = vadd.f32 %v9688_v17, %v9625_v35  ;;  %v9690_v4 = vpop.f32.mrb[142].mxu0 }
0x100d   : > { %v9691_v32 = vpop.f32.mrb[143].mxu0  ;;  %v9762_v27 = vadd.f32 %v15495_v20, %v9693_v13 }
0x100e   : > { %v9763_v49 = vadd.f32 %v15497_v39, %v9694_v46 }
0x1015   : > { %v9824_v0 = vpop.f32.mrb[144].mxu0 }
0x1016   : > { %v9831_v33 = vadd.f32 %v9824_v0, %v9762_v27  ;;  %v9826_v55 = vpop.f32.mrb[145].mxu0 }
0x1017   : > { %v9832_v11 = vadd.f32 %v9826_v55, %v9763_v49  ;;  %v9828_v53 = vpop.f32.mrb[146].mxu0 }
0x1018   : > { %v9833_v63 = vadd.f32 %v9831_v33, %v16433_v61  ;;  %v9829_v10 = vpop.f32.mrb[147].mxu0 }
0x1019   : > { %v9834_v8 = vadd.f32 %v9832_v11, %v16433_v61 }
0x101b   : > { %v9837_v7 = vcombine.low %v9833_v63, %v9834_v8 }
0x101d   : > { %10560 = vst.sshfl [vmem:[%s353_s17] sm:$0x33 pattern:$0x76325410] %v9837_v7 }
0x101e   : > { %11089 = shalt.err (!%p11086_p3)
}
0x101f   : > { %s11090_s13 = scalar_lea.hbm %s15524_s9, 64  ;;  %s11094_s11 = scalar_lea.hbm %s16434_s3, 128 }
0x1020   : > { %p11091_p4 = scmp.ne.s32.totalorder %s15524_s9, %s11090_s13  ;;  %p11095_p9 = scmp.lt.u32.totalorder %s15524_s9, %s16434_s3 }
0x1021   : > { %p11096_p10 = scmp.lt.u32.totalorder %s11094_s11, %s11090_s13  ;;  %p11098_p12 = scmp.lt.u32.totalorder %s11090_s13, %s15524_s9 }
0x1022   : > { %p11092_p7 = pnand %p11091_p4, %p11317_p5 }
0x1023   : > { %p11097_p11 = por %p11096_p10, %p11095_p9 }
0x1024   : > { %p11093_p8 = pneg %p11092_p7 }
0x1025   : > { %p11099_p13 = por %p11098_p12, %p11097_p11 }
0x1027   : > { %p11100_p0 = pnand %p11099_p13, %p11093_p8 }
0x1029   : > { %11103 = shalt.err (!%p11100_p0)
}
0x102a   : > { %s16435_s0 = sld [smem:[#allocation16_spill]]  ;;  %s16436_s4 = sld [smem:[#allocation224_spill]]  ;;  %vm9970_vm3 = vcmask 1024  }
0x102b   : > { %10847 = dma.vmem_to_hbm [thread:$0]  (%p11317_p5), %s15526_s25, 64, %s15524_s9, %s9973_s28  }
0x102c   : > { %s16437_s20 = sld [smem:[#allocation226_spill]] }
0x1030   : > { %s10083_s24 = sshll.u32 %s16435_s0, 1  ;;  %v9968_v20 = vld [vmem:[%s16436_s4] sm:$0x3] }
0x1032   : > { %s368_s8 = scalar_lea.vmem %s16437_s20, %s10083_s24 }
0x105e   : > { %v9965_v39 = vpop.xlane.xlu0 %9964 }
0x105f   : > { %v9967_v62 = vmul.f32 0.0078125, %v9965_v39 }
0x1061   : > { %v9969_v58 = vadd.f32 %v9968_v20, %v9967_v62 }
0x1063   : > { %9971 = vst.msk [vmem:[%s368_s8] sm:$0x3] %vm9970_vm3, %v9969_v58 }
0x1064 PF: > { %s16438_s15 = sld [smem:[#allocation10_spill]]  ;;  %s16439_s1 = sld [smem:[#allocation7_spill]] }
0x106a   : > { %p10853_p1 = scmp.ge.s32.totalorder %s16438_s15, 2  ;;  %s10006_s2 = sand.u32 1, %s16439_s1  }
0x106b   : > { %s10007_s17 = scalar_lea.sflag [#allocation5], %s10006_s2 }
0x106c   : > { %p10850_p5 = pnand %p10853_p1, %p11321_p6 }
0x106e   : > { %11121 = dma.done.wait (!%p10850_p5), %s10007_s17, 64  }
0x106f   : > { %11123 = vsyncadd (!%p10850_p5), %s10007_s17, 4294967232  ;;  %s16441_s16 = sld [smem:[#allocation12_spill]]  ;;  %s16442_s13 = sld [smem:[#allocation8_spill]] }
0x1070   : > { %s16443_s14 = sld [smem:[#allocation9_spill]]  ;;  %s16444_s15 = sld [smem:[#allocation13_spill]] }
0x1075   : > { %p21_p2 = scmp.ge.s32.totalorder %s16441_s16, 4  }
0x1077   :  { %23 = sbr.rel (!%p21_p2) target bundleno = 15 (0xf), region = 219 }
0x107e   :  { %10019 = vsyncpa [#allocation5], 1 }
0x107f   :  { %10021 = vsyncpa [#allocation5 + $0x1], 1 }

</bundles_post_ra>
